<compile_context>
chip_gen: v7x
topology: tpu7x:2x2x1
jax: 0.10.0
libtpu: 0.0.40
codegen_flags: <defaults>
</compile_context>

<pallas_src>
import functools

import numpy as np
import jax
import jax.numpy as jnp
from jax import lax
from jax.experimental import pallas as pl
from jax.experimental.pallas import tpu as pltpu


# ----------------------------------------------------------------------------
# Shared conv tail: im2col taps -> single MXU matmul -> folded BN -> ReLU
# ----------------------------------------------------------------------------
def _taps_matmul_bn_relu(taps, w_ref, s_ref, t_ref, o_ref):
    # taps: list of 9 arrays (Ho*Wo, Cin); w_ref: (9*Cin, Cout)
    x = jnp.concatenate(taps, axis=-1)                       # (Ho*Wo, 9*Cin)
    acc = jnp.dot(x, w_ref[...], preferred_element_type=jnp.float32)
    out = jnp.maximum(acc * s_ref[...] + t_ref[...], 0.0)    # folded BN + ReLU
    o_ref[0] = out.astype(o_ref.dtype)


def _conv_kernel(a_ref, w_ref, s_ref, t_ref, o_ref, *, Ho, Wo):
    # a_ref: (1, Ho+2, Wo+2, Cin) NHWC with a zero halo.
    x = a_ref[0]
    c = x.shape[-1]
    taps = [x[dy:dy + Ho, dx:dx + Wo, :].reshape(Ho * Wo, c)
            for dy in range(3) for dx in range(3)]
    _taps_matmul_bn_relu(taps, w_ref, s_ref, t_ref, o_ref)


def _mul_conv_kernel(a_ref, b_ref, w_ref, s_ref, t_ref, o_ref, *, Ho, Wo):
    # conv3x3(a * b) + BN + ReLU.  Both inputs carry the zero halo, so the halo of
    # the product is also zero (matches conv padding of the product).
    x = a_ref[0] * b_ref[0]
    c = x.shape[-1]
    taps = [x[dy:dy + Ho, dx:dx + Wo, :].reshape(Ho * Wo, c)
            for dy in range(3) for dx in range(3)]
    _taps_matmul_bn_relu(taps, w_ref, s_ref, t_ref, o_ref)


def _down_conv_kernel(p_ref, w_ref, s_ref, t_ref, o_ref, *, Ho, Wo):
    # Stride-2 conv3x3 (padding=1) done with the minimum number of MACs.
    # p_ref: (4, Ho+1, Wo+1, Cin) parity planes of the padded input:
    #   plane[2*p + q][u, v] = x_padded[2*u + p, 2*v + q]
    # so the stride-2 tap (dy, dx) at output (i, j) is
    #   x_padded[2*i + dy, 2*j + dx] = plane[2*(dy%2) + (dx%2)][i + dy//2, j + dx//2]
    c = p_ref.shape[-1]
    planes = [p_ref[i] for i in range(4)]
    taps = []
    for dy in range(3):
        for dx in range(3):
            pq = 2 * (dy % 2) + (dx % 2)
            u0, v0 = dy // 2, dx // 2
            taps.append(planes[pq][u0:u0 + Ho, v0:v0 + Wo, :].reshape(Ho * Wo, c))
    _taps_matmul_bn_relu(taps, w_ref, s_ref, t_ref, o_ref)


def _conv_call(kernel, inputs, in_specs, N, Ho, Wo, c_out, dtype):
    out_flat = pl.pallas_call(
        kernel,
        out_shape=jax.ShapeDtypeStruct((N, Ho * Wo, c_out), dtype),
        grid=(N,),
        in_specs=in_specs,
        out_specs=pl.BlockSpec((1, Ho * Wo, c_out), lambda n: (n, 0, 0)),
        compiler_params=pltpu.CompilerParams(dimension_semantics=("parallel",)),
    )(*inputs)
    return out_flat.reshape(N, Ho, Wo, c_out)      # free metadata reshape in XLA


def conv3x3_bn_relu(a_p, w, scale, bias):
    """a_p: zero-halo padded NHWC (N, Ho+2, Wo+2, Cin).  No elementwise multiply."""
    N, Hp, Wp, C = a_p.shape
    Ho, Wo = Hp - 2, Wp - 2
    c_out = w.shape[-1]
    w9 = w.reshape(9 * C, c_out)
    s2 = scale.reshape(1, c_out).astype(jnp.float32)
    t2 = bias.reshape(1, c_out).astype(jnp.float32)
    kernel = functools.partial(_conv_kernel, Ho=Ho, Wo=Wo)
    in_specs = [
        pl.BlockSpec((1, Hp, Wp, C), lambda n: (n, 0, 0, 0)),
        pl.BlockSpec((9 * C, c_out), lambda n: (0, 0)),
        pl.BlockSpec((1, c_out), lambda n: (0, 0)),
        pl.BlockSpec((1, c_out), lambda n: (0, 0)),
    ]
    return _conv_call(kernel, (a_p, w9, s2, t2), in_specs, N, Ho, Wo, c_out, a_p.dtype)


def mul_conv3x3_bn_relu(a_p, b_p, w, scale, bias):
    """a_p, b_p: identically shaped zero-halo padded NHWC; conv3x3(a*b)+BN+ReLU."""
    N, Hp, Wp, C = a_p.shape
    Ho, Wo = Hp - 2, Wp - 2
    c_out = w.shape[-1]
    w9 = w.reshape(9 * C, c_out)
    s2 = scale.reshape(1, c_out).astype(jnp.float32)
    t2 = bias.reshape(1, c_out).astype(jnp.float32)
    kernel = functools.partial(_mul_conv_kernel, Ho=Ho, Wo=Wo)
    in_specs = [
        pl.BlockSpec((1, Hp, Wp, C), lambda n: (n, 0, 0, 0)),
        pl.BlockSpec((1, Hp, Wp, C), lambda n: (n, 0, 0, 0)),
        pl.BlockSpec((9 * C, c_out), lambda n: (0, 0)),
        pl.BlockSpec((1, c_out), lambda n: (0, 0)),
        pl.BlockSpec((1, c_out), lambda n: (0, 0)),
    ]
    return _conv_call(kernel, (a_p, b_p, w9, s2, t2), in_specs, N, Ho, Wo, c_out,
                      a_p.dtype)


def down_conv3x3_s2_bn_relu(planes, w, scale, bias):
    """planes: (N*4, Ho+1, Wo+1, Cin) parity planes (see _parity_planes)."""
    N4, Hp1, Wp1, C = planes.shape
    N, Ho, Wo = N4 // 4, Hp1 - 1, Wp1 - 1
    c_out = w.shape[-1]
    w9 = w.reshape(9 * C, c_out)
    s2 = scale.reshape(1, c_out).astype(jnp.float32)
    t2 = bias.reshape(1, c_out).astype(jnp.float32)
    kernel = functools.partial(_down_conv_kernel, Ho=Ho, Wo=Wo)
    in_specs = [
        pl.BlockSpec((4, Hp1, Wp1, C), lambda n: (n, 0, 0, 0)),
        pl.BlockSpec((9 * C, c_out), lambda n: (0, 0)),
        pl.BlockSpec((1, c_out), lambda n: (0, 0)),
        pl.BlockSpec((1, c_out), lambda n: (0, 0)),
    ]
    return _conv_call(kernel, (planes, w9, s2, t2), in_specs, N, Ho, Wo, c_out,
                      planes.dtype)


# ----------------------------------------------------------------------------
# Bilinear upsample (align_corners=True), grid=(N,), NCHW:
#   W-interp as one (C*Hh, Wh) @ (Wh, Wl) matmul, H-interp as a batched dot over C.
# ----------------------------------------------------------------------------
def _bilinear_kernel(x_ref, ah_ref, awt_ref, o_ref):
    C, Hh, Wh = x_ref.shape[1], x_ref.shape[2], x_ref.shape[3]
    Hl = ah_ref.shape[0]
    x = x_ref[0]                                              # (C, Hh, Wh)
    tw = jnp.dot(x.reshape(C * Hh, Wh), awt_ref[...],
                 preferred_element_type=jnp.float32)          # (C*Hh, Wl)
    tw = tw.reshape(C, Hh, awt_ref.shape[1])                  # (C, Hh, Wl)
    ah = jnp.broadcast_to(ah_ref[...], (C, Hl, Hh))           # (C, Hl, Hh)
    up = lax.dot_general(ah, tw, dimension_numbers=(((2,), (1,)), ((0,), (0,))),
                         preferred_element_type=jnp.float32)  # (C, Hl, Wl)
    o_ref[0] = up.astype(o_ref.dtype)


def _interp_matrix(out_size, in_size):
    """PyTorch F.interpolate(mode='bilinear', align_corners=True) as a matrix."""
    A = np.zeros((out_size, in_size), dtype=np.float32)
    if out_size == 1:
        A[0, 0] = 1.0
        return jnp.asarray(A)
    for i in range(out_size):
        src = i * (in_size - 1) / (out_size - 1)
        i0 = min(int(np.floor(src)), in_size - 1)
        i1 = min(i0 + 1, in_size - 1)
        f = src - i0
        A[i, i0] += 1.0 - f
        A[i, i1] += f
    return jnp.asarray(A)


def bilinear_upsample_nchw(x, out_hw):
    """x: NCHW -> NCHW upsampled to out_hw with align_corners=True."""
    N, C, Hh, Wh = x.shape
    Hl, Wl = out_hw
    Ah = _interp_matrix(Hl, Hh)        # (Hl, Hh)
    Awt = _interp_matrix(Wl, Wh).T     # (Wh, Wl)
    return pl.pallas_call(
        _bilinear_kernel,
        out_shape=jax.ShapeDtypeStruct((N, C, Hl, Wl), x.dtype),
        grid=(N,),
        in_specs=[
            pl.BlockSpec((1, C, Hh, Wh), lambda n: (n, 0, 0, 0)),
            pl.BlockSpec((Hl, Hh), lambda n: (0, 0)),
            pl.BlockSpec((Wh, Wl), lambda n: (0, 0)),
        ],
        out_specs=pl.BlockSpec((1, C, Hl, Wl), lambda n: (n, 0, 0, 0)),
        compiler_params=pltpu.CompilerParams(dimension_semantics=("parallel",)),
    )(x, Ah, Awt)


# ----------------------------------------------------------------------------
# Parameters (deterministic synthetic init; BN folded to scale/bias, eps=1e-5)
# ----------------------------------------------------------------------------
def _fold_bn(gamma, beta, mean, var, eps=1e-5):
    scale = gamma / jnp.sqrt(var + eps)
    bias = beta - mean * scale
    return scale, bias


def init_params(key, C):
    names = ["down", "conv1", "conv2", "ffm1", "ffm2"]
    params = {}
    for i, name in enumerate(names):
        k = jax.random.fold_in(key, i)
        kw, kg, kb, km, kv = jax.random.split(k, 5)
        w = 0.1 * jax.random.normal(kw, (3, 3, C, C), jnp.float32)  # HWIO
        gamma = 1.0 + 0.1 * jax.random.normal(kg, (C,), jnp.float32)
        beta = 0.1 * jax.random.normal(kb, (C,), jnp.float32)
        mean = 0.1 * jax.random.normal(km, (C,), jnp.float32)
        var = 0.9 + 0.2 * jax.random.uniform(kv, (C,), jnp.float32)
        scale, bias = _fold_bn(gamma, beta, mean, var)
        params[name] = (w, scale, bias)
    return params


# ----------------------------------------------------------------------------
# Glue
# ----------------------------------------------------------------------------
def _pad_hw(x_nhwc):
    return jnp.pad(x_nhwc, ((0, 0), (1, 1), (1, 1), (0, 0)))


def _parity_planes(x_p):
    """x_p: padded NHWC (N, 2*Ho+2, 2*Wo+2, C) -> (N*4, Ho+1, Wo+1, C),
    plane index 2*p + q holds x_p[:, p::2, q::2, :]."""
    N = x_p.shape[0]
    planes = jnp.stack([x_p[:, p::2, q::2, :] for p in (0, 1) for q in (0, 1)],
                       axis=1)
    return planes.reshape((N * 4,) + planes.shape[2:])


@jax.jit
def cam_forward(x_high, x_low, params):
    # x_high (N,C,Hh,Wh), x_low (N,C,Hl,Wl) -- NCHW in/out (PyTorch convention).
    N, C, Hh, Wh = x_high.shape
    _, _, Hl, Wl = x_low.shape
    xh = jnp.transpose(x_high, (0, 2, 3, 1))   # NHWC
    xl = jnp.transpose(x_low, (0, 2, 3, 1))    # NHWC
    xl_p = _pad_hw(xl)                         # padded once; reused twice
    xh_p = _pad_hw(xh)

    # left_2 = relu(BN(conv3x3 stride=2 (x_low))) -- stride handled inside kernel
    wd, sd, bd = params["down"]
    left_2 = down_conv3x3_s2_bn_relu(_parity_planes(xl_p), wd, sd, bd)  # (N,Hh,Wh,C)

    # right_1 = bilinear upsample of x_high to x_low size (align_corners=True)
    right_1 = bilinear_upsample_nchw(x_high, (Hl, Wl))                  # NCHW
    r1_p = _pad_hw(jnp.transpose(right_1, (0, 2, 3, 1)))

    w1, s1, b1 = params["conv1"]
    left = mul_conv3x3_bn_relu(xl_p, r1_p, w1, s1, b1)                  # (N,Hl,Wl,C)

    w2, s2, b2 = params["conv2"]
    right = mul_conv3x3_bn_relu(_pad_hw(left_2), xh_p, w2, s2, b2)      # (N,Hh,Wh,C)

    right_up = bilinear_upsample_nchw(jnp.transpose(right, (0, 3, 1, 2)), (Hl, Wl))
    ru_p = _pad_hw(jnp.transpose(right_up, (0, 2, 3, 1)))

    # FFM(left, right_up)
    wf1, sf1, bf1 = params["ffm1"]
    out = mul_conv3x3_bn_relu(_pad_hw(left), ru_p, wf1, sf1, bf1)
    wf2, sf2, bf2 = params["ffm2"]
    out = conv3x3_bn_relu(_pad_hw(out), wf2, sf2, bf2)                  # no ones-mul

    return jnp.transpose(out, (0, 3, 1, 2))                             # NCHW


# ----------------------------------------------------------------------------
# Pure-JAX reference (for correctness check)
# ----------------------------------------------------------------------------
def _conv3x3_ref(x_nhwc, w, stride=1):
    return lax.conv_general_dilated(
        x_nhwc, w, window_strides=(stride, stride), padding=((1, 1), (1, 1)),
        dimension_numbers=("NHWC", "HWIO", "NHWC"))


def _bn_relu_ref(x, scale, bias):
    return jnp.maximum(x * scale + bias, 0.0)


def _bilinear_ref(x_nchw, out_hw):
    _, _, H, W = x_nchw.shape
    Ah = _interp_matrix(out_hw[0], H)
    Aw = _interp_matrix(out_hw[1], W)
    return jnp.einsum("lh,nchw,mw->nclm", Ah, x_nchw, Aw)


def cam_ref(x_high, x_low, params):
    _, _, Hl, Wl = x_low.shape
    xh = jnp.transpose(x_high, (0, 2, 3, 1))
    xl = jnp.transpose(x_low, (0, 2, 3, 1))
    wd, sd, bd = params["down"]
    left_2 = _bn_relu_ref(_conv3x3_ref(xl, wd, stride=2), sd, bd)
    right_1 = jnp.transpose(_bilinear_ref(x_high, (Hl, Wl)), (0, 2, 3, 1))
    w1, s1, b1 = params["conv1"]
    left = _bn_relu_ref(_conv3x3_ref(xl * right_1, w1), s1, b1)
    w2, s2, b2 = params["conv2"]
    right = _bn_relu_ref(_conv3x3_ref(left_2 * xh, w2), s2, b2)
    right_up = jnp.transpose(
        _bilinear_ref(jnp.transpose(right, (0, 3, 1, 2)), (Hl, Wl)), (0, 2, 3, 1))
    wf1, sf1, bf1 = params["ffm1"]
    out = _bn_relu_ref(_conv3x3_ref(left * right_up, wf1), sf1, bf1)
    wf2, sf2, bf2 = params["ffm2"]
    out = _bn_relu_ref(_conv3x3_ref(out, wf2), sf2, bf2)
    return jnp.transpose(out, (0, 3, 1, 2))


if __name__ == "__main__":
    key = jax.random.PRNGKey(0)
    k1, k2, k3 = jax.random.split(key, 3)

    N, C = 2, 8
    Hh, Wh = 8, 8          # high-level (small spatial) feature
    Hl, Wl = 16, 16        # low-level (2x spatial) feature
    x_high = jax.random.normal(k1, (N, C, Hh, Wh), jnp.float32)
    x_low = jax.random.normal(k2, (N, C, Hl, Wl), jnp.float32)
    params = init_params(k3, C)

    out = jax.block_until_ready(cam_forward(x_high, x_low, params))
    ref = jax.block_until_ready(cam_ref(x_high, x_low, params))

    assert out.shape == (N, C, Hl, Wl), out.shape
    assert bool(jnp.all(jnp.isfinite(out)))
    assert jnp.allclose(out, ref, rtol=2e-2, atol=2e-2), float(
        jnp.max(jnp.abs(out - ref)))
    print("KERNEL_OK")
</pallas_src>

<mosaic_0001>
module attributes {stable_mosaic.version = 11 : i64} {
  func.func @_bilinear_kernel(%arg0: i32, %arg1: memref<1x8x8x8xf32, #tpu.memory_space<vmem>>, %arg2: memref<16x8xf32, #tpu.memory_space<vmem>>, %arg3: memref<8x16xf32, #tpu.memory_space<vmem>>, %arg4: memref<1x8x16x16xf32, #tpu.memory_space<vmem>>) attributes {dimension_semantics = [#tpu.dimension_semantics<parallel>], iteration_bounds = array<i64: 2>, scalar_prefetch = 0 : i64, scratch_operands = 0 : i64, tpu.core_type = #tpu.core_type<tc>, window_params = [{transform_indices = @transform_0, window_bounds = array<i64: 1, 8, 8, 8>}, {pipeline_mode = #tpu.pipeline_mode<synchronous>, transform_indices = @transform_1, window_bounds = array<i64: 16, 8>}, {pipeline_mode = #tpu.pipeline_mode<synchronous>, transform_indices = @transform_2, window_bounds = array<i64: 8, 16>}, {transform_indices = @transform_3, window_bounds = array<i64: 1, 8, 16, 16>}]} {
    %c0 = arith.constant 0 : index
    %c0_0 = arith.constant 0 : index
    %c0_1 = arith.constant 0 : index
    %c0_2 = arith.constant 0 : index
    %0 = vector.load %arg1[%c0, %c0_0, %c0_1, %c0_2] : memref<1x8x8x8xf32, #tpu.memory_space<vmem>>, vector<1x8x8x8xf32>
    %1 = vector.shape_cast %0 : vector<1x8x8x8xf32> to vector<8x8x8xf32>
    %2 = vector.shape_cast %1 : vector<8x8x8xf32> to vector<64x8xf32>
    %c0_3 = arith.constant 0 : index
    %c0_4 = arith.constant 0 : index
    %3 = vector.load %arg3[%c0_3, %c0_4] : memref<8x16xf32, #tpu.memory_space<vmem>>, vector<8x16xf32>
    %cst = arith.constant dense<0.000000e+00> : vector<64x16xf32>
    %4 = tpu.matmul %2, %3, %cst {dimension_numbers = #tpu.dot_dimension_numbers<[1], [0], [0], [1], [0, 0, 1, 1], [], []>} : vector<64x8xf32>, vector<8x16xf32>, vector<64x16xf32> -> vector<64x16xf32>
    %5 = vector.shape_cast %4 : vector<64x16xf32> to vector<8x8x16xf32>
    %c0_5 = arith.constant 0 : index
    %c0_6 = arith.constant 0 : index
    %6 = vector.load %arg2[%c0_5, %c0_6] : memref<16x8xf32, #tpu.memory_space<vmem>>, vector<16x8xf32>
    %7 = vector.shape_cast %6 : vector<16x8xf32> to vector<1x16x8xf32>
    %8 = vector.broadcast %7 : vector<1x16x8xf32> to vector<8x16x8xf32>
    %cst_7 = arith.constant dense<0.000000e+00> : vector<8x16x16xf32>
    %9 = tpu.matmul %8, %5, %cst_7 {dimension_numbers = #tpu.dot_dimension_numbers<[2], [1], [1], [2], [0, 0, 0, 1, 1, 2], [0], [0]>} : vector<8x16x8xf32>, vector<8x8x16xf32>, vector<8x16x16xf32> -> vector<8x16x16xf32>
    %c0_8 = arith.constant 0 : index
    %c0_9 = arith.constant 0 : index
    %c0_10 = arith.constant 0 : index
    %c0_11 = arith.constant 0 : index
    %10 = vector.load %arg4[%c0_8, %c0_9, %c0_10, %c0_11] : memref<1x8x16x16xf32, #tpu.memory_space<vmem>>, vector<1x8x16x16xf32>
    %11 = vector.shape_cast %10 : vector<1x8x16x16xf32> to vector<8x16x16xf32>
    %12 = vector.shape_cast %9 : vector<8x16x16xf32> to vector<1x8x16x16xf32>
    tpu.vector_store %arg4[%c0_8, %c0_9, %c0_10, %c0_11], %12 {strides = array<i32>} : memref<1x8x16x16xf32, #tpu.memory_space<vmem>>, vector<1x8x16x16xf32>,
    return
  }
  func.func @transform_0(%arg0: i32) -> (i32, i32, i32, i32) {
    %c0_i32 = arith.constant 0 : i32
    %c0_i32_0 = arith.constant 0 : i32
    %c0_i32_1 = arith.constant 0 : i32
    %c0_i32_2 = arith.constant 0 : i32
    return %arg0, %c0_i32, %c0_i32_0, %c0_i32_1 : i32, i32, i32, i32
  }
  func.func @transform_1(%arg0: i32) -> (i32, i32) {
    %c0_i32 = arith.constant 0 : i32
    %c0_i32_0 = arith.constant 0 : i32
    %c0_i32_1 = arith.constant 0 : i32
    return %c0_i32, %c0_i32_0 : i32, i32
  }
  func.func @transform_2(%arg0: i32) -> (i32, i32) {
    %c0_i32 = arith.constant 0 : i32
    %c0_i32_0 = arith.constant 0 : i32
    %c0_i32_1 = arith.constant 0 : i32
    return %c0_i32, %c0_i32_0 : i32, i32
  }
  func.func @transform_3(%arg0: i32) -> (i32, i32, i32, i32) {
    %c0_i32 = arith.constant 0 : i32
    %c0_i32_0 = arith.constant 0 : i32
    %c0_i32_1 = arith.constant 0 : i32
    %c0_i32_2 = arith.constant 0 : i32
    return %arg0, %c0_i32, %c0_i32_0, %c0_i32_1 : i32, i32, i32, i32
  }
}

module attributes {stable_mosaic.version = 11 : i64} {
  func.func @_mul_conv_kernel(%arg0: i32, %arg1: memref<1x18x18x8xf32, #tpu.memory_space<vmem>>, %arg2: memref<1x18x18x8xf32, #tpu.memory_space<vmem>>, %arg3: memref<72x8xf32, #tpu.memory_space<vmem>>, %arg4: memref<1x8xf32, #tpu.memory_space<vmem>>, %arg5: memref<1x8xf32, #tpu.memory_space<vmem>>, %arg6: memref<1x256x8xf32, #tpu.memory_space<vmem>>) attributes {dimension_semantics = [#tpu.dimension_semantics<parallel>], iteration_bounds = array<i64: 2>, scalar_prefetch = 0 : i64, scratch_operands = 0 : i64, tpu.core_type = #tpu.core_type<tc>, window_params = [{transform_indices = @transform_0, window_bounds = array<i64: 1, 18, 18, 8>}, {transform_indices = @transform_1, window_bounds = array<i64: 1, 18, 18, 8>}, {pipeline_mode = #tpu.pipeline_mode<synchronous>, transform_indices = @transform_2, window_bounds = array<i64: 72, 8>}, {pipeline_mode = #tpu.pipeline_mode<synchronous>, transform_indices = @transform_3, window_bounds = array<i64: 1, 8>}, {pipeline_mode = #tpu.pipeline_mode<synchronous>, transform_indices = @transform_4, window_bounds = array<i64: 1, 8>}, {transform_indices = @transform_5, window_bounds = array<i64: 1, 256, 8>}]} {
    %c0 = arith.constant 0 : index
    %c0_0 = arith.constant 0 : index
    %c0_1 = arith.constant 0 : index
    %c0_2 = arith.constant 0 : index
    %0 = vector.load %arg1[%c0, %c0_0, %c0_1, %c0_2] : memref<1x18x18x8xf32, #tpu.memory_space<vmem>>, vector<1x18x18x8xf32>
    %1 = vector.shape_cast %0 : vector<1x18x18x8xf32> to vector<18x18x8xf32>
    %c0_3 = arith.constant 0 : index
    %c0_4 = arith.constant 0 : index
    %c0_5 = arith.constant 0 : index
    %c0_6 = arith.constant 0 : index
    %2 = vector.load %arg2[%c0_3, %c0_4, %c0_5, %c0_6] : memref<1x18x18x8xf32, #tpu.memory_space<vmem>>, vector<1x18x18x8xf32>
    %3 = vector.shape_cast %2 : vector<1x18x18x8xf32> to vector<18x18x8xf32>
    %4 = arith.mulf %1, %3 : vector<18x18x8xf32>
    %5 = vector.extract_strided_slice %4 {offsets = [0, 0, 0], sizes = [16, 16, 8], strides = [1, 1, 1]} : vector<18x18x8xf32> to vector<16x16x8xf32>
    %6 = vector.shape_cast %5 : vector<16x16x8xf32> to vector<256x8xf32>
    %7 = vector.extract_strided_slice %4 {offsets = [0, 1, 0], sizes = [16, 16, 8], strides = [1, 1, 1]} : vector<18x18x8xf32> to vector<16x16x8xf32>
    %8 = vector.shape_cast %7 : vector<16x16x8xf32> to vector<256x8xf32>
    %9 = vector.extract_strided_slice %4 {offsets = [0, 2, 0], sizes = [16, 16, 8], strides = [1, 1, 1]} : vector<18x18x8xf32> to vector<16x16x8xf32>
    %10 = vector.shape_cast %9 : vector<16x16x8xf32> to vector<256x8xf32>
    %11 = vector.extract_strided_slice %4 {offsets = [1, 0, 0], sizes = [16, 16, 8], strides = [1, 1, 1]} : vector<18x18x8xf32> to vector<16x16x8xf32>
    %12 = vector.shape_cast %11 : vector<16x16x8xf32> to vector<256x8xf32>
    %13 = vector.extract_strided_slice %4 {offsets = [1, 1, 0], sizes = [16, 16, 8], strides = [1, 1, 1]} : vector<18x18x8xf32> to vector<16x16x8xf32>
    %14 = vector.shape_cast %13 : vector<16x16x8xf32> to vector<256x8xf32>
    %15 = vector.extract_strided_slice %4 {offsets = [1, 2, 0], sizes = [16, 16, 8], strides = [1, 1, 1]} : vector<18x18x8xf32> to vector<16x16x8xf32>
    %16 = vector.shape_cast %15 : vector<16x16x8xf32> to vector<256x8xf32>
    %17 = vector.extract_strided_slice %4 {offsets = [2, 0, 0], sizes = [16, 16, 8], strides = [1, 1, 1]} : vector<18x18x8xf32> to vector<16x16x8xf32>
    %18 = vector.shape_cast %17 : vector<16x16x8xf32> to vector<256x8xf32>
    %19 = vector.extract_strided_slice %4 {offsets = [2, 1, 0], sizes = [16, 16, 8], strides = [1, 1, 1]} : vector<18x18x8xf32> to vector<16x16x8xf32>
    %20 = vector.shape_cast %19 : vector<16x16x8xf32> to vector<256x8xf32>
    %21 = vector.extract_strided_slice %4 {offsets = [2, 2, 0], sizes = [16, 16, 8], strides = [1, 1, 1]} : vector<18x18x8xf32> to vector<16x16x8xf32>
    %22 = vector.shape_cast %21 : vector<16x16x8xf32> to vector<256x8xf32>
    %23 = tpu.concatenate %6, %8, %10, %12, %14, %16, %18, %20, %22 in 1 : vector<256x8xf32>, vector<256x8xf32>, vector<256x8xf32>, vector<256x8xf32>, vector<256x8xf32>, vector<256x8xf32>, vector<256x8xf32>, vector<256x8xf32>, vector<256x8xf32> -> vector<256x72xf32>
    %c0_7 = arith.constant 0 : index
    %c0_8 = arith.constant 0 : index
    %24 = vector.load %arg3[%c0_7, %c0_8] : memref<72x8xf32, #tpu.memory_space<vmem>>, vector<72x8xf32>
    %cst = arith.constant dense<0.000000e+00> : vector<256x8xf32>
    %25 = tpu.matmul %23, %24, %cst {dimension_numbers = #tpu.dot_dimension_numbers<[1], [0], [0], [1], [0, 0, 1, 1], [], []>} : vector<256x72xf32>, vector<72x8xf32>, vector<256x8xf32> -> vector<256x8xf32>
    %c0_9 = arith.constant 0 : index
    %c0_10 = arith.constant 0 : index
    %26 = vector.load %arg4[%c0_9, %c0_10] : memref<1x8xf32, #tpu.memory_space<vmem>>, vector<1x8xf32>
    %27 = vector.broadcast %26 : vector<1x8xf32> to vector<256x8xf32>
    %28 = arith.mulf %25, %27 : vector<256x8xf32>
    %c0_11 = arith.constant 0 : index
    %c0_12 = arith.constant 0 : index
    %29 = vector.load %arg5[%c0_11, %c0_12] : memref<1x8xf32, #tpu.memory_space<vmem>>, vector<1x8xf32>
    %30 = vector.broadcast %29 : vector<1x8xf32> to vector<256x8xf32>
    %31 = arith.addf %28, %30 : vector<256x8xf32>
    %cst_13 = arith.constant 0.000000e+00 : f32
    %32 = vector.broadcast %cst_13 : f32 to vector<256x8xf32>
    %33 = arith.maximumf %31, %32 : vector<256x8xf32>
    %c0_14 = arith.constant 0 : index
    %c0_15 = arith.constant 0 : index
    %c0_16 = arith.constant 0 : index
    %34 = vector.load %arg6[%c0_14, %c0_15, %c0_16] : memref<1x256x8xf32, #tpu.memory_space<vmem>>, vector<1x256x8xf32>
    %35 = vector.shape_cast %34 : vector<1x256x8xf32> to vector<256x8xf32>
    %36 = vector.shape_cast %33 : vector<256x8xf32> to vector<1x256x8xf32>
    tpu.vector_store %arg6[%c0_14, %c0_15, %c0_16], %36 {strides = array<i32>} : memref<1x256x8xf32, #tpu.memory_space<vmem>>, vector<1x256x8xf32>,
    return
  }
  func.func @transform_0(%arg0: i32) -> (i32, i32, i32, i32) {
    %c0_i32 = arith.constant 0 : i32
    %c0_i32_0 = arith.constant 0 : i32
    %c0_i32_1 = arith.constant 0 : i32
    %c0_i32_2 = arith.constant 0 : i32
    return %arg0, %c0_i32, %c0_i32_0, %c0_i32_1 : i32, i32, i32, i32
  }
  func.func @transform_1(%arg0: i32) -> (i32, i32, i32, i32) {
    %c0_i32 = arith.constant 0 : i32
    %c0_i32_0 = arith.constant 0 : i32
    %c0_i32_1 = arith.constant 0 : i32
    %c0_i32_2 = arith.constant 0 : i32
    return %arg0, %c0_i32, %c0_i32_0, %c0_i32_1 : i32, i32, i32, i32
  }
  func.func @transform_2(%arg0: i32) -> (i32, i32) {
    %c0_i32 = arith.constant 0 : i32
    %c0_i32_0 = arith.constant 0 : i32
    %c0_i32_1 = arith.constant 0 : i32
    return %c0_i32, %c0_i32_0 : i32, i32
  }
  func.func @transform_3(%arg0: i32) -> (i32, i32) {
    %c0_i32 = arith.constant 0 : i32
    %c0_i32_0 = arith.constant 0 : i32
    %c0_i32_1 = arith.constant 0 : i32
    return %c0_i32, %c0_i32_0 : i32, i32
  }
  func.func @transform_4(%arg0: i32) -> (i32, i32) {
    %c0_i32 = arith.constant 0 : i32
    %c0_i32_0 = arith.constant 0 : i32
    %c0_i32_1 = arith.constant 0 : i32
    return %c0_i32, %c0_i32_0 : i32, i32
  }
  func.func @transform_5(%arg0: i32) -> (i32, i32, i32) {
    %c0_i32 = arith.constant 0 : i32
    %c0_i32_0 = arith.constant 0 : i32
    %c0_i32_1 = arith.constant 0 : i32
    return %arg0, %c0_i32, %c0_i32_0 : i32, i32, i32
  }
}

module attributes {stable_mosaic.version = 11 : i64} {
  func.func @_down_conv_kernel(%arg0: i32, %arg1: memref<4x9x9x8xf32, #tpu.memory_space<vmem>>, %arg2: memref<72x8xf32, #tpu.memory_space<vmem>>, %arg3: memref<1x8xf32, #tpu.memory_space<vmem>>, %arg4: memref<1x8xf32, #tpu.memory_space<vmem>>, %arg5: memref<1x64x8xf32, #tpu.memory_space<vmem>>) attributes {dimension_semantics = [#tpu.dimension_semantics<parallel>], iteration_bounds = array<i64: 2>, scalar_prefetch = 0 : i64, scratch_operands = 0 : i64, tpu.core_type = #tpu.core_type<tc>, window_params = [{transform_indices = @transform_0, window_bounds = array<i64: 4, 9, 9, 8>}, {pipeline_mode = #tpu.pipeline_mode<synchronous>, transform_indices = @transform_1, window_bounds = array<i64: 72, 8>}, {pipeline_mode = #tpu.pipeline_mode<synchronous>, transform_indices = @transform_2, window_bounds = array<i64: 1, 8>}, {pipeline_mode = #tpu.pipeline_mode<synchronous>, transform_indices = @transform_3, window_bounds = array<i64: 1, 8>}, {transform_indices = @transform_4, window_bounds = array<i64: 1, 64, 8>}]} {
    %c0 = arith.constant 0 : index
    %c0_0 = arith.constant 0 : index
    %c0_1 = arith.constant 0 : index
    %c0_2 = arith.constant 0 : index
    %0 = vector.load %arg1[%c0, %c0_0, %c0_1, %c0_2] : memref<4x9x9x8xf32, #tpu.memory_space<vmem>>, vector<1x9x9x8xf32>
    %1 = vector.shape_cast %0 : vector<1x9x9x8xf32> to vector<9x9x8xf32>
    %c1 = arith.constant 1 : index
    %c0_3 = arith.constant 0 : index
    %c0_4 = arith.constant 0 : index
    %c0_5 = arith.constant 0 : index
    %2 = vector.load %arg1[%c1, %c0_3, %c0_4, %c0_5] : memref<4x9x9x8xf32, #tpu.memory_space<vmem>>, vector<1x9x9x8xf32>
    %3 = vector.shape_cast %2 : vector<1x9x9x8xf32> to vector<9x9x8xf32>
    %c2 = arith.constant 2 : index
    %c0_6 = arith.constant 0 : index
    %c0_7 = arith.constant 0 : index
    %c0_8 = arith.constant 0 : index
    %4 = vector.load %arg1[%c2, %c0_6, %c0_7, %c0_8] : memref<4x9x9x8xf32, #tpu.memory_space<vmem>>, vector<1x9x9x8xf32>
    %5 = vector.shape_cast %4 : vector<1x9x9x8xf32> to vector<9x9x8xf32>
    %c3 = arith.constant 3 : index
    %c0_9 = arith.constant 0 : index
    %c0_10 = arith.constant 0 : index
    %c0_11 = arith.constant 0 : index
    %6 = vector.load %arg1[%c3, %c0_9, %c0_10, %c0_11] : memref<4x9x9x8xf32, #tpu.memory_space<vmem>>, vector<1x9x9x8xf32>
    %7 = vector.shape_cast %6 : vector<1x9x9x8xf32> to vector<9x9x8xf32>
    %8 = vector.extract_strided_slice %1 {offsets = [0, 0, 0], sizes = [8, 8, 8], strides = [1, 1, 1]} : vector<9x9x8xf32> to vector<8x8x8xf32>
    %9 = vector.shape_cast %8 : vector<8x8x8xf32> to vector<64x8xf32>
    %10 = vector.extract_strided_slice %3 {offsets = [0, 0, 0], sizes = [8, 8, 8], strides = [1, 1, 1]} : vector<9x9x8xf32> to vector<8x8x8xf32>
    %11 = vector.shape_cast %10 : vector<8x8x8xf32> to vector<64x8xf32>
    %12 = vector.extract_strided_slice %1 {offsets = [0, 1, 0], sizes = [8, 8, 8], strides = [1, 1, 1]} : vector<9x9x8xf32> to vector<8x8x8xf32>
    %13 = vector.shape_cast %12 : vector<8x8x8xf32> to vector<64x8xf32>
    %14 = vector.extract_strided_slice %5 {offsets = [0, 0, 0], sizes = [8, 8, 8], strides = [1, 1, 1]} : vector<9x9x8xf32> to vector<8x8x8xf32>
    %15 = vector.shape_cast %14 : vector<8x8x8xf32> to vector<64x8xf32>
    %16 = vector.extract_strided_slice %7 {offsets = [0, 0, 0], sizes = [8, 8, 8], strides = [1, 1, 1]} : vector<9x9x8xf32> to vector<8x8x8xf32>
    %17 = vector.shape_cast %16 : vector<8x8x8xf32> to vector<64x8xf32>
    %18 = vector.extract_strided_slice %5 {offsets = [0, 1, 0], sizes = [8, 8, 8], strides = [1, 1, 1]} : vector<9x9x8xf32> to vector<8x8x8xf32>
    %19 = vector.shape_cast %18 : vector<8x8x8xf32> to vector<64x8xf32>
    %20 = vector.extract_strided_slice %1 {offsets = [1, 0, 0], sizes = [8, 8, 8], strides = [1, 1, 1]} : vector<9x9x8xf32> to vector<8x8x8xf32>
    %21 = vector.shape_cast %20 : vector<8x8x8xf32> to vector<64x8xf32>
    %22 = vector.extract_strided_slice %3 {offsets = [1, 0, 0], sizes = [8, 8, 8], strides = [1, 1, 1]} : vector<9x9x8xf32> to vector<8x8x8xf32>
    %23 = vector.shape_cast %22 : vector<8x8x8xf32> to vector<64x8xf32>
    %24 = vector.extract_strided_slice %1 {offsets = [1, 1, 0], sizes = [8, 8, 8], strides = [1, 1, 1]} : vector<9x9x8xf32> to vector<8x8x8xf32>
    %25 = vector.shape_cast %24 : vector<8x8x8xf32> to vector<64x8xf32>
    %26 = tpu.concatenate %9, %11, %13, %15, %17, %19, %21, %23, %25 in 1 : vector<64x8xf32>, vector<64x8xf32>, vector<64x8xf32>, vector<64x8xf32>, vector<64x8xf32>, vector<64x8xf32>, vector<64x8xf32>, vector<64x8xf32>, vector<64x8xf32> -> vector<64x72xf32>
    %c0_12 = arith.constant 0 : index
    %c0_13 = arith.constant 0 : index
    %27 = vector.load %arg2[%c0_12, %c0_13] : memref<72x8xf32, #tpu.memory_space<vmem>>, vector<72x8xf32>
    %cst = arith.constant dense<0.000000e+00> : vector<64x8xf32>
    %28 = tpu.matmul %26, %27, %cst {dimension_numbers = #tpu.dot_dimension_numbers<[1], [0], [0], [1], [0, 0, 1, 1], [], []>} : vector<64x72xf32>, vector<72x8xf32>, vector<64x8xf32> -> vector<64x8xf32>
    %c0_14 = arith.constant 0 : index
    %c0_15 = arith.constant 0 : index
    %29 = vector.load %arg3[%c0_14, %c0_15] : memref<1x8xf32, #tpu.memory_space<vmem>>, vector<1x8xf32>
    %30 = vector.broadcast %29 : vector<1x8xf32> to vector<64x8xf32>
    %31 = arith.mulf %28, %30 : vector<64x8xf32>
    %c0_16 = arith.constant 0 : index
    %c0_17 = arith.constant 0 : index
    %32 = vector.load %arg4[%c0_16, %c0_17] : memref<1x8xf32, #tpu.memory_space<vmem>>, vector<1x8xf32>
    %33 = vector.broadcast %32 : vector<1x8xf32> to vector<64x8xf32>
    %34 = arith.addf %31, %33 : vector<64x8xf32>
    %cst_18 = arith.constant 0.000000e+00 : f32
    %35 = vector.broadcast %cst_18 : f32 to vector<64x8xf32>
    %36 = arith.maximumf %34, %35 : vector<64x8xf32>
    %c0_19 = arith.constant 0 : index
    %c0_20 = arith.constant 0 : index
    %c0_21 = arith.constant 0 : index
    %37 = vector.load %arg5[%c0_19, %c0_20, %c0_21] : memref<1x64x8xf32, #tpu.memory_space<vmem>>, vector<1x64x8xf32>
    %38 = vector.shape_cast %37 : vector<1x64x8xf32> to vector<64x8xf32>
    %39 = vector.shape_cast %36 : vector<64x8xf32> to vector<1x64x8xf32>
    tpu.vector_store %arg5[%c0_19, %c0_20, %c0_21], %39 {strides = array<i32>} : memref<1x64x8xf32, #tpu.memory_space<vmem>>, vector<1x64x8xf32>,
    return
  }
  func.func @transform_0(%arg0: i32) -> (i32, i32, i32, i32) {
    %c0_i32 = arith.constant 0 : i32
    %c0_i32_0 = arith.constant 0 : i32
    %c0_i32_1 = arith.constant 0 : i32
    %c0_i32_2 = arith.constant 0 : i32
    return %arg0, %c0_i32, %c0_i32_0, %c0_i32_1 : i32, i32, i32, i32
  }
  func.func @transform_1(%arg0: i32) -> (i32, i32) {
    %c0_i32 = arith.constant 0 : i32
    %c0_i32_0 = arith.constant 0 : i32
    %c0_i32_1 = arith.constant 0 : i32
    return %c0_i32, %c0_i32_0 : i32, i32
  }
  func.func @transform_2(%arg0: i32) -> (i32, i32) {
    %c0_i32 = arith.constant 0 : i32
    %c0_i32_0 = arith.constant 0 : i32
    %c0_i32_1 = arith.constant 0 : i32
    return %c0_i32, %c0_i32_0 : i32, i32
  }
  func.func @transform_3(%arg0: i32) -> (i32, i32) {
    %c0_i32 = arith.constant 0 : i32
    %c0_i32_0 = arith.constant 0 : i32
    %c0_i32_1 = arith.constant 0 : i32
    return %c0_i32, %c0_i32_0 : i32, i32
  }
  func.func @transform_4(%arg0: i32) -> (i32, i32, i32) {
    %c0_i32 = arith.constant 0 : i32
    %c0_i32_0 = arith.constant 0 : i32
    %c0_i32_1 = arith.constant 0 : i32
    return %arg0, %c0_i32, %c0_i32_0 : i32, i32, i32
  }
}

module attributes {stable_mosaic.version = 11 : i64} {
  func.func @_mul_conv_kernel(%arg0: i32, %arg1: memref<1x10x10x8xf32, #tpu.memory_space<vmem>>, %arg2: memref<1x10x10x8xf32, #tpu.memory_space<vmem>>, %arg3: memref<72x8xf32, #tpu.memory_space<vmem>>, %arg4: memref<1x8xf32, #tpu.memory_space<vmem>>, %arg5: memref<1x8xf32, #tpu.memory_space<vmem>>, %arg6: memref<1x64x8xf32, #tpu.memory_space<vmem>>) attributes {dimension_semantics = [#tpu.dimension_semantics<parallel>], iteration_bounds = array<i64: 2>, scalar_prefetch = 0 : i64, scratch_operands = 0 : i64, tpu.core_type = #tpu.core_type<tc>, window_params = [{transform_indices = @transform_0, window_bounds = array<i64: 1, 10, 10, 8>}, {transform_indices = @transform_1, window_bounds = array<i64: 1, 10, 10, 8>}, {pipeline_mode = #tpu.pipeline_mode<synchronous>, transform_indices = @transform_2, window_bounds = array<i64: 72, 8>}, {pipeline_mode = #tpu.pipeline_mode<synchronous>, transform_indices = @transform_3, window_bounds = array<i64: 1, 8>}, {pipeline_mode = #tpu.pipeline_mode<synchronous>, transform_indices = @transform_4, window_bounds = array<i64: 1, 8>}, {transform_indices = @transform_5, window_bounds = array<i64: 1, 64, 8>}]} {
    %c0 = arith.constant 0 : index
    %c0_0 = arith.constant 0 : index
    %c0_1 = arith.constant 0 : index
    %c0_2 = arith.constant 0 : index
    %0 = vector.load %arg1[%c0, %c0_0, %c0_1, %c0_2] : memref<1x10x10x8xf32, #tpu.memory_space<vmem>>, vector<1x10x10x8xf32>
    %1 = vector.shape_cast %0 : vector<1x10x10x8xf32> to vector<10x10x8xf32>
    %c0_3 = arith.constant 0 : index
    %c0_4 = arith.constant 0 : index
    %c0_5 = arith.constant 0 : index
    %c0_6 = arith.constant 0 : index
    %2 = vector.load %arg2[%c0_3, %c0_4, %c0_5, %c0_6] : memref<1x10x10x8xf32, #tpu.memory_space<vmem>>, vector<1x10x10x8xf32>
    %3 = vector.shape_cast %2 : vector<1x10x10x8xf32> to vector<10x10x8xf32>
    %4 = arith.mulf %1, %3 : vector<10x10x8xf32>
    %5 = vector.extract_strided_slice %4 {offsets = [0, 0, 0], sizes = [8, 8, 8], strides = [1, 1, 1]} : vector<10x10x8xf32> to vector<8x8x8xf32>
    %6 = vector.shape_cast %5 : vector<8x8x8xf32> to vector<64x8xf32>
    %7 = vector.extract_strided_slice %4 {offsets = [0, 1, 0], sizes = [8, 8, 8], strides = [1, 1, 1]} : vector<10x10x8xf32> to vector<8x8x8xf32>
    %8 = vector.shape_cast %7 : vector<8x8x8xf32> to vector<64x8xf32>
    %9 = vector.extract_strided_slice %4 {offsets = [0, 2, 0], sizes = [8, 8, 8], strides = [1, 1, 1]} : vector<10x10x8xf32> to vector<8x8x8xf32>
    %10 = vector.shape_cast %9 : vector<8x8x8xf32> to vector<64x8xf32>
    %11 = vector.extract_strided_slice %4 {offsets = [1, 0, 0], sizes = [8, 8, 8], strides = [1, 1, 1]} : vector<10x10x8xf32> to vector<8x8x8xf32>
    %12 = vector.shape_cast %11 : vector<8x8x8xf32> to vector<64x8xf32>
    %13 = vector.extract_strided_slice %4 {offsets = [1, 1, 0], sizes = [8, 8, 8], strides = [1, 1, 1]} : vector<10x10x8xf32> to vector<8x8x8xf32>
    %14 = vector.shape_cast %13 : vector<8x8x8xf32> to vector<64x8xf32>
    %15 = vector.extract_strided_slice %4 {offsets = [1, 2, 0], sizes = [8, 8, 8], strides = [1, 1, 1]} : vector<10x10x8xf32> to vector<8x8x8xf32>
    %16 = vector.shape_cast %15 : vector<8x8x8xf32> to vector<64x8xf32>
    %17 = vector.extract_strided_slice %4 {offsets = [2, 0, 0], sizes = [8, 8, 8], strides = [1, 1, 1]} : vector<10x10x8xf32> to vector<8x8x8xf32>
    %18 = vector.shape_cast %17 : vector<8x8x8xf32> to vector<64x8xf32>
    %19 = vector.extract_strided_slice %4 {offsets = [2, 1, 0], sizes = [8, 8, 8], strides = [1, 1, 1]} : vector<10x10x8xf32> to vector<8x8x8xf32>
    %20 = vector.shape_cast %19 : vector<8x8x8xf32> to vector<64x8xf32>
    %21 = vector.extract_strided_slice %4 {offsets = [2, 2, 0], sizes = [8, 8, 8], strides = [1, 1, 1]} : vector<10x10x8xf32> to vector<8x8x8xf32>
    %22 = vector.shape_cast %21 : vector<8x8x8xf32> to vector<64x8xf32>
    %23 = tpu.concatenate %6, %8, %10, %12, %14, %16, %18, %20, %22 in 1 : vector<64x8xf32>, vector<64x8xf32>, vector<64x8xf32>, vector<64x8xf32>, vector<64x8xf32>, vector<64x8xf32>, vector<64x8xf32>, vector<64x8xf32>, vector<64x8xf32> -> vector<64x72xf32>
    %c0_7 = arith.constant 0 : index
    %c0_8 = arith.constant 0 : index
    %24 = vector.load %arg3[%c0_7, %c0_8] : memref<72x8xf32, #tpu.memory_space<vmem>>, vector<72x8xf32>
    %cst = arith.constant dense<0.000000e+00> : vector<64x8xf32>
    %25 = tpu.matmul %23, %24, %cst {dimension_numbers = #tpu.dot_dimension_numbers<[1], [0], [0], [1], [0, 0, 1, 1], [], []>} : vector<64x72xf32>, vector<72x8xf32>, vector<64x8xf32> -> vector<64x8xf32>
    %c0_9 = arith.constant 0 : index
    %c0_10 = arith.constant 0 : index
    %26 = vector.load %arg4[%c0_9, %c0_10] : memref<1x8xf32, #tpu.memory_space<vmem>>, vector<1x8xf32>
    %27 = vector.broadcast %26 : vector<1x8xf32> to vector<64x8xf32>
    %28 = arith.mulf %25, %27 : vector<64x8xf32>
    %c0_11 = arith.constant 0 : index
    %c0_12 = arith.constant 0 : index
    %29 = vector.load %arg5[%c0_11, %c0_12] : memref<1x8xf32, #tpu.memory_space<vmem>>, vector<1x8xf32>
    %30 = vector.broadcast %29 : vector<1x8xf32> to vector<64x8xf32>
    %31 = arith.addf %28, %30 : vector<64x8xf32>
    %cst_13 = arith.constant 0.000000e+00 : f32
    %32 = vector.broadcast %cst_13 : f32 to vector<64x8xf32>
    %33 = arith.maximumf %31, %32 : vector<64x8xf32>
    %c0_14 = arith.constant 0 : index
    %c0_15 = arith.constant 0 : index
    %c0_16 = arith.constant 0 : index
    %34 = vector.load %arg6[%c0_14, %c0_15, %c0_16] : memref<1x64x8xf32, #tpu.memory_space<vmem>>, vector<1x64x8xf32>
    %35 = vector.shape_cast %34 : vector<1x64x8xf32> to vector<64x8xf32>
    %36 = vector.shape_cast %33 : vector<64x8xf32> to vector<1x64x8xf32>
    tpu.vector_store %arg6[%c0_14, %c0_15, %c0_16], %36 {strides = array<i32>} : memref<1x64x8xf32, #tpu.memory_space<vmem>>, vector<1x64x8xf32>,
    return
  }
  func.func @transform_0(%arg0: i32) -> (i32, i32, i32, i32) {
    %c0_i32 = arith.constant 0 : i32
    %c0_i32_0 = arith.constant 0 : i32
    %c0_i32_1 = arith.constant 0 : i32
    %c0_i32_2 = arith.constant 0 : i32
    return %arg0, %c0_i32, %c0_i32_0, %c0_i32_1 : i32, i32, i32, i32
  }
  func.func @transform_1(%arg0: i32) -> (i32, i32, i32, i32) {
    %c0_i32 = arith.constant 0 : i32
    %c0_i32_0 = arith.constant 0 : i32
    %c0_i32_1 = arith.constant 0 : i32
    %c0_i32_2 = arith.constant 0 : i32
    return %arg0, %c0_i32, %c0_i32_0, %c0_i32_1 : i32, i32, i32, i32
  }
  func.func @transform_2(%arg0: i32) -> (i32, i32) {
    %c0_i32 = arith.constant 0 : i32
    %c0_i32_0 = arith.constant 0 : i32
    %c0_i32_1 = arith.constant 0 : i32
    return %c0_i32, %c0_i32_0 : i32, i32
  }
  func.func @transform_3(%arg0: i32) -> (i32, i32) {
    %c0_i32 = arith.constant 0 : i32
    %c0_i32_0 = arith.constant 0 : i32
    %c0_i32_1 = arith.constant 0 : i32
    return %c0_i32, %c0_i32_0 : i32, i32
  }
  func.func @transform_4(%arg0: i32) -> (i32, i32) {
    %c0_i32 = arith.constant 0 : i32
    %c0_i32_0 = arith.constant 0 : i32
    %c0_i32_1 = arith.constant 0 : i32
    return %c0_i32, %c0_i32_0 : i32, i32
  }
  func.func @transform_5(%arg0: i32) -> (i32, i32, i32) {
    %c0_i32 = arith.constant 0 : i32
    %c0_i32_0 = arith.constant 0 : i32
    %c0_i32_1 = arith.constant 0 : i32
    return %arg0, %c0_i32, %c0_i32_0 : i32, i32, i32
  }
}

module attributes {stable_mosaic.version = 11 : i64} {
  func.func @_conv_kernel(%arg0: i32, %arg1: memref<1x18x18x8xf32, #tpu.memory_space<vmem>>, %arg2: memref<72x8xf32, #tpu.memory_space<vmem>>, %arg3: memref<1x8xf32, #tpu.memory_space<vmem>>, %arg4: memref<1x8xf32, #tpu.memory_space<vmem>>, %arg5: memref<1x256x8xf32, #tpu.memory_space<vmem>>) attributes {dimension_semantics = [#tpu.dimension_semantics<parallel>], iteration_bounds = array<i64: 2>, scalar_prefetch = 0 : i64, scratch_operands = 0 : i64, tpu.core_type = #tpu.core_type<tc>, window_params = [{transform_indices = @transform_0, window_bounds = array<i64: 1, 18, 18, 8>}, {pipeline_mode = #tpu.pipeline_mode<synchronous>, transform_indices = @transform_1, window_bounds = array<i64: 72, 8>}, {pipeline_mode = #tpu.pipeline_mode<synchronous>, transform_indices = @transform_2, window_bounds = array<i64: 1, 8>}, {pipeline_mode = #tpu.pipeline_mode<synchronous>, transform_indices = @transform_3, window_bounds = array<i64: 1, 8>}, {transform_indices = @transform_4, window_bounds = array<i64: 1, 256, 8>}]} {
    %c0 = arith.constant 0 : index
    %c0_0 = arith.constant 0 : index
    %c0_1 = arith.constant 0 : index
    %c0_2 = arith.constant 0 : index
    %0 = vector.load %arg1[%c0, %c0_0, %c0_1, %c0_2] : memref<1x18x18x8xf32, #tpu.memory_space<vmem>>, vector<1x18x18x8xf32>
    %1 = vector.shape_cast %0 : vector<1x18x18x8xf32> to vector<18x18x8xf32>
    %2 = vector.extract_strided_slice %1 {offsets = [0, 0, 0], sizes = [16, 16, 8], strides = [1, 1, 1]} : vector<18x18x8xf32> to vector<16x16x8xf32>
    %3 = vector.shape_cast %2 : vector<16x16x8xf32> to vector<256x8xf32>
    %4 = vector.extract_strided_slice %1 {offsets = [0, 1, 0], sizes = [16, 16, 8], strides = [1, 1, 1]} : vector<18x18x8xf32> to vector<16x16x8xf32>
    %5 = vector.shape_cast %4 : vector<16x16x8xf32> to vector<256x8xf32>
    %6 = vector.extract_strided_slice %1 {offsets = [0, 2, 0], sizes = [16, 16, 8], strides = [1, 1, 1]} : vector<18x18x8xf32> to vector<16x16x8xf32>
    %7 = vector.shape_cast %6 : vector<16x16x8xf32> to vector<256x8xf32>
    %8 = vector.extract_strided_slice %1 {offsets = [1, 0, 0], sizes = [16, 16, 8], strides = [1, 1, 1]} : vector<18x18x8xf32> to vector<16x16x8xf32>
    %9 = vector.shape_cast %8 : vector<16x16x8xf32> to vector<256x8xf32>
    %10 = vector.extract_strided_slice %1 {offsets = [1, 1, 0], sizes = [16, 16, 8], strides = [1, 1, 1]} : vector<18x18x8xf32> to vector<16x16x8xf32>
    %11 = vector.shape_cast %10 : vector<16x16x8xf32> to vector<256x8xf32>
    %12 = vector.extract_strided_slice %1 {offsets = [1, 2, 0], sizes = [16, 16, 8], strides = [1, 1, 1]} : vector<18x18x8xf32> to vector<16x16x8xf32>
    %13 = vector.shape_cast %12 : vector<16x16x8xf32> to vector<256x8xf32>
    %14 = vector.extract_strided_slice %1 {offsets = [2, 0, 0], sizes = [16, 16, 8], strides = [1, 1, 1]} : vector<18x18x8xf32> to vector<16x16x8xf32>
    %15 = vector.shape_cast %14 : vector<16x16x8xf32> to vector<256x8xf32>
    %16 = vector.extract_strided_slice %1 {offsets = [2, 1, 0], sizes = [16, 16, 8], strides = [1, 1, 1]} : vector<18x18x8xf32> to vector<16x16x8xf32>
    %17 = vector.shape_cast %16 : vector<16x16x8xf32> to vector<256x8xf32>
    %18 = vector.extract_strided_slice %1 {offsets = [2, 2, 0], sizes = [16, 16, 8], strides = [1, 1, 1]} : vector<18x18x8xf32> to vector<16x16x8xf32>
    %19 = vector.shape_cast %18 : vector<16x16x8xf32> to vector<256x8xf32>
    %20 = tpu.concatenate %3, %5, %7, %9, %11, %13, %15, %17, %19 in 1 : vector<256x8xf32>, vector<256x8xf32>, vector<256x8xf32>, vector<256x8xf32>, vector<256x8xf32>, vector<256x8xf32>, vector<256x8xf32>, vector<256x8xf32>, vector<256x8xf32> -> vector<256x72xf32>
    %c0_3 = arith.constant 0 : index
    %c0_4 = arith.constant 0 : index
    %21 = vector.load %arg2[%c0_3, %c0_4] : memref<72x8xf32, #tpu.memory_space<vmem>>, vector<72x8xf32>
    %cst = arith.constant dense<0.000000e+00> : vector<256x8xf32>
    %22 = tpu.matmul %20, %21, %cst {dimension_numbers = #tpu.dot_dimension_numbers<[1], [0], [0], [1], [0, 0, 1, 1], [], []>} : vector<256x72xf32>, vector<72x8xf32>, vector<256x8xf32> -> vector<256x8xf32>
    %c0_5 = arith.constant 0 : index
    %c0_6 = arith.constant 0 : index
    %23 = vector.load %arg3[%c0_5, %c0_6] : memref<1x8xf32, #tpu.memory_space<vmem>>, vector<1x8xf32>
    %24 = vector.broadcast %23 : vector<1x8xf32> to vector<256x8xf32>
    %25 = arith.mulf %22, %24 : vector<256x8xf32>
    %c0_7 = arith.constant 0 : index
    %c0_8 = arith.constant 0 : index
    %26 = vector.load %arg4[%c0_7, %c0_8] : memref<1x8xf32, #tpu.memory_space<vmem>>, vector<1x8xf32>
    %27 = vector.broadcast %26 : vector<1x8xf32> to vector<256x8xf32>
    %28 = arith.addf %25, %27 : vector<256x8xf32>
    %cst_9 = arith.constant 0.000000e+00 : f32
    %29 = vector.broadcast %cst_9 : f32 to vector<256x8xf32>
    %30 = arith.maximumf %28, %29 : vector<256x8xf32>
    %c0_10 = arith.constant 0 : index
    %c0_11 = arith.constant 0 : index
    %c0_12 = arith.constant 0 : index
    %31 = vector.load %arg5[%c0_10, %c0_11, %c0_12] : memref<1x256x8xf32, #tpu.memory_space<vmem>>, vector<1x256x8xf32>
    %32 = vector.shape_cast %31 : vector<1x256x8xf32> to vector<256x8xf32>
    %33 = vector.shape_cast %30 : vector<256x8xf32> to vector<1x256x8xf32>
    tpu.vector_store %arg5[%c0_10, %c0_11, %c0_12], %33 {strides = array<i32>} : memref<1x256x8xf32, #tpu.memory_space<vmem>>, vector<1x256x8xf32>,
    return
  }
  func.func @transform_0(%arg0: i32) -> (i32, i32, i32, i32) {
    %c0_i32 = arith.constant 0 : i32
    %c0_i32_0 = arith.constant 0 : i32
    %c0_i32_1 = arith.constant 0 : i32
    %c0_i32_2 = arith.constant 0 : i32
    return %arg0, %c0_i32, %c0_i32_0, %c0_i32_1 : i32, i32, i32, i32
  }
  func.func @transform_1(%arg0: i32) -> (i32, i32) {
    %c0_i32 = arith.constant 0 : i32
    %c0_i32_0 = arith.constant 0 : i32
    %c0_i32_1 = arith.constant 0 : i32
    return %c0_i32, %c0_i32_0 : i32, i32
  }
  func.func @transform_2(%arg0: i32) -> (i32, i32) {
    %c0_i32 = arith.constant 0 : i32
    %c0_i32_0 = arith.constant 0 : i32
    %c0_i32_1 = arith.constant 0 : i32
    return %c0_i32, %c0_i32_0 : i32, i32
  }
  func.func @transform_3(%arg0: i32) -> (i32, i32) {
    %c0_i32 = arith.constant 0 : i32
    %c0_i32_0 = arith.constant 0 : i32
    %c0_i32_1 = arith.constant 0 : i32
    return %c0_i32, %c0_i32_0 : i32, i32
  }
  func.func @transform_4(%arg0: i32) -> (i32, i32, i32) {
    %c0_i32 = arith.constant 0 : i32
    %c0_i32_0 = arith.constant 0 : i32
    %c0_i32_1 = arith.constant 0 : i32
    return %arg0, %c0_i32, %c0_i32_0 : i32, i32, i32
  }
}

</mosaic_0001>

<bundles_post_ra>
// kernel: cam_forward.8
= control target key start
LH: loop header
LB: loop body
LE: loop exit
PB: predicated region body
PF: predicated region fallthrough
CT: control target
= control target key end

     0   :  { %s1150_s12 = smov 0   ;;  %s1238_s0 = inlined_call_operand.vmem [shape: f32[2,8,8,8], index: 0, kind: input, shape index: {}]   ;;  %s1239_s1 = inlined_call_operand.vmem [shape: f32[16,8], index: 1, kind: input, shape index: {}]   ;;  %s1240_s2 = inlined_call_operand.vmem [shape: f32[8,16], index: 2, kind: input, shape index: {}]   ;;  %s1241_s3 = inlined_call_operand.vmem [shape: f32[2,8,16,16], index: 3, kind: output, shape index: {}]  }
   0x1 LB: > { %s990_s13 = sadd.s32 4294967295, %s1128_s12   ;;  %p994_p0 = scmp.ge.s32.totalorder %s1128_s12, 1  ;;  %s1128_s12 = sphi %s1150_s12, %s13_s12  }
   0x2   : > { %p137_p1 = scmp.lt.s32.totalorder %s1128_s12, 3 }
   0x4   : > { %p138_p2 = pnand %p994_p0, %p137_p1 }
   0x5   : > { %v179_v0 = vld [vmem:[%s1240_s2] sm:$0xff] (!%p138_p2)  ;;  %p161_p3 = scmp.lt.s32.totalorder (!%p138_p2), %s990_s13, 1  ;;  %vm180_vm0 = vcmask (!%p138_p2), 64512   ;;  %v311_v12 = vld [vmem:[%s1239_s1 + $0x8] sm:$0xff] (!%p138_p2)  ;;  %vm918_vm1 = vcmask (!%p138_p2), 130048  }
   0x6   : > { %141 = sbr.rel (%p138_p2) target bundleno = 467 (0x1d3), region = 32  ;;  %1060 = vmatprep.subr.mxu0 (!%p138_p2), %v179_v0  ;;  %v310_v9 = vld [vmem:[%s1239_s1] sm:$0xff] (!%p138_p2) }
   0x7   : > { %1061 = vmatpush3.msra.mxu0 (!%p138_p2), %v179_v0  ;;  %1076 = vmatprep.mubr.msk.f32.mxu1 (!%p138_p2), %vm180_vm0, %v310_v9 }
   0xd   : > { %s1243_s13 = smov (!%p161_p3, %s990_s13), 1 }
   0xe   : > { %s1025_s16 = sshll.u32 %s1243_s13, 6  ;;  %s1026_s24 = sshll.u32 %s1243_s13, 7 }
   0xf   : > { %s165_s19 = scalar_lea.vmem %s1238_s0, %s1025_s16  ;;  %s1201_s27 = scalar_lea.vmem %s1241_s3, %s1026_s24 }
  0x10   : > { %v171_v1 = vld [vmem:[%s165_s19] sm:$0xff]  ;;  %v172_v2 = vld [vmem:[%s165_s19 + $0x8] sm:$0xff]  ;;  %v173_v3 = vld [vmem:[%s165_s19 + $0x10] sm:$0xff] }
  0x11   : > { %1062 = vmatprep.mubr.msk.f32.mxu0 %vm180_vm0, %v171_v1  ;;  %v174_v4 = vld [vmem:[%s165_s19 + $0x18] sm:$0xff]  ;;  %v175_v5 = vld [vmem:[%s165_s19 + $0x20] sm:$0xff]  ;;  %v176_v6 = vld [vmem:[%s165_s19 + $0x28] sm:$0xff] }
  0x12   : > { %1063 = vmatmul.mubr.msk.f32.vlgmr.msra.gmra.mrb[0].mxu0 %vm180_vm0, %v172_v2  ;;  %v177_v7 = vld [vmem:[%s165_s19 + $0x30] sm:$0xff]  ;;  %v178_v8 = vld [vmem:[%s165_s19 + $0x38] sm:$0xff] }
  0x13   : > { %1065 = vmatprep.mubr.msk.f32.mxu0 %vm180_vm0, %v173_v3 }
  0x16   : > { %1066 = vmatmul.mubr.msk.f32.gmra.mrb[2].mxu0 %vm180_vm0, %v174_v4 }
  0x17   : > { %1068 = vmatprep.mubr.msk.f32.mxu0 %vm180_vm0, %v175_v5 }
  0x1a   : > { %1069 = vmatmul.mubr.msk.f32.gmra.mrb[4].mxu0 %vm180_vm0, %v176_v6 }
  0x1b   : > { %1071 = vmatprep.mubr.msk.f32.mxu0 %vm180_vm0, %v177_v7 }
  0x1e   : > { %1072 = vmatmul.mubr.msk.f32.gmra.mrb[6].mxu0 %vm180_vm0, %v178_v8 }
  0x1f   : > { %1096 = vmatprep.mubr.msk.f32.mxu0 %vm180_vm0, %v310_v9 }
  0xe5   : > { %v1064_v10 = vpop.f32.mrb[0].mxu0 }
  0xe6   : > { %v271_v11 = vpop.f32.mrb[1].mxu0 }
  0xe7   : > { %1074 = vmatprep.subr.mxu1 %v271_v11 }
  0xe8   : > { %1075 = vmatpush3.msra.mxu1 %v271_v11 }
  0xe9   : > { %v1067_v13 = vpop.f32.mrb[2].mxu0  ;;  %1077 = vmatmul.mubr.msk.f32.vlgmr.msra.gmra.mrb[0].mxu1 %vm180_vm0, %v311_v12  ;;  %1079 = vmatprep.subr.mxu1 %v1064_v10 }
  0xea   : > { %v281_v14 = vpop.f32.mrb[3].mxu0  ;;  %1080 = vmatpush3.msra.mxu1 %v1064_v10  ;;  %1081 = vmatprep.mubr.msk.f32.mxu1 %vm180_vm0, %v310_v9 }
  0xeb   : > { %1084 = vmatprep.subr.mxu1 %v281_v14 }
  0xed   : > { %v1070_v15 = vpop.f32.mrb[4].mxu0  ;;  %1082 = vmatmul.mubr.msk.f32.vlgmr.msra.gmra.mrb[2].mxu1 %vm180_vm0, %v311_v12 }
  0xee   : > { %1085 = vmatpush3.msra.mxu1 %v281_v14  ;;  %v291_v16 = vpop.f32.mrb[5].mxu0  ;;  %1086 = vmatprep.mubr.msk.f32.mxu1 %vm180_vm0, %v310_v9 }
  0xef   : > { %1089 = vmatprep.subr.mxu1 %v1067_v13  ;;  %1094 = vmatprep.subr.mxu0 %v291_v16 }
  0xf0   : > { %1095 = vmatpush3.msra.mxu0 %v291_v16 }
  0xf1   : > { %1087 = vmatmul.mubr.msk.f32.vlgmr.msra.gmra.mrb[4].mxu1 %vm180_vm0, %v311_v12  ;;  %v1073_v17 = vpop.f32.mrb[6].mxu0  ;;  %1097 = vmatmul.mubr.msk.f32.vlgmr.msra.gmra.mrb[8].mxu0 %vm180_vm0, %v311_v12 }
  0xf2   : > { %1090 = vmatpush3.msra.mxu1 %v1067_v13  ;;  %1091 = vmatprep.mubr.msk.f32.mxu1 %vm180_vm0, %v310_v9  ;;  %v301_v18 = vpop.f32.mrb[7].mxu0 }
  0xf3   : > { %1099 = vmatprep.subr.mxu1 %v1070_v15  ;;  %1104 = vmatprep.subr.mxu0 %v301_v18 }
  0xf4   : > { %1105 = vmatpush3.msra.mxu0 %v301_v18  ;;  %1106 = vmatprep.mubr.msk.f32.mxu0 %vm180_vm0, %v310_v9 }
  0xf5   : > { %1092 = vmatmul.mubr.msk.f32.vlgmr.msra.gmra.mrb[6].mxu1 %vm180_vm0, %v311_v12  ;;  %1107 = vmatmul.mubr.msk.f32.vlgmr.msra.gmra.mrb[10].mxu0 %vm180_vm0, %v311_v12 }
  0xf6   : > { %1100 = vmatpush3.msra.mxu1 %v1070_v15  ;;  %1101 = vmatprep.mubr.msk.f32.mxu1 %vm180_vm0, %v310_v9 }
  0xf7   : > { %1109 = vmatprep.subr.mxu1 %v1073_v17 }
  0xf9   : > { %1102 = vmatmul.mubr.msk.f32.vlgmr.msra.gmra.mrb[8].mxu1 %vm180_vm0, %v311_v12 }
  0xfa   : > { %1110 = vmatpush3.msra.mxu1 %v1073_v17  ;;  %1111 = vmatprep.mubr.msk.f32.mxu1 %vm180_vm0, %v310_v9 }
  0xfd   : > { %1112 = vmatmul.mubr.msk.f32.vlgmr.msra.gmra.mrb[10].mxu1 %vm180_vm0, %v311_v12 }
 0x1bc   : > { %v1078_v19 = vpop.f32.mrb[0].mxu1 }
 0x1bd   : > { %920 = vst.msk [vmem:[%s1201_s27 + $0x8] sm:$0xff] %vm918_vm1, %v1078_v19  ;;  %v384_v20 = vpop.f32.mrb[1].mxu1 }
 0x1be   : > { %919 = vst.msk [vmem:[%s1201_s27] sm:$0xff] %vm918_vm1, %v384_v20 }
 0x1c0   : > { %v1083_v21 = vpop.f32.mrb[2].mxu1 }
 0x1c1   : > { %922 = vst.msk [vmem:[%s1201_s27 + $0x18] sm:$0xff] %vm918_vm1, %v1083_v21  ;;  %v459_v22 = vpop.f32.mrb[3].mxu1 }
 0x1c2   : > { %921 = vst.msk [vmem:[%s1201_s27 + $0x10] sm:$0xff] %vm918_vm1, %v459_v22 }
 0x1c4   : > { %v1088_v23 = vpop.f32.mrb[4].mxu1  ;;  %v1098_v24 = vpop.f32.mrb[8].mxu0 }
 0x1c5   : > { %924 = vst.msk [vmem:[%s1201_s27 + $0x28] sm:$0xff] %vm918_vm1, %v1088_v23  ;;  %v534_v25 = vpop.f32.mrb[5].mxu1  ;;  %928 = vst.msk [vmem:[%s1201_s27 + $0x48] sm:$0xff] %vm918_vm1, %v1098_v24  ;;  %v684_v26 = vpop.f32.mrb[9].mxu0 }
 0x1c6   : > { %923 = vst.msk [vmem:[%s1201_s27 + $0x20] sm:$0xff] %vm918_vm1, %v534_v25  ;;  %927 = vst.msk [vmem:[%s1201_s27 + $0x40] sm:$0xff] %vm918_vm1, %v684_v26 }
 0x1c8   : > { %v1093_v27 = vpop.f32.mrb[6].mxu1  ;;  %v1108_v28 = vpop.f32.mrb[10].mxu0 }
 0x1c9   : > { %926 = vst.msk [vmem:[%s1201_s27 + $0x38] sm:$0xff] %vm918_vm1, %v1093_v27  ;;  %v609_v29 = vpop.f32.mrb[7].mxu1  ;;  %932 = vst.msk [vmem:[%s1201_s27 + $0x68] sm:$0xff] %vm918_vm1, %v1108_v28  ;;  %v834_v30 = vpop.f32.mrb[11].mxu0 }
 0x1ca   : > { %925 = vst.msk [vmem:[%s1201_s27 + $0x30] sm:$0xff] %vm918_vm1, %v609_v29  ;;  %931 = vst.msk [vmem:[%s1201_s27 + $0x60] sm:$0xff] %vm918_vm1, %v834_v30 }
 0x1cc   : > { %v1103_v31 = vpop.f32.mrb[8].mxu1 }
 0x1cd   : > { %930 = vst.msk [vmem:[%s1201_s27 + $0x58] sm:$0xff] %vm918_vm1, %v1103_v31  ;;  %v759_v32 = vpop.f32.mrb[9].mxu1 }
 0x1ce   : > { %929 = vst.msk [vmem:[%s1201_s27 + $0x50] sm:$0xff] %vm918_vm1, %v759_v32 }
 0x1d0   : > { %v1113_v33 = vpop.f32.mrb[10].mxu1 }
 0x1d1   : > { %934 = vst.msk [vmem:[%s1201_s27 + $0x78] sm:$0xff] %vm918_vm1, %v1113_v33  ;;  %v909_v34 = vpop.f32.mrb[11].mxu1 }
 0x1d2   : > { %933 = vst.msk [vmem:[%s1201_s27 + $0x70] sm:$0xff] %vm918_vm1, %v909_v34 }
 0x1d3 PF: > { %s13_s12 = sadd.s32 1, %s1128_s12  }
 0x1d4   : > { %p10_p4 = scmp.ge.s32.totalorder %s13_s12, 4  }
 0x1d6   :  { %12 = sbr.rel (!%p10_p4) target bundleno = 1 (0x1), region = 62 }

// kernel: cam_forward.7
= control target key start
LH: loop header
LB: loop body
LE: loop exit
PB: predicated region body
PF: predicated region fallthrough
CT: control target
= control target key end

     0   :  { %s1050_s15 = smov 0   ;;  %s1487_s0 = inlined_call_operand.vmem [shape: f32[8,9,9,8], index: 0, kind: input, shape index: {}]   ;;  %s1488_s1 = inlined_call_operand.vmem [shape: f32[72,8], index: 1, kind: input, shape index: {}]   ;;  %s1489_s2 = inlined_call_operand.vmem [shape: f32[1,8], index: 2, kind: input, shape index: {}]   ;;  %s1490_s3 = inlined_call_operand.vmem [shape: f32[1,8], index: 3, kind: input, shape index: {}]   ;;  %s1491_s4 = inlined_call_operand.vmem [shape: f32[2,64,8], index: 4, kind: output, shape index: {}]  }
   0x1 LB: > { %s1056_s16 = sadd.s32 4294967295, %s1015_s15   ;;  %p868_p0 = scmp.ge.s32.totalorder %s1015_s15, 1  ;;  %s1015_s15 = sphi %s1050_s15, %s14_s15  }
   0x2   : > { %p164_p1 = scmp.lt.s32.totalorder %s1015_s15, 3 }
   0x4   : > { %p165_p2 = pnand %p868_p0, %p164_p1 }
   0x5   : > { %s869_s17 = sshll.u32 (!%p165_p2), %s1056_s16, 2  ;;  %s1017_s22 = smov (!%p165_p2), 8   ;;  %vm273_vm0 = vcmask (!%p165_p2), 1046528   ;;  %vm552_vm1 = vcmask (!%p165_p2), 64512   ;;  %vm561_vm2 = vcmask (!%p165_p2), 130048   ;;  %vm570_vm3 = vcmask (!%p165_p2), 195584  }
   0x6   : > { %168 = sbr.rel (%p165_p2) target bundleno = 478 (0x1de), region = 36  ;;  %p192_p3 = scmp.lt.s32.totalorder (!%p165_p2), %s869_s17, 7  ;;  %vm579_vm4 = vcmask (!%p165_p2), 261120   ;;  %vm588_vm5 = vcmask (!%p165_p2), 326656   ;;  %vm597_vm6 = vcmask (!%p165_p2), 392192   ;;  %vm606_vm7 = vcmask (!%p165_p2), 457728  }
   0x7   : > { %s1018_s23 = smov (!%p165_p2), 16   ;;  %s1019_s24 = smov (!%p165_p2), 24   ;;  %vm615_vm8 = vcmask (!%p165_p2), 523264   ;;  %vm633_vm9 = vcmask (!%p165_p2), 588800  }
   0x8   : > { %s1020_s25 = smov (!%p165_p2), 32   ;;  %s1021_s26 = smov (!%p165_p2), 40  }
   0x9   : > { %s1022_s27 = smov (!%p165_p2), 48   ;;  %s1023_s10 = smov (!%p165_p2), 56  }
   0xa   : > { %p198_p4 = scmp.lt.s32.totalorder (!%p165_p2), %s1056_s16, 1 }
   0xd   : > { %s1493_s17 = smov (!%p192_p3, %s869_s17), 7  ;;  %s1495_s16 = smov (!%p198_p4, %s1056_s16), 1 }
   0xe   : > { %s992_s18 = smul.u32 144, %s1493_s17  ;;  %s918_s28 = sshll.u32 %s1495_s16, 6 }
   0xf   : > { %s202_s5 = scalar_lea.vmem %s1491_s4, %s918_s28 }
  0x10   : > { %s1064_s21 = scalar_lea.vmem %s1487_s0, %s992_s18 }
  0x11   : > { %v1067_v0 = vld [vmem:[%s1064_s21 + $0xa0] sm:$0xff]  ;;  %v873_v1 = vld [vmem:[%s1064_s21 + $0x90] sm:$0xff]  ;;  %v212_v5 = vld [vmem:[%s1064_s21 + $0x48] sm:$0x1] }
  0x12   : > { %v1071_v2 = vld [vmem:[%s1064_s21 + $0xe0] sm:$0xff]  ;;  %353 = vrot.lane.b32.xlu1 %v1067_v0, %s1017_s22  ;;  %351 = vrot.lane.b32.xlu0 %v873_v1, %s1017_s22  ;;  %v1077_v3 = vld [vmem:[%s1064_s21 + $0xd0] sm:$0xff]  ;;  %v287_v9 = vrot.slane %v212_v5, 1 }
  0x13   : > { %v1080_v4 = vld [vmem:[%s1064_s21 + $0x40] sm:$0xff]  ;;  %v204_v8 = vld [vmem:[%s1064_s21 + $0x8] sm:$0x1]  ;;  %v1090_v12 = vld [vmem:[%s1064_s21 + $0x50] sm:$0xff] }
  0x14   : > { %v286_v6 = vrot.slane %v1080_v4, 1  ;;  %v1085_v7 = vld [vmem:[%s1064_s21] sm:$0xff]  ;;  %v275_v11 = vrot.slane %v204_v8, 1  ;;  %v214_v13 = vld [vmem:[%s1064_s21 + $0x58] sm:$0x1]  ;;  %v1094_v14 = vld [vmem:[%s1064_s21 + $0x10] sm:$0xff] }
  0x15   : > { %v274_v10 = vrot.slane %v1085_v7, 1  ;;  %v206_v15 = vld [vmem:[%s1064_s21 + $0x18] sm:$0x1]  ;;  %v289_v16 = vrot.slane %v1090_v12, 1  ;;  %v290_v17 = vrot.slane %v214_v13, 1  ;;  %v277_v20 = vrot.slane %v1094_v14, 1 }
  0x16   : > { %361 = vrot.lane.b32.xlu1 %v1071_v2, %s1017_s22  ;;  %359 = vrot.lane.b32.xlu0 %v1077_v3, %s1017_s22  ;;  %v1103_v18 = vsel %vm273_vm0, %v286_v6, %v287_v9  ;;  %v278_v21 = vrot.slane %v206_v15, 1  ;;  %v890_v24 = vld [vmem:[%s1064_s21 + $0x160] sm:$0xff]  ;;  %v1129_v28 = vld [vmem:[%s1064_s21 + $0x170] sm:$0xff] }
  0x17   : > { %v276_v19 = vsel %vm273_vm0, %v274_v10, %v275_v11  ;;  %v1111_v22 = vsel %vm273_vm0, %v289_v16, %v290_v17  ;;  %v882_v25 = vld [vmem:[%s1064_s21 + $0x120] sm:$0xff]  ;;  %v1132_v29 = vld [vmem:[%s1064_s21 + $0x130] sm:$0xff]  ;;  %v895_v36 = vld [vmem:[%s1064_s21 + $0x188] sm:$0x1]  ;;  %v326_v59 = vrot.slane %v890_v24, 1 }
  0x18   : > { %v1114_v23 = vsel %vm273_vm0, %v277_v20, %v278_v21  ;;  %v1123_v26 = vld [vmem:[%s1064_s21 + $0x180] sm:$0xff]  ;;  %v1137_v32 = vld [vmem:[%s1064_s21 + $0x190] sm:$0xff]  ;;  %v887_v37 = vld [vmem:[%s1064_s21 + $0x148] sm:$0x1]  ;;  %v333_v38 = vrot.slane %v895_v36, 1  ;;  %v314_v60 = vrot.slane %v882_v25, 1 }
  0x19   : > { %v1126_v27 = vld [vmem:[%s1064_s21 + $0x140] sm:$0xff]  ;;  %v332_v30 = vrot.slane %v1123_v26, 1  ;;  %v1140_v33 = vld [vmem:[%s1064_s21 + $0x150] sm:$0xff]  ;;  %v335_v34 = vrot.slane %v1137_v32, 1  ;;  %v321_v39 = vrot.slane %v887_v37, 1 }
  0x1a   : > { %383 = vrot.lane.b32.xlu1 %v1103_v18, %s1018_s23  ;;  %375 = vrot.lane.b32.xlu0 %v276_v19, %s1018_s23  ;;  %v320_v31 = vrot.slane %v1126_v27, 1  ;;  %v323_v35 = vrot.slane %v1140_v33, 1  ;;  %v897_v40 = vld [vmem:[%s1064_s21 + $0x198] sm:$0x1]  ;;  %v1151_v44 = vld [vmem:[%s1064_s21 + $0x80] sm:$0xff] }
  0x1b   : > { %v889_v41 = vld [vmem:[%s1064_s21 + $0x158] sm:$0x1]  ;;  %v336_v42 = vrot.slane %v897_v40, 1  ;;  %v220_v45 = vld [vmem:[%s1064_s21 + $0x88] sm:$0x1]  ;;  %v1155_v46 = vsel %vm273_vm0, %v332_v30, %v333_v38  ;;  %v340_v48 = vrot.slane %v1151_v44, 1 }
  0x1c   : > { %v324_v43 = vrot.slane %v889_v41, 1  ;;  %v1158_v47 = vsel %vm273_vm0, %v320_v31, %v321_v39  ;;  %v341_v49 = vrot.slane %v220_v45, 1  ;;  %v902_v52 = vld [vmem:[%s1064_s21 + $0x1f0] sm:$0xff]  ;;  %v891_v57 = vld [vmem:[%s1064_s21 + $0x168] sm:$0x1]  ;;  %v903_v61 = vld [vmem:[%s1064_s21 + $0x200] sm:$0xff] }
  0x1d   : > { %v1166_v50 = vsel %vm273_vm0, %v335_v34, %v336_v42  ;;  %v898_v53 = vld [vmem:[%s1064_s21 + $0x1b0] sm:$0xff]  ;;  %v883_v58 = vld [vmem:[%s1064_s21 + $0x128] sm:$0x1]  ;;  %v899_v62 = vld [vmem:[%s1064_s21 + $0x1c0] sm:$0xff]  ;;  %v327_v63 = vrot.slane %v891_v57, 1  ;;  %v317_v30 = vrot.slane %v1132_v29, 1 }
  0x1e   : > { %385 = vrot.lane.b32.xlu1 %v1111_v22, %s1018_s23  ;;  %377 = vrot.lane.b32.xlu0 %v1114_v23, %s1018_s23  ;;  %v1169_v51 = vsel %vm273_vm0, %v323_v35, %v324_v43  ;;  %v1174_v54 = vsel %vm273_vm0, %v340_v48, %v341_v49  ;;  %v1179_v55 = vld [vmem:[%s1064_s21 + $0xf0] sm:$0xff]  ;;  %v315_v1 = vrot.slane %v883_v58, 1  ;;  %v1197_v8 = vld [vmem:[%s1064_s21 + $0x60] sm:$0xff] }
  0x1f   : > { %v1182_v56 = vld [vmem:[%s1064_s21 + $0xb0] sm:$0xff]  ;;  %v328_v5 = vsel %vm273_vm0, %v326_v59, %v327_v63  ;;  %v216_v9 = vld [vmem:[%s1064_s21 + $0x68] sm:$0x1]  ;;  %v1201_v10 = vld [vmem:[%s1064_s21 + $0x20] sm:$0xff]  ;;  %v292_v16 = vrot.slane %v1197_v8, 1 }
  0x20   : > { %v316_v6 = vsel %vm273_vm0, %v314_v60, %v315_v1  ;;  %v208_v11 = vld [vmem:[%s1064_s21 + $0x28] sm:$0x1]  ;;  %v1207_v13 = vld [vmem:[%s1064_s21 + $0x100] sm:$0xff]  ;;  %v293_v17 = vrot.slane %v216_v9, 1  ;;  %v280_v19 = vrot.slane %v1201_v10, 1  ;;  %v1235_v37 = vld [vmem:[%s1064_s21 + $0x70] sm:$0xff] }
  0x21   : > { %v1210_v15 = vld [vmem:[%s1064_s21 + $0xc0] sm:$0xff]  ;;  %v281_v20 = vrot.slane %v208_v11, 1  ;;  %v893_v21 = vld [vmem:[%s1064_s21 + $0x178] sm:$0x1]  ;;  %v1239_v39 = vld [vmem:[%s1064_s21 + $0x30] sm:$0xff]  ;;  %v295_v41 = vrot.slane %v1235_v37, 1 }
  0x22   : > { %407 = vrot.lane.b32.xlu1 %v890_v24, %s1019_s24  ;;  %399 = vrot.lane.b32.xlu0 %v882_v25, %s1019_s24  ;;  %v885_v24 = vld [vmem:[%s1064_s21 + $0x138] sm:$0x1]  ;;  %v329_v25 = vrot.slane %v1129_v28, 1  ;;  %v1223_v31 = vsel %vm273_vm0, %v292_v16, %v293_v17  ;;  %v330_v35 = vrot.slane %v893_v21, 1  ;;  %v283_v43 = vrot.slane %v1239_v39, 1  ;;  %v628_v59 = vld [vmem:[%s1488_s1 + $0x20] sm:$0xff] }
  0x23   : > { %v1226_v34 = vsel %vm273_vm0, %v280_v19, %v281_v20  ;;  %v318_v36 = vrot.slane %v885_v24, 1  ;;  %v218_v38 = vld [vmem:[%s1064_s21 + $0x78] sm:$0x1]  ;;  %v629_v60 = vld [vmem:[%s1488_s1 + $0x28] sm:$0xff]  ;;  %v905_v1 = vld [vmem:[%s1064_s21 + $0x220] sm:$0xff] }
  0x24   : > { %v210_v40 = vld [vmem:[%s1064_s21 + $0x38] sm:$0x1]  ;;  %v296_v42 = vrot.slane %v218_v38, 1 }
  0x25   : > { %v284_v45 = vrot.slane %v210_v40, 1  ;;  %v631_v63 = vld [vmem:[%s1488_s1 + $0x38] sm:$0xff] }
  0x26   : > { %409 = vrot.lane.b32.xlu1 %v1129_v28, %s1019_s24  ;;  %401 = vrot.lane.b32.xlu0 %v1132_v29, %s1019_s24  ;;  %v331_v28 = vsel %vm273_vm0, %v329_v25, %v330_v35  ;;  %v319_v29 = vsel %vm273_vm0, %v317_v30, %v318_v36  ;;  %v1251_v48 = vsel %vm273_vm0, %v295_v41, %v296_v42 }
  0x27   : > { %v1254_v49 = vsel %vm273_vm0, %v283_v43, %v284_v45 }
  0x2a   : > { %439 = vrot.lane.b32.xlu1 %v902_v52, %s1020_s25  ;;  %431 = vrot.lane.b32.xlu0 %v898_v53, %s1020_s25  ;;  %v624_v52 = vld [vmem:[%s1488_s1] sm:$0xff]  ;;  %v625_v53 = vld [vmem:[%s1488_s1 + $0x8] sm:$0xff] }
  0x2b   : > { %v966_v57 = vpack.c.bf16 %v625_v53, %v624_v52 }
  0x2d   : > { %967 = vmatprep.subr.bf16.mxu0 %v966_v57  ;;  %982 = vmatprep.subr.bf16.mxu1 %v966_v57 }
  0x2e   : > { %363 = vrot.lane.b32.xlu1 %v1179_v55, %s1017_s22  ;;  %355 = vrot.lane.b32.xlu0 %v1182_v56, %s1017_s22 }
  0x2f   : > { %969 = vmatpush3.bf16.msra.mxu0 %v966_v57  ;;  %987 = vmatpush3.bf16.msra.mxu1 %v966_v57 }
  0x32   : > { %441 = vrot.lane.b32.xlu1 %v903_v61, %s1020_s25  ;;  %433 = vrot.lane.b32.xlu0 %v899_v62, %s1020_s25  ;;  %v900_v61 = vld [vmem:[%s1064_s21 + $0x1d0] sm:$0xff] }
  0x33   : > { %v630_v62 = vld [vmem:[%s1488_s1 + $0x30] sm:$0xff] }
  0x36   : > { %463 = vrot.lane.b32.xlu1 %v328_v5, %s1021_s26  ;;  %455 = vrot.lane.b32.xlu0 %v316_v6, %s1021_s26  ;;  %v901_v5 = vld [vmem:[%s1064_s21 + $0x1e0] sm:$0xff] }
  0x3a   : > { %365 = vrot.lane.b32.xlu1 %v1207_v13, %s1017_s22  ;;  %357 = vrot.lane.b32.xlu0 %v1210_v15, %s1017_s22 }
  0x3e   : > { %387 = vrot.lane.b32.xlu1 %v1223_v31, %s1018_s23  ;;  %379 = vrot.lane.b32.xlu0 %v1226_v34, %s1018_s23 }
  0x42   : > { %465 = vrot.lane.b32.xlu1 %v331_v28, %s1021_s26  ;;  %457 = vrot.lane.b32.xlu0 %v319_v29, %s1021_s26 }
  0x46   : > { %487 = vrot.lane.b32.xlu1 %v1090_v12, %s1022_s27  ;;  %479 = vrot.lane.b32.xlu0 %v1094_v14, %s1022_s27 }
  0x4a   : > { %389 = vrot.lane.b32.xlu1 %v1251_v48, %s1018_s23  ;;  %381 = vrot.lane.b32.xlu0 %v1254_v49, %s1018_s23 }
  0x4e   : > { %411 = vrot.lane.b32.xlu1 %v1123_v26, %s1019_s24  ;;  %403 = vrot.lane.b32.xlu0 %v1126_v27, %s1019_s24  ;;  %v626_v26 = vld [vmem:[%s1488_s1 + $0x10] sm:$0xff]  ;;  %v627_v27 = vld [vmem:[%s1488_s1 + $0x18] sm:$0xff] }
  0x4f   : > { %v970_v58 = vpack.c.bf16 %v627_v27, %v626_v26 }
  0x51   : > { %971 = vmatprep.subr.bf16.mxu0 %v970_v58  ;;  %983 = vmatprep.subr.bf16.mxu1 %v970_v58 }
  0x52   : > { %489 = vrot.lane.b32.xlu1 %v1197_v8, %s1022_s27  ;;  %481 = vrot.lane.b32.xlu0 %v1201_v10, %s1022_s27 }
  0x53   : > { %973 = vmatpush3.bf16.msra.mxu0 %v970_v58  ;;  %988 = vmatpush3.bf16.msra.mxu1 %v970_v58 }
  0x56   : > { %512 = vrot.lane.b32.xlu1 %v1071_v2, %s1023_s10  ;;  %504 = vrot.lane.b32.xlu0 %v1067_v0, %s1023_s10  ;;  %v974_v0 = vpack.c.bf16 %v629_v60, %v628_v59  ;;  %v904_v2 = vld [vmem:[%s1064_s21 + $0x210] sm:$0xff] }
  0x58   : > { %975 = vmatprep.subr.bf16.mxu0 %v974_v0  ;;  %984 = vmatprep.subr.bf16.mxu1 %v974_v0 }
  0x59   : > { %977 = vmatpush3.bf16.msra.mxu0 %v974_v0  ;;  %989 = vmatpush3.bf16.msra.mxu1 %v974_v0 }
  0x5a   : > { %413 = vrot.lane.b32.xlu1 %v1137_v32, %s1019_s24  ;;  %405 = vrot.lane.b32.xlu0 %v1140_v33, %s1019_s24  ;;  %v978_v32 = vpack.c.bf16 %v631_v63, %v630_v62  ;;  %v632_v33 = vld [vmem:[%s1488_s1 + $0x40] sm:$0xff]  ;;  %s1024_s24 = smov 64  }
  0x5c   : > { %979 = vmatprep.subr.bf16.mxu0 %v978_v32  ;;  %985 = vmatprep.subr.bf16.mxu1 %v978_v32 }
  0x5d   : > { %981 = vmatpush3.bf16.msra.mxu0 %v978_v32  ;;  %990 = vmatpush3.bf16.msra.mxu1 %v978_v32 }
  0x5e   : > { %443 = vrot.lane.b32.xlu1 %v904_v2, %s1020_s25  ;;  %435 = vrot.lane.b32.xlu0 %v900_v61, %s1020_s25 }
  0x5f   : > { %952 = vmatprep.subr.mxu0 %v632_v33  ;;  %986 = vmatprep.subr.mxu1 %v632_v33 }
  0x61   : > { %953 = vmatpush3.msra.mxu0 %v632_v33  ;;  %991 = vmatpush3.msra.mxu1 %v632_v33 }
  0x62   : > { %514 = vrot.lane.b32.xlu1 %v1179_v55, %s1023_s10  ;;  %506 = vrot.lane.b32.xlu0 %v1182_v56, %s1023_s10 }
  0x66   : > { %536 = vrot.lane.b32.xlu1 %v1111_v22, %s1024_s24  ;;  %528 = vrot.lane.b32.xlu0 %v1114_v23, %s1024_s24  ;;  %v881_v22 = vld [vmem:[%s1064_s21 + $0x110] sm:$0xff] }
  0x6a   : > { %445 = vrot.lane.b32.xlu1 %v905_v1, %s1020_s25  ;;  %437 = vrot.lane.b32.xlu0 %v901_v5, %s1020_s25 }
  0x6e   : > { %467 = vrot.lane.b32.xlu1 %v1155_v46, %s1021_s26  ;;  %459 = vrot.lane.b32.xlu0 %v1158_v47, %s1021_s26 }
  0x72   : > { %538 = vrot.lane.b32.xlu1 %v1223_v31, %s1024_s24  ;;  %530 = vrot.lane.b32.xlu0 %v1226_v34, %s1024_s24 }
  0x76   : > { %469 = vrot.lane.b32.xlu1 %v1166_v50, %s1021_s26  ;;  %461 = vrot.lane.b32.xlu0 %v1169_v51, %s1021_s26 }
  0x7a   : > { %491 = vrot.lane.b32.xlu1 %v1235_v37, %s1022_s27  ;;  %483 = vrot.lane.b32.xlu0 %v1239_v39, %s1022_s27 }
  0x7e   : > { %493 = vrot.lane.b32.xlu1 %v1151_v44, %s1022_s27  ;;  %485 = vrot.lane.b32.xlu0 %v1080_v4, %s1022_s27 }
  0x82   : > { %516 = vrot.lane.b32.xlu1 %v1207_v13, %s1023_s10  ;;  %508 = vrot.lane.b32.xlu0 %v1210_v15, %s1023_s10 }
  0x84   : > { %v354_v23 = vpop.permute.xlu1 %353  ;;  %v352_v46 = vpop.permute.xlu0 %351 }
  0x85   : > { %v553_v44 = vsel %vm552_vm1, %v1085_v7, %v352_v46  ;;  %v554_v9 = vsel %vm552_vm1, %v1094_v14, %v354_v23 }
  0x86   : > { %518 = vrot.lane.b32.xlu1 %v881_v22, %s1023_s10  ;;  %510 = vrot.lane.b32.xlu0 %v1077_v3, %s1023_s10 }
  0x88   : > { %v362_v47 = vpop.permute.xlu1 %361  ;;  %v360_v50 = vpop.permute.xlu0 %359 }
  0x89   : > { %v557_v51 = vsel %vm552_vm1, %v1080_v4, %v360_v50  ;;  %v558_v7 = vsel %vm552_vm1, %v1090_v12, %v362_v47 }
  0x8a   : > { %540 = vrot.lane.b32.xlu1 %v1251_v48, %s1024_s24  ;;  %532 = vrot.lane.b32.xlu0 %v1254_v49, %s1024_s24 }
  0x8c   : > { %v384_v55 = vpop.permute.xlu1 %383  ;;  %v376_v56 = vpop.permute.xlu0 %375 }
  0x8d   : > { %v566_v3 = vsel %vm561_vm2, %v557_v51, %v384_v55  ;;  %v562_v6 = vsel %vm561_vm2, %v553_v44, %v376_v56 }
  0x8e   : > { %542 = vrot.lane.b32.xlu1 %v1174_v54, %s1024_s24  ;;  %534 = vrot.lane.b32.xlu0 %v1103_v18, %s1024_s24 }
  0x90   : > { %v386_v11 = vpop.permute.xlu1 %385  ;;  %v378_v4 = vpop.permute.xlu0 %377 }
  0x91   : > { %v567_v13 = vsel %vm561_vm2, %v558_v7, %v386_v11  ;;  %v563_v15 = vsel %vm561_vm2, %v554_v9, %v378_v4 }
  0x94   : > { %v408_v16 = vpop.permute.xlu1 %407  ;;  %v400_v17 = vpop.permute.xlu0 %399 }
  0x95   : > { %v575_v61 = vsel %vm570_vm3, %v566_v3, %v408_v16  ;;  %v571_v62 = vsel %vm570_vm3, %v562_v6, %v400_v17 }
  0x98   : > { %v410_v19 = vpop.permute.xlu1 %409  ;;  %v402_v54 = vpop.permute.xlu0 %401 }
  0x99   : > { %v1368_v20 = vsel %vm570_vm3, %v567_v13, %v410_v19  ;;  %v1371_v18 = vsel %vm570_vm3, %v563_v15, %v402_v54 }
  0x9c   : > { %v440_v14 = vpop.permute.xlu1 %439  ;;  %v432_v21 = vpop.permute.xlu0 %431 }
  0x9d   : > { %v584_v33 = vsel %vm579_vm4, %v575_v61, %v440_v14  ;;  %v580_v1 = vsel %vm579_vm4, %v571_v62, %v432_v21 }
  0xa0   : > { %v364_v12 = vpop.permute.xlu1 %363  ;;  %v356_v24 = vpop.permute.xlu0 %355 }
  0xa1   : > { %v559_v28 = vsel %vm552_vm1, %v1197_v8, %v364_v12  ;;  %v555_v29 = vsel %vm552_vm1, %v1201_v10, %v356_v24 }
  0xa4   : > { %v442_v25 = vpop.permute.xlu1 %441  ;;  %v434_v30 = vpop.permute.xlu0 %433 }
  0xa5   : > { %v585_v11 = vsel %vm579_vm4, %v1368_v20, %v442_v25  ;;  %v581_v4 = vsel %vm579_vm4, %v1371_v18, %v434_v30 }
  0xa8   : > { %v464_v31 = vpop.permute.xlu1 %463  ;;  %v456_v34 = vpop.permute.xlu0 %455 }
  0xa9   : > { %v593_v5 = vsel %vm588_vm5, %v584_v33, %v464_v31  ;;  %v589_v22 = vsel %vm588_vm5, %v580_v1, %v456_v34 }
  0xac   : > { %v1373_v35 = vpop.permute.xlu1 %365  ;;  %v1375_v36 = vpop.permute.xlu0 %357 }
  0xb0   : > { %v388_v38 = vpop.permute.xlu1 %387  ;;  %v380_v40 = vpop.permute.xlu0 %379 }
  0xb1   : > { %v1382_v41 = vsel %vm561_vm2, %v559_v28, %v388_v38  ;;  %v1385_v42 = vsel %vm561_vm2, %v555_v29, %v380_v40 }
  0xb4   : > { %v466_v43 = vpop.permute.xlu1 %465  ;;  %v458_v45 = vpop.permute.xlu0 %457 }
  0xb5   : > { %v594_v13 = vsel %vm588_vm5, %v585_v11, %v466_v43  ;;  %v590_v15 = vsel %vm588_vm5, %v581_v4, %v458_v45 }
  0xb8   : > { %v488_v48 = vpop.permute.xlu1 %487  ;;  %v480_v49 = vpop.permute.xlu0 %479 }
  0xb9   : > { %v602_v23 = vsel %vm597_vm6, %v593_v5, %v488_v48  ;;  %v598_v46 = vsel %vm597_vm6, %v589_v22, %v480_v49 }
  0xbc   : > { %v1387_v52 = vpop.permute.xlu1 %389  ;;  %v1389_v53 = vpop.permute.xlu0 %381 }
  0xc0   : > { %v412_v8 = vpop.permute.xlu1 %411  ;;  %v404_v57 = vpop.permute.xlu0 %403 }
  0xc1   : > { %v577_v38 = vsel %vm570_vm3, %v1382_v41, %v412_v8  ;;  %v573_v40 = vsel %vm570_vm3, %v1385_v42, %v404_v57 }
  0xc4   : > { %v490_v26 = vpop.permute.xlu1 %489  ;;  %v482_v10 = vpop.permute.xlu0 %481 }
  0xc5   : > { %v603_v16 = vsel %vm597_vm6, %v594_v13, %v490_v26  ;;  %v599_v17 = vsel %vm597_vm6, %v590_v15, %v482_v10  ;;  %v560_v26 = vsel %vm552_vm1, %v1235_v37, %v1373_v35  ;;  %v556_v10 = vsel %vm552_vm1, %v1239_v39, %v1375_v36 }
  0xc6   : > { %v569_v42 = vsel %vm561_vm2, %v560_v26, %v1387_v52  ;;  %v565_v8 = vsel %vm561_vm2, %v556_v10, %v1389_v53 }
  0xc8   : > { %v513_v27 = vpop.permute.xlu1 %512  ;;  %v505_v58 = vpop.permute.xlu0 %504 }
  0xc9   : > { %v611_v47 = vsel %vm606_vm7, %v602_v23, %v513_v27  ;;  %v607_v50 = vsel %vm606_vm7, %v598_v46, %v505_v58 }
  0xcc   : > { %v1391_v59 = vpop.permute.xlu1 %413  ;;  %v1393_v60 = vpop.permute.xlu0 %405 }
  0xcd   : > { %v578_v37 = vsel %vm570_vm3, %v569_v42, %v1391_v59  ;;  %v574_v39 = vsel %vm570_vm3, %v565_v8, %v1393_v60 }
  0xd0   : > { %v444_v0 = vpop.permute.xlu1 %443  ;;  %v436_v2 = vpop.permute.xlu0 %435 }
  0xd1   : > { %v586_v48 = vsel %vm579_vm4, %v577_v38, %v444_v0  ;;  %v582_v49 = vsel %vm579_vm4, %v573_v40, %v436_v2 }
  0xd4   : > { %v515_v63 = vpop.permute.xlu1 %514  ;;  %v507_v32 = vpop.permute.xlu0 %506 }
  0xd5   : > { %v612_v19 = vsel %vm606_vm7, %v603_v16, %v515_v63  ;;  %v608_v54 = vsel %vm606_vm7, %v599_v17, %v507_v32 }
  0xd8   : > { %v537_v44 = vpop.permute.xlu1 %536  ;;  %v529_v51 = vpop.permute.xlu0 %528 }
  0xd9   : > { %v616_v55 = vsel %vm615_vm8, %v607_v50, %v529_v51  ;;  %v620_v56 = vsel %vm615_vm8, %v611_v47, %v537_v44  ;;  %v914_v47 = vld [vmem:[%s1489_s2] ss:$0 sm:$0xff] }
  0xda   : > { %954 = vmatprep.mubr.msk.f32.mxu0 %vm633_vm9, %v616_v55  ;;  %960 = vmatprep.mubr.msk.f32.mxu1 %vm633_vm9, %v620_v56  ;;  %v915_v44 = vld [vmem:[%s1490_s3] ss:$0 sm:$0xff] }
  0xdc   : > { %v446_v3 = vpop.permute.xlu1 %445  ;;  %v438_v6 = vpop.permute.xlu0 %437 }
  0xdd   : > { %v587_v52 = vsel %vm579_vm4, %v578_v37, %v446_v3  ;;  %v583_v53 = vsel %vm579_vm4, %v574_v39, %v438_v6 }
  0xe0   : > { %v468_v9 = vpop.permute.xlu1 %467  ;;  %v460_v7 = vpop.permute.xlu0 %459 }
  0xe1   : > { %v595_v27 = vsel %vm588_vm5, %v586_v48, %v468_v9  ;;  %v591_v41 = vsel %vm588_vm5, %v582_v49, %v460_v7 }
  0xe4   : > { %v539_v14 = vpop.permute.xlu1 %538  ;;  %v531_v21 = vpop.permute.xlu0 %530 }
  0xe5   : > { %v621_v12 = vsel %vm615_vm8, %v612_v19, %v539_v14  ;;  %v617_v20 = vsel %vm615_vm8, %v608_v54, %v531_v21 }
  0xe6   : > { %955 = vmatmul.mubr.msk.f32.vlgmr.msra.gmra.mrb[0].mxu0 %vm633_vm9, %v617_v20  ;;  %961 = vmatmul.mubr.msk.f32.vlgmr.msra.gmra.mrb[0].mxu1 %vm633_vm9, %v621_v12 }
  0xe8   : > { %v470_v18 = vpop.permute.xlu1 %469  ;;  %v462_v24 = vpop.permute.xlu0 %461 }
  0xe9   : > { %v596_v59 = vsel %vm588_vm5, %v587_v52, %v470_v18  ;;  %v592_v60 = vsel %vm588_vm5, %v583_v53, %v462_v24 }
  0xec   : > { %v492_v25 = vpop.permute.xlu1 %491  ;;  %v484_v30 = vpop.permute.xlu0 %483 }
  0xed   : > { %v604_v57 = vsel %vm597_vm6, %v595_v27, %v492_v25  ;;  %v600_v58 = vsel %vm597_vm6, %v591_v41, %v484_v30 }
  0xf0   : > { %v494_v31 = vpop.permute.xlu1 %493  ;;  %v486_v34 = vpop.permute.xlu0 %485 }
  0xf1   : > { %v605_v63 = vsel %vm597_vm6, %v596_v59, %v494_v31  ;;  %v601_v32 = vsel %vm597_vm6, %v592_v60, %v486_v34 }
  0xf4   : > { %v517_v28 = vpop.permute.xlu1 %516  ;;  %v509_v29 = vpop.permute.xlu0 %508 }
  0xf5   : > { %v613_v35 = vsel %vm606_vm7, %v604_v57, %v517_v28  ;;  %v609_v36 = vsel %vm606_vm7, %v600_v58, %v509_v29 }
  0xf8   : > { %v519_v43 = vpop.permute.xlu1 %518  ;;  %v511_v45 = vpop.permute.xlu0 %510 }
  0xf9   : > { %v614_v33 = vsel %vm606_vm7, %v605_v63, %v519_v43  ;;  %v610_v1 = vsel %vm606_vm7, %v601_v32, %v511_v45 }
  0xfc   : > { %v541_v0 = vpop.permute.xlu1 %540  ;;  %v533_v2 = vpop.permute.xlu0 %532 }
  0xfd   : > { %v622_v61 = vsel %vm615_vm8, %v613_v35, %v541_v0  ;;  %v618_v62 = vsel %vm615_vm8, %v609_v36, %v533_v2 }
  0xfe   : > { %957 = vmatprep.mubr.msk.f32.mxu0 %vm633_vm9, %v618_v62  ;;  %963 = vmatprep.mubr.msk.f32.mxu1 %vm633_vm9, %v622_v61 }
 0x100   : > { %v543_v5 = vpop.permute.xlu1 %542  ;;  %v535_v22 = vpop.permute.xlu0 %534 }
 0x101   : > { %v623_v23 = vsel %vm615_vm8, %v614_v33, %v543_v5  ;;  %v619_v46 = vsel %vm615_vm8, %v610_v1, %v535_v22 }
 0x102   : > { %958 = vmatmul.mubr.msk.f32.gmra.mrb[2].mxu0 %vm633_vm9, %v619_v46  ;;  %964 = vmatmul.mubr.msk.f32.gmra.mrb[2].mxu1 %vm633_vm9, %v623_v23 }
 0x1b9   : > { %v956_v50 = vpop.f32.mrb[0].mxu0  ;;  %v962_v51 = vpop.f32.mrb[0].mxu1 }
 0x1ba   : > { %v771_v55 = vmul.f32 %v956_v50, %v914_v47  ;;  %v775_v56 = vmul.f32 %v962_v51, %v914_v47  ;;  %v724_v3 = vpop.f32.mrb[1].mxu0  ;;  %v744_v6 = vpop.f32.mrb[1].mxu1 }
 0x1bb   : > { %v770_v9 = vmul.f32 %v914_v47, %v724_v3  ;;  %v774_v7 = vmul.f32 %v914_v47, %v744_v6 }
 0x1bc   : > { %v786_v11 = vadd.f32 %v915_v44, %v771_v55  ;;  %v790_v4 = vadd.f32 %v915_v44, %v775_v56 }
 0x1bd   : > { %v785_v13 = vadd.f32 %v915_v44, %v770_v9  ;;  %v789_v15 = vadd.f32 %v915_v44, %v774_v7 }
 0x1be   : > { %v794_v16 = vmax.f32 %v786_v11, 0.0  ;;  %v798_v17 = vmax.f32 %v790_v4, 0.0 }
 0x1bf   : > { %v793_v19 = vmax.f32 %v785_v13, 0.0  ;;  %v797_v54 = vmax.f32 %v789_v15, 0.0 }
 0x1c0   : > { %802 = vst.msk [vmem:[%s202_s5 + $0x8] sm:$0xff] %vm552_vm1, %v794_v16  ;;  %806 = vst.msk [vmem:[%s202_s5 + $0x28] sm:$0xff] %vm552_vm1, %v798_v17 }
 0x1c1   : > { %801 = vst.msk [vmem:[%s202_s5] sm:$0xff] %vm552_vm1, %v793_v19  ;;  %805 = vst.msk [vmem:[%s202_s5 + $0x20] sm:$0xff] %vm552_vm1, %v797_v54 }
 0x1d5   : > { %v959_v14 = vpop.f32.mrb[2].mxu0  ;;  %v965_v21 = vpop.f32.mrb[2].mxu1 }
 0x1d6   : > { %v773_v12 = vmul.f32 %v959_v14, %v914_v47  ;;  %v777_v20 = vmul.f32 %v965_v21, %v914_v47  ;;  %v734_v18 = vpop.f32.mrb[3].mxu0  ;;  %v754_v24 = vpop.f32.mrb[3].mxu1 }
 0x1d7   : > { %v772_v25 = vmul.f32 %v914_v47, %v734_v18  ;;  %v776_v30 = vmul.f32 %v914_v47, %v754_v24 }
 0x1d8   : > { %v788_v31 = vadd.f32 %v915_v44, %v773_v12  ;;  %v792_v34 = vadd.f32 %v915_v44, %v777_v20 }
 0x1d9   : > { %v787_v28 = vadd.f32 %v915_v44, %v772_v25  ;;  %v791_v29 = vadd.f32 %v915_v44, %v776_v30 }
 0x1da   : > { %v796_v38 = vmax.f32 %v788_v31, 0.0  ;;  %v800_v40 = vmax.f32 %v792_v34, 0.0 }
 0x1db   : > { %v795_v43 = vmax.f32 %v787_v28, 0.0  ;;  %v799_v45 = vmax.f32 %v791_v29, 0.0 }
 0x1dc   : > { %804 = vst.msk [vmem:[%s202_s5 + $0x18] sm:$0xff] %vm552_vm1, %v796_v38  ;;  %808 = vst.msk [vmem:[%s202_s5 + $0x38] sm:$0xff] %vm552_vm1, %v800_v40 }
 0x1dd   : > { %803 = vst.msk [vmem:[%s202_s5 + $0x10] sm:$0xff] %vm552_vm1, %v795_v43  ;;  %807 = vst.msk [vmem:[%s202_s5 + $0x30] sm:$0xff] %vm552_vm1, %v799_v45 }
 0x1de PF: > { %s14_s15 = sadd.s32 1, %s1015_s15  }
 0x1df   : > { %p11_p5 = scmp.ge.s32.totalorder %s14_s15, 4  }
 0x1e1   :  { %13 = sbr.rel (!%p11_p5) target bundleno = 1 (0x1), region = 69 }

// kernel: cam_forward.9
= control target key start
LH: loop header
LB: loop body
LE: loop exit
PB: predicated region body
PF: predicated region fallthrough
CT: control target
= control target key end

     0   :  { %s2457_s18 = smov 0   ;;  %s4347_s0 = inlined_call_operand.vmem [shape: f32[2,18,18,8], index: 0, kind: input, shape index: {}]   ;;  %s4348_s1 = inlined_call_operand.vmem [shape: f32[2,18,18,8], index: 1, kind: input, shape index: {}]   ;;  %s4349_s2 = inlined_call_operand.vmem [shape: f32[72,8], index: 2, kind: input, shape index: {}]   ;;  %s4350_s3 = inlined_call_operand.vmem [shape: f32[1,8], index: 3, kind: input, shape index: {}]   ;;  %s4351_s4 = inlined_call_operand.vmem [shape: f32[1,8], index: 4, kind: input, shape index: {}]   ;;  %s4352_s5 = inlined_call_operand.vmem [shape: f32[2,256,8], index: 5, kind: output, shape index: {}]  }
   0x1 LB: > { %s2215_s19 = sadd.s32 4294967295, %s2417_s18   ;;  %p2219_p0 = scmp.ge.s32.totalorder %s2417_s18, 1  ;;  %s2417_s18 = sphi %s2457_s18, %s15_s18  }
   0x2   : > { %p197_p1 = scmp.lt.s32.totalorder %s2417_s18, 3 }
   0x4   : > { %p198_p2 = pnand %p2219_p0, %p197_p1 }
   0x6   : > { %201 = sbr.rel (%p198_p2) target bundleno = 872 (0x368), region = 40 }
   0xd   : > { %p230_p3 = scmp.lt.s32.totalorder %s2215_s19, 1  ;;  %vm455_vm0 = vcmask 1046528   ;;  %s2419_s27 = smov 8   ;;  %vm536_vm1 = vcmask 1045504   ;;  %vm1411_vm2 = vcmask 64512   ;;  %vm1444_vm3 = vcmask 130048  }
   0xe   : > { %s2420_s28 = smov 16   ;;  %s2421_s29 = smov 24   ;;  %vm1477_vm4 = vcmask 195584   ;;  %vm1510_vm5 = vcmask 261120   ;;  %vm1543_vm6 = vcmask 326656   ;;  %vm1576_vm7 = vcmask 392192  }
   0xf   : > { %s4689_s19 = smov (!%p230_p3, %s2215_s19), 1  ;;  %s2422_s30 = smov 32   ;;  %vm1609_vm8 = vcmask 457728   ;;  %vm1642_vm9 = vcmask 523264   ;;  %vm1684_vm10 = vcmask 588800  }
  0x10   : > { %s2394_s20 = smul.u32 432, %s4689_s19  ;;  %s2423_s6 = smov 40  }
  0x11   : > { %s2424_s11 = smov 48   ;;  %s2425_s22 = smov 56  }
  0x12   : > { %s2471_s23 = scalar_lea.vmem %s4347_s0, %s2394_s20  ;;  %s2476_s26 = scalar_lea.vmem %s4348_s1, %s2394_s20 }
  0x13   : > { %v248_v0 = vld [vmem:[%s2471_s23 + $0x18] sm:$0xff]  ;;  %v249_v1 = vld [vmem:[%s2471_s23 + $0x20] sm:$0xff]  ;;  %v246_v6 = vld [vmem:[%s2471_s23 + $0x8] sm:$0xff]  ;;  %s2426_s8 = smov 64   ;;  %s2260_s9 = sshll.u32 %s4689_s19, 8 }
  0x14   : > { %v302_v2 = vld [vmem:[%s2476_s26 + $0x18] sm:$0xff]  ;;  %v303_v3 = vld [vmem:[%s2476_s26 + $0x20] sm:$0xff]  ;;  %v300_v9 = vld [vmem:[%s2476_s26 + $0x8] sm:$0xff]  ;;  %s4151_s12 = scalar_lea.vmem %s4352_s5, %s2260_s9 }
  0x15   : > { %v2482_v4 = vmul.f32 %v302_v2, %v248_v0  ;;  %v245_v5 = vld [vmem:[%s2471_s23] sm:$0xff]  ;;  %v2486_v7 = vmul.f32 %v303_v3, %v249_v1  ;;  %v250_v10 = vld [vmem:[%s2471_s23 + $0x28] sm:$0x3]  ;;  %v2494_v13 = vmul.f32 %v300_v9, %v246_v6  ;;  %v247_v15 = vld [vmem:[%s2471_s23 + $0x10] sm:$0x3] }
  0x16   : > { %v299_v8 = vld [vmem:[%s2476_s26] sm:$0xff]  ;;  %v304_v14 = vld [vmem:[%s2476_s26 + $0x28] sm:$0x3]  ;;  %v252_v16 = vld [vmem:[%s2471_s23 + $0x38] sm:$0xff] }
  0x17   : > { %4480 = vst [vmem:[#allocation2_spill] sm:$0xff] %v2482_v4  ;;  %4481 = vst [vmem:[#allocation3_spill] sm:$0xff] %v2486_v7  ;;  %v461_v11 = vrot.slane %v2482_v4, 1  ;;  %v2492_v12 = vmul.f32 %v299_v8, %v245_v5  ;;  %v462_v17 = vrot.slane %v2486_v7, 1  ;;  %v2500_v18 = vmul.f32 %v304_v14, %v250_v10  ;;  %v301_v19 = vld [vmem:[%s2476_s26 + $0x10] sm:$0x3] }
  0x18   : > { %4483 = vst [vmem:[#allocation5_spill] sm:$0xff] %v2494_v13  ;;  %v253_v20 = vld [vmem:[%s2471_s23 + $0x40] sm:$0x3]  ;;  %v306_v21 = vld [vmem:[%s2476_s26 + $0x38] sm:$0xff]  ;;  %v457_v23 = vrot.slane %v2494_v13, 1  ;;  %v2507_v24 = vmul.f32 %v301_v19, %v247_v15  ;;  %v251_v27 = vld [vmem:[%s2471_s23 + $0x30] sm:$0xff] }
  0x19   : > { %4482 = vst [vmem:[#allocation4_spill] sm:$0xff] %v2492_v12  ;;  %v456_v22 = vrot.slane %v2492_v12, 1  ;;  %v307_v25 = vld [vmem:[%s2476_s26 + $0x40] sm:$0x3]  ;;  %v2510_v26 = vmul.f32 %v306_v21, %v252_v16  ;;  %v305_v28 = vld [vmem:[%s2476_s26 + $0x30] sm:$0xff]  ;;  %v2515_v29 = vsel %vm455_vm0, %v461_v11, %v462_v17  ;;  %v464_v30 = vrot.slane %v2500_v18, 1 }
  0x1a   : > { %4484 = vst [vmem:[#allocation6_spill] sm:$0xff] %v2515_v29  ;;  %v2518_v31 = vmul.f32 %v307_v25, %v253_v20  ;;  %v2520_v32 = vmul.f32 %v305_v28, %v251_v27  ;;  %v255_v33 = vld [vmem:[%s2471_s23 + $0x50] sm:$0xff]  ;;  %v256_v34 = vld [vmem:[%s2471_s23 + $0x58] sm:$0x3]  ;;  %647 = vrot.lane.b32.xlu1 %v2515_v29, %s2419_s27  ;;  %v459_v37 = vrot.slane %v2507_v24, 1  ;;  %v254_v40 = vld [vmem:[%s2471_s23 + $0x48] sm:$0xff] }
  0x1b   : > { %v309_v35 = vld [vmem:[%s2476_s26 + $0x50] sm:$0xff]  ;;  %v458_v36 = vsel %vm455_vm0, %v456_v22, %v457_v23  ;;  %v467_v38 = vrot.slane %v2510_v26, 1  ;;  %v310_v39 = vld [vmem:[%s2476_s26 + $0x58] sm:$0x3]  ;;  %v308_v41 = vld [vmem:[%s2476_s26 + $0x48] sm:$0xff]  ;;  %v2535_v42 = vsel %vm455_vm0, %v462_v17, %v464_v30 }
  0x1c   : > { %643 = vrot.lane.b32.xlu0 %v458_v36, %s2419_s27  ;;  %v469_v43 = vrot.slane %v2518_v31, 1  ;;  %v2538_v44 = vmul.f32 %v309_v35, %v255_v33  ;;  %v2540_v45 = vmul.f32 %v310_v39, %v256_v34  ;;  %v258_v46 = vld [vmem:[%s2471_s23 + $0x68] sm:$0xff]  ;;  %v460_v48 = vsel %vm455_vm0, %v457_v23, %v459_v37  ;;  %v259_v51 = vld [vmem:[%s2471_s23 + $0x70] sm:$0x3]  ;;  %v257_v53 = vld [vmem:[%s2471_s23 + $0x60] sm:$0xff] }
  0x1d   : > { %v312_v47 = vld [vmem:[%s2476_s26 + $0x68] sm:$0xff]  ;;  %v466_v49 = vrot.slane %v2520_v32, 1  ;;  %v2546_v50 = vmul.f32 %v308_v41, %v254_v40  ;;  %v313_v52 = vld [vmem:[%s2476_s26 + $0x70] sm:$0x3]  ;;  %v311_v54 = vld [vmem:[%s2476_s26 + $0x60] sm:$0xff] }
  0x1e   : > { %649 = vrot.lane.b32.xlu1 %v2535_v42, %s2419_s27  ;;  %v2554_v55 = vmul.f32 %v312_v47, %v258_v46  ;;  %v2558_v56 = vsel %vm455_vm0, %v467_v38, %v469_v43  ;;  %v472_v57 = vrot.slane %v2538_v44, 1  ;;  %v474_v58 = vrot.slane %v2540_v45, 1  ;;  %v261_v60 = vld [vmem:[%s2471_s23 + $0x80] sm:$0xff]  ;;  %v262_v0 = vld [vmem:[%s2471_s23 + $0x88] sm:$0x3]  ;;  %v260_v3 = vld [vmem:[%s2471_s23 + $0x78] sm:$0xff] }
  0x1f   : > { %4485 = vst [vmem:[#allocation7_spill] sm:$0xff] %v2558_v56  ;;  %v2562_v59 = vmul.f32 %v313_v52, %v259_v51  ;;  %v2566_v61 = vsel %vm455_vm0, %v466_v49, %v467_v38  ;;  %v471_v62 = vrot.slane %v2546_v50, 1  ;;  %v2569_v63 = vmul.f32 %v311_v54, %v257_v53  ;;  %v315_v1 = vld [vmem:[%s2476_s26 + $0x80] sm:$0xff]  ;;  %v316_v2 = vld [vmem:[%s2476_s26 + $0x88] sm:$0x3]  ;;  %v314_v5 = vld [vmem:[%s2476_s26 + $0x78] sm:$0xff] }
  0x20   : > { %645 = vrot.lane.b32.xlu0 %v460_v48, %s2419_s27  ;;  %4486 = vst [vmem:[#allocation8_spill] sm:$0xff] %v2566_v61  ;;  %v477_v6 = vrot.slane %v2554_v55, 1  ;;  %v2582_v8 = vsel %vm455_vm0, %v472_v57, %v474_v58  ;;  %v2585_v10 = vmul.f32 %v315_v1, %v261_v60  ;;  %v2587_v11 = vmul.f32 %v316_v2, %v262_v0  ;;  %v264_v14 = vld [vmem:[%s2471_s23 + $0x98] sm:$0xff]  ;;  %v265_v20 = vld [vmem:[%s2471_s23 + $0xa0] sm:$0x3]  ;;  %v263_v22 = vld [vmem:[%s2471_s23 + $0x90] sm:$0xff] }
  0x21   : > { %4487 = vst [vmem:[#allocation9_spill] sm:$0xff] %v2582_v8  ;;  %v479_v9 = vrot.slane %v2562_v59, 1  ;;  %v318_v15 = vld [vmem:[%s2476_s26 + $0x98] sm:$0xff]  ;;  %v2592_v16 = vsel %vm455_vm0, %v471_v62, %v472_v57  ;;  %v476_v17 = vrot.slane %v2569_v63, 1  ;;  %v2595_v19 = vmul.f32 %v314_v5, %v260_v3  ;;  %v319_v21 = vld [vmem:[%s2476_s26 + $0xa0] sm:$0x3] }
  0x22   : > { %653 = vrot.lane.b32.xlu1 %v2558_v56, %s2419_s27  ;;  %4488 = vst [vmem:[#allocation10_spill] sm:$0xff] %v2592_v16  ;;  %v317_v23 = vld [vmem:[%s2476_s26 + $0x90] sm:$0xff]  ;;  %v2603_v25 = vmul.f32 %v318_v15, %v264_v14  ;;  %v482_v28 = vrot.slane %v2585_v10, 1  ;;  %v484_v30 = vrot.slane %v2587_v11, 1  ;;  %v2612_v33 = vmul.f32 %v319_v21, %v265_v20  ;;  %v268_v38 = vld [vmem:[%s2471_s23 + $0xb8] sm:$0x3] }
  0x23   : > { %v2608_v27 = vsel %vm455_vm0, %v477_v6, %v479_v9  ;;  %v267_v34 = vld [vmem:[%s2471_s23 + $0xb0] sm:$0xff]  ;;  %v2616_v35 = vsel %vm455_vm0, %v476_v17, %v477_v6  ;;  %v481_v36 = vrot.slane %v2595_v19, 1  ;;  %v2619_v37 = vmul.f32 %v317_v23, %v263_v22  ;;  %v322_v40 = vld [vmem:[%s2476_s26 + $0xb8] sm:$0x3]  ;;  %v266_v41 = vld [vmem:[%s2471_s23 + $0xa8] sm:$0xff] }
  0x24   : > { %651 = vrot.lane.b32.xlu0 %v2566_v61, %s2419_s27  ;;  %4489 = vst [vmem:[#allocation11_spill] sm:$0xff] %v2608_v27  ;;  %4490 = vst [vmem:[#allocation12_spill] sm:$0xff] %v2616_v35  ;;  %v321_v39 = vld [vmem:[%s2476_s26 + $0xb0] sm:$0xff]  ;;  %v320_v43 = vld [vmem:[%s2476_s26 + $0xa8] sm:$0xff]  ;;  %v487_v46 = vrot.slane %v2603_v25, 1  ;;  %v2632_v47 = vsel %vm455_vm0, %v482_v28, %v484_v30  ;;  %v489_v48 = vrot.slane %v2612_v33, 1  ;;  %v2637_v51 = vmul.f32 %v322_v40, %v268_v38 }
  0x25   : > { %4491 = vst [vmem:[#allocation13_spill] sm:$0xff] %v2632_v47  ;;  %v2635_v49 = vmul.f32 %v321_v39, %v267_v34  ;;  %v270_v52 = vld [vmem:[%s2471_s23 + $0xc8] sm:$0xff]  ;;  %v2642_v54 = vsel %vm455_vm0, %v481_v36, %v482_v28  ;;  %v486_v57 = vrot.slane %v2619_v37, 1  ;;  %v2645_v58 = vmul.f32 %v320_v43, %v266_v41  ;;  %v271_v60 = vld [vmem:[%s2471_s23 + $0xd0] sm:$0x3]  ;;  %v269_v0 = vld [vmem:[%s2471_s23 + $0xc0] sm:$0xff] }
  0x26   : > { %657 = vrot.lane.b32.xlu1 %v2582_v8, %s2419_s27  ;;  %v324_v53 = vld [vmem:[%s2476_s26 + $0xc8] sm:$0xff]  ;;  %4492 = vst [vmem:[#allocation14_spill] sm:$0xff] %v2642_v54  ;;  %v325_v62 = vld [vmem:[%s2476_s26 + $0xd0] sm:$0x3]  ;;  %v323_v1 = vld [vmem:[%s2476_s26 + $0xc0] sm:$0xff]  ;;  %v2658_v3 = vsel %vm455_vm0, %v487_v46, %v489_v48  ;;  %v494_v6 = vrot.slane %v2637_v51, 1 }
  0x27   : > { %v2653_v2 = vmul.f32 %v324_v53, %v270_v52  ;;  %4494 = vst [vmem:[#allocation16_spill] sm:$0xff] %v2658_v3  ;;  %v492_v5 = vrot.slane %v2635_v49, 1  ;;  %v2662_v9 = vmul.f32 %v325_v62, %v271_v60  ;;  %v273_v14 = vld [vmem:[%s2471_s23 + $0xe0] sm:$0xff]  ;;  %v2666_v15 = vsel %vm455_vm0, %v486_v57, %v487_v46  ;;  %v274_v21 = vld [vmem:[%s2471_s23 + $0xe8] sm:$0x3]  ;;  %v272_v28 = vld [vmem:[%s2471_s23 + $0xd8] sm:$0xff] }
  0x28   : > { %655 = vrot.lane.b32.xlu0 %v2592_v16, %s2419_s27  ;;  %4495 = vst [vmem:[#allocation17_spill] sm:$0xff] %v2666_v15  ;;  %v491_v17 = vrot.slane %v2645_v58, 1  ;;  %v2669_v20 = vmul.f32 %v323_v1, %v269_v0  ;;  %v327_v22 = vld [vmem:[%s2476_s26 + $0xe0] sm:$0xff]  ;;  %v328_v23 = vld [vmem:[%s2476_s26 + $0xe8] sm:$0x3]  ;;  %v326_v30 = vld [vmem:[%s2476_s26 + $0xd8] sm:$0xff] }
  0x29   : > { %4493 = vst [vmem:[#allocation15_spill] sm:$0xff] %v2653_v2  ;;  %v497_v34 = vrot.slane %v2653_v2, 1  ;;  %v2682_v36 = vsel %vm455_vm0, %v492_v5, %v494_v6  ;;  %v499_v38 = vrot.slane %v2662_v9, 1  ;;  %v2685_v39 = vmul.f32 %v327_v22, %v273_v14  ;;  %v276_v41 = vld [vmem:[%s2471_s23 + $0xf8] sm:$0xff]  ;;  %v277_v53 = vld [vmem:[%s2471_s23 + $0x100] sm:$0x3] }
  0x2a   : > { %661 = vrot.lane.b32.xlu1 %v2608_v27, %s2419_s27  ;;  %4496 = vst [vmem:[#allocation18_spill] sm:$0xff] %v2669_v20  ;;  %4497 = vst [vmem:[#allocation19_spill] sm:$0xff] %v2682_v36  ;;  %v2687_v40 = vmul.f32 %v328_v23, %v274_v21  ;;  %v330_v43 = vld [vmem:[%s2476_s26 + $0xf8] sm:$0xff]  ;;  %v2692_v46 = vsel %vm455_vm0, %v491_v17, %v492_v5  ;;  %v496_v48 = vrot.slane %v2669_v20, 1  ;;  %v331_v57 = vld [vmem:[%s2476_s26 + $0x100] sm:$0x3] }
  0x2b   : > { %4498 = vst [vmem:[#allocation20_spill] sm:$0xff] %v2685_v39  ;;  %4499 = vst [vmem:[#allocation21_spill] sm:$0xff] %v2692_v46  ;;  %v2695_v52 = vmul.f32 %v326_v30, %v272_v28  ;;  %v275_v60 = vld [vmem:[%s2471_s23 + $0xf0] sm:$0xff]  ;;  %v2703_v0 = vmul.f32 %v330_v43, %v276_v41  ;;  %v2708_v1 = vsel %vm455_vm0, %v497_v34, %v499_v38  ;;  %v502_v5 = vrot.slane %v2685_v39, 1  ;;  %v280_v28 = vld [vmem:[%s2471_s23 + $0x118] sm:$0x3] }
  0x2c   : > { %659 = vrot.lane.b32.xlu0 %v2616_v35, %s2419_s27  ;;  %v329_v62 = vld [vmem:[%s2476_s26 + $0xf0] sm:$0xff]  ;;  %4501 = vst [vmem:[#allocation23_spill] sm:$0xff] %v2708_v1  ;;  %v504_v6 = vrot.slane %v2687_v40, 1  ;;  %v2712_v14 = vmul.f32 %v331_v57, %v277_v53  ;;  %v2716_v21 = vsel %vm455_vm0, %v496_v48, %v497_v34  ;;  %v334_v38 = vld [vmem:[%s2476_s26 + $0x118] sm:$0x3]  ;;  %v278_v41 = vld [vmem:[%s2471_s23 + $0x108] sm:$0xff] }
  0x2d   : > { %4500 = vst [vmem:[#allocation22_spill] sm:$0xff] %v2695_v52  ;;  %v279_v17 = vld [vmem:[%s2471_s23 + $0x110] sm:$0xff]  ;;  %4502 = vst [vmem:[#allocation24_spill] sm:$0xff] %v2716_v21  ;;  %v501_v22 = vrot.slane %v2695_v52, 1  ;;  %v2719_v23 = vmul.f32 %v329_v62, %v275_v60  ;;  %v332_v43 = vld [vmem:[%s2476_s26 + $0x108] sm:$0xff]  ;;  %v507_v34 = vrot.slane %v2703_v0, 1  ;;  %v2737_v60 = vmul.f32 %v334_v38, %v280_v28 }
  0x2e   : > { %665 = vrot.lane.b32.xlu1 %v2632_v47, %s2419_s27  ;;  %v333_v30 = vld [vmem:[%s2476_s26 + $0x110] sm:$0xff]  ;;  %v2732_v48 = vsel %vm455_vm0, %v502_v5, %v504_v6  ;;  %v509_v53 = vrot.slane %v2712_v14, 1  ;;  %v282_v62 = vld [vmem:[%s2471_s23 + $0x128] sm:$0xff]  ;;  %v284_v27 = vld [vmem:[%s2471_s23 + $0x138] sm:$0xff] }
  0x2f   : > { %4503 = vst [vmem:[#allocation25_spill] sm:$0xff] %v2732_v48  ;;  %v2735_v57 = vmul.f32 %v333_v30, %v279_v17  ;;  %v337_v6 = vld [vmem:[%s2476_s26 + $0x130] sm:$0x3]  ;;  %v335_v17 = vld [vmem:[%s2476_s26 + $0x120] sm:$0xff]  ;;  %v514_v30 = vrot.slane %v2737_v60, 1  ;;  %v338_v35 = vld [vmem:[%s2476_s26 + $0x138] sm:$0xff] }
  0x30   : > { %663 = vrot.lane.b32.xlu0 %v2642_v54, %s2419_s27  ;;  %v286_v47 = vld [vmem:[%s2471_s23 + $0x148] sm:$0x3]  ;;  %v339_v54 = vld [vmem:[%s2476_s26 + $0x140] sm:$0xff]  ;;  %v342_v8 = vld [vmem:[%s2476_s26 + $0x158] sm:$0xff]  ;;  %v2795_v16 = vmul.f32 %v338_v35, %v284_v27 }
  0x31   : > { %v345_v61 = vld [vmem:[%s2476_s26 + $0x170] sm:$0xff]  ;;  %v290_v56 = vld [vmem:[%s2471_s23 + $0x168] sm:$0xff] }
  0x32   : > { %669 = vrot.lane.b32.xlu1 %v2658_v3, %s2419_s27  ;;  %v2745_v3 = vmul.f32 %v332_v43, %v278_v41  ;;  %v285_v41 = vld [vmem:[%s2471_s23 + $0x140] sm:$0xff]  ;;  %4512 = vst [vmem:[#allocation34_spill] sm:$0xff] %v2795_v16 }
  0x34   : > { %667 = vrot.lane.b32.xlu0 %v2666_v15, %s2419_s27  ;;  %v281_v15 = vld [vmem:[%s2471_s23 + $0x120] sm:$0xff] }
  0x36   : > { %673 = vrot.lane.b32.xlu1 %v2682_v36, %s2419_s27  ;;  %v336_v36 = vld [vmem:[%s2476_s26 + $0x128] sm:$0xff] }
  0x37   : > { %v2753_v28 = vmul.f32 %v336_v36, %v282_v62  ;;  %v511_v36 = vrot.slane %v2745_v3, 1  ;;  %v2769_v62 = vmul.f32 %v335_v17, %v281_v15  ;;  %v288_v17 = vld [vmem:[%s2471_s23 + $0x158] sm:$0xff] }
  0x38   : > { %671 = vrot.lane.b32.xlu0 %v2692_v46, %s2419_s27  ;;  %v2742_v46 = vsel %vm455_vm0, %v501_v22, %v502_v5  ;;  %v2758_v5 = vsel %vm455_vm0, %v507_v34, %v509_v53  ;;  %v512_v22 = vrot.slane %v2735_v57, 1  ;;  %v340_v53 = vld [vmem:[%s2476_s26 + $0x148] sm:$0x3] }
  0x39   : > { %4504 = vst [vmem:[#allocation26_spill] sm:$0xff] %v2742_v46  ;;  %4505 = vst [vmem:[#allocation27_spill] sm:$0xff] %v2753_v28 }
  0x3a   : > { %677 = vrot.lane.b32.xlu1 %v2708_v1, %s2419_s27  ;;  %v506_v1 = vrot.slane %v2719_v23, 1  ;;  %4506 = vst [vmem:[#allocation28_spill] sm:$0xff] %v2758_v5  ;;  %4508 = vst [vmem:[#allocation30_spill] sm:$0xff] %v2769_v62  ;;  %v2782_v15 = vsel %vm455_vm0, %v512_v22, %v514_v30  ;;  %v343_v30 = vld [vmem:[%s2476_s26 + $0x160] sm:$0x3] }
  0x3b   : > { %4509 = vst [vmem:[#allocation31_spill] sm:$0xff] %v2782_v15 }
  0x3c   : > { %675 = vrot.lane.b32.xlu0 %v2716_v21, %s2419_s27  ;;  %v283_v21 = vld [vmem:[%s2471_s23 + $0x130] sm:$0x3]  ;;  %v2766_v43 = vsel %vm455_vm0, %v506_v1, %v507_v34  ;;  %v517_v1 = vrot.slane %v2753_v28, 1  ;;  %v2785_v34 = vmul.f32 %v339_v54, %v285_v41 }
  0x3d   : > { %v2762_v38 = vmul.f32 %v337_v6, %v283_v21  ;;  %4507 = vst [vmem:[#allocation29_spill] sm:$0xff] %v2766_v43  ;;  %v2787_v6 = vmul.f32 %v340_v53, %v286_v47  ;;  %v341_v54 = vld [vmem:[%s2476_s26 + $0x150] sm:$0xff]  ;;  %v2803_v47 = vmul.f32 %v342_v8, %v288_v17  ;;  %v292_v17 = vld [vmem:[%s2471_s23 + $0x178] sm:$0x3] }
  0x3e   : > { %681 = vrot.lane.b32.xlu1 %v2732_v48, %s2419_s27  ;;  %4510 = vst [vmem:[#allocation32_spill] sm:$0xff] %v2785_v34  ;;  %v2792_v48 = vsel %vm455_vm0, %v511_v36, %v512_v22  ;;  %v522_v35 = vrot.slane %v2785_v34, 1  ;;  %v291_v36 = vld [vmem:[%s2471_s23 + $0x170] sm:$0xff] }
  0x3f   : > { %v519_v21 = vrot.slane %v2762_v38, 1  ;;  %4511 = vst [vmem:[#allocation33_spill] sm:$0xff] %v2792_v48  ;;  %4513 = vst [vmem:[#allocation35_spill] sm:$0xff] %v2803_v47  ;;  %v524_v22 = vrot.slane %v2787_v6, 1  ;;  %v527_v29 = vrot.slane %v2803_v47, 1 }
  0x40   : > { %679 = vrot.lane.b32.xlu0 %v2742_v46, %s2419_s27  ;;  %v287_v46 = vld [vmem:[%s2471_s23 + $0x150] sm:$0xff] }
  0x41   : > { %v2808_v27 = vsel %vm455_vm0, %v517_v1, %v519_v21  ;;  %v2819_v8 = vmul.f32 %v341_v54, %v287_v46  ;;  %v344_v21 = vld [vmem:[%s2476_s26 + $0x168] sm:$0xff]  ;;  %v2835_v46 = vmul.f32 %v345_v61, %v291_v36  ;;  %v538_v36 = vrot.slane %v2494_v13, 2 }
  0x42   : > { %685 = vrot.lane.b32.xlu1 %v2758_v5, %s2419_s27  ;;  %v516_v5 = vrot.slane %v2769_v62, 1  ;;  %4514 = vst [vmem:[#allocation36_spill] sm:$0xff] %v2808_v27 }
  0x43   : > { %4516 = vst [vmem:[#allocation38_spill] sm:$0xff] %v2819_v8  ;;  %4518 = vst [vmem:[#allocation40_spill] sm:$0xff] %v2835_v46  ;;  %v526_v54 = vrot.slane %v2819_v8, 1  ;;  %v532_v61 = vrot.slane %v2835_v46, 1 }
  0x44   : > { %683 = vrot.lane.b32.xlu0 %v2766_v43, %s2419_s27  ;;  %v289_v43 = vld [vmem:[%s2471_s23 + $0x160] sm:$0x3]  ;;  %v2816_v53 = vsel %vm455_vm0, %v516_v5, %v517_v1  ;;  %v2832_v5 = vsel %vm455_vm0, %v522_v35, %v524_v22 }
  0x45   : > { %v2812_v41 = vmul.f32 %v343_v30, %v289_v43  ;;  %4515 = vst [vmem:[#allocation37_spill] sm:$0xff] %v2816_v53  ;;  %4517 = vst [vmem:[#allocation39_spill] sm:$0xff] %v2832_v5 }
  0x46   : > { %689 = vrot.lane.b32.xlu1 %v2782_v15, %s2419_s27  ;;  %v521_v15 = vrot.slane %v2795_v16, 1 }
  0x47   : > { %v529_v43 = vrot.slane %v2812_v41, 1 }
  0x48   : > { %687 = vrot.lane.b32.xlu0 %v2792_v48, %s2419_s27  ;;  %v346_v48 = vld [vmem:[%s2476_s26 + $0x178] sm:$0x3]  ;;  %v2840_v30 = vsel %vm455_vm0, %v521_v15, %v522_v35  ;;  %v2855_v15 = vsel %vm455_vm0, %v526_v54, %v527_v29  ;;  %v543_v54 = vrot.slane %v2486_v7, 2 }
  0x49   : > { %v2837_v1 = vmul.f32 %v346_v48, %v292_v17  ;;  %4519 = vst [vmem:[#allocation41_spill] sm:$0xff] %v2840_v30  ;;  %v2850_v22 = vsel %vm455_vm0, %v527_v29, %v529_v43  ;;  %4522 = vst [vmem:[#allocation44_spill] sm:$0xff] %v2855_v15  ;;  %v540_v17 = vrot.slane %v2507_v24, 2  ;;  %v537_v29 = vrot.slane %v2492_v12, 2 }
  0x4a   : > { %693 = vrot.lane.b32.xlu1 %v2808_v27, %s2419_s27  ;;  %v2843_v27 = vmul.f32 %v344_v21, %v290_v56  ;;  %4521 = vst [vmem:[#allocation43_spill] sm:$0xff] %v2850_v22 }
  0x4b   : > { %v534_v48 = vrot.slane %v2837_v1, 1  ;;  %v541_v43 = vsel %vm536_vm1, %v538_v36, %v540_v17  ;;  %v539_v24 = vsel %vm536_vm1, %v537_v29, %v538_v36  ;;  %v550_v17 = vrot.slane %v2518_v31, 2 }
  0x4c   : > { %691 = vrot.lane.b32.xlu0 %v2816_v53, %s2419_s27  ;;  %4520 = vst [vmem:[#allocation42_spill] sm:$0xff] %v2843_v27  ;;  %v531_v35 = vrot.slane %v2843_v27, 1  ;;  %v553_v29 = vrot.slane %v2538_v44, 2  ;;  %v347_v53 = vld [vmem:[%s2476_s26 + $0x180] sm:$0xff] }
  0x4d   : > { %v2863_v56 = vsel %vm455_vm0, %v532_v61, %v534_v48  ;;  %v545_v48 = vrot.slane %v2500_v18, 2  ;;  %v547_v18 = vrot.slane %v2520_v32, 2 }
  0x4e   : > { %697 = vrot.lane.b32.xlu1 %v2832_v5, %s2419_s27  ;;  %4523 = vst [vmem:[#allocation45_spill] sm:$0xff] %v2863_v56  ;;  %v2868_v21 = vsel %vm455_vm0, %v531_v35, %v532_v61  ;;  %v542_v61 = vrot.slane %v2482_v4, 2 }
  0x4f   : > { %4524 = vst [vmem:[#allocation46_spill] sm:$0xff] %v2868_v21  ;;  %v2883_v35 = vsel %vm536_vm1, %v543_v54, %v545_v48 }
  0x50   : > { %695 = vrot.lane.b32.xlu0 %v2840_v30, %s2419_s27 }
  0x52   : > { %701 = vrot.lane.b32.xlu1 %v2850_v22, %s2419_s27  ;;  %v570_v22 = vrot.slane %v2612_v33, 2 }
  0x54   : > { %699 = vrot.lane.b32.xlu0 %v2855_v15, %s2419_s27  ;;  %v575_v15 = vrot.slane %v2637_v51, 2 }
  0x56   : > { %705 = vrot.lane.b32.xlu1 %v2863_v56, %s2419_s27  ;;  %v548_v56 = vrot.slane %v2510_v26, 2 }
  0x58   : > { %703 = vrot.lane.b32.xlu0 %v2868_v21, %s2419_s27  ;;  %v2888_v21 = vsel %vm536_vm1, %v542_v61, %v543_v54  ;;  %v2896_v36 = vsel %vm536_vm1, %v548_v56, %v550_v17  ;;  %v2901_v31 = vsel %vm536_vm1, %v547_v18, %v548_v56  ;;  %v552_v54 = vrot.slane %v2546_v50, 2 }
  0x59   : > { %v560_v61 = vrot.slane %v2562_v59, 2  ;;  %v557_v56 = vrot.slane %v2569_v63, 2  ;;  %v563_v18 = vrot.slane %v2585_v10, 2 }
  0x5a   : > { %741 = vrot.lane.b32.xlu1 %v541_v43, %s2420_s28  ;;  %v555_v43 = vrot.slane %v2540_v45, 2  ;;  %v2914_v45 = vsel %vm536_vm1, %v552_v54, %v553_v29 }
  0x5c   : > { %739 = vrot.lane.b32.xlu0 %v539_v24, %s2420_s28  ;;  %v2909_v48 = vsel %vm536_vm1, %v553_v29, %v555_v43  ;;  %v558_v24 = vrot.slane %v2554_v55, 2  ;;  %v565_v43 = vrot.slane %v2587_v11, 2  ;;  %v562_v29 = vrot.slane %v2595_v19, 2 }
  0x5e   : > { %745 = vrot.lane.b32.xlu1 %v2883_v35, %s2420_s28  ;;  %v2922_v17 = vsel %vm536_vm1, %v558_v24, %v560_v61  ;;  %v2927_v59 = vsel %vm536_vm1, %v557_v56, %v558_v24  ;;  %v2935_v54 = vsel %vm536_vm1, %v563_v18, %v565_v43  ;;  %v568_v61 = vrot.slane %v2603_v25, 2 }
  0x5f   : > { %4525 = vst [vmem:[#allocation47_spill] sm:$0xff] %v2922_v17  ;;  %4526 = vst [vmem:[#allocation48_spill] sm:$0xff] %v2927_v59  ;;  %v2940_v11 = vsel %vm536_vm1, %v562_v29, %v563_v18  ;;  %v567_v24 = vrot.slane %v2619_v37, 2  ;;  %v573_v43 = vrot.slane %v2635_v49, 2  ;;  %v572_v18 = vrot.slane %v2645_v58, 2 }
  0x60   : > { %743 = vrot.lane.b32.xlu0 %v2888_v21, %s2420_s28  ;;  %4527 = vst [vmem:[#allocation49_spill] sm:$0xff] %v2935_v54  ;;  %4528 = vst [vmem:[#allocation50_spill] sm:$0xff] %v2940_v11  ;;  %v2948_v56 = vsel %vm536_vm1, %v568_v61, %v570_v22  ;;  %v578_v22 = vrot.slane %v2653_v2, 2 }
  0x61   : > { %4529 = vst [vmem:[#allocation51_spill] sm:$0xff] %v2948_v56  ;;  %v2953_v33 = vsel %vm536_vm1, %v567_v24, %v568_v61  ;;  %v2961_v29 = vsel %vm536_vm1, %v573_v43, %v575_v15  ;;  %v2966_v51 = vsel %vm536_vm1, %v572_v18, %v573_v43  ;;  %v577_v61 = vrot.slane %v2669_v20, 2 }
  0x62   : > { %749 = vrot.lane.b32.xlu1 %v2896_v36, %s2420_s28  ;;  %4530 = vst [vmem:[#allocation52_spill] sm:$0xff] %v2953_v33  ;;  %4531 = vst [vmem:[#allocation53_spill] sm:$0xff] %v2961_v29  ;;  %v583_v15 = vrot.slane %v2685_v39, 2  ;;  %v582_v43 = vrot.slane %v2695_v52, 2 }
  0x63   : > { %4532 = vst [vmem:[#allocation54_spill] sm:$0xff] %v2966_v51 }
  0x64   : > { %747 = vrot.lane.b32.xlu0 %v2901_v31, %s2420_s28 }
  0x66   : > { %753 = vrot.lane.b32.xlu1 %v2909_v48, %s2420_s28 }
  0x68   : > { %751 = vrot.lane.b32.xlu0 %v2914_v45, %s2420_s28 }
  0x6a   : > { %757 = vrot.lane.b32.xlu1 %v2922_v17, %s2420_s28 }
  0x6c   : > { %755 = vrot.lane.b32.xlu0 %v2927_v59, %s2420_s28 }
  0x6e   : > { %761 = vrot.lane.b32.xlu1 %v2935_v54, %s2420_s28  ;;  %v580_v54 = vrot.slane %v2662_v9, 2  ;;  %v2979_v9 = vsel %vm536_vm1, %v577_v61, %v578_v22 }
  0x6f   : > { %4534 = vst [vmem:[#allocation56_spill] sm:$0xff] %v2979_v9 }
  0x70   : > { %759 = vrot.lane.b32.xlu0 %v2940_v11, %s2420_s28  ;;  %v2974_v24 = vsel %vm536_vm1, %v578_v22, %v580_v54  ;;  %v588_v54 = vrot.slane %v2703_v0, 2  ;;  %v587_v22 = vrot.slane %v2719_v23, 2 }
  0x71   : > { %4533 = vst [vmem:[#allocation55_spill] sm:$0xff] %v2974_v24 }
  0x72   : > { %765 = vrot.lane.b32.xlu1 %v2948_v56, %s2420_s28  ;;  %v585_v56 = vrot.slane %v2687_v40, 2  ;;  %v2992_v40 = vsel %vm536_vm1, %v582_v43, %v583_v15 }
  0x73   : > { %4536 = vst [vmem:[#allocation58_spill] sm:$0xff] %v2992_v40 }
  0x74   : > { %763 = vrot.lane.b32.xlu0 %v2953_v33, %s2420_s28  ;;  %v2987_v18 = vsel %vm536_vm1, %v583_v15, %v585_v56  ;;  %v593_v56 = vrot.slane %v2735_v57, 2  ;;  %v592_v15 = vrot.slane %v2745_v3, 2  ;;  %v610_v33 = vrot.slane %v2812_v41, 2 }
  0x75   : > { %4535 = vst [vmem:[#allocation57_spill] sm:$0xff] %v2987_v18  ;;  %v613_v41 = vrot.slane %v2835_v46, 2 }
  0x76   : > { %769 = vrot.lane.b32.xlu1 %v2961_v29, %s2420_s28  ;;  %v590_v29 = vrot.slane %v2712_v14, 2  ;;  %v3005_v14 = vsel %vm536_vm1, %v587_v22, %v588_v54 }
  0x78   : > { %767 = vrot.lane.b32.xlu0 %v2966_v51, %s2420_s28  ;;  %v3000_v61 = vsel %vm536_vm1, %v588_v54, %v590_v29  ;;  %v598_v29 = vrot.slane %v2753_v28, 2  ;;  %v597_v54 = vrot.slane %v2769_v62, 2  ;;  %v605_v51 = vrot.slane %v2787_v6, 2 }
  0x7a   : > { %773 = vrot.lane.b32.xlu1 %v2974_v24, %s2420_s28  ;;  %v595_v24 = vrot.slane %v2737_v60, 2  ;;  %v3018_v60 = vsel %vm536_vm1, %v592_v15, %v593_v56 }
  0x7c   : > { %771 = vrot.lane.b32.xlu0 %v2979_v9, %s2420_s28  ;;  %v3013_v43 = vsel %vm536_vm1, %v593_v56, %v595_v24  ;;  %v600_v9 = vrot.slane %v2762_v38, 2  ;;  %v603_v24 = vrot.slane %v2785_v34, 2  ;;  %v3031_v38 = vsel %vm536_vm1, %v597_v54, %v598_v29 }
  0x7d   : > { %4538 = vst [vmem:[#allocation60_spill] sm:$0xff] %v3031_v38  ;;  %v602_v56 = vrot.slane %v2795_v16, 2 }
  0x7e   : > { %777 = vrot.lane.b32.xlu1 %v2987_v18, %s2420_s28  ;;  %v3026_v22 = vsel %vm536_vm1, %v598_v29, %v600_v9  ;;  %v3039_v15 = vsel %vm536_vm1, %v603_v24, %v605_v51  ;;  %v608_v9 = vrot.slane %v2803_v47, 2  ;;  %v607_v29 = vrot.slane %v2819_v8, 2 }
  0x7f   : > { %4537 = vst [vmem:[#allocation59_spill] sm:$0xff] %v3026_v22  ;;  %4539 = vst [vmem:[#allocation61_spill] sm:$0xff] %v3039_v15  ;;  %v3046_v6 = vsel %vm536_vm1, %v602_v56, %v603_v24  ;;  %v612_v56 = vrot.slane %v2843_v27, 2 }
  0x80   : > { %775 = vrot.lane.b32.xlu0 %v2992_v40, %s2420_s28  ;;  %4541 = vst [vmem:[#allocation63_spill] sm:$0xff] %v3046_v6  ;;  %v3056_v51 = vsel %vm536_vm1, %v608_v9, %v610_v33  ;;  %v3063_v24 = vsel %vm536_vm1, %v607_v29, %v608_v9 }
  0x81   : > { %4543 = vst [vmem:[#allocation65_spill] sm:$0xff] %v3056_v51  ;;  %4545 = vst [vmem:[#allocation67_spill] sm:$0xff] %v3063_v24 }
  0x82   : > { %781 = vrot.lane.b32.xlu1 %v3000_v61, %s2420_s28 }
  0x84   : > { %779 = vrot.lane.b32.xlu0 %v3005_v14, %s2420_s28 }
  0x86   : > { %785 = vrot.lane.b32.xlu1 %v3013_v43, %s2420_s28 }
  0x88   : > { %783 = vrot.lane.b32.xlu0 %v3018_v60, %s2420_s28 }
  0x8a   : > { %789 = vrot.lane.b32.xlu1 %v3026_v22, %s2420_s28 }
  0x8c   : > { %787 = vrot.lane.b32.xlu0 %v3031_v38, %s2420_s28  ;;  %v3043_v11 = vpop.permute.xlu1 %647 }
  0x8d   : > { %4540 = vst [vmem:[#allocation62_spill] sm:$0xff] %v3043_v11  ;;  %v615_v11 = vrot.slane %v2837_v1, 2  ;;  %v3078_v1 = vsel %vm536_vm1, %v612_v56, %v613_v41 }
  0x8e   : > { %v3049_v54 = vpop.permute.xlu0 %643  ;;  %793 = vrot.lane.b32.xlu1 %v3039_v15, %s2420_s28  ;;  %4548 = vst [vmem:[#allocation70_spill] sm:$0xff] %v3078_v1 }
  0x8f   : > { %4542 = vst [vmem:[#allocation64_spill] sm:$0xff] %v3049_v54  ;;  %v3073_v33 = vsel %vm536_vm1, %v613_v41, %v615_v11 }
  0x90   : > { %791 = vrot.lane.b32.xlu0 %v3046_v6, %s2420_s28  ;;  %v3060_v13 = vpop.permute.xlu1 %649  ;;  %4547 = vst [vmem:[#allocation69_spill] sm:$0xff] %v3073_v33 }
  0x91   : > { %4544 = vst [vmem:[#allocation66_spill] sm:$0xff] %v3060_v13 }
  0x92   : > { %v3066_v5 = vpop.permute.xlu0 %645  ;;  %797 = vrot.lane.b32.xlu1 %v3056_v51, %s2420_s28 }
  0x93   : > { %4546 = vst [vmem:[#allocation68_spill] sm:$0xff] %v3066_v5 }
  0x94   : > { %795 = vrot.lane.b32.xlu0 %v3063_v24, %s2420_s28  ;;  %v3075_v15 = vpop.permute.xlu1 %653 }
  0x96   : > { %v3080_v9 = vpop.permute.xlu0 %651  ;;  %801 = vrot.lane.b32.xlu1 %v3073_v33, %s2420_s28 }
  0x98   : > { %799 = vrot.lane.b32.xlu0 %v3078_v1, %s2420_s28  ;;  %v3086_v29 = vpop.permute.xlu1 %657 }
  0x9a   : > { %v3088_v51 = vpop.permute.xlu0 %655  ;;  %837 = vrot.lane.b32.xlu1 %v2486_v7, %s2421_s29 }
  0x9c   : > { %835 = vrot.lane.b32.xlu0 %v2482_v4, %s2421_s29  ;;  %v3094_v11 = vpop.permute.xlu1 %661 }
  0x9e   : > { %v3096_v41 = vpop.permute.xlu0 %659  ;;  %841 = vrot.lane.b32.xlu1 %v2510_v26, %s2421_s29 }
  0xa0   : > { %839 = vrot.lane.b32.xlu0 %v2520_v32, %s2421_s29  ;;  %v3102_v56 = vpop.permute.xlu1 %665 }
  0xa2   : > { %v3104_v33 = vpop.permute.xlu0 %663  ;;  %845 = vrot.lane.b32.xlu1 %v2538_v44, %s2421_s29 }
  0xa4   : > { %843 = vrot.lane.b32.xlu0 %v2546_v50, %s2421_s29  ;;  %v3110_v1 = vpop.permute.xlu1 %669 }
  0xa6   : > { %v3112_v7 = vpop.permute.xlu0 %667  ;;  %849 = vrot.lane.b32.xlu1 %v2554_v55, %s2421_s29 }
  0xa8   : > { %847 = vrot.lane.b32.xlu0 %v2569_v63, %s2421_s29  ;;  %v3118_v13 = vpop.permute.xlu1 %673 }
  0xaa   : > { %v3120_v24 = vpop.permute.xlu0 %671  ;;  %853 = vrot.lane.b32.xlu1 %v2585_v10, %s2421_s29 }
  0xac   : > { %851 = vrot.lane.b32.xlu0 %v2595_v19, %s2421_s29  ;;  %v3126_v4 = vpop.permute.xlu1 %677 }
  0xad   : > { %4549 = vst [vmem:[#allocation71_spill] sm:$0xff] %v3126_v4 }
  0xae   : > { %v3128_v6 = vpop.permute.xlu0 %675  ;;  %857 = vrot.lane.b32.xlu1 %v2603_v25, %s2421_s29 }
  0xaf   : > { %4550 = vst [vmem:[#allocation72_spill] sm:$0xff] %v3128_v6 }
  0xb0   : > { %855 = vrot.lane.b32.xlu0 %v2619_v37, %s2421_s29  ;;  %v3134_v5 = vpop.permute.xlu1 %681 }
  0xb1   : > { %4551 = vst [vmem:[#allocation73_spill] sm:$0xff] %v3134_v5 }
  0xb2   : > { %v3136_v12 = vpop.permute.xlu0 %679  ;;  %861 = vrot.lane.b32.xlu1 %v2635_v49, %s2421_s29 }
  0xb3   : > { %4552 = vst [vmem:[#allocation74_spill] sm:$0xff] %v3136_v12 }
  0xb4   : > { %859 = vrot.lane.b32.xlu0 %v2645_v58, %s2421_s29  ;;  %v3142_v54 = vpop.permute.xlu1 %685 }
  0xb6   : > { %v3144_v4 = vpop.permute.xlu0 %683  ;;  %865 = vrot.lane.b32.xlu1 %v2653_v2, %s2421_s29 }
  0xb8   : > { %863 = vrot.lane.b32.xlu0 %v2669_v20, %s2421_s29  ;;  %v3150_v6 = vpop.permute.xlu1 %689 }
  0xba   : > { %v3152_v5 = vpop.permute.xlu0 %687  ;;  %869 = vrot.lane.b32.xlu1 %v2685_v39, %s2421_s29 }
  0xbc   : > { %867 = vrot.lane.b32.xlu0 %v2695_v52, %s2421_s29  ;;  %v3158_v12 = vpop.permute.xlu1 %693 }
  0xbd   : > { %4553 = vst [vmem:[#allocation75_spill] sm:$0xff] %v3158_v12 }
  0xbe   : > { %v3160_v30 = vpop.permute.xlu0 %691  ;;  %873 = vrot.lane.b32.xlu1 %v2703_v0, %s2421_s29 }
  0xbf   : > { %4554 = vst [vmem:[#allocation76_spill] sm:$0xff] %v3160_v30 }
  0xc0   : > { %871 = vrot.lane.b32.xlu0 %v2719_v23, %s2421_s29  ;;  %v3166_v2 = vpop.permute.xlu1 %697 }
  0xc1   : > { %4555 = vst [vmem:[#allocation77_spill] sm:$0xff] %v3166_v2 }
  0xc2   : > { %v3168_v20 = vpop.permute.xlu0 %695  ;;  %877 = vrot.lane.b32.xlu1 %v2735_v57, %s2421_s29 }
  0xc3   : > { %4556 = vst [vmem:[#allocation78_spill] sm:$0xff] %v3168_v20 }
  0xc4   : > { %875 = vrot.lane.b32.xlu0 %v2745_v3, %s2421_s29  ;;  %v3174_v39 = vpop.permute.xlu1 %701 }
  0xc5   : > { %4557 = vst [vmem:[#allocation79_spill] sm:$0xff] %v3174_v39 }
  0xc6   : > { %v3176_v52 = vpop.permute.xlu0 %699  ;;  %881 = vrot.lane.b32.xlu1 %v2753_v28, %s2421_s29  ;;  %v1676_v28 = vld [vmem:[%s4349_s2 + $0x8] sm:$0xff] }
  0xc7   : > { %4558 = vst [vmem:[#allocation80_spill] sm:$0xff] %v3176_v52  ;;  %v294_v52 = vld [vmem:[%s2471_s23 + $0x188] sm:$0xff] }
  0xc8   : > { %879 = vrot.lane.b32.xlu0 %v2769_v62, %s2421_s29  ;;  %v3182_v17 = vpop.permute.xlu1 %705  ;;  %v1683_v62 = vld [vmem:[%s4349_s2 + $0x40] sm:$0xff] }
  0xc9   : > { %4559 = vst [vmem:[#allocation81_spill] sm:$0xff] %v3182_v17  ;;  %v348_v17 = vld [vmem:[%s2476_s26 + $0x188] sm:$0xff] }
  0xca   : > { %v3184_v22 = vpop.permute.xlu0 %703  ;;  %885 = vrot.lane.b32.xlu1 %v2785_v34, %s2421_s29  ;;  %v4572_v34 = vld [vmem:[#allocation25_spill] sm:$0xff] }
  0xcb   : > { %4560 = vst [vmem:[#allocation82_spill] sm:$0xff] %v3184_v22  ;;  %v293_v22 = vld [vmem:[%s2471_s23 + $0x180] sm:$0xff] }
  0xcc   : > { %883 = vrot.lane.b32.xlu0 %v2795_v16, %s2421_s29  ;;  %v3190_v59 = vpop.permute.xlu1 %741 }
  0xcd   : > { %4561 = vst [vmem:[#allocation83_spill] sm:$0xff] %v3190_v59  ;;  %v3208_v59 = vmul.f32 %v348_v17, %v294_v52  ;;  %v4567_v52 = vld [vmem:[#allocation6_spill] sm:$0xff] }
  0xce   : > { %v3192_v38 = vpop.permute.xlu0 %739  ;;  %889 = vrot.lane.b32.xlu1 %v2803_v47, %s2421_s29 }
  0xcf   : > { %4562 = vst [vmem:[#allocation84_spill] sm:$0xff] %v3192_v38  ;;  %4565 = vst [vmem:[#allocation87_spill] sm:$0xff] %v3208_v59  ;;  %v3212_v38 = vmul.f32 %v347_v53, %v293_v22  ;;  %v4568_v22 = vld [vmem:[#allocation7_spill] sm:$0xff] }
  0xd0   : > { %887 = vrot.lane.b32.xlu0 %v2819_v8, %s2421_s29  ;;  %v3200_v39 = vpop.permute.xlu1 %745 }
  0xd1   : > { %4563 = vst [vmem:[#allocation85_spill] sm:$0xff] %v3200_v39  ;;  %4566 = vst [vmem:[#allocation88_spill] sm:$0xff] %v3212_v38 }
  0xd2   : > { %v3204_v20 = vpop.permute.xlu0 %743  ;;  %893 = vrot.lane.b32.xlu1 %v2835_v46, %s2421_s29  ;;  %v4570_v46 = vld [vmem:[#allocation26_spill] sm:$0xff] }
  0xd3   : > { %4564 = vst [vmem:[#allocation86_spill] sm:$0xff] %v3204_v20 }
  0xd4   : > { %891 = vrot.lane.b32.xlu0 %v2843_v27, %s2421_s29  ;;  %v3214_v47 = vpop.permute.xlu1 %749 }
  0xd6   : > { %v3216_v8 = vpop.permute.xlu0 %747  ;;  %897 = vrot.lane.b32.xlu1 %v3208_v59, %s2421_s29  ;;  %v4569_v59 = vld [vmem:[#allocation8_spill] sm:$0xff] }
  0xd8   : > { %895 = vrot.lane.b32.xlu0 %v3212_v38, %s2421_s29  ;;  %v3222_v39 = vpop.permute.xlu1 %753 }
  0xda   : > { %v3224_v20 = vpop.permute.xlu0 %751  ;;  %933 = vrot.lane.b32.xlu1 %v2535_v42, %s2422_s30  ;;  %v4571_v42 = vld [vmem:[#allocation10_spill] sm:$0xff] }
  0xdc   : > { %931 = vrot.lane.b32.xlu0 %v4567_v52, %s2422_s30  ;;  %v3230_v53 = vpop.permute.xlu1 %757 }
  0xde   : > { %v3232_v17 = vpop.permute.xlu0 %755  ;;  %937 = vrot.lane.b32.xlu1 %v4568_v22, %s2422_s30 }
  0xe0   : > { %935 = vrot.lane.b32.xlu0 %v4569_v59, %s2422_s30  ;;  %v3238_v38 = vpop.permute.xlu1 %761 }
  0xe2   : > { %v3240_v27 = vpop.permute.xlu0 %759  ;;  %963 = vrot.lane.b32.xlu1 %v4570_v46, %s2422_s30  ;;  %v1675_v46 = vld [vmem:[%s4349_s2] sm:$0xff] }
  0xe4   : > { %939 = vrot.lane.b32.xlu0 %v4571_v42, %s2422_s30  ;;  %v3246_v52 = vpop.permute.xlu1 %765 }
  0xe6   : > { %v3248_v16 = vpop.permute.xlu0 %763  ;;  %1027 = vrot.lane.b32.xlu1 %v2888_v21, %s2423_s6  ;;  %v2368_v21 = vpack.c.bf16 %v1676_v28, %v1675_v46 }
  0xe8   : > { %965 = vrot.lane.b32.xlu0 %v4572_v34, %s2422_s30  ;;  %v3254_v2 = vpop.permute.xlu1 %769  ;;  %2369 = vmatprep.subr.bf16.mxu0 %v2368_v21 }
  0xe9   : > { %2384 = vmatprep.subr.bf16.mxu1 %v2368_v21  ;;  %2371 = vmatpush3.bf16.msra.mxu0 %v2368_v21 }
  0xea   : > { %v3256_v30 = vpop.permute.xlu0 %767  ;;  %1029 = vrot.lane.b32.xlu1 %v2883_v35, %s2423_s6  ;;  %v1677_v35 = vld [vmem:[%s4349_s2 + $0x10] sm:$0xff]  ;;  %2389 = vmatpush3.bf16.msra.mxu1 %v2368_v21 }
  0xec   : > { %1059 = vrot.lane.b32.xlu0 %v2992_v40, %s2423_s6  ;;  %v3268_v34 = vpop.permute.xlu1 %773  ;;  %v1678_v40 = vld [vmem:[%s4349_s2 + $0x18] sm:$0xff] }
  0xed   : > { %4573 = vst [vmem:[#allocation6_spill] sm:$0xff] %v3268_v34  ;;  %v2372_v28 = vpack.c.bf16 %v1678_v40, %v1677_v35 }
  0xee   : > { %v3270_v12 = vpop.permute.xlu0 %771  ;;  %1123 = vrot.lane.b32.xlu1 %v2520_v32, %s2424_s11 }
  0xef   : > { %4574 = vst [vmem:[#allocation7_spill] sm:$0xff] %v3270_v12  ;;  %2373 = vmatprep.subr.bf16.mxu0 %v2372_v28  ;;  %2385 = vmatprep.subr.bf16.mxu1 %v2372_v28  ;;  %v1679_v12 = vld [vmem:[%s4349_s2 + $0x20] sm:$0xff] }
  0xf0   : > { %1061 = vrot.lane.b32.xlu0 %v2987_v18, %s2423_s6  ;;  %v3282_v46 = vpop.permute.xlu1 %777  ;;  %2375 = vmatpush3.bf16.msra.mxu0 %v2372_v28  ;;  %v1680_v18 = vld [vmem:[%s4349_s2 + $0x28] sm:$0xff] }
  0xf1   : > { %4575 = vst [vmem:[#allocation8_spill] sm:$0xff] %v3282_v46  ;;  %v2376_v40 = vpack.c.bf16 %v1680_v18, %v1679_v12  ;;  %2390 = vmatpush3.bf16.msra.mxu1 %v2372_v28  ;;  %v1681_v46 = vld [vmem:[%s4349_s2 + $0x30] sm:$0xff]  ;;  %v1682_v12 = vld [vmem:[%s4349_s2 + $0x38] sm:$0xff] }
  0xf2   : > { %v3284_v34 = vpop.permute.xlu0 %775  ;;  %1125 = vrot.lane.b32.xlu1 %v2510_v26, %s2424_s11  ;;  %v2380_v18 = vpack.c.bf16 %v1682_v12, %v1681_v46  ;;  %v4580_v12 = vld [vmem:[#allocation28_spill] sm:$0xff] }
  0xf3   : > { %4576 = vst [vmem:[#allocation10_spill] sm:$0xff] %v3284_v34  ;;  %2377 = vmatprep.subr.bf16.mxu0 %v2376_v40  ;;  %2386 = vmatprep.subr.bf16.mxu1 %v2376_v40 }
  0xf4   : > { %1155 = vrot.lane.b32.xlu0 %v2719_v23, %s2424_s11  ;;  %v3296_v21 = vpop.permute.xlu1 %781  ;;  %2379 = vmatpush3.bf16.msra.mxu0 %v2376_v40 }
  0xf5   : > { %2391 = vmatpush3.bf16.msra.mxu1 %v2376_v40  ;;  %2381 = vmatprep.subr.bf16.mxu0 %v2380_v18 }
  0xf6   : > { %v3298_v35 = vpop.permute.xlu0 %779  ;;  %1219 = vrot.lane.b32.xlu1 %v4569_v59, %s2425_s22  ;;  %2387 = vmatprep.subr.bf16.mxu1 %v2380_v18  ;;  %v4578_v59 = vld [vmem:[#allocation29_spill] sm:$0xff] }
  0xf8   : > { %1157 = vrot.lane.b32.xlu0 %v2703_v0, %s2424_s11  ;;  %v3310_v28 = vpop.permute.xlu1 %785  ;;  %2383 = vmatpush3.bf16.msra.mxu0 %v2380_v18 }
  0xf9   : > { %2392 = vmatpush3.bf16.msra.mxu1 %v2380_v18  ;;  %2318 = vmatprep.subr.mxu0 %v1683_v62 }
  0xfa   : > { %v3312_v34 = vpop.permute.xlu0 %783  ;;  %967 = vrot.lane.b32.xlu1 %v4578_v59, %s2422_s30  ;;  %2388 = vmatprep.subr.mxu1 %v1683_v62 }
  0xfb   : > { %4577 = vst [vmem:[#allocation89_spill] sm:$0xff] %v3312_v34 }
  0xfc   : > { %1251 = vrot.lane.b32.xlu0 %v4578_v59, %s2425_s22  ;;  %v3321_v46 = vpop.permute.xlu1 %789  ;;  %2319 = vmatpush3.msra.mxu0 %v1683_v62 }
  0xfd   : > { %2393 = vmatpush3.msra.mxu1 %v1683_v62 }
  0xfe   : > { %v3323_v40 = vpop.permute.xlu0 %787  ;;  %1253 = vrot.lane.b32.xlu1 %v4580_v12, %s2425_s22 }
  0xff   : > { %4579 = vst [vmem:[#allocation29_spill] sm:$0xff] %v3323_v40 }
 0x100   : > { %1221 = vrot.lane.b32.xlu0 %v4568_v22, %s2425_s22  ;;  %v3329_v59 = vpop.permute.xlu1 %793 }
 0x102   : > { %v3331_v34 = vpop.permute.xlu0 %791  ;;  %1347 = vrot.lane.b32.xlu1 %v3005_v14, %s2426_s8 }
 0x103   : > { %4581 = vst [vmem:[#allocation28_spill] sm:$0xff] %v3331_v34 }
 0x104   : > { %1315 = vrot.lane.b32.xlu0 %v2901_v31, %s2426_s8  ;;  %v3337_v18 = vpop.permute.xlu1 %797 }
 0x105   : > { %4582 = vst [vmem:[#allocation90_spill] sm:$0xff] %v3337_v18 }
 0x106   : > { %v3339_v40 = vpop.permute.xlu0 %795  ;;  %1031 = vrot.lane.b32.xlu1 %v2901_v31, %s2423_s6 }
 0x108   : > { %969 = vrot.lane.b32.xlu0 %v4580_v12, %s2422_s30  ;;  %v3345_v62 = vpop.permute.xlu1 %801 }
 0x10a   : > { %v3347_v22 = vpop.permute.xlu0 %799  ;;  %1317 = vrot.lane.b32.xlu1 %v2896_v36, %s2426_s8 }
 0x10c   : > { %1063 = vrot.lane.b32.xlu0 %v3005_v14, %s2423_s6  ;;  %v3353_v34 = vpop.permute.xlu1 %837  ;;  %v1417_v14 = vsel %vm1411_vm2, %v2510_v26, %v3075_v15 }
 0x10d   : > { %4583 = vst [vmem:[#allocation91_spill] sm:$0xff] %v3353_v34 }
 0x10e   : > { %v3355_v18 = vpop.permute.xlu0 %835  ;;  %1033 = vrot.lane.b32.xlu1 %v2896_v36, %s2423_s6  ;;  %v1416_v36 = vsel %vm1411_vm2, %v2520_v32, %v3080_v9  ;;  %v1419_v32 = vsel %vm1411_vm2, %v2538_v44, %v3086_v29 }
 0x10f   : > { %4584 = vst [vmem:[#allocation92_spill] sm:$0xff] %v3355_v18  ;;  %v1449_v34 = vsel %vm1444_vm3, %v1416_v36, %v3216_v8  ;;  %v1452_v8 = vsel %vm1444_vm3, %v1419_v32, %v3222_v39 }
 0x110   : > { %1349 = vrot.lane.b32.xlu0 %v3000_v61, %s2426_s8  ;;  %v3361_v31 = vpop.permute.xlu1 %841 }
 0x111   : > { %4585 = vst [vmem:[#allocation93_spill] sm:$0xff] %v3361_v31  ;;  %v1450_v31 = vsel %vm1444_vm3, %v1417_v14, %v3214_v47  ;;  %v1418_v47 = vsel %vm1411_vm2, %v2546_v50, %v3088_v51  ;;  %v4587_v14 = vld [vmem:[#allocation33_spill] sm:$0xff] }
 0x112   : > { %v3363_v12 = vpop.permute.xlu0 %839  ;;  %1127 = vrot.lane.b32.xlu1 %v2546_v50, %s2424_s11  ;;  %v1421_v50 = vsel %vm1411_vm2, %v2554_v55, %v3094_v11 }
 0x113   : > { %4586 = vst [vmem:[#allocation94_spill] sm:$0xff] %v3363_v12  ;;  %v1454_v39 = vsel %vm1444_vm3, %v1421_v50, %v3230_v53  ;;  %v1422_v53 = vsel %vm1411_vm2, %v2595_v19, %v3104_v33  ;;  %v1425_v33 = vsel %vm1411_vm2, %v2603_v25, %v3110_v1 }
 0x114   : > { %1065 = vrot.lane.b32.xlu0 %v3000_v61, %s2423_s6  ;;  %v846_v12 = vpop.permute.xlu1 %845 }
 0x115   : > { %v3380_v18 = vsel %vm1477_vm4, %v1450_v31, %v846_v12 }
 0x116   : > { %v844_v26 = vpop.permute.xlu0 %843  ;;  %1129 = vrot.lane.b32.xlu1 %v2538_v44, %s2424_s11 }
 0x117   : > { %v3383_v15 = vsel %vm1477_vm4, %v1449_v34, %v844_v26  ;;  %v1451_v34 = vsel %vm1444_vm3, %v1418_v47, %v3224_v20  ;;  %v1420_v20 = vsel %vm1411_vm2, %v2569_v63, %v3096_v41  ;;  %v1423_v41 = vsel %vm1411_vm2, %v2585_v10, %v3102_v56 }
 0x118   : > { %1159 = vrot.lane.b32.xlu0 %v2745_v3, %s2424_s11  ;;  %v850_v61 = vpop.permute.xlu1 %849  ;;  %v1453_v29 = vsel %vm1444_vm3, %v1420_v20, %v3232_v17  ;;  %v1456_v17 = vsel %vm1444_vm3, %v1423_v41, %v3238_v38  ;;  %v1455_v26 = vsel %vm1444_vm3, %v1422_v53, %v3240_v27  ;;  %v4589_v38 = vld [vmem:[#allocation9_spill] sm:$0xff]  ;;  %v1424_v27 = vsel %vm1411_vm2, %v2619_v37, %v3112_v7 }
 0x119   : > { %v3400_v9 = vsel %vm1477_vm4, %v1452_v8, %v850_v61  ;;  %v4588_v8 = vld [vmem:[#allocation31_spill] sm:$0xff]  ;;  %v1458_v61 = vsel %vm1444_vm3, %v1425_v33, %v3246_v52  ;;  %v1427_v7 = vsel %vm1411_vm2, %v2635_v49, %v3118_v13  ;;  %v1433_v41 = vsel %vm1411_vm2, %v2703_v0, %v3142_v54 }
 0x11a   : > { %v848_v31 = vpop.permute.xlu0 %847  ;;  %1223 = vrot.lane.b32.xlu1 %v4571_v42, %s2425_s22  ;;  %v1460_v52 = vsel %vm1444_vm3, %v1427_v7, %v3254_v2  ;;  %v4595_v33 = vld [vmem:[#allocation27_spill] sm:$0xff] }
 0x11b   : > { %v3403_v44 = vsel %vm1477_vm4, %v1451_v34, %v848_v31  ;;  %v1457_v31 = vsel %vm1444_vm3, %v1424_v27, %v3248_v16  ;;  %v1426_v16 = vsel %vm1411_vm2, %v2645_v58, %v3120_v24 }
 0x11c   : > { %1161 = vrot.lane.b32.xlu0 %v2735_v57, %s2424_s11  ;;  %v854_v51 = vpop.permute.xlu1 %853 }
 0x11d   : > { %v3420_v42 = vsel %vm1477_vm4, %v1454_v39, %v854_v51  ;;  %v1459_v51 = vsel %vm1444_vm3, %v1426_v16, %v3256_v30  ;;  %v4599_v16 = vld [vmem:[#allocation32_spill] sm:$0xff] }
 0x11e   : > { %v852_v12 = vpop.permute.xlu0 %851  ;;  %971 = vrot.lane.b32.xlu1 %v4587_v14, %s2422_s30 }
 0x11f   : > { %v3423_v11 = vsel %vm1477_vm4, %v1453_v29, %v852_v12 }
 0x120   : > { %1255 = vrot.lane.b32.xlu0 %v4587_v14, %s2425_s22  ;;  %v858_v36 = vpop.permute.xlu1 %857 }
 0x121   : > { %v3440_v32 = vsel %vm1477_vm4, %v1456_v17, %v858_v36 }
 0x122   : > { %v856_v47 = vpop.permute.xlu0 %855  ;;  %1257 = vrot.lane.b32.xlu1 %v4588_v8, %s2425_s22 }
 0x123   : > { %v3443_v56 = vsel %vm1477_vm4, %v1455_v26, %v856_v47 }
 0x124   : > { %1225 = vrot.lane.b32.xlu0 %v4589_v38, %s2425_s22  ;;  %v862_v34 = vpop.permute.xlu1 %861 }
 0x125   : > { %v3460_v50 = vsel %vm1477_vm4, %v1458_v61, %v862_v34  ;;  %v4597_v61 = vld [vmem:[#allocation29_spill] sm:$0xff] }
 0x126   : > { %v860_v20 = vpop.permute.xlu0 %859  ;;  %1351 = vrot.lane.b32.xlu1 %v3018_v60, %s2426_s8 }
 0x127   : > { %v3463_v1 = vsel %vm1477_vm4, %v1457_v31, %v860_v20 }
 0x128   : > { %1319 = vrot.lane.b32.xlu0 %v2914_v45, %s2426_s8  ;;  %v866_v39 = vpop.permute.xlu1 %865 }
 0x129   : > { %v3480_v29 = vsel %vm1477_vm4, %v1460_v52, %v866_v39  ;;  %v4601_v39 = vld [vmem:[#allocation34_spill] sm:$0xff] }
 0x12a   : > { %4590 = vst [vmem:[#allocation33_spill] sm:$0xff] %v3480_v29  ;;  %v864_v12 = vpop.permute.xlu0 %863  ;;  %973 = vrot.lane.b32.xlu1 %v4588_v8, %s2422_s30  ;;  %v4629_v29 = vld [vmem:[#allocation84_spill] sm:$0xff] }
 0x12b   : > { %v3483_v13 = vsel %vm1477_vm4, %v1459_v51, %v864_v12 }
 0x12c   : > { %4591 = vst [vmem:[#allocation31_spill] sm:$0xff] %v3483_v13  ;;  %941 = vrot.lane.b32.xlu0 %v4589_v38, %s2422_s30  ;;  %v3489_v24 = vpop.permute.xlu1 %869 }
 0x12e   : > { %v3491_v2 = vpop.permute.xlu0 %867  ;;  %1067 = vrot.lane.b32.xlu1 %v3018_v60, %s2423_s6  ;;  %v1432_v60 = vsel %vm1411_vm2, %v2719_v23, %v3144_v4  ;;  %v1435_v4 = vsel %vm1411_vm2, %v2735_v57, %v3150_v6  ;;  %v1434_v23 = vsel %vm1411_vm2, %v2745_v3, %v3152_v5  ;;  %v4594_v6 = vld [vmem:[#allocation75_spill] sm:$0xff]  ;;  %v4596_v5 = vld [vmem:[#allocation76_spill] sm:$0xff] }
 0x12f   : > { %v1465_v17 = vsel %vm1444_vm3, %v1432_v60, %v3298_v35  ;;  %v1468_v54 = vsel %vm1444_vm3, %v1435_v4, %v3310_v28  ;;  %v4592_v35 = vld [vmem:[#allocation89_spill] sm:$0xff]  ;;  %v1437_v3 = vsel %vm1411_vm2, %v4595_v33, %v4594_v6  ;;  %v4602_v60 = vld [vmem:[#allocation28_spill] sm:$0xff]  ;;  %v4604_v4 = vld [vmem:[#allocation79_spill] sm:$0xff] }
 0x130   : > { %1035 = vrot.lane.b32.xlu0 %v2914_v45, %s2423_s6  ;;  %v3497_v30 = vpop.permute.xlu1 %873  ;;  %v1466_v45 = vsel %vm1444_vm3, %v1433_v41, %v3296_v21  ;;  %v1467_v47 = vsel %vm1444_vm3, %v1434_v23, %v4592_v35  ;;  %v1470_v38 = vsel %vm1444_vm3, %v1437_v3, %v3321_v46  ;;  %v4600_v46 = vld [vmem:[#allocation78_spill] sm:$0xff]  ;;  %v4605_v23 = vld [vmem:[#allocation35_spill] sm:$0xff] }
 0x131   : > { %v1438_v51 = vsel %vm1411_vm2, %v4601_v39, %v4600_v46  ;;  %v4608_v35 = vld [vmem:[#allocation38_spill] sm:$0xff] }
 0x132   : > { %v3499_v14 = vpop.permute.xlu0 %871  ;;  %1353 = vrot.lane.b32.xlu1 %v3013_v43, %s2426_s8 }
 0x134   : > { %1321 = vrot.lane.b32.xlu0 %v2909_v48, %s2426_s8  ;;  %v878_v53 = vpop.permute.xlu1 %877 }
 0x135   : > { %v3516_v36 = vsel %vm1477_vm4, %v1466_v45, %v878_v53  ;;  %v1471_v45 = vsel %vm1444_vm3, %v1438_v51, %v4602_v60  ;;  %v4616_v60 = vld [vmem:[#allocation36_spill] sm:$0xff] }
 0x136   : > { %v876_v26 = vpop.permute.xlu0 %875  ;;  %1069 = vrot.lane.b32.xlu1 %v3013_v43, %s2423_s6 }
 0x137   : > { %v3519_v0 = vsel %vm1477_vm4, %v1465_v17, %v876_v26 }
 0x138   : > { %1037 = vrot.lane.b32.xlu0 %v2909_v48, %s2423_s6  ;;  %v882_v21 = vpop.permute.xlu1 %881  ;;  %v4593_v48 = vld [vmem:[#allocation30_spill] sm:$0xff] }
 0x139   : > { %v3536_v43 = vsel %vm1477_vm4, %v1468_v54, %v882_v21  ;;  %v1436_v28 = vsel %vm1411_vm2, %v4593_v48, %v4596_v5  ;;  %v1441_v54 = vsel %vm1411_vm2, %v4605_v23, %v4604_v4  ;;  %v4607_v21 = vld [vmem:[#allocation80_spill] sm:$0xff] }
 0x13a   : > { %v880_v8 = vpop.permute.xlu0 %879  ;;  %1163 = vrot.lane.b32.xlu1 %v4593_v48, %s2424_s11  ;;  %v1469_v34 = vsel %vm1444_vm3, %v1436_v28, %v4597_v61 }
 0x13b   : > { %v3539_v57 = vsel %vm1477_vm4, %v1467_v47, %v880_v8  ;;  %v1440_v47 = vsel %vm1411_vm2, %v4608_v35, %v4607_v21  ;;  %v4609_v8 = vld [vmem:[#allocation90_spill] sm:$0xff] }
 0x13c   : > { %1131 = vrot.lane.b32.xlu0 %v2569_v63, %s2424_s11  ;;  %v886_v27 = vpop.permute.xlu1 %885  ;;  %v4598_v63 = vld [vmem:[#allocation77_spill] sm:$0xff]  ;;  %v1474_v48 = vsel %vm1444_vm3, %v1441_v54, %v4609_v8 }
 0x13d   : > { %v3556_v31 = vsel %vm1477_vm4, %v1470_v38, %v886_v27  ;;  %v1439_v52 = vsel %vm1411_vm2, %v4599_v16, %v4598_v63  ;;  %v4610_v38 = vld [vmem:[#allocation81_spill] sm:$0xff]  ;;  %v4611_v27 = vld [vmem:[#allocation40_spill] sm:$0xff] }
 0x13e   : > { %v884_v20 = vpop.permute.xlu0 %883  ;;  %1165 = vrot.lane.b32.xlu1 %v4595_v33, %s2424_s11  ;;  %v1472_v12 = vsel %vm1444_vm3, %v1439_v52, %v3329_v59  ;;  %v4606_v59 = vld [vmem:[#allocation12_spill] sm:$0xff]  ;;  %v1473_v33 = vsel %vm1444_vm3, %v1440_v47, %v3339_v40  ;;  %v1443_v61 = vsel %vm1411_vm2, %v4611_v27, %v4610_v38 }
 0x13f   : > { %v3559_v7 = vsel %vm1477_vm4, %v1469_v34, %v884_v20  ;;  %v4612_v34 = vld [vmem:[#allocation82_spill] sm:$0xff]  ;;  %v1476_v63 = vsel %vm1444_vm3, %v1443_v61, %v3345_v62 }
 0x140   : > { %1133 = vrot.lane.b32.xlu0 %v2554_v55, %s2424_s11  ;;  %v890_v41 = vpop.permute.xlu1 %889  ;;  %v4603_v55 = vld [vmem:[#allocation37_spill] sm:$0xff]  ;;  %v4613_v20 = vld [vmem:[#allocation42_spill] sm:$0xff] }
 0x141   : > { %v3576_v53 = vsel %vm1477_vm4, %v1472_v12, %v890_v41  ;;  %v1442_v40 = vsel %vm1411_vm2, %v4613_v20, %v4612_v34 }
 0x142   : > { %v888_v17 = vpop.permute.xlu0 %887  ;;  %1259 = vrot.lane.b32.xlu1 %v4603_v55, %s2425_s22  ;;  %v1475_v46 = vsel %vm1444_vm3, %v1442_v40, %v3347_v22  ;;  %v4619_v22 = vld [vmem:[#allocation48_spill] sm:$0xff] }
 0x143   : > { %v3579_v26 = vsel %vm1477_vm4, %v1471_v45, %v888_v17  ;;  %v4617_v45 = vld [vmem:[#allocation11_spill] sm:$0xff] }
 0x144   : > { %1227 = vrot.lane.b32.xlu0 %v4606_v59, %s2425_s22  ;;  %v894_v6 = vpop.permute.xlu1 %893 }
 0x145   : > { %v3596_v3 = vsel %vm1477_vm4, %v1474_v48, %v894_v6  ;;  %v4620_v48 = vld [vmem:[#allocation59_spill] sm:$0xff] }
 0x146   : > { %v892_v5 = vpop.permute.xlu0 %891  ;;  %975 = vrot.lane.b32.xlu1 %v4603_v55, %s2422_s30  ;;  %v4618_v55 = vld [vmem:[#allocation60_spill] sm:$0xff]  ;;  %v4621_v6 = vld [vmem:[#allocation47_spill] sm:$0xff] }
 0x147   : > { %v3599_v28 = vsel %vm1477_vm4, %v1473_v33, %v892_v5 }
 0x148   : > { %943 = vrot.lane.b32.xlu0 %v4606_v59, %s2422_s30  ;;  %v898_v52 = vpop.permute.xlu1 %897 }
 0x149   : > { %v3616_v51 = vsel %vm1477_vm4, %v1476_v63, %v898_v52 }
 0x14a   : > { %4614 = vst [vmem:[#allocation9_spill] sm:$0xff] %v3616_v51  ;;  %v896_v12 = vpop.permute.xlu0 %895  ;;  %1261 = vrot.lane.b32.xlu1 %v4616_v60, %s2425_s22 }
 0x14b   : > { %v3619_v41 = vsel %vm1477_vm4, %v1475_v46, %v896_v12  ;;  %v4622_v46 = vld [vmem:[#allocation41_spill] sm:$0xff]  ;;  %v4623_v12 = vld [vmem:[#allocation14_spill] sm:$0xff] }
 0x14c   : > { %4615 = vst [vmem:[#allocation89_spill] sm:$0xff] %v3619_v41  ;;  %1229 = vrot.lane.b32.xlu0 %v4617_v45, %s2425_s22  ;;  %v3625_v17 = vpop.permute.xlu1 %933 }
 0x14e   : > { %v932_v62 = vpop.permute.xlu0 %931  ;;  %1355 = vrot.lane.b32.xlu1 %v4618_v55, %s2426_s8 }
 0x150   : > { %1323 = vrot.lane.b32.xlu0 %v4619_v22, %s2426_s8  ;;  %v3631_v4 = vpop.permute.xlu1 %937 }
 0x152   : > { %v3633_v54 = vpop.permute.xlu0 %935  ;;  %977 = vrot.lane.b32.xlu1 %v4616_v60, %s2422_s30 }
 0x154   : > { %945 = vrot.lane.b32.xlu0 %v4617_v45, %s2422_s30  ;;  %v964_v59 = vpop.permute.xlu1 %963  ;;  %v4625_v45 = vld [vmem:[#allocation18_spill] sm:$0xff] }
 0x156   : > { %v3639_v21 = vpop.permute.xlu0 %939  ;;  %1071 = vrot.lane.b32.xlu1 %v4618_v55, %s2423_s6 }
 0x158   : > { %1039 = vrot.lane.b32.xlu0 %v4619_v22, %s2423_s6  ;;  %v1028_v47 = vpop.permute.xlu1 %1027 }
 0x15a   : > { %v3645_v8 = vpop.permute.xlu0 %965  ;;  %1357 = vrot.lane.b32.xlu1 %v4620_v48, %s2426_s8 }
 0x15c   : > { %1325 = vrot.lane.b32.xlu0 %v4621_v6, %s2426_s8  ;;  %v1030_v33 = vpop.permute.xlu1 %1029 }
 0x15e   : > { %v1060_v5 = vpop.permute.xlu0 %1059  ;;  %1073 = vrot.lane.b32.xlu1 %v4620_v48, %s2423_s6  ;;  %v4628_v48 = vld [vmem:[#allocation7_spill] sm:$0xff] }
 0x160   : > { %1041 = vrot.lane.b32.xlu0 %v4621_v6, %s2423_s6  ;;  %v1124_v38 = vpop.permute.xlu1 %1123 }
 0x162   : > { %v3655_v61 = vpop.permute.xlu0 %1061  ;;  %1167 = vrot.lane.b32.xlu1 %v4601_v39, %s2424_s11 }
 0x164   : > { %1135 = vrot.lane.b32.xlu0 %v2595_v19, %s2424_s11  ;;  %v1126_v34 = vpop.permute.xlu1 %1125  ;;  %v4624_v19 = vld [vmem:[#allocation72_spill] sm:$0xff] }
 0x165   : > { %v1428_v55 = vsel %vm1411_vm2, %v4625_v45, %v4624_v19 }
 0x166   : > { %v1156_v40 = vpop.permute.xlu0 %1155  ;;  %1169 = vrot.lane.b32.xlu1 %v4599_v16, %s2424_s11  ;;  %v4626_v16 = vld [vmem:[#allocation64_spill] sm:$0xff]  ;;  %v1461_v6 = vsel %vm1444_vm3, %v1428_v55, %v4628_v48 }
 0x167   : > { %v1494_v19 = vsel %vm1477_vm4, %v1461_v6, %v3491_v2 }
 0x168   : > { %1137 = vrot.lane.b32.xlu0 %v2585_v10, %s2424_s11  ;;  %v1220_v63 = vpop.permute.xlu1 %1219  ;;  %v4627_v10 = vld [vmem:[#allocation4_spill] sm:$0xff] }
 0x169   : > { %v1412_v22 = vsel %vm1411_vm2, %v4627_v10, %v4626_v16  ;;  %v1527_v16 = vsel %vm1510_vm5, %v1494_v19, %v964_v59  ;;  %v4633_v19 = vld [vmem:[#allocation68_spill] sm:$0xff] }
 0x16a   : > { %v1158_v52 = vpop.permute.xlu0 %1157  ;;  %1263 = vrot.lane.b32.xlu1 %v4622_v46, %s2425_s22  ;;  %v1445_v51 = vsel %vm1444_vm3, %v1412_v22, %v4629_v29  ;;  %v1560_v48 = vsel %vm1543_vm6, %v1527_v16, %v1060_v5  ;;  %v4632_v22 = vld [vmem:[#allocation13_spill] sm:$0xff] }
 0x16b   : > { %v1593_v2 = vsel %vm1576_vm7, %v1560_v48, %v1156_v40  ;;  %v4635_v40 = vld [vmem:[#allocation63_spill] sm:$0xff] }
 0x16c   : > { %1231 = vrot.lane.b32.xlu0 %v4623_v12, %s2425_s22  ;;  %v3669_v39 = vpop.permute.xlu1 %967 }
 0x16e   : > { %v1252_v60 = vpop.permute.xlu0 %1251  ;;  %979 = vrot.lane.b32.xlu1 %v4622_v46, %s2422_s30  ;;  %v4630_v46 = vld [vmem:[#allocation92_spill] sm:$0xff] }
 0x16f   : > { %v1478_v41 = vsel %vm1477_vm4, %v1445_v51, %v4630_v46  ;;  %v1626_v59 = vsel %vm1609_vm8, %v1593_v2, %v1252_v60  ;;  %v4634_v46 = vld [vmem:[#allocation5_spill] sm:$0xff] }
 0x170   : > { %947 = vrot.lane.b32.xlu0 %v4623_v12, %s2422_s30  ;;  %v1254_v13 = vpop.permute.xlu1 %1253  ;;  %v1511_v55 = vsel %vm1510_vm5, %v1478_v41, %v932_v62  ;;  %v4631_v12 = vld [vmem:[#allocation39_spill] sm:$0xff] }
 0x171   : > { %v1544_v29 = vsel %vm1543_vm6, %v1511_v55, %v1028_v47  ;;  %v1413_v47 = vsel %vm1411_vm2, %v4634_v46, %v4633_v19  ;;  %v4637_v55 = vld [vmem:[#allocation50_spill] sm:$0xff] }
 0x172   : > { %v1222_v10 = vpop.permute.xlu0 %1221  ;;  %1265 = vrot.lane.b32.xlu1 %v4631_v12, %s2425_s22  ;;  %v1577_v51 = vsel %vm1576_vm7, %v1544_v29, %v1124_v38  ;;  %v4636_v38 = vld [vmem:[#allocation83_spill] sm:$0xff]  ;;  %v4641_v19 = vld [vmem:[#allocation6_spill] sm:$0xff] }
 0x173   : > { %v1610_v62 = vsel %vm1609_vm8, %v1577_v51, %v1220_v63  ;;  %v1446_v60 = vsel %vm1444_vm3, %v1413_v47, %v4636_v38  ;;  %v4638_v63 = vld [vmem:[#allocation91_spill] sm:$0xff] }
 0x174   : > { %1233 = vrot.lane.b32.xlu0 %v4632_v22, %s2425_s22  ;;  %v1348_v41 = vpop.permute.xlu1 %1347  ;;  %v1479_v48 = vsel %vm1477_vm4, %v1446_v60, %v4638_v63  ;;  %v4642_v63 = vld [vmem:[#allocation61_spill] sm:$0xff] }
 0x175   : > { %v1659_v6 = vsel %vm1642_vm9, %v1626_v59, %v1348_v41  ;;  %v1512_v2 = vsel %vm1510_vm5, %v1479_v48, %v3625_v17  ;;  %v4639_v41 = vld [vmem:[#allocation71_spill] sm:$0xff] }
 0x176   : > { %v1316_v5 = vpop.permute.xlu0 %1315  ;;  %1359 = vrot.lane.b32.xlu1 %v4635_v40, %s2426_s8  ;;  %2344 = vmatprep.mubr.msk.f32.mxu1 %vm1684_vm10, %v1659_v6  ;;  %v1545_v59 = vsel %vm1543_vm6, %v1512_v2, %v1030_v33 }
 0x177   : > { %v1643_v16 = vsel %vm1642_vm9, %v1610_v62, %v1316_v5  ;;  %v4640_v62 = vld [vmem:[#allocation15_spill] sm:$0xff]  ;;  %v1578_v6 = vsel %vm1576_vm7, %v1545_v59, %v1126_v34 }
 0x178   : > { %1327 = vrot.lane.b32.xlu0 %v4637_v55, %s2426_s8  ;;  %2320 = vmatprep.mubr.msk.f32.mxu0 %vm1684_vm10, %v1643_v16  ;;  %v1032_v29 = vpop.permute.xlu1 %1031  ;;  %v1429_v5 = vsel %vm1411_vm2, %v4640_v62, %v4639_v41  ;;  %v1611_v17 = vsel %vm1609_vm8, %v1578_v6, %v1222_v10  ;;  %v4645_v6 = vld [vmem:[#allocation22_spill] sm:$0xff] }
 0x179   : > { %v1462_v46 = vsel %vm1444_vm3, %v1429_v5, %v4641_v19  ;;  %v4644_v5 = vld [vmem:[#allocation74_spill] sm:$0xff] }
 0x17a   : > { %v3718_v51 = vpop.permute.xlu0 %969  ;;  %981 = vrot.lane.b32.xlu1 %v4631_v12, %s2422_s30  ;;  %v1495_v33 = vsel %vm1477_vm4, %v1462_v46, %v3489_v24  ;;  %v1430_v19 = vsel %vm1411_vm2, %v4645_v6, %v4644_v5  ;;  %v4647_v46 = vld [vmem:[#allocation62_spill] sm:$0xff] }
 0x17b   : > { %v1528_v38 = vsel %vm1510_vm5, %v1495_v33, %v3645_v8  ;;  %v4650_v33 = vld [vmem:[#allocation17_spill] sm:$0xff] }
 0x17c   : > { %949 = vrot.lane.b32.xlu0 %v4632_v22, %s2422_s30  ;;  %v1318_v47 = vpop.permute.xlu1 %1317  ;;  %v1561_v34 = vsel %vm1543_vm6, %v1528_v38, %v3655_v61 }
 0x17d   : > { %v1644_v12 = vsel %vm1642_vm9, %v1611_v17, %v1318_v47  ;;  %v1594_v10 = vsel %vm1576_vm7, %v1561_v34, %v1158_v52  ;;  %v4649_v47 = vld [vmem:[#allocation10_spill] sm:$0xff] }
 0x17e   : > { %v1064_v16 = vpop.permute.xlu0 %1063  ;;  %1075 = vrot.lane.b32.xlu1 %v4635_v40, %s2423_s6  ;;  %2321 = vmatmul.mubr.msk.f32.vlgmr.msra.gmra.mrb[0].mxu0 %vm1684_vm10, %v1644_v12  ;;  %v1627_v22 = vsel %vm1609_vm8, %v1594_v10, %v1254_v13  ;;  %v4643_v40 = vld [vmem:[#allocation49_spill] sm:$0xff]  ;;  %v4652_v10 = vld [vmem:[#allocation94_spill] sm:$0xff] }
 0x180   : > { %1043 = vrot.lane.b32.xlu0 %v4637_v55, %s2423_s6  ;;  %v3745_v24 = vpop.permute.xlu1 %1033 }
 0x182   : > { %v1350_v60 = vpop.permute.xlu0 %1349  ;;  %1361 = vrot.lane.b32.xlu1 %v4642_v63, %s2426_s8 }
 0x183   : > { %v1660_v8 = vsel %vm1642_vm9, %v1627_v22, %v1350_v60 }
 0x184   : > { %1329 = vrot.lane.b32.xlu0 %v4643_v40, %s2426_s8  ;;  %2345 = vmatmul.mubr.msk.f32.vlgmr.msra.gmra.mrb[0].mxu1 %vm1684_vm10, %v1660_v8  ;;  %v1128_v61 = vpop.permute.xlu1 %1127 }
 0x186   : > { %v1066_v48 = vpop.permute.xlu0 %1065  ;;  %1077 = vrot.lane.b32.xlu1 %v4642_v63, %s2423_s6 }
 0x188   : > { %1045 = vrot.lane.b32.xlu0 %v4643_v40, %s2423_s6  ;;  %v1130_v13 = vpop.permute.xlu1 %1129 }
 0x18a   : > { %v1160_v52 = vpop.permute.xlu0 %1159  ;;  %1171 = vrot.lane.b32.xlu1 %v4608_v35, %s2424_s11  ;;  %v4646_v35 = vld [vmem:[#allocation44_spill] sm:$0xff] }
 0x18c   : > { %1139 = vrot.lane.b32.xlu0 %v2619_v37, %s2424_s11  ;;  %v1224_v55 = vpop.permute.xlu1 %1223  ;;  %v4648_v37 = vld [vmem:[#allocation2_spill] sm:$0xff] }
 0x18d   : > { %v1414_v17 = vsel %vm1411_vm2, %v4648_v37, %v4647_v46 }
 0x18e   : > { %v1162_v2 = vpop.permute.xlu0 %1161  ;;  %1173 = vrot.lane.b32.xlu1 %v4605_v23, %s2424_s11  ;;  %v1463_v23 = vsel %vm1444_vm3, %v1430_v19, %v4649_v47 }
 0x18f   : > { %v1496_v38 = vsel %vm1477_vm4, %v1463_v23, %v3499_v14  ;;  %v4657_v23 = vld [vmem:[#allocation67_spill] sm:$0xff] }
 0x190   : > { %1141 = vrot.lane.b32.xlu0 %v2603_v25, %s2424_s11  ;;  %v3766_v59 = vpop.permute.xlu1 %971  ;;  %v4651_v25 = vld [vmem:[#allocation86_spill] sm:$0xff]  ;;  %v1529_v60 = vsel %vm1510_vm5, %v1496_v38, %v3669_v39  ;;  %v4660_v38 = vld [vmem:[#allocation8_spill] sm:$0xff] }
 0x191   : > { %v1447_v12 = vsel %vm1444_vm3, %v1414_v17, %v4651_v25  ;;  %v1562_v40 = vsel %vm1543_vm6, %v1529_v60, %v1064_v16  ;;  %v4659_v25 = vld [vmem:[#allocation3_spill] sm:$0xff]  ;;  %v4662_v60 = vld [vmem:[#allocation85_spill] sm:$0xff] }
 0x192   : > { %v1256_v41 = vpop.permute.xlu0 %1255  ;;  %1267 = vrot.lane.b32.xlu1 %v4646_v35, %s2425_s22  ;;  %v1480_v22 = vsel %vm1477_vm4, %v1447_v12, %v4652_v10  ;;  %v1595_v14 = vsel %vm1576_vm7, %v1562_v40, %v1160_v52 }
 0x193   : > { %v1513_v63 = vsel %vm1510_vm5, %v1480_v22, %v3633_v54  ;;  %v1628_v39 = vsel %vm1609_vm8, %v1595_v14, %v1256_v41  ;;  %v4656_v41 = vld [vmem:[#allocation20_spill] sm:$0xff]  ;;  %v4663_v14 = vld [vmem:[#allocation93_spill] sm:$0xff] }
 0x194   : > { %1235 = vrot.lane.b32.xlu0 %v4650_v33, %s2425_s22  ;;  %v1258_v34 = vpop.permute.xlu1 %1257  ;;  %v1546_v5 = vsel %vm1543_vm6, %v1513_v63, %v1032_v29  ;;  %v4654_v29 = vld [vmem:[#allocation16_spill] sm:$0xff] }
 0x195   : > { %v1579_v19 = vsel %vm1576_vm7, %v1546_v5, %v1128_v61  ;;  %v4661_v22 = vld [vmem:[#allocation52_spill] sm:$0xff] }
 0x196   : > { %v1226_v8 = vpop.permute.xlu0 %1225  ;;  %983 = vrot.lane.b32.xlu1 %v4646_v35, %s2422_s30  ;;  %v1612_v37 = vsel %vm1609_vm8, %v1579_v19, %v1224_v55  ;;  %v4653_v35 = vld [vmem:[#allocation43_spill] sm:$0xff]  ;;  %v4655_v55 = vld [vmem:[#allocation73_spill] sm:$0xff] }
 0x197   : > { %v1431_v47 = vsel %vm1411_vm2, %v4656_v41, %v4655_v55 }
 0x198   : > { %951 = vrot.lane.b32.xlu0 %v4650_v33, %s2422_s30  ;;  %v1352_v46 = vpop.permute.xlu1 %1351  ;;  %v4658_v33 = vld [vmem:[#allocation66_spill] sm:$0xff]  ;;  %v1464_v10 = vsel %vm1444_vm3, %v1431_v47, %v4660_v38 }
 0x199   : > { %v1661_v54 = vsel %vm1642_vm9, %v1628_v39, %v1352_v46  ;;  %v1415_v12 = vsel %vm1411_vm2, %v4659_v25, %v4658_v33  ;;  %v1497_v40 = vsel %vm1477_vm4, %v1464_v10, %v3497_v30 }
 0x19a   : > { %v1320_v16 = vpop.permute.xlu0 %1319  ;;  %1269 = vrot.lane.b32.xlu1 %v4653_v35, %s2425_s22  ;;  %2347 = vmatprep.mubr.msk.f32.mxu1 %vm1684_vm10, %v1661_v54  ;;  %v1448_v63 = vsel %vm1444_vm3, %v1415_v12, %v4662_v60  ;;  %v1530_v39 = vsel %vm1510_vm5, %v1497_v40, %v3718_v51 }
 0x19b   : > { %v1645_v17 = vsel %vm1642_vm9, %v1612_v37, %v1320_v16  ;;  %v1481_v19 = vsel %vm1477_vm4, %v1448_v63, %v4663_v14  ;;  %v1563_v54 = vsel %vm1543_vm6, %v1530_v39, %v1066_v48 }
 0x19c   : > { %1237 = vrot.lane.b32.xlu0 %v4654_v29, %s2425_s22  ;;  %2323 = vmatprep.mubr.msk.f32.mxu0 %vm1684_vm10, %v1645_v17  ;;  %v3808_v61 = vpop.permute.xlu1 %973  ;;  %v1514_v37 = vsel %vm1510_vm5, %v1481_v19, %v3631_v4  ;;  %v1596_v30 = vsel %vm1576_vm7, %v1563_v54, %v1162_v2  ;;  %v4664_v2 = vld [vmem:[#allocation65_spill] sm:$0xff] }
 0x19d   : > { %v1547_v16 = vsel %vm1543_vm6, %v1514_v37, %v3745_v24  ;;  %v1629_v51 = vsel %vm1609_vm8, %v1596_v30, %v1258_v34  ;;  %v4665_v34 = vld [vmem:[#allocation51_spill] sm:$0xff]  ;;  %v4668_v37 = vld [vmem:[#allocation45_spill] sm:$0xff]  ;;  %v4670_v30 = vld [vmem:[#allocation70_spill] sm:$0xff] }
 0x19e   : > { %v3810_v52 = vpop.permute.xlu0 %941  ;;  %1363 = vrot.lane.b32.xlu1 %v4657_v23, %s2426_s8  ;;  %v1580_v17 = vsel %vm1576_vm7, %v1547_v16, %v1130_v13 }
 0x19f   : > { %v1613_v4 = vsel %vm1609_vm8, %v1580_v17, %v1226_v8  ;;  %v4671_v17 = vld [vmem:[#allocation54_spill] sm:$0xff] }
 0x1a0   : > { %1331 = vrot.lane.b32.xlu0 %v4661_v22, %s2426_s8  ;;  %v1068_v5 = vpop.permute.xlu1 %1067 }
 0x1a2   : > { %v1036_v46 = vpop.permute.xlu0 %1035  ;;  %985 = vrot.lane.b32.xlu1 %v4653_v35, %s2422_s30 }
 0x1a4   : > { %953 = vrot.lane.b32.xlu0 %v4654_v29, %s2422_s30  ;;  %v1354_v55 = vpop.permute.xlu1 %1353 }
 0x1a5   : > { %v1662_v48 = vsel %vm1642_vm9, %v1629_v51, %v1354_v55  ;;  %v1532_v55 = vsel %vm1510_vm5, %v3516_v36, %v3808_v61 }
 0x1a6   : > { %v1322_v47 = vpop.permute.xlu0 %1321  ;;  %1079 = vrot.lane.b32.xlu1 %v4657_v23, %s2423_s6  ;;  %2348 = vmatmul.mubr.msk.f32.gmra.mrb[2].mxu1 %vm1684_vm10, %v1662_v48  ;;  %v1516_v48 = vsel %vm1510_vm5, %v3380_v18, %v3810_v52 }
 0x1a7   : > { %v1646_v35 = vsel %vm1642_vm9, %v1613_v4, %v1322_v47 }
 0x1a8   : > { %1047 = vrot.lane.b32.xlu0 %v4661_v22, %s2423_s6  ;;  %2324 = vmatmul.mubr.msk.f32.gmra.mrb[2].mxu0 %vm1684_vm10, %v1646_v35  ;;  %v1070_v24 = vpop.permute.xlu1 %1069  ;;  %v4666_v22 = vld [vmem:[#allocation46_spill] sm:$0xff] }
 0x1a9   : > { %v1565_v47 = vsel %vm1543_vm6, %v1532_v55, %v1070_v24 }
 0x1aa   : > { %v1038_v13 = vpop.permute.xlu0 %1037  ;;  %1365 = vrot.lane.b32.xlu1 %v4664_v2, %s2426_s8 }
 0x1ab   : > { %v1549_v35 = vsel %vm1543_vm6, %v1516_v48, %v1038_v13 }
 0x1ac   : > { %1333 = vrot.lane.b32.xlu0 %v4665_v34, %s2426_s8  ;;  %v1164_v8 = vpop.permute.xlu1 %1163 }
 0x1ae   : > { %v1132_v29 = vpop.permute.xlu0 %1131  ;;  %1081 = vrot.lane.b32.xlu1 %v4664_v2, %s2423_s6 }
 0x1b0   : > { %1049 = vrot.lane.b32.xlu0 %v4665_v34, %s2423_s6  ;;  %v1166_v23 = vpop.permute.xlu1 %1165 }
 0x1b1   : > { %v1598_v2 = vsel %vm1576_vm7, %v1565_v47, %v1166_v23  ;;  %v4672_v23 = vld [vmem:[#allocation69_spill] sm:$0xff] }
 0x1b2   : > { %v1134_v33 = vpop.permute.xlu0 %1133  ;;  %1175 = vrot.lane.b32.xlu1 %v4613_v20, %s2424_s11  ;;  %v4667_v20 = vld [vmem:[#allocation21_spill] sm:$0xff] }
 0x1b3   : > { %v1582_v34 = vsel %vm1576_vm7, %v1549_v35, %v1134_v33  ;;  %v4673_v33 = vld [vmem:[#allocation53_spill] sm:$0xff] }
 0x1b4   : > { %1143 = vrot.lane.b32.xlu0 %v2645_v58, %s2424_s11  ;;  %v1260_v25 = vpop.permute.xlu1 %1259  ;;  %v1531_v58 = vsel %vm1510_vm5, %v3519_v0, %v3766_v59 }
 0x1b6   : > { %v1228_v12 = vpop.permute.xlu0 %1227  ;;  %1177 = vrot.lane.b32.xlu1 %v4611_v27, %s2424_s11  ;;  %v1564_v27 = vsel %vm1543_vm6, %v1531_v58, %v1068_v5 }
 0x1b7   : > { %v1597_v14 = vsel %vm1576_vm7, %v1564_v27, %v1164_v8  ;;  %v295_v27 = vld [vmem:[%s2471_s23 + $0x190] sm:$0x3] }
 0x1b8   : > { %1145 = vrot.lane.b32.xlu0 %v2635_v49, %s2424_s11  ;;  %v3869_v38 = vpop.permute.xlu1 %975  ;;  %v1515_v49 = vsel %vm1510_vm5, %v3383_v15, %v3639_v21  ;;  %v1630_v0 = vsel %vm1609_vm8, %v1597_v14, %v1260_v25 }
 0x1b9   : > { %v1548_v40 = vsel %vm1543_vm6, %v1515_v49, %v1036_v46  ;;  %v4669_v46 = vld [vmem:[#allocation19_spill] sm:$0xff] }
 0x1ba   : > { %v3871_v10 = vpop.permute.xlu0 %943  ;;  %1271 = vrot.lane.b32.xlu1 %v4666_v22, %s2425_s22  ;;  %v1581_v19 = vsel %vm1576_vm7, %v1548_v40, %v1132_v29  ;;  %v349_v40 = vld [vmem:[%s2476_s26 + $0x190] sm:$0x3] }
 0x1bb   : > { %v1614_v39 = vsel %vm1609_vm8, %v1581_v19, %v1228_v12 }
 0x1bc   : > { %1239 = vrot.lane.b32.xlu0 %v4667_v20, %s2425_s22  ;;  %v1262_v60 = vpop.permute.xlu1 %1261 }
 0x1bd   : > { %v1631_v36 = vsel %vm1609_vm8, %v1598_v2, %v1262_v60  ;;  %v4674_v60 = vld [vmem:[#allocation88_spill] sm:$0xff] }
 0x1be   : > { %v1230_v63 = vpop.permute.xlu0 %1229  ;;  %987 = vrot.lane.b32.xlu1 %v4666_v22, %s2422_s30  ;;  %v620_v58 = vrot.slane %v4674_v60, 1 }
 0x1bf   : > { %v1615_v8 = vsel %vm1609_vm8, %v1582_v34, %v1230_v63  ;;  %v4675_v63 = vld [vmem:[#allocation87_spill] sm:$0xff] }
 0x1c0   : > { %955 = vrot.lane.b32.xlu0 %v4667_v20, %s2422_s30  ;;  %v1356_v59 = vpop.permute.xlu1 %1355  ;;  %v621_v49 = vrot.slane %v4675_v63, 1  ;;  %v4677_v34 = vld [vmem:[#allocation23_spill] sm:$0xff] }
 0x1c1   : > { %v1663_v15 = vsel %vm1642_vm9, %v1630_v0, %v1356_v59  ;;  %v403_v0 = vmul.f32 %v349_v40, %v295_v27  ;;  %v4679_v27 = vld [vmem:[#allocation55_spill] sm:$0xff]  ;;  %v296_v40 = vld [vmem:[%s2471_s23 + $0x198] sm:$0xff] }
 0x1c2   : > { %v1324_v21 = vpop.permute.xlu0 %1323  ;;  %1273 = vrot.lane.b32.xlu1 %v4668_v37, %s2425_s22  ;;  %2350 = vmatprep.mubr.msk.f32.mxu1 %vm1684_vm10, %v1663_v15  ;;  %v622_v59 = vsel %vm455_vm0, %v620_v58, %v621_v49 }
 0x1c3   : > { %v1647_v5 = vsel %vm1642_vm9, %v1614_v39, %v1324_v21  ;;  %v623_v15 = vrot.slane %v403_v0, 1  ;;  %v4676_v21 = vld [vmem:[#allocation24_spill] sm:$0xff]  ;;  %v628_v58 = vrot.slane %v403_v0, 2  ;;  %v297_v0 = vld [vmem:[%s2471_s23 + $0x1a0] sm:$0xff] }
 0x1c4   : > { %1241 = vrot.lane.b32.xlu0 %v4669_v46, %s2425_s22  ;;  %2326 = vmatprep.mubr.msk.f32.mxu0 %vm1684_vm10, %v1647_v5  ;;  %v3901_v54 = vpop.permute.xlu1 %977 }
 0x1c6   : > { %v3903_v16 = vpop.permute.xlu0 %945  ;;  %1367 = vrot.lane.b32.xlu1 %v4670_v30, %s2426_s8 }
 0x1c8   : > { %1335 = vrot.lane.b32.xlu0 %v4671_v17, %s2426_s8  ;;  %v1072_v51 = vpop.permute.xlu1 %1071 }
 0x1ca   : > { %v1040_v4 = vpop.permute.xlu0 %1039  ;;  %989 = vrot.lane.b32.xlu1 %v4668_v37, %s2422_s30  ;;  %v1533_v37 = vsel %vm1510_vm5, %v3539_v57, %v3869_v38  ;;  %v625_v57 = vrot.slane %v4674_v60, 2  ;;  %v626_v38 = vrot.slane %v4675_v63, 2 }
 0x1cc   : > { %957 = vrot.lane.b32.xlu0 %v4669_v46, %s2422_s30  ;;  %v1358_v61 = vpop.permute.xlu1 %1357 }
 0x1cd   : > { %v1664_v18 = vsel %vm1642_vm9, %v1631_v36, %v1358_v61  ;;  %v627_v36 = vsel %vm536_vm1, %v625_v57, %v626_v38 }
 0x1ce   : > { %v1326_v52 = vpop.permute.xlu0 %1325  ;;  %1083 = vrot.lane.b32.xlu1 %v4670_v30, %s2423_s6  ;;  %2351 = vmatmul.mubr.msk.f32.gmra.mrb[4].mxu1 %vm1684_vm10, %v1664_v18  ;;  %v1566_v30 = vsel %vm1543_vm6, %v1533_v37, %v1072_v51  ;;  %v4678_v18 = vld [vmem:[#allocation56_spill] sm:$0xff] }
 0x1cf   : > { %v1648_v24 = vsel %vm1642_vm9, %v1615_v8, %v1326_v52 }
 0x1d0   : > { %1051 = vrot.lane.b32.xlu0 %v4671_v17, %s2423_s6  ;;  %2327 = vmatmul.mubr.msk.f32.gmra.mrb[4].mxu0 %vm1684_vm10, %v1648_v24  ;;  %v1074_v13 = vpop.permute.xlu1 %1073  ;;  %v624_v17 = vsel %vm455_vm0, %v621_v49, %v623_v15  ;;  %v1534_v24 = vsel %vm1510_vm5, %v3536_v43, %v3901_v54 }
 0x1d2   : > { %v1042_v29 = vpop.permute.xlu0 %1041  ;;  %1369 = vrot.lane.b32.xlu1 %v4672_v23, %s2426_s8 }
 0x1d4   : > { %1337 = vrot.lane.b32.xlu0 %v4673_v33, %s2426_s8  ;;  %v1168_v25 = vpop.permute.xlu1 %1167 }
 0x1d5   : > { %v1599_v48 = vsel %vm1576_vm7, %v1566_v30, %v1168_v25  ;;  %v1567_v25 = vsel %vm1543_vm6, %v1534_v24, %v1074_v13 }
 0x1d6   : > { %v1136_v12 = vpop.permute.xlu0 %1135  ;;  %1085 = vrot.lane.b32.xlu1 %v4672_v23, %s2423_s6 }
 0x1d8   : > { %1053 = vrot.lane.b32.xlu0 %v4673_v33, %s2423_s6  ;;  %v1170_v22 = vpop.permute.xlu1 %1169  ;;  %v1518_v33 = vsel %vm1510_vm5, %v3400_v9, %v3903_v16 }
 0x1da   : > { %v1138_v20 = vpop.permute.xlu0 %1137  ;;  %1179 = vrot.lane.b32.xlu1 %v4674_v60, %s2424_s11  ;;  %v1600_v60 = vsel %vm1576_vm7, %v1567_v25, %v1170_v22  ;;  %v629_v22 = vsel %vm536_vm1, %v626_v38, %v628_v58 }
 0x1dc   : > { %1147 = vrot.lane.b32.xlu0 %v4625_v45, %s2424_s11  ;;  %v1264_v14 = vpop.permute.xlu1 %1263 }
 0x1de   : > { %v1232_v19 = vpop.permute.xlu0 %1231  ;;  %1181 = vrot.lane.b32.xlu1 %v4675_v63, %s2424_s11 }
 0x1e0   : > { %1149 = vrot.lane.b32.xlu0 %v4640_v62, %s2424_s11  ;;  %v3954_v39 = vpop.permute.xlu1 %979  ;;  %v1517_v62 = vsel %vm1510_vm5, %v3403_v44, %v3871_v10  ;;  %v1632_v44 = vsel %vm1609_vm8, %v1599_v48, %v1264_v14  ;;  %v350_v14 = vld [vmem:[%s2476_s26 + $0x198] sm:$0xff] }
 0x1e1   : > { %v1550_v55 = vsel %vm1543_vm6, %v1517_v62, %v1040_v4  ;;  %v352_v62 = vld [vmem:[%s2476_s26 + $0x1a8] sm:$0x3] }
 0x1e2   : > { %v3956_v45 = vpop.permute.xlu0 %947  ;;  %1275 = vrot.lane.b32.xlu1 %v622_v59, %s2425_s22  ;;  %v1583_v47 = vsel %vm1576_vm7, %v1550_v55, %v1136_v12  ;;  %v1551_v12 = vsel %vm1543_vm6, %v1518_v33, %v1042_v29 }
 0x1e3   : > { %v1616_v51 = vsel %vm1609_vm8, %v1583_v47, %v1232_v19  ;;  %v1584_v43 = vsel %vm1576_vm7, %v1551_v12, %v1138_v20  ;;  %v4681_v12 = vld [vmem:[#allocation25_spill] sm:$0xff] }
 0x1e4   : > { %1243 = vrot.lane.b32.xlu0 %v4676_v21, %s2425_s22  ;;  %v1266_v5 = vpop.permute.xlu1 %1265 }
 0x1e5   : > { %v1633_v54 = vsel %vm1609_vm8, %v1600_v60, %v1266_v5 }
 0x1e6   : > { %v1234_v46 = vpop.permute.xlu0 %1233  ;;  %991 = vrot.lane.b32.xlu1 %v622_v59, %s2422_s30  ;;  %v351_v59 = vld [vmem:[%s2476_s26 + $0x1a0] sm:$0xff] }
 0x1e7   : > { %v1617_v9 = vsel %vm1609_vm8, %v1584_v43, %v1234_v46  ;;  %v405_v5 = vmul.f32 %v351_v59, %v297_v0  ;;  %v298_v46 = vld [vmem:[%s2471_s23 + $0x1a8] sm:$0x3] }
 0x1e8   : > { %959 = vrot.lane.b32.xlu0 %v4676_v21, %s2422_s30  ;;  %v1360_v10 = vpop.permute.xlu1 %1359  ;;  %v404_v21 = vmul.f32 %v350_v14, %v296_v40  ;;  %v406_v48 = vmul.f32 %v352_v62, %v298_v46 }
 0x1e9   : > { %v1665_v35 = vsel %vm1642_vm9, %v1632_v44, %v1360_v10  ;;  %v634_v55 = vrot.slane %v405_v5, 1 }
 0x1ea   : > { %v1328_v2 = vpop.permute.xlu0 %1327  ;;  %1277 = vrot.lane.b32.xlu1 %v624_v17, %s2425_s22  ;;  %2353 = vmatprep.mubr.msk.f32.mxu1 %vm1684_vm10, %v1665_v35  ;;  %v636_v44 = vrot.slane %v406_v48, 1 }
 0x1eb   : > { %v1649_v4 = vsel %vm1642_vm9, %v1616_v51, %v1328_v2  ;;  %v638_v2 = vrot.slane %v404_v21, 2 }
 0x1ec   : > { %1245 = vrot.lane.b32.xlu0 %v4677_v34, %s2425_s22  ;;  %2329 = vmatprep.mubr.msk.f32.mxu0 %vm1684_vm10, %v1649_v4  ;;  %v3987_v61 = vpop.permute.xlu1 %981  ;;  %v637_v35 = vsel %vm455_vm0, %v634_v55, %v636_v44  ;;  %v639_v4 = vrot.slane %v405_v5, 2 }
 0x1ee   : > { %v3989_v8 = vpop.permute.xlu0 %949  ;;  %1371 = vrot.lane.b32.xlu1 %v627_v36, %s2426_s8 }
 0x1ef   : > { %v1520_v40 = vsel %vm1510_vm5, %v3420_v42, %v3989_v8 }
 0x1f0   : > { %1339 = vrot.lane.b32.xlu0 %v4678_v18, %s2426_s8  ;;  %v3994_v52 = vpop.permute.xlu1 %1075 }
 0x1f2   : > { %v3999_v23 = vpop.permute.xlu0 %1043  ;;  %993 = vrot.lane.b32.xlu1 %v624_v17, %s2422_s30  ;;  %v633_v17 = vrot.slane %v404_v21, 1 }
 0x1f4   : > { %961 = vrot.lane.b32.xlu0 %v4677_v34, %s2422_s30  ;;  %v1362_v63 = vpop.permute.xlu1 %1361  ;;  %v635_v47 = vsel %vm455_vm0, %v633_v17, %v634_v55 }
 0x1f5   : > { %v1666_v16 = vsel %vm1642_vm9, %v1633_v54, %v1362_v63  ;;  %v4682_v54 = vld [vmem:[#allocation58_spill] sm:$0xff] }
 0x1f6   : > { %v1330_v13 = vpop.permute.xlu0 %1329  ;;  %1087 = vrot.lane.b32.xlu1 %v627_v36, %s2423_s6  ;;  %2354 = vmatmul.mubr.msk.f32.gmra.mrb[6].mxu1 %vm1684_vm10, %v1666_v16 }
 0x1f7   : > { %v1650_v29 = vsel %vm1642_vm9, %v1617_v9, %v1330_v13  ;;  %v4683_v13 = vld [vmem:[#allocation57_spill] sm:$0xff] }
 0x1f8   : > { %1055 = vrot.lane.b32.xlu0 %v4678_v18, %s2423_s6  ;;  %2330 = vmatmul.mubr.msk.f32.gmra.mrb[6].mxu0 %vm1684_vm10, %v1650_v29  ;;  %v4021_v20 = vpop.permute.xlu1 %1077  ;;  %v1519_v18 = vsel %vm1510_vm5, %v3423_v11, %v3956_v45 }
 0x1f9   : > { %v1552_v33 = vsel %vm1543_vm6, %v1519_v18, %v3999_v23 }
 0x1fa   : > { %v4023_v49 = vpop.permute.xlu0 %1045  ;;  %1373 = vrot.lane.b32.xlu1 %v629_v22, %s2426_s8 }
 0x1fc   : > { %1341 = vrot.lane.b32.xlu0 %v4679_v27, %s2426_s8  ;;  %v1172_v19 = vpop.permute.xlu1 %1171 }
 0x1fe   : > { %v1140_v15 = vpop.permute.xlu0 %1139  ;;  %1089 = vrot.lane.b32.xlu1 %v629_v22, %s2423_s6  ;;  %v1536_v22 = vsel %vm1510_vm5, %v3556_v31, %v3987_v61 }
 0x1ff   : > { %v1585_v60 = vsel %vm1576_vm7, %v1552_v33, %v1140_v15  ;;  %v1569_v14 = vsel %vm1543_vm6, %v1536_v22, %v4021_v20 }
 0x200   : > { %1057 = vrot.lane.b32.xlu0 %v4679_v27, %s2423_s6  ;;  %v1174_v37 = vpop.permute.xlu1 %1173 }
 0x201   : > { %v1602_v0 = vsel %vm1576_vm7, %v1569_v14, %v1174_v37 }
 0x202   : > { %v1142_v30 = vpop.permute.xlu0 %1141  ;;  %1183 = vrot.lane.b32.xlu1 %v404_v21, %s2424_s11 }
 0x204   : > { %1151 = vrot.lane.b32.xlu0 %v4645_v6, %s2424_s11  ;;  %v1268_v57 = vpop.permute.xlu1 %1267  ;;  %v4680_v6 = vld [vmem:[#allocation26_spill] sm:$0xff] }
 0x206   : > { %v1236_v38 = vpop.permute.xlu0 %1235  ;;  %1185 = vrot.lane.b32.xlu1 %v405_v5, %s2424_s11 }
 0x208   : > { %1153 = vrot.lane.b32.xlu0 %v4656_v41, %s2424_s11  ;;  %v984_v10 = vpop.permute.xlu1 %983  ;;  %v1535_v41 = vsel %vm1510_vm5, %v3559_v7, %v3954_v39  ;;  %v640_v7 = vsel %vm536_vm1, %v638_v2, %v639_v4  ;;  %v641_v39 = vrot.slane %v406_v48, 2 }
 0x209   : > { %v1568_v24 = vsel %vm1543_vm6, %v1535_v41, %v3994_v52  ;;  %v1618_v52 = vsel %vm1609_vm8, %v1585_v60, %v1236_v38  ;;  %v1537_v38 = vsel %vm1510_vm5, %v3579_v26, %v984_v10 }
 0x20a   : > { %v4044_v51 = vpop.permute.xlu0 %951  ;;  %1279 = vrot.lane.b32.xlu1 %v635_v47, %s2425_s22  ;;  %v1601_v25 = vsel %vm1576_vm7, %v1568_v24, %v1172_v19  ;;  %v642_v63 = vsel %vm536_vm1, %v639_v4, %v641_v39  ;;  %v1553_v19 = vsel %vm1543_vm6, %v1520_v40, %v4023_v49 }
 0x20b   : > { %v1634_v11 = vsel %vm1609_vm8, %v1601_v25, %v1268_v57  ;;  %v1586_v59 = vsel %vm1576_vm7, %v1553_v19, %v1142_v30  ;;  %v1521_v44 = vsel %vm1510_vm5, %v3443_v56, %v4044_v51 }
 0x20c   : > { %1247 = vrot.lane.b32.xlu0 %v4680_v6, %s2425_s22  ;;  %v1270_v34 = vpop.permute.xlu1 %1269 }
 0x20d   : > { %v1635_v15 = vsel %vm1609_vm8, %v1602_v0, %v1270_v34 }
 0x20e   : > { %v1238_v36 = vpop.permute.xlu0 %1237  ;;  %1281 = vrot.lane.b32.xlu1 %v637_v35, %s2425_s22 }
 0x20f   : > { %v1619_v31 = vsel %vm1609_vm8, %v1586_v59, %v1238_v36 }
 0x210   : > { %1249 = vrot.lane.b32.xlu0 %v4681_v12, %s2425_s22  ;;  %v1364_v45 = vpop.permute.xlu1 %1363 }
 0x211   : > { %v1667_v58 = vsel %vm1642_vm9, %v1634_v11, %v1364_v45 }
 0x212   : > { %v1332_v43 = vpop.permute.xlu0 %1331  ;;  %1375 = vrot.lane.b32.xlu1 %v640_v7, %s2426_s8  ;;  %2356 = vmatprep.mubr.msk.f32.mxu1 %vm1684_vm10, %v1667_v58 }
 0x213   : > { %v1651_v23 = vsel %vm1642_vm9, %v1618_v52, %v1332_v43 }
 0x214   : > { %1343 = vrot.lane.b32.xlu0 %v4682_v54, %s2426_s8  ;;  %2332 = vmatprep.mubr.msk.f32.mxu0 %vm1684_vm10, %v1651_v23  ;;  %v986_v9 = vpop.permute.xlu1 %985 }
 0x215   : > { %v1538_v33 = vsel %vm1510_vm5, %v3576_v53, %v986_v9 }
 0x216   : > { %v954_v16 = vpop.permute.xlu0 %953  ;;  %1377 = vrot.lane.b32.xlu1 %v642_v63, %s2426_s8 }
 0x217   : > { %v1522_v12 = vsel %vm1510_vm5, %v3440_v32, %v954_v16  ;;  %v4137_v16 = vld [vmem:[%s4350_s3] ss:$0 sm:$0xff] }
 0x218   : > { %1345 = vrot.lane.b32.xlu0 %v4683_v13, %s2426_s8  ;;  %v1080_v29 = vpop.permute.xlu1 %1079 }
 0x219   : > { %v1570_v6 = vsel %vm1543_vm6, %v1537_v38, %v1080_v29 }
 0x21a   : > { %v1048_v27 = vpop.permute.xlu0 %1047 }
 0x21b   : > { %v1554_v35 = vsel %vm1543_vm6, %v1521_v44, %v1048_v27  ;;  %v4142_v27 = vld [vmem:[%s4351_s4] ss:$0 sm:$0xff] }
 0x21c   : > { %v1366_v21 = vpop.permute.xlu1 %1365 }
 0x21d   : > { %v1668_v61 = vsel %vm1642_vm9, %v1635_v15, %v1366_v21 }
 0x21e   : > { %v1334_v5 = vpop.permute.xlu0 %1333  ;;  %2357 = vmatmul.mubr.msk.f32.gmra.mrb[8].mxu1 %vm1684_vm10, %v1668_v61 }
 0x21f   : > { %v1652_v42 = vsel %vm1642_vm9, %v1619_v31, %v1334_v5 }
 0x220   : > { %2333 = vmatmul.mubr.msk.f32.gmra.mrb[8].mxu0 %vm1684_vm10, %v1652_v42  ;;  %v1082_v8 = vpop.permute.xlu1 %1081 }
 0x221   : > { %v1571_v7 = vsel %vm1543_vm6, %v1538_v33, %v1082_v8 }
 0x222   : > { %v1050_v20 = vpop.permute.xlu0 %1049 }
 0x223   : > { %v1555_v39 = vsel %vm1543_vm6, %v1522_v12, %v1050_v20 }
 0x224   : > { %v1176_v49 = vpop.permute.xlu1 %1175 }
 0x225   : > { %v1603_v2 = vsel %vm1576_vm7, %v1570_v6, %v1176_v49 }
 0x226   : > { %v1144_v37 = vpop.permute.xlu0 %1143 }
 0x227   : > { %v1587_v4 = vsel %vm1576_vm7, %v1554_v35, %v1144_v37 }
 0x228   : > { %v1178_v46 = vpop.permute.xlu1 %1177 }
 0x229   : > { %v1604_v60 = vsel %vm1576_vm7, %v1571_v7, %v1178_v46 }
 0x22a   : > { %v1146_v62 = vpop.permute.xlu0 %1145 }
 0x22b   : > { %v1588_v11 = vsel %vm1576_vm7, %v1555_v39, %v1146_v62 }
 0x22c   : > { %v1272_v30 = vpop.permute.xlu1 %1271 }
 0x22d   : > { %v1636_v34 = vsel %vm1609_vm8, %v1603_v2, %v1272_v30 }
 0x22e   : > { %v1240_v17 = vpop.permute.xlu0 %1239 }
 0x22f   : > { %v1620_v36 = vsel %vm1609_vm8, %v1587_v4, %v1240_v17 }
 0x230   : > { %v4097_v55 = vpop.permute.xlu1 %987 }
 0x231   : > { %v1539_v38 = vsel %vm1510_vm5, %v3599_v28, %v4097_v55 }
 0x232   : > { %v4099_v48 = vpop.permute.xlu0 %955 }
 0x233   : > { %v1523_v44 = vsel %vm1510_vm5, %v3463_v1, %v4099_v48 }
 0x234   : > { %v1274_v57 = vpop.permute.xlu1 %1273 }
 0x235   : > { %v1637_v45 = vsel %vm1609_vm8, %v1604_v60, %v1274_v57 }
 0x236   : > { %v1242_v47 = vpop.permute.xlu0 %1241 }
 0x237   : > { %v1621_v58 = vsel %vm1609_vm8, %v1588_v11, %v1242_v47 }
 0x238   : > { %v1368_v41 = vpop.permute.xlu1 %1367 }
 0x239   : > { %v1669_v26 = vsel %vm1642_vm9, %v1636_v34, %v1368_v41 }
 0x23a   : > { %v1336_v10 = vpop.permute.xlu0 %1335  ;;  %2359 = vmatprep.mubr.msk.f32.mxu1 %vm1684_vm10, %v1669_v26 }
 0x23b   : > { %v1653_v18 = vsel %vm1642_vm9, %v1620_v36, %v1336_v10 }
 0x23c   : > { %2335 = vmatprep.mubr.msk.f32.mxu0 %vm1684_vm10, %v1653_v18  ;;  %v4116_v56 = vpop.permute.xlu1 %989 }
 0x23d   : > { %v1540_v18 = vsel %vm1510_vm5, %v3596_v3, %v4116_v56 }
 0x23e   : > { %v4118_v51 = vpop.permute.xlu0 %957 }
 0x23f   : > { %v1524_v33 = vsel %vm1510_vm5, %v3460_v50, %v4118_v51 }
 0x240   : > { %v1084_v24 = vpop.permute.xlu1 %1083 }
 0x241   : > { %v1572_v6 = vsel %vm1543_vm6, %v1539_v38, %v1084_v24 }
 0x242   : > { %v1052_v25 = vpop.permute.xlu0 %1051 }
 0x243   : > { %v1556_v35 = vsel %vm1543_vm6, %v1523_v44, %v1052_v25 }
 0x244   : > { %v1370_v52 = vpop.permute.xlu1 %1369 }
 0x245   : > { %v1670_v53 = vsel %vm1642_vm9, %v1637_v45, %v1370_v52 }
 0x246   : > { %v1338_v43 = vpop.permute.xlu0 %1337  ;;  %2360 = vmatmul.mubr.msk.f32.gmra.mrb[10].mxu1 %vm1684_vm10, %v1670_v53 }
 0x247   : > { %v1654_v23 = vsel %vm1642_vm9, %v1621_v58, %v1338_v43 }
 0x248   : > { %2336 = vmatmul.mubr.msk.f32.gmra.mrb[10].mxu0 %vm1684_vm10, %v1654_v23  ;;  %v1086_v32 = vpop.permute.xlu1 %1085 }
 0x249   : > { %v1573_v25 = vsel %vm1543_vm6, %v1540_v18, %v1086_v32 }
 0x24a   : > { %v1054_v54 = vpop.permute.xlu0 %1053 }
 0x24b   : > { %v1557_v12 = vsel %vm1543_vm6, %v1524_v33, %v1054_v54 }
 0x24c   : > { %v1180_v63 = vpop.permute.xlu1 %1179 }
 0x24d   : > { %v1605_v2 = vsel %vm1576_vm7, %v1572_v6, %v1180_v63 }
 0x24e   : > { %v1148_v9 = vpop.permute.xlu0 %1147 }
 0x24f   : > { %v1589_v4 = vsel %vm1576_vm7, %v1556_v35, %v1148_v9  ;;  %v4686_v35 = vld [vmem:[#allocation9_spill] sm:$0xff] }
 0x250   : > { %v1182_v13 = vpop.permute.xlu1 %1181 }
 0x251   : > { %v2322_v22 = vpop.f32.mrb[0].mxu0  ;;  %v1606_v7 = vsel %vm1576_vm7, %v1573_v25, %v1182_v13 }
 0x252   : > { %v1150_v29 = vpop.permute.xlu0 %1149  ;;  %v2014_v40 = vmul.f32 %v2322_v22, %v4137_v16  ;;  %v1847_v14 = vpop.f32.mrb[1].mxu0 }
 0x253   : > { %v2013_v19 = vmul.f32 %v4137_v16, %v1847_v14  ;;  %v1590_v39 = vsel %vm1576_vm7, %v1557_v12, %v1150_v29 }
 0x254   : > { %v2053_v0 = vadd.f32 %v4142_v27, %v2014_v40  ;;  %v1276_v59 = vpop.permute.xlu1 %1275 }
 0x255   : > { %v2052_v15 = vadd.f32 %v4142_v27, %v2013_v19  ;;  %v1638_v34 = vsel %vm1609_vm8, %v1605_v2, %v1276_v59 }
 0x256   : > { %v1244_v21 = vpop.permute.xlu0 %1243  ;;  %v2085_v31 = vmax.f32 %v2053_v0, 0.0 }
 0x257   : > { %v2346_v61 = vpop.f32.mrb[0].mxu1  ;;  %v2084_v5 = vmax.f32 %v2052_v15, 0.0  ;;  %v1622_v55 = vsel %vm1609_vm8, %v1589_v4, %v1244_v21 }
 0x258   : > { %v2030_v42 = vmul.f32 %v2346_v61, %v4137_v16  ;;  %v1927_v8 = vpop.f32.mrb[1].mxu1  ;;  %2117 = vst.msk [vmem:[%s4151_s12 + $0x8] sm:$0xff] %vm1411_vm2, %v2085_v31  ;;  %v4158_v49 = vpop.permute.xlu1 %991 }
 0x259   : > { %v2029_v20 = vmul.f32 %v4137_v16, %v1927_v8  ;;  %2116 = vst.msk [vmem:[%s4151_s12] sm:$0xff] %vm1411_vm2, %v2084_v5 }
 0x25a   : > { %v2069_v37 = vadd.f32 %v4142_v27, %v2030_v42  ;;  %v4163_v46 = vpop.permute.xlu0 %959 }
 0x25b   : > { %v2068_v62 = vadd.f32 %v4142_v27, %v2029_v20  ;;  %v4684_v20 = vld [vmem:[#allocation89_spill] sm:$0xff] }
 0x25c   : > { %v2101_v30 = vmax.f32 %v2069_v37, 0.0  ;;  %v1278_v57 = vpop.permute.xlu1 %1277  ;;  %v1541_v37 = vsel %vm1510_vm5, %v4684_v20, %v4158_v49 }
 0x25d   : > { %v2100_v17 = vmax.f32 %v2068_v62, 0.0  ;;  %v1639_v60 = vsel %vm1609_vm8, %v1606_v7, %v1278_v57 }
 0x25e   : > { %2133 = vst.msk [vmem:[%s4151_s12 + $0x88] sm:$0xff] %vm1411_vm2, %v2101_v30  ;;  %v1246_v47 = vpop.permute.xlu0 %1245  ;;  %v4685_v30 = vld [vmem:[#allocation31_spill] sm:$0xff] }
 0x25f   : > { %2132 = vst.msk [vmem:[%s4151_s12 + $0x80] sm:$0xff] %vm1411_vm2, %v2100_v17  ;;  %v1623_v45 = vsel %vm1609_vm8, %v1590_v39, %v1246_v47  ;;  %v1525_v17 = vsel %vm1510_vm5, %v4685_v30, %v4163_v46 }
 0x260   : > { %v1372_v28 = vpop.permute.xlu1 %1371 }
 0x261   : > { %v1671_v41 = vsel %vm1642_vm9, %v1638_v34, %v1372_v28  ;;  %v4687_v28 = vld [vmem:[#allocation33_spill] sm:$0xff] }
 0x262   : > { %v1340_v36 = vpop.permute.xlu0 %1339  ;;  %2362 = vmatprep.mubr.msk.f32.mxu1 %vm1684_vm10, %v1671_v41 }
 0x263   : > { %v1655_v1 = vsel %vm1642_vm9, %v1622_v55, %v1340_v36 }
 0x264   : > { %2338 = vmatprep.mubr.msk.f32.mxu0 %vm1684_vm10, %v1655_v1  ;;  %v994_v48 = vpop.permute.xlu1 %993 }
 0x265   : > { %v1542_v2 = vsel %vm1510_vm5, %v4686_v35, %v994_v48 }
 0x266   : > { %v962_v26 = vpop.permute.xlu0 %961 }
 0x267   : > { %v1526_v55 = vsel %vm1510_vm5, %v4687_v28, %v962_v26 }
 0x268   : > { %v1088_v10 = vpop.permute.xlu1 %1087 }
 0x269   : > { %v1574_v57 = vsel %vm1543_vm6, %v1541_v37, %v1088_v10 }
 0x26a   : > { %v1056_v24 = vpop.permute.xlu0 %1055 }
 0x26b   : > { %v1558_v38 = vsel %vm1543_vm6, %v1525_v17, %v1056_v24 }
 0x26c   : > { %v1374_v11 = vpop.permute.xlu1 %1373 }
 0x26d   : > { %v1672_v3 = vsel %vm1642_vm9, %v1639_v60, %v1374_v11 }
 0x26e   : > { %v1342_v56 = vpop.permute.xlu0 %1341  ;;  %2363 = vmatmul.mubr.msk.f32.gmra.mrb[12].mxu1 %vm1684_vm10, %v1672_v3 }
 0x26f   : > { %v1656_v52 = vsel %vm1642_vm9, %v1623_v45, %v1342_v56 }
 0x270   : > { %2339 = vmatmul.mubr.msk.f32.gmra.mrb[12].mxu0 %vm1684_vm10, %v1656_v52  ;;  %v1090_v50 = vpop.permute.xlu1 %1089 }
 0x271   : > { %v1575_v41 = vsel %vm1543_vm6, %v1542_v2, %v1090_v50 }
 0x272   : > { %v1058_v51 = vpop.permute.xlu0 %1057 }
 0x273   : > { %v1559_v1 = vsel %vm1543_vm6, %v1526_v55, %v1058_v51 }
 0x274   : > { %v1184_v58 = vpop.permute.xlu1 %1183 }
 0x275   : > { %v1607_v47 = vsel %vm1576_vm7, %v1574_v57, %v1184_v58 }
 0x276   : > { %v1152_v53 = vpop.permute.xlu0 %1151 }
 0x277   : > { %v1591_v44 = vsel %vm1576_vm7, %v1558_v38, %v1152_v53 }
 0x278   : > { %v1186_v43 = vpop.permute.xlu1 %1185 }
 0x279   : > { %v2349_v32 = vpop.f32.mrb[2].mxu1  ;;  %v1608_v10 = vsel %vm1576_vm7, %v1575_v41, %v1186_v43 }
 0x27a   : > { %v1154_v23 = vpop.permute.xlu0 %1153  ;;  %v2032_v63 = vmul.f32 %v2349_v32, %v4137_v16  ;;  %v1937_v9 = vpop.f32.mrb[3].mxu1 }
 0x27b   : > { %v2325_v54 = vpop.f32.mrb[2].mxu0  ;;  %v2031_v22 = vmul.f32 %v4137_v16, %v1937_v9  ;;  %v1592_v48 = vsel %vm1576_vm7, %v1559_v1, %v1154_v23 }
 0x27c   : > { %v2016_v13 = vmul.f32 %v2325_v54, %v4137_v16  ;;  %v1857_v29 = vpop.f32.mrb[3].mxu0  ;;  %v2071_v40 = vadd.f32 %v4142_v27, %v2032_v63  ;;  %v1280_v19 = vpop.permute.xlu1 %1279 }
 0x27d   : > { %v2015_v14 = vmul.f32 %v4137_v16, %v1857_v29  ;;  %v2070_v59 = vadd.f32 %v4142_v27, %v2031_v22  ;;  %v1640_v49 = vsel %vm1609_vm8, %v1607_v47, %v1280_v19 }
 0x27e   : > { %v2055_v0 = vadd.f32 %v4142_v27, %v2016_v13  ;;  %v1248_v15 = vpop.permute.xlu0 %1247  ;;  %v2103_v21 = vmax.f32 %v2071_v40, 0.0 }
 0x27f   : > { %v2054_v31 = vadd.f32 %v4142_v27, %v2015_v14  ;;  %v2102_v5 = vmax.f32 %v2070_v59, 0.0  ;;  %v1624_v4 = vsel %vm1609_vm8, %v1591_v44, %v1248_v15 }
 0x280   : > { %v2087_v61 = vmax.f32 %v2055_v0, 0.0  ;;  %2135 = vst.msk [vmem:[%s4151_s12 + $0x98] sm:$0xff] %vm1411_vm2, %v2103_v21  ;;  %v1282_v8 = vpop.permute.xlu1 %1281 }
 0x281   : > { %v2086_v42 = vmax.f32 %v2054_v31, 0.0  ;;  %2134 = vst.msk [vmem:[%s4151_s12 + $0x90] sm:$0xff] %vm1411_vm2, %v2102_v5  ;;  %v1641_v18 = vsel %vm1609_vm8, %v1608_v10, %v1282_v8 }
 0x282   : > { %2119 = vst.msk [vmem:[%s4151_s12 + $0x18] sm:$0xff] %vm1411_vm2, %v2087_v61  ;;  %v1250_v62 = vpop.permute.xlu0 %1249 }
 0x283   : > { %2118 = vst.msk [vmem:[%s4151_s12 + $0x10] sm:$0xff] %vm1411_vm2, %v2086_v42  ;;  %v1625_v33 = vsel %vm1609_vm8, %v1592_v48, %v1250_v62 }
 0x284   : > { %v1376_v6 = vpop.permute.xlu1 %1375 }
 0x285   : > { %v1673_v46 = vsel %vm1642_vm9, %v1640_v49, %v1376_v6 }
 0x286   : > { %v1344_v34 = vpop.permute.xlu0 %1343  ;;  %2365 = vmatprep.mubr.msk.f32.mxu1 %vm1684_vm10, %v1673_v46 }
 0x287   : > { %v1657_v36 = vsel %vm1642_vm9, %v1624_v4, %v1344_v34 }
 0x288   : > { %2341 = vmatprep.mubr.msk.f32.mxu0 %vm1684_vm10, %v1657_v36  ;;  %v1378_v24 = vpop.permute.xlu1 %1377 }
 0x289   : > { %v1674_v26 = vsel %vm1642_vm9, %v1641_v18, %v1378_v24 }
 0x28a   : > { %v1346_v25 = vpop.permute.xlu0 %1345  ;;  %2366 = vmatmul.mubr.msk.f32.gmra.mrb[14].mxu1 %vm1684_vm10, %v1674_v26 }
 0x28b   : > { %v1658_v12 = vsel %vm1642_vm9, %v1625_v33, %v1346_v25 }
 0x28c   : > { %2342 = vmatmul.mubr.msk.f32.gmra.mrb[14].mxu0 %vm1684_vm10, %v1658_v12 }
 0x2a1   : > { %v2352_v7 = vpop.f32.mrb[4].mxu1 }
 0x2a2   : > { %v2034_v60 = vmul.f32 %v2352_v7, %v4137_v16  ;;  %v1947_v11 = vpop.f32.mrb[5].mxu1 }
 0x2a3   : > { %v2328_v39 = vpop.f32.mrb[4].mxu0  ;;  %v2033_v56 = vmul.f32 %v4137_v16, %v1947_v11 }
 0x2a4   : > { %v2018_v45 = vmul.f32 %v2328_v39, %v4137_v16  ;;  %v1867_v3 = vpop.f32.mrb[5].mxu0  ;;  %v2073_v52 = vadd.f32 %v4142_v27, %v2034_v60 }
 0x2a5   : > { %v2017_v50 = vmul.f32 %v4137_v16, %v1867_v3  ;;  %v2072_v58 = vadd.f32 %v4142_v27, %v2033_v56 }
 0x2a6   : > { %v2057_v51 = vadd.f32 %v4142_v27, %v2018_v45  ;;  %v2105_v53 = vmax.f32 %v2073_v52, 0.0 }
 0x2a7   : > { %v2056_v43 = vadd.f32 %v4142_v27, %v2017_v50  ;;  %v2104_v32 = vmax.f32 %v2072_v58, 0.0 }
 0x2a8   : > { %v2089_v23 = vmax.f32 %v2057_v51, 0.0  ;;  %2137 = vst.msk [vmem:[%s4151_s12 + $0xa8] sm:$0xff] %vm1411_vm2, %v2105_v53 }
 0x2a9   : > { %v2088_v54 = vmax.f32 %v2056_v43, 0.0  ;;  %2136 = vst.msk [vmem:[%s4151_s12 + $0xa0] sm:$0xff] %vm1411_vm2, %v2104_v32 }
 0x2aa   : > { %2121 = vst.msk [vmem:[%s4151_s12 + $0x28] sm:$0xff] %vm1411_vm2, %v2089_v23 }
 0x2ab   : > { %2120 = vst.msk [vmem:[%s4151_s12 + $0x20] sm:$0xff] %vm1411_vm2, %v2088_v54 }
 0x2c9   : > { %v2355_v63 = vpop.f32.mrb[6].mxu1 }
 0x2ca   : > { %v2036_v13 = vmul.f32 %v2355_v63, %v4137_v16  ;;  %v1957_v29 = vpop.f32.mrb[7].mxu1 }
 0x2cb   : > { %v2331_v9 = vpop.f32.mrb[6].mxu0  ;;  %v2035_v14 = vmul.f32 %v4137_v16, %v1957_v29 }
 0x2cc   : > { %v2020_v22 = vmul.f32 %v2331_v9, %v4137_v16  ;;  %v1877_v40 = vpop.f32.mrb[7].mxu0  ;;  %v2075_v19 = vadd.f32 %v4142_v27, %v2036_v13 }
 0x2cd   : > { %v2019_v0 = vmul.f32 %v4137_v16, %v1877_v40  ;;  %v2074_v15 = vadd.f32 %v4142_v27, %v2035_v14 }
 0x2ce   : > { %v2059_v59 = vadd.f32 %v4142_v27, %v2020_v22  ;;  %v2107_v21 = vmax.f32 %v2075_v19, 0.0 }
 0x2cf   : > { %v2058_v31 = vadd.f32 %v4142_v27, %v2019_v0  ;;  %v2106_v5 = vmax.f32 %v2074_v15, 0.0 }
 0x2d0   : > { %v2091_v61 = vmax.f32 %v2059_v59, 0.0  ;;  %2139 = vst.msk [vmem:[%s4151_s12 + $0xb8] sm:$0xff] %vm1411_vm2, %v2107_v21 }
 0x2d1   : > { %v2090_v42 = vmax.f32 %v2058_v31, 0.0  ;;  %2138 = vst.msk [vmem:[%s4151_s12 + $0xb0] sm:$0xff] %vm1411_vm2, %v2106_v5 }
 0x2d2   : > { %2123 = vst.msk [vmem:[%s4151_s12 + $0x38] sm:$0xff] %vm1411_vm2, %v2091_v61 }
 0x2d3   : > { %2122 = vst.msk [vmem:[%s4151_s12 + $0x30] sm:$0xff] %vm1411_vm2, %v2090_v42 }
 0x2f1   : > { %v2358_v8 = vpop.f32.mrb[8].mxu1 }
 0x2f2   : > { %v2038_v37 = vmul.f32 %v2358_v8, %v4137_v16  ;;  %v1967_v62 = vpop.f32.mrb[9].mxu1 }
 0x2f3   : > { %v2334_v20 = vpop.f32.mrb[8].mxu0  ;;  %v2037_v57 = vmul.f32 %v4137_v16, %v1967_v62 }
 0x2f4   : > { %v2022_v30 = vmul.f32 %v2334_v20, %v4137_v16  ;;  %v1887_v17 = vpop.f32.mrb[9].mxu0  ;;  %v2077_v38 = vadd.f32 %v4142_v27, %v2038_v37 }
 0x2f5   : > { %v2021_v47 = vmul.f32 %v4137_v16, %v1887_v17  ;;  %v2076_v49 = vadd.f32 %v4142_v27, %v2037_v57 }
 0x2f6   : > { %v2061_v44 = vadd.f32 %v4142_v27, %v2022_v30  ;;  %v2109_v6 = vmax.f32 %v2077_v38, 0.0 }
 0x2f7   : > { %v2060_v35 = vadd.f32 %v4142_v27, %v2021_v47  ;;  %v2108_v4 = vmax.f32 %v2076_v49, 0.0 }
 0x2f8   : > { %v2093_v2 = vmax.f32 %v2061_v44, 0.0  ;;  %2141 = vst.msk [vmem:[%s4151_s12 + $0xc8] sm:$0xff] %vm1411_vm2, %v2109_v6 }
 0x2f9   : > { %v2092_v46 = vmax.f32 %v2060_v35, 0.0  ;;  %2140 = vst.msk [vmem:[%s4151_s12 + $0xc0] sm:$0xff] %vm1411_vm2, %v2108_v4 }
 0x2fa   : > { %2125 = vst.msk [vmem:[%s4151_s12 + $0x48] sm:$0xff] %vm1411_vm2, %v2093_v2 }
 0x2fb   : > { %2124 = vst.msk [vmem:[%s4151_s12 + $0x40] sm:$0xff] %vm1411_vm2, %v2092_v46 }
 0x319   : > { %v2361_v34 = vpop.f32.mrb[10].mxu1 }
 0x31a   : > { %v2040_v55 = vmul.f32 %v2361_v34, %v4137_v16  ;;  %v1977_v41 = vpop.f32.mrb[11].mxu1 }
 0x31b   : > { %v2337_v28 = vpop.f32.mrb[10].mxu0  ;;  %v2039_v10 = vmul.f32 %v4137_v16, %v1977_v41 }
 0x31c   : > { %v2024_v36 = vmul.f32 %v2337_v28, %v4137_v16  ;;  %v1897_v1 = vpop.f32.mrb[11].mxu0  ;;  %v2079_v48 = vadd.f32 %v4142_v27, %v2040_v55 }
 0x31d   : > { %v2023_v18 = vmul.f32 %v4137_v16, %v1897_v1  ;;  %v2078_v33 = vadd.f32 %v4142_v27, %v2039_v10 }
 0x31e   : > { %v2063_v24 = vadd.f32 %v4142_v27, %v2024_v36  ;;  %v2111_v26 = vmax.f32 %v2079_v48, 0.0 }
 0x31f   : > { %v2062_v25 = vadd.f32 %v4142_v27, %v2023_v18  ;;  %v2110_v7 = vmax.f32 %v2078_v33, 0.0 }
 0x320   : > { %v2095_v12 = vmax.f32 %v2063_v24, 0.0  ;;  %2143 = vst.msk [vmem:[%s4151_s12 + $0xd8] sm:$0xff] %vm1411_vm2, %v2111_v26 }
 0x321   : > { %v2094_v39 = vmax.f32 %v2062_v25, 0.0  ;;  %2142 = vst.msk [vmem:[%s4151_s12 + $0xd0] sm:$0xff] %vm1411_vm2, %v2110_v7 }
 0x322   : > { %2127 = vst.msk [vmem:[%s4151_s12 + $0x58] sm:$0xff] %vm1411_vm2, %v2095_v12 }
 0x323   : > { %2126 = vst.msk [vmem:[%s4151_s12 + $0x50] sm:$0xff] %vm1411_vm2, %v2094_v39 }
 0x341   : > { %v2364_v60 = vpop.f32.mrb[12].mxu1 }
 0x342   : > { %v2042_v45 = vmul.f32 %v2364_v60, %v4137_v16  ;;  %v1987_v3 = vpop.f32.mrb[13].mxu1 }
 0x343   : > { %v2340_v11 = vpop.f32.mrb[12].mxu0  ;;  %v2041_v50 = vmul.f32 %v4137_v16, %v1987_v3 }
 0x344   : > { %v2026_v56 = vmul.f32 %v2340_v11, %v4137_v16  ;;  %v1907_v52 = vpop.f32.mrb[13].mxu0  ;;  %v2081_v51 = vadd.f32 %v4142_v27, %v2042_v45 }
 0x345   : > { %v2025_v58 = vmul.f32 %v4137_v16, %v1907_v52  ;;  %v2080_v43 = vadd.f32 %v4142_v27, %v2041_v50 }
 0x346   : > { %v2065_v53 = vadd.f32 %v4142_v27, %v2026_v56  ;;  %v2113_v23 = vmax.f32 %v2081_v51, 0.0 }
 0x347   : > { %v2064_v32 = vadd.f32 %v4142_v27, %v2025_v58  ;;  %v2112_v63 = vmax.f32 %v2080_v43, 0.0 }
 0x348   : > { %v2097_v54 = vmax.f32 %v2065_v53, 0.0  ;;  %2145 = vst.msk [vmem:[%s4151_s12 + $0xe8] sm:$0xff] %vm1411_vm2, %v2113_v23 }
 0x349   : > { %v2096_v9 = vmax.f32 %v2064_v32, 0.0  ;;  %2144 = vst.msk [vmem:[%s4151_s12 + $0xe0] sm:$0xff] %vm1411_vm2, %v2112_v63 }
 0x34a   : > { %2129 = vst.msk [vmem:[%s4151_s12 + $0x68] sm:$0xff] %vm1411_vm2, %v2097_v54 }
 0x34b   : > { %2128 = vst.msk [vmem:[%s4151_s12 + $0x60] sm:$0xff] %vm1411_vm2, %v2096_v9 }
 0x35d   : > { %v2367_v13 = vpop.f32.mrb[14].mxu1 }
 0x35e   : > { %v2044_v22 = vmul.f32 %v2367_v13, %v4137_v16  ;;  %v1997_v40 = vpop.f32.mrb[15].mxu1 }
 0x35f   : > { %v2343_v29 = vpop.f32.mrb[14].mxu0  ;;  %v2043_v0 = vmul.f32 %v4137_v16, %v1997_v40 }
 0x360   : > { %v2028_v14 = vmul.f32 %v2343_v29, %v4137_v16  ;;  %v1917_v19 = vpop.f32.mrb[15].mxu0  ;;  %v2083_v59 = vadd.f32 %v4142_v27, %v2044_v22 }
 0x361   : > { %v2027_v15 = vmul.f32 %v4137_v16, %v1917_v19  ;;  %v2082_v31 = vadd.f32 %v4142_v27, %v2043_v0 }
 0x362   : > { %v2067_v21 = vadd.f32 %v4142_v27, %v2028_v14  ;;  %v2115_v61 = vmax.f32 %v2083_v59, 0.0 }
 0x363   : > { %v2066_v5 = vadd.f32 %v4142_v27, %v2027_v15  ;;  %v2114_v8 = vmax.f32 %v2082_v31, 0.0 }
 0x364   : > { %v2099_v42 = vmax.f32 %v2067_v21, 0.0  ;;  %2147 = vst.msk [vmem:[%s4151_s12 + $0xf8] sm:$0xff] %vm1411_vm2, %v2115_v61 }
 0x365   : > { %v2098_v20 = vmax.f32 %v2066_v5, 0.0  ;;  %2146 = vst.msk [vmem:[%s4151_s12 + $0xf0] sm:$0xff] %vm1411_vm2, %v2114_v8 }
 0x366   : > { %2131 = vst.msk [vmem:[%s4151_s12 + $0x78] sm:$0xff] %vm1411_vm2, %v2099_v42 }
 0x367   : > { %2130 = vst.msk [vmem:[%s4151_s12 + $0x70] sm:$0xff] %vm1411_vm2, %v2098_v20 }
 0x368 PF: > { %s15_s18 = sadd.s32 1, %s2417_s18  }
 0x369   : > { %p12_p4 = scmp.ge.s32.totalorder %s15_s18, 4  }
 0x36b   :  { %14 = sbr.rel (!%p12_p4) target bundleno = 1 (0x1), region = 73 }

// kernel: cam_forward.10
= control target key start
LH: loop header
LB: loop body
LE: loop exit
PB: predicated region body
PF: predicated region fallthrough
CT: control target
= control target key end

     0   :  { %s1061_s18 = smov 0   ;;  %s1472_s0 = inlined_call_operand.vmem [shape: f32[2,10,10,8], index: 0, kind: input, shape index: {}]   ;;  %s1473_s1 = inlined_call_operand.vmem [shape: f32[2,10,10,8], index: 1, kind: input, shape index: {}]   ;;  %s1474_s2 = inlined_call_operand.vmem [shape: f32[72,8], index: 2, kind: input, shape index: {}]   ;;  %s1475_s3 = inlined_call_operand.vmem [shape: f32[1,8], index: 3, kind: input, shape index: {}]   ;;  %s1476_s4 = inlined_call_operand.vmem [shape: f32[1,8], index: 4, kind: input, shape index: {}]   ;;  %s1477_s5 = inlined_call_operand.vmem [shape: f32[2,64,8], index: 5, kind: output, shape index: {}]  }
   0x1 LB: > { %s903_s19 = sadd.s32 4294967295, %s1021_s18   ;;  %p907_p0 = scmp.ge.s32.totalorder %s1021_s18, 1  ;;  %s1021_s18 = sphi %s1061_s18, %s15_s18  }
   0x2   : > { %p197_p1 = scmp.lt.s32.totalorder %s1021_s18, 3 }
   0x4   : > { %p198_p2 = pnand %p907_p0, %p197_p1 }
   0x5   : > { %p230_p3 = scmp.lt.s32.totalorder (!%p198_p2), %s903_s19, 1  ;;  %vm321_vm0 = vcmask (!%p198_p2), 1046528   ;;  %s1023_s27 = smov (!%p198_p2), 8   ;;  %vm346_vm1 = vcmask (!%p198_p2), 1045504   ;;  %vm579_vm2 = vcmask (!%p198_p2), 64512   ;;  %vm588_vm3 = vcmask (!%p198_p2), 130048  }
   0x6   : > { %201 = sbr.rel (%p198_p2) target bundleno = 485 (0x1e5), region = 40  ;;  %s1024_s28 = smov (!%p198_p2), 16   ;;  %vm597_vm4 = vcmask (!%p198_p2), 195584   ;;  %vm606_vm5 = vcmask (!%p198_p2), 261120   ;;  %vm615_vm6 = vcmask (!%p198_p2), 326656   ;;  %vm624_vm7 = vcmask (!%p198_p2), 392192  }
   0x7   : > { %s1025_s29 = smov (!%p198_p2), 24   ;;  %s1026_s30 = smov (!%p198_p2), 32   ;;  %vm633_vm8 = vcmask (!%p198_p2), 457728   ;;  %vm642_vm9 = vcmask (!%p198_p2), 523264   ;;  %vm660_vm10 = vcmask (!%p198_p2), 588800  }
   0x8   : > { %s1027_s6 = smov (!%p198_p2), 40   ;;  %s1028_s7 = smov (!%p198_p2), 48  }
   0x9   : > { %s1029_s12 = smov (!%p198_p2), 56  }
   0xd   : > { %s1479_s19 = smov (!%p230_p3, %s903_s19), 1 }
   0xe   : > { %s998_s20 = smul.u32 160, %s1479_s19  ;;  %s924_s9 = sshll.u32 %s1479_s19, 6 }
  0x10   : > { %s1075_s23 = scalar_lea.vmem %s1472_s0, %s998_s20  ;;  %s1080_s26 = scalar_lea.vmem %s1473_s1, %s998_s20 }
  0x11   : > { %v247_v0 = vld [vmem:[%s1075_s23 + $0x10] sm:$0xff]  ;;  %v248_v1 = vld [vmem:[%s1075_s23 + $0x18] sm:$0x3]  ;;  %v245_v5 = vld [vmem:[%s1075_s23] sm:$0xff] }
  0x12   : > { %v267_v2 = vld [vmem:[%s1080_s26 + $0x10] sm:$0xff]  ;;  %v268_v3 = vld [vmem:[%s1080_s26 + $0x18] sm:$0x3]  ;;  %v246_v6 = vld [vmem:[%s1075_s23 + $0x8] sm:$0x3] }
  0x13   : > { %v1086_v4 = vmul.f32 %v267_v2, %v247_v0  ;;  %v288_v7 = vmul.f32 %v268_v3, %v248_v1  ;;  %v265_v8 = vld [vmem:[%s1080_s26] sm:$0xff]  ;;  %v266_v9 = vld [vmem:[%s1080_s26 + $0x8] sm:$0x3]  ;;  %v255_v10 = vld [vmem:[%s1075_s23 + $0x50] sm:$0xff] }
  0x14   : > { %v1094_v12 = vmul.f32 %v265_v8, %v245_v5  ;;  %v286_v13 = vmul.f32 %v266_v9, %v246_v6  ;;  %v256_v14 = vld [vmem:[%s1075_s23 + $0x58] sm:$0x3]  ;;  %v275_v15 = vld [vmem:[%s1080_s26 + $0x50] sm:$0xff]  ;;  %v253_v20 = vld [vmem:[%s1075_s23 + $0x40] sm:$0xff] }
  0x15   : > { %v325_v11 = vrot.slane %v1086_v4, 1  ;;  %v276_v16 = vld [vmem:[%s1080_s26 + $0x58] sm:$0x3]  ;;  %v326_v17 = vrot.slane %v288_v7, 1  ;;  %v1099_v18 = vmul.f32 %v275_v15, %v255_v10  ;;  %v254_v21 = vld [vmem:[%s1075_s23 + $0x48] sm:$0x3] }
  0x16   : > { %v296_v19 = vmul.f32 %v276_v16, %v256_v14  ;;  %v273_v22 = vld [vmem:[%s1080_s26 + $0x40] sm:$0xff]  ;;  %v322_v23 = vrot.slane %v1094_v12, 1  ;;  %v323_v24 = vrot.slane %v286_v13, 1  ;;  %v274_v25 = vld [vmem:[%s1080_s26 + $0x48] sm:$0x3]  ;;  %v347_v37 = vrot.slane %v1094_v12, 2 }
  0x17   : > { %v1106_v26 = vmul.f32 %v273_v22, %v253_v20  ;;  %v1109_v27 = vsel %vm321_vm0, %v325_v11, %v326_v17  ;;  %v337_v28 = vrot.slane %v1099_v18, 1  ;;  %v294_v30 = vmul.f32 %v274_v25, %v254_v21  ;;  %v261_v46 = vld [vmem:[%s1075_s23 + $0x80] sm:$0xff]  ;;  %v262_v48 = vld [vmem:[%s1075_s23 + $0x88] sm:$0x3]  ;;  %v263_v50 = vld [vmem:[%s1075_s23 + $0x90] sm:$0xff] }
  0x18   : > { %v338_v29 = vrot.slane %v296_v19, 1  ;;  %389 = vrot.lane.b32.xlu1 %v1109_v27, %s1023_s27  ;;  %v324_v31 = vsel %vm321_vm0, %v322_v23, %v323_v24  ;;  %v348_v38 = vrot.slane %v286_v13, 2  ;;  %v362_v41 = vrot.slane %v1099_v18, 2  ;;  %v281_v47 = vld [vmem:[%s1080_s26 + $0x80] sm:$0xff]  ;;  %v282_v49 = vld [vmem:[%s1080_s26 + $0x88] sm:$0x3] }
  0x19   : > { %v334_v32 = vrot.slane %v1106_v26, 1  ;;  %387 = vrot.lane.b32.xlu0 %v324_v31, %s1023_s27  ;;  %v335_v34 = vrot.slane %v294_v30, 1  ;;  %v359_v35 = vrot.slane %v1106_v26, 2  ;;  %v360_v36 = vrot.slane %v294_v30, 2  ;;  %v283_v51 = vld [vmem:[%s1080_s26 + $0x90] sm:$0xff]  ;;  %v257_v56 = vld [vmem:[%s1075_s23 + $0x60] sm:$0xff] }
  0x1a   : > { %v1118_v33 = vsel %vm321_vm0, %v337_v28, %v338_v29  ;;  %v363_v42 = vrot.slane %v296_v19, 2  ;;  %v349_v43 = vsel %vm346_vm1, %v347_v37, %v348_v38  ;;  %v350_v44 = vrot.slane %v1086_v4, 2  ;;  %v264_v53 = vld [vmem:[%s1075_s23 + $0x98] sm:$0x3]  ;;  %v277_v60 = vld [vmem:[%s1080_s26 + $0x60] sm:$0xff]  ;;  %v259_v30 = vld [vmem:[%s1075_s23 + $0x70] sm:$0xff] }
  0x1b   : > { %v1123_v39 = vsel %vm321_vm0, %v334_v32, %v335_v34  ;;  %v1130_v40 = vsel %vm346_vm1, %v359_v35, %v360_v36  ;;  %v351_v45 = vrot.slane %v288_v7, 2  ;;  %v284_v54 = vld [vmem:[%s1080_s26 + $0x98] sm:$0x3]  ;;  %v1153_v57 = vmul.f32 %v281_v47, %v261_v46  ;;  %v249_v61 = vld [vmem:[%s1075_s23 + $0x20] sm:$0xff]  ;;  %v258_v0 = vld [vmem:[%s1075_s23 + $0x68] sm:$0x3] }
  0x1c   : > { %397 = vrot.lane.b32.xlu1 %v1118_v33, %s1023_s27  ;;  %v1145_v52 = vsel %vm346_vm1, %v362_v41, %v363_v42  ;;  %v302_v58 = vmul.f32 %v282_v49, %v262_v48  ;;  %v1155_v59 = vmul.f32 %v283_v51, %v263_v50  ;;  %v269_v62 = vld [vmem:[%s1080_s26 + $0x20] sm:$0xff]  ;;  %v304_v63 = vmul.f32 %v284_v54, %v264_v53  ;;  %v278_v6 = vld [vmem:[%s1080_s26 + $0x68] sm:$0x3]  ;;  %v279_v31 = vld [vmem:[%s1080_s26 + $0x70] sm:$0xff] }
  0x1d   : > { %395 = vrot.lane.b32.xlu0 %v1123_v39, %s1023_s27  ;;  %v1150_v55 = vsel %vm346_vm1, %v350_v44, %v351_v45  ;;  %v373_v1 = vrot.slane %v1153_v57, 1  ;;  %v376_v3 = vrot.slane %v1153_v57, 2  ;;  %v250_v11 = vld [vmem:[%s1075_s23 + $0x28] sm:$0x3]  ;;  %v1180_v16 = vmul.f32 %v277_v60, %v257_v56  ;;  %v260_v34 = vld [vmem:[%s1075_s23 + $0x78] sm:$0x3] }
  0x1e   : > { %v374_v2 = vrot.slane %v302_v58, 1  ;;  %v377_v5 = vrot.slane %v302_v58, 2  ;;  %v381_v7 = vrot.slane %v1155_v59, 1  ;;  %v382_v8 = vrot.slane %v304_v63, 1  ;;  %v270_v13 = vld [vmem:[%s1080_s26 + $0x28] sm:$0x3] }
  0x1f   : > { %v384_v9 = vrot.slane %v1155_v59, 2  ;;  %v385_v10 = vrot.slane %v304_v63, 2  ;;  %v1190_v20 = vmul.f32 %v269_v62, %v249_v61  ;;  %v298_v21 = vmul.f32 %v278_v6, %v258_v0  ;;  %v280_v35 = vld [vmem:[%s1080_s26 + $0x78] sm:$0x3]  ;;  %v251_v36 = vld [vmem:[%s1075_s23 + $0x30] sm:$0xff] }
  0x20   : > { %419 = vrot.lane.b32.xlu1 %v1130_v40, %s1024_s28  ;;  %v1173_v14 = vsel %vm321_vm0, %v373_v1, %v374_v2  ;;  %v1176_v15 = vsel %vm346_vm1, %v376_v3, %v377_v5  ;;  %v1183_v17 = vsel %vm321_vm0, %v381_v7, %v382_v8  ;;  %v290_v22 = vmul.f32 %v270_v13, %v250_v11  ;;  %v252_v37 = vld [vmem:[%s1075_s23 + $0x38] sm:$0x3]  ;;  %v271_v38 = vld [vmem:[%s1080_s26 + $0x30] sm:$0xff]  ;;  %v651_v2 = vld [vmem:[%s1474_s2] sm:$0xff] }
  0x21   : > { %411 = vrot.lane.b32.xlu0 %v349_v43, %s1024_s28  ;;  %v1186_v19 = vsel %vm346_vm1, %v384_v9, %v385_v10  ;;  %v340_v23 = vrot.slane %v1180_v16, 1  ;;  %v341_v24 = vrot.slane %v298_v21, 1  ;;  %v328_v25 = vrot.slane %v1190_v20, 1  ;;  %v272_v41 = vld [vmem:[%s1080_s26 + $0x38] sm:$0x3]  ;;  %v652_v3 = vld [vmem:[%s1474_s2 + $0x8] sm:$0xff] }
  0x22   : > { %v329_v28 = vrot.slane %v290_v22, 1  ;;  %v1214_v42 = vmul.f32 %v279_v31, %v259_v30  ;;  %v300_v43 = vmul.f32 %v280_v35, %v260_v34  ;;  %v292_v44 = vmul.f32 %v272_v41, %v252_v37  ;;  %v653_v6 = vld [vmem:[%s1474_s2 + $0x10] sm:$0xff]  ;;  %v654_v7 = vld [vmem:[%s1474_s2 + $0x18] sm:$0xff]  ;;  %v655_v9 = vld [vmem:[%s1474_s2 + $0x20] sm:$0xff] }
  0x23   : > { %v342_v29 = vsel %vm321_vm0, %v340_v23, %v341_v24  ;;  %v365_v50 = vrot.slane %v1180_v16, 2  ;;  %v366_v51 = vrot.slane %v298_v21, 2  ;;  %v353_v54 = vrot.slane %v1190_v20, 2  ;;  %v656_v10 = vld [vmem:[%s1474_s2 + $0x28] sm:$0xff]  ;;  %v657_v13 = vld [vmem:[%s1474_s2 + $0x30] sm:$0xff]  ;;  %v658_v21 = vld [vmem:[%s1474_s2 + $0x38] sm:$0xff] }
  0x24   : > { %421 = vrot.lane.b32.xlu1 %v1145_v52, %s1024_s28  ;;  %v330_v32 = vsel %vm321_vm0, %v328_v25, %v329_v28  ;;  %v343_v45 = vrot.slane %v1214_v42, 1  ;;  %v344_v46 = vrot.slane %v300_v43, 1  ;;  %v332_v48 = vrot.slane %v292_v44, 1  ;;  %v659_v23 = vld [vmem:[%s1474_s2 + $0x40] sm:$0xff] }
  0x25   : > { %413 = vrot.lane.b32.xlu0 %v1150_v55, %s1024_s28  ;;  %v354_v56 = vrot.slane %v290_v22, 2  ;;  %v367_v58 = vsel %vm346_vm1, %v365_v50, %v366_v51  ;;  %v369_v61 = vrot.slane %v300_v43, 2  ;;  %v357_v63 = vrot.slane %v292_v44, 2 }
  0x26   : > { %v345_v49 = vsel %vm321_vm0, %v343_v45, %v344_v46  ;;  %v972_v5 = vpack.c.bf16 %v652_v3, %v651_v2  ;;  %v976_v8 = vpack.c.bf16 %v654_v7, %v653_v6  ;;  %v980_v11 = vpack.c.bf16 %v656_v10, %v655_v9 }
  0x27   : > { %v355_v60 = vsel %vm346_vm1, %v353_v54, %v354_v56  ;;  %v984_v22 = vpack.c.bf16 %v658_v21, %v657_v13 }
  0x28   : > { %443 = vrot.lane.b32.xlu1 %v1099_v18, %s1025_s29  ;;  %973 = vmatprep.subr.bf16.mxu0 %v972_v5 }
  0x29   : > { %435 = vrot.lane.b32.xlu0 %v1086_v4, %s1025_s29  ;;  %988 = vmatprep.subr.bf16.mxu1 %v972_v5 }
  0x2a   : > { %975 = vmatpush3.bf16.msra.mxu0 %v972_v5  ;;  %993 = vmatpush3.bf16.msra.mxu1 %v972_v5 }
  0x2b   : > { %977 = vmatprep.subr.bf16.mxu0 %v976_v8  ;;  %989 = vmatprep.subr.bf16.mxu1 %v976_v8 }
  0x2c   : > { %445 = vrot.lane.b32.xlu1 %v1180_v16, %s1025_s29 }
  0x2d   : > { %437 = vrot.lane.b32.xlu0 %v1190_v20, %s1025_s29 }
  0x2e   : > { %979 = vmatpush3.bf16.msra.mxu0 %v976_v8  ;;  %994 = vmatpush3.bf16.msra.mxu1 %v976_v8 }
  0x2f   : > { %981 = vmatprep.subr.bf16.mxu0 %v980_v11  ;;  %990 = vmatprep.subr.bf16.mxu1 %v980_v11 }
  0x30   : > { %467 = vrot.lane.b32.xlu1 %v1118_v33, %s1026_s30 }
  0x31   : > { %459 = vrot.lane.b32.xlu0 %v1109_v27, %s1026_s30  ;;  %v1216_v27 = vmul.f32 %v271_v38, %v251_v36 }
  0x32   : > { %983 = vmatpush3.bf16.msra.mxu0 %v980_v11  ;;  %995 = vmatpush3.bf16.msra.mxu1 %v980_v11 }
  0x33   : > { %v331_v47 = vrot.slane %v1216_v27, 1  ;;  %v356_v62 = vrot.slane %v1216_v27, 2  ;;  %985 = vmatprep.subr.bf16.mxu0 %v984_v22  ;;  %991 = vmatprep.subr.bf16.mxu1 %v984_v22 }
  0x34   : > { %399 = vrot.lane.b32.xlu1 %v342_v29, %s1023_s27 }
  0x35   : > { %391 = vrot.lane.b32.xlu0 %v330_v32, %s1023_s27  ;;  %v333_v53 = vsel %vm321_vm0, %v331_v47, %v332_v48  ;;  %v358_v1 = vsel %vm346_vm1, %v356_v62, %v357_v63 }
  0x36   : > { %987 = vmatpush3.bf16.msra.mxu0 %v984_v22  ;;  %996 = vmatpush3.bf16.msra.mxu1 %v984_v22 }
  0x37   : > { %958 = vmatprep.subr.mxu0 %v659_v23  ;;  %992 = vmatprep.subr.mxu1 %v659_v23 }
  0x38   : > { %469 = vrot.lane.b32.xlu1 %v342_v29, %s1026_s30 }
  0x39   : > { %461 = vrot.lane.b32.xlu0 %v330_v32, %s1026_s30 }
  0x3a   : > { %959 = vmatpush3.msra.mxu0 %v659_v23  ;;  %997 = vmatpush3.msra.mxu1 %v659_v23 }
  0x3c   : > { %491 = vrot.lane.b32.xlu1 %v1145_v52, %s1027_s6 }
  0x3d   : > { %483 = vrot.lane.b32.xlu0 %v1150_v55, %s1027_s6  ;;  %v368_v55 = vrot.slane %v1214_v42, 2 }
  0x3f   : > { %v370_v0 = vsel %vm346_vm1, %v368_v55, %v369_v61 }
  0x40   : > { %401 = vrot.lane.b32.xlu1 %v345_v49, %s1023_s27 }
  0x41   : > { %393 = vrot.lane.b32.xlu0 %v333_v53, %s1023_s27 }
  0x44   : > { %423 = vrot.lane.b32.xlu1 %v367_v58, %s1024_s28 }
  0x45   : > { %415 = vrot.lane.b32.xlu0 %v355_v60, %s1024_s28 }
  0x48   : > { %493 = vrot.lane.b32.xlu1 %v367_v58, %s1027_s6 }
  0x49   : > { %485 = vrot.lane.b32.xlu0 %v355_v60, %s1027_s6 }
  0x4c   : > { %515 = vrot.lane.b32.xlu1 %v1180_v16, %s1028_s7 }
  0x4d   : > { %507 = vrot.lane.b32.xlu0 %v1190_v20, %s1028_s7 }
  0x50   : > { %425 = vrot.lane.b32.xlu1 %v370_v0, %s1024_s28 }
  0x51   : > { %417 = vrot.lane.b32.xlu0 %v358_v1, %s1024_s28 }
  0x54   : > { %447 = vrot.lane.b32.xlu1 %v1214_v42, %s1025_s29 }
  0x55   : > { %439 = vrot.lane.b32.xlu0 %v1216_v27, %s1025_s29 }
  0x58   : > { %517 = vrot.lane.b32.xlu1 %v1214_v42, %s1028_s7 }
  0x59   : > { %509 = vrot.lane.b32.xlu0 %v1216_v27, %s1028_s7 }
  0x5c   : > { %539 = vrot.lane.b32.xlu1 %v342_v29, %s1029_s12 }
  0x5d   : > { %531 = vrot.lane.b32.xlu0 %v330_v32, %s1029_s12 }
  0x60   : > { %449 = vrot.lane.b32.xlu1 %v1153_v57, %s1025_s29 }
  0x61   : > { %441 = vrot.lane.b32.xlu0 %v1106_v26, %s1025_s29  ;;  %s1030_s29 = smov 64  }
  0x64   : > { %471 = vrot.lane.b32.xlu1 %v345_v49, %s1026_s30 }
  0x65   : > { %463 = vrot.lane.b32.xlu0 %v333_v53, %s1026_s30 }
  0x68   : > { %541 = vrot.lane.b32.xlu1 %v345_v49, %s1029_s12 }
  0x69   : > { %533 = vrot.lane.b32.xlu0 %v333_v53, %s1029_s12 }
  0x6c   : > { %563 = vrot.lane.b32.xlu1 %v367_v58, %s1030_s29 }
  0x6d   : > { %555 = vrot.lane.b32.xlu0 %v355_v60, %s1030_s29 }
  0x70   : > { %473 = vrot.lane.b32.xlu1 %v1173_v14, %s1026_s30 }
  0x71   : > { %465 = vrot.lane.b32.xlu0 %v1123_v39, %s1026_s30 }
  0x74   : > { %495 = vrot.lane.b32.xlu1 %v370_v0, %s1027_s6 }
  0x75   : > { %487 = vrot.lane.b32.xlu0 %v358_v1, %s1027_s6 }
  0x78   : > { %565 = vrot.lane.b32.xlu1 %v370_v0, %s1030_s29 }
  0x79   : > { %557 = vrot.lane.b32.xlu0 %v358_v1, %s1030_s29 }
  0x7c   : > { %497 = vrot.lane.b32.xlu1 %v1176_v15, %s1027_s6 }
  0x7d   : > { %489 = vrot.lane.b32.xlu0 %v1130_v40, %s1027_s6 }
  0x80   : > { %519 = vrot.lane.b32.xlu1 %v1153_v57, %s1028_s7 }
  0x81   : > { %511 = vrot.lane.b32.xlu0 %v1106_v26, %s1028_s7 }
  0x84   : > { %521 = vrot.lane.b32.xlu1 %v1155_v59, %s1028_s7 }
  0x85   : > { %513 = vrot.lane.b32.xlu0 %v1099_v18, %s1028_s7 }
  0x88   : > { %543 = vrot.lane.b32.xlu1 %v1173_v14, %s1029_s12 }
  0x89   : > { %535 = vrot.lane.b32.xlu0 %v1123_v39, %s1029_s12 }
  0x8a   : > { %v390_v24 = vpop.permute.xlu1 %389 }
  0x8b   : > { %v388_v25 = vpop.permute.xlu0 %387 }
  0x8c   : > { %545 = vrot.lane.b32.xlu1 %v1183_v17, %s1029_s12  ;;  %v580_v14 = vsel %vm579_vm2, %v1094_v12, %v388_v25 }
  0x8d   : > { %537 = vrot.lane.b32.xlu0 %v1118_v33, %s1029_s12  ;;  %s1451_s12 = scalar_lea.vmem %s1477_s5, %s924_s9 }
  0x8e   : > { %v398_v57 = vpop.permute.xlu1 %397 }
  0x8f   : > { %v396_v28 = vpop.permute.xlu0 %395 }
  0x90   : > { %567 = vrot.lane.b32.xlu1 %v1176_v15, %s1030_s29  ;;  %v584_v39 = vsel %vm579_vm2, %v1106_v26, %v396_v28  ;;  %v581_v26 = vsel %vm579_vm2, %v1086_v4, %v390_v24 }
  0x91   : > { %559 = vrot.lane.b32.xlu0 %v1130_v40, %s1030_s29  ;;  %v585_v40 = vsel %vm579_vm2, %v1099_v18, %v398_v57 }
  0x92   : > { %v420_v59 = vpop.permute.xlu1 %419 }
  0x93   : > { %v593_v17 = vsel %vm588_vm3, %v584_v39, %v420_v59  ;;  %v412_v33 = vpop.permute.xlu0 %411 }
  0x94   : > { %v589_v29 = vsel %vm588_vm3, %v580_v14, %v412_v33  ;;  %569 = vrot.lane.b32.xlu1 %v1186_v19, %s1030_s29 }
  0x95   : > { %561 = vrot.lane.b32.xlu0 %v1145_v52, %s1030_s29 }
  0x96   : > { %v422_v15 = vpop.permute.xlu1 %421 }
  0x97   : > { %v594_v12 = vsel %vm588_vm3, %v585_v40, %v422_v15  ;;  %v414_v30 = vpop.permute.xlu0 %413 }
  0x98   : > { %v590_v31 = vsel %vm588_vm3, %v581_v26, %v414_v30 }
  0x9a   : > { %v444_v32 = vpop.permute.xlu1 %443 }
  0x9b   : > { %v436_v34 = vpop.permute.xlu0 %435  ;;  %v602_v8 = vsel %vm597_vm4, %v593_v17, %v444_v32 }
  0x9c   : > { %v598_v10 = vsel %vm597_vm4, %v589_v29, %v436_v34 }
  0x9e   : > { %v446_v35 = vpop.permute.xlu1 %445 }
  0x9f   : > { %v1344_v19 = vsel %vm597_vm4, %v594_v12, %v446_v35  ;;  %v438_v52 = vpop.permute.xlu0 %437 }
  0xa0   : > { %v1347_v36 = vsel %vm597_vm4, %v590_v31, %v438_v52 }
  0xa2   : > { %v468_v18 = vpop.permute.xlu1 %467 }
  0xa3   : > { %v460_v37 = vpop.permute.xlu0 %459  ;;  %v611_v11 = vsel %vm606_vm5, %v602_v8, %v468_v18 }
  0xa4   : > { %v607_v21 = vsel %vm606_vm5, %v598_v10, %v460_v37 }
  0xa6   : > { %v400_v38 = vpop.permute.xlu1 %399 }
  0xa7   : > { %v392_v4 = vpop.permute.xlu0 %391  ;;  %v586_v48 = vsel %vm579_vm2, %v1180_v16, %v400_v38 }
  0xa8   : > { %v582_v50 = vsel %vm579_vm2, %v1190_v20, %v392_v4 }
  0xaa   : > { %v470_v41 = vpop.permute.xlu1 %469 }
  0xab   : > { %v462_v43 = vpop.permute.xlu0 %461  ;;  %v612_v15 = vsel %vm606_vm5, %v1344_v19, %v470_v41 }
  0xac   : > { %v608_v12 = vsel %vm606_vm5, %v1347_v36, %v462_v43 }
  0xae   : > { %v492_v44 = vpop.permute.xlu1 %491 }
  0xaf   : > { %v484_v45 = vpop.permute.xlu0 %483  ;;  %v620_v22 = vsel %vm615_vm6, %v611_v11, %v492_v44 }
  0xb0   : > { %v616_v23 = vsel %vm615_vm6, %v607_v21, %v484_v45 }
  0xb2   : > { %v1349_v46 = vpop.permute.xlu1 %401 }
  0xb3   : > { %v1351_v47 = vpop.permute.xlu0 %393 }
  0xb6   : > { %v424_v49 = vpop.permute.xlu1 %423 }
  0xb7   : > { %v1358_v51 = vsel %vm588_vm3, %v586_v48, %v424_v49  ;;  %v416_v53 = vpop.permute.xlu0 %415 }
  0xb8   : > { %v1361_v54 = vsel %vm588_vm3, %v582_v50, %v416_v53 }
  0xba   : > { %v494_v56 = vpop.permute.xlu1 %493 }
  0xbb   : > { %v486_v58 = vpop.permute.xlu0 %485  ;;  %v621_v30 = vsel %vm615_vm6, %v612_v15, %v494_v56 }
  0xbc   : > { %v617_v31 = vsel %vm615_vm6, %v608_v12, %v486_v58 }
  0xbe   : > { %v516_v60 = vpop.permute.xlu1 %515 }
  0xbf   : > { %v508_v55 = vpop.permute.xlu0 %507  ;;  %v629_v24 = vsel %vm624_vm7, %v620_v22, %v516_v60 }
  0xc0   : > { %v625_v25 = vsel %vm624_vm7, %v616_v23, %v508_v55  ;;  %v587_v55 = vsel %vm579_vm2, %v1214_v42, %v1349_v46 }
  0xc2   : > { %v1363_v61 = vpop.permute.xlu1 %425 }
  0xc3   : > { %v1365_v62 = vpop.permute.xlu0 %417 }
  0xc6   : > { %v448_v16 = vpop.permute.xlu1 %447 }
  0xc7   : > { %v440_v63 = vpop.permute.xlu0 %439  ;;  %v604_v50 = vsel %vm597_vm4, %v1358_v51, %v448_v16  ;;  %v596_v51 = vsel %vm588_vm3, %v587_v55, %v1363_v61 }
  0xc8   : > { %v600_v56 = vsel %vm597_vm4, %v1361_v54, %v440_v63 }
  0xca   : > { %v518_v0 = vpop.permute.xlu1 %517 }
  0xcb   : > { %v510_v1 = vpop.permute.xlu0 %509  ;;  %v630_v32 = vsel %vm624_vm7, %v621_v30, %v518_v0 }
  0xcc   : > { %v626_v34 = vsel %vm624_vm7, %v617_v31, %v510_v1 }
  0xce   : > { %v540_v20 = vpop.permute.xlu1 %539 }
  0xcf   : > { %v532_v2 = vpop.permute.xlu0 %531  ;;  %v638_v57 = vsel %vm633_vm8, %v629_v24, %v540_v20  ;;  %v583_v20 = vsel %vm579_vm2, %v1216_v27, %v1351_v47 }
  0xd0   : > { %v634_v39 = vsel %vm633_vm8, %v625_v25, %v532_v2  ;;  %v592_v63 = vsel %vm588_vm3, %v583_v20, %v1365_v62 }
  0xd2   : > { %v1367_v3 = vpop.permute.xlu1 %449 }
  0xd3   : > { %v1369_v5 = vpop.permute.xlu0 %441  ;;  %v605_v42 = vsel %vm597_vm4, %v596_v51, %v1367_v3 }
  0xd4   : > { %v601_v27 = vsel %vm597_vm4, %v592_v63, %v1369_v5 }
  0xd6   : > { %v472_v6 = vpop.permute.xlu1 %471 }
  0xd7   : > { %v464_v7 = vpop.permute.xlu0 %463  ;;  %v613_v58 = vsel %vm606_vm5, %v604_v50, %v472_v6 }
  0xd8   : > { %v609_v0 = vsel %vm606_vm5, %v600_v56, %v464_v7 }
  0xda   : > { %v542_v9 = vpop.permute.xlu1 %541 }
  0xdb   : > { %v534_v13 = vpop.permute.xlu0 %533  ;;  %v639_v35 = vsel %vm633_vm8, %v630_v32, %v542_v9 }
  0xdc   : > { %v635_v18 = vsel %vm633_vm8, %v626_v34, %v534_v13 }
  0xde   : > { %v564_v28 = vpop.permute.xlu1 %563 }
  0xdf   : > { %v556_v59 = vpop.permute.xlu0 %555  ;;  %v647_v14 = vsel %vm642_vm9, %v638_v57, %v564_v28  ;;  %v920_v57 = vld [vmem:[%s1475_s3] ss:$0 sm:$0xff] }
  0xe0   : > { %v643_v17 = vsel %vm642_vm9, %v634_v39, %v556_v59  ;;  %966 = vmatprep.mubr.msk.f32.mxu1 %vm660_vm10, %v647_v14  ;;  %v921_v28 = vld [vmem:[%s1476_s4] ss:$0 sm:$0xff] }
  0xe1   : > { %960 = vmatprep.mubr.msk.f32.mxu0 %vm660_vm10, %v643_v17 }
  0xe2   : > { %v474_v33 = vpop.permute.xlu1 %473 }
  0xe3   : > { %v466_v29 = vpop.permute.xlu0 %465  ;;  %v614_v47 = vsel %vm606_vm5, %v605_v42, %v474_v33 }
  0xe4   : > { %v610_v62 = vsel %vm606_vm5, %v601_v27, %v466_v29 }
  0xe6   : > { %v496_v40 = vpop.permute.xlu1 %495 }
  0xe7   : > { %v488_v26 = vpop.permute.xlu0 %487  ;;  %v622_v1 = vsel %vm615_vm6, %v613_v58, %v496_v40 }
  0xe8   : > { %v618_v54 = vsel %vm615_vm6, %v609_v0, %v488_v26 }
  0xea   : > { %v566_v52 = vpop.permute.xlu1 %565 }
  0xeb   : > { %v648_v37 = vsel %vm642_vm9, %v639_v35, %v566_v52  ;;  %v558_v19 = vpop.permute.xlu0 %557 }
  0xec   : > { %v644_v38 = vsel %vm642_vm9, %v635_v18, %v558_v19  ;;  %967 = vmatmul.mubr.msk.f32.vlgmr.msra.gmra.mrb[0].mxu1 %vm660_vm10, %v648_v37 }
  0xed   : > { %961 = vmatmul.mubr.msk.f32.vlgmr.msra.gmra.mrb[0].mxu0 %vm660_vm10, %v644_v38 }
  0xee   : > { %v498_v36 = vpop.permute.xlu1 %497 }
  0xef   : > { %v490_v4 = vpop.permute.xlu0 %489  ;;  %v623_v9 = vsel %vm615_vm6, %v614_v47, %v498_v36 }
  0xf0   : > { %v619_v10 = vsel %vm615_vm6, %v610_v62, %v490_v4 }
  0xf2   : > { %v520_v41 = vpop.permute.xlu1 %519 }
  0xf3   : > { %v512_v43 = vpop.permute.xlu0 %511  ;;  %v631_v16 = vsel %vm624_vm7, %v622_v1, %v520_v41 }
  0xf4   : > { %v627_v46 = vsel %vm624_vm7, %v618_v54, %v512_v43 }
  0xf6   : > { %v522_v44 = vpop.permute.xlu1 %521 }
  0xf7   : > { %v514_v45 = vpop.permute.xlu0 %513  ;;  %v632_v5 = vsel %vm624_vm7, %v623_v9, %v522_v44 }
  0xf8   : > { %v628_v11 = vsel %vm624_vm7, %v619_v10, %v514_v45 }
  0xfa   : > { %v544_v48 = vpop.permute.xlu1 %543 }
  0xfb   : > { %v536_v49 = vpop.permute.xlu0 %535  ;;  %v640_v2 = vsel %vm633_vm8, %v631_v16, %v544_v48 }
  0xfc   : > { %v636_v61 = vsel %vm633_vm8, %v627_v46, %v536_v49 }
  0xfe   : > { %v546_v53 = vpop.permute.xlu1 %545 }
  0xff   : > { %v538_v60 = vpop.permute.xlu0 %537  ;;  %v641_v13 = vsel %vm633_vm8, %v632_v5, %v546_v53 }
 0x100   : > { %v637_v22 = vsel %vm633_vm8, %v628_v11, %v538_v60 }
 0x102   : > { %v568_v6 = vpop.permute.xlu1 %567 }
 0x103   : > { %v649_v7 = vsel %vm642_vm9, %v640_v2, %v568_v6  ;;  %v560_v8 = vpop.permute.xlu0 %559 }
 0x104   : > { %v645_v3 = vsel %vm642_vm9, %v636_v61, %v560_v8  ;;  %969 = vmatprep.mubr.msk.f32.mxu1 %vm660_vm10, %v649_v7 }
 0x105   : > { %963 = vmatprep.mubr.msk.f32.mxu0 %vm660_vm10, %v645_v3 }
 0x106   : > { %v570_v21 = vpop.permute.xlu1 %569 }
 0x107   : > { %v650_v23 = vsel %vm642_vm9, %v641_v13, %v570_v21  ;;  %v562_v24 = vpop.permute.xlu0 %561 }
 0x108   : > { %v646_v25 = vsel %vm642_vm9, %v637_v22, %v562_v24  ;;  %970 = vmatmul.mubr.msk.f32.gmra.mrb[2].mxu1 %vm660_vm10, %v650_v23 }
 0x109   : > { %964 = vmatmul.mubr.msk.f32.gmra.mrb[2].mxu0 %vm660_vm10, %v646_v25 }
 0x1bf   : > { %v968_v39 = vpop.f32.mrb[0].mxu1 }
 0x1c0   : > { %v962_v59 = vpop.f32.mrb[0].mxu0  ;;  %v802_v14 = vmul.f32 %v968_v39, %v920_v57  ;;  %v771_v17 = vpop.f32.mrb[1].mxu1 }
 0x1c1   : > { %v798_v33 = vmul.f32 %v962_v59, %v920_v57  ;;  %v751_v29 = vpop.f32.mrb[1].mxu0  ;;  %v801_v40 = vmul.f32 %v920_v57, %v771_v17 }
 0x1c2   : > { %v817_v15 = vadd.f32 %v921_v28, %v802_v14  ;;  %v797_v26 = vmul.f32 %v920_v57, %v751_v29 }
 0x1c3   : > { %v813_v12 = vadd.f32 %v921_v28, %v798_v33  ;;  %v816_v30 = vadd.f32 %v921_v28, %v801_v40 }
 0x1c4   : > { %v825_v31 = vmax.f32 %v817_v15, 0.0  ;;  %v812_v32 = vadd.f32 %v921_v28, %v797_v26 }
 0x1c5   : > { %v821_v34 = vmax.f32 %v813_v12, 0.0  ;;  %v824_v35 = vmax.f32 %v816_v30, 0.0 }
 0x1c6   : > { %833 = vst.msk [vmem:[%s1451_s12 + $0x28] sm:$0xff] %vm579_vm2, %v825_v31  ;;  %v820_v52 = vmax.f32 %v812_v32, 0.0 }
 0x1c7   : > { %829 = vst.msk [vmem:[%s1451_s12 + $0x8] sm:$0xff] %vm579_vm2, %v821_v34  ;;  %832 = vst.msk [vmem:[%s1451_s12 + $0x20] sm:$0xff] %vm579_vm2, %v824_v35 }
 0x1c8   : > { %828 = vst.msk [vmem:[%s1451_s12] sm:$0xff] %vm579_vm2, %v820_v52 }
 0x1db   : > { %v971_v18 = vpop.f32.mrb[2].mxu1 }
 0x1dc   : > { %v965_v37 = vpop.f32.mrb[2].mxu0  ;;  %v804_v19 = vmul.f32 %v971_v18, %v920_v57  ;;  %v781_v38 = vpop.f32.mrb[3].mxu1 }
 0x1dd   : > { %v800_v36 = vmul.f32 %v965_v37, %v920_v57  ;;  %v761_v4 = vpop.f32.mrb[3].mxu0  ;;  %v803_v41 = vmul.f32 %v920_v57, %v781_v38 }
 0x1de   : > { %v819_v43 = vadd.f32 %v921_v28, %v804_v19  ;;  %v799_v44 = vmul.f32 %v920_v57, %v761_v4 }
 0x1df   : > { %v815_v45 = vadd.f32 %v921_v28, %v800_v36  ;;  %v818_v48 = vadd.f32 %v921_v28, %v803_v41 }
 0x1e0   : > { %v827_v49 = vmax.f32 %v819_v43, 0.0  ;;  %v814_v50 = vadd.f32 %v921_v28, %v799_v44 }
 0x1e1   : > { %v823_v53 = vmax.f32 %v815_v45, 0.0  ;;  %v826_v56 = vmax.f32 %v818_v48, 0.0 }
 0x1e2   : > { %835 = vst.msk [vmem:[%s1451_s12 + $0x38] sm:$0xff] %vm579_vm2, %v827_v49  ;;  %v822_v58 = vmax.f32 %v814_v50, 0.0 }
 0x1e3   : > { %831 = vst.msk [vmem:[%s1451_s12 + $0x18] sm:$0xff] %vm579_vm2, %v823_v53  ;;  %834 = vst.msk [vmem:[%s1451_s12 + $0x30] sm:$0xff] %vm579_vm2, %v826_v56 }
 0x1e4   : > { %830 = vst.msk [vmem:[%s1451_s12 + $0x10] sm:$0xff] %vm579_vm2, %v822_v58 }
 0x1e5 PF: > { %s15_s18 = sadd.s32 1, %s1021_s18  }
 0x1e6   : > { %p12_p4 = scmp.ge.s32.totalorder %s15_s18, 4  }
 0x1e8   :  { %14 = sbr.rel (!%p12_p4) target bundleno = 1 (0x1), region = 73 }

// kernel: cam_forward.13
= control target key start
LH: loop header
LB: loop body
LE: loop exit
PB: predicated region body
PF: predicated region fallthrough
CT: control target
= control target key end

     0   :  { %s2303_s15 = smov 0   ;;  %s4149_s0 = inlined_call_operand.vmem [shape: f32[2,18,18,8], index: 0, kind: input, shape index: {}]   ;;  %s4150_s1 = inlined_call_operand.vmem [shape: f32[72,8], index: 1, kind: input, shape index: {}]   ;;  %s4151_s2 = inlined_call_operand.vmem [shape: f32[1,8], index: 2, kind: input, shape index: {}]   ;;  %s4152_s3 = inlined_call_operand.vmem [shape: f32[1,8], index: 3, kind: input, shape index: {}]   ;;  %s4153_s4 = inlined_call_operand.vmem [shape: f32[2,256,8], index: 4, kind: output, shape index: {}]  }
   0x1 LB: > { %s2048_s16 = sadd.s32 4294967295, %s2268_s15   ;;  %p2052_p0 = scmp.ge.s32.totalorder %s2268_s15, 1  ;;  %s2268_s15 = sphi %s2303_s15, %s14_s15  }
   0x2   : > { %p162_p1 = scmp.lt.s32.totalorder %s2268_s15, 3 }
   0x4   : > { %p163_p2 = pnand %p2052_p0, %p162_p1 }
   0x6   : > { %166 = sbr.rel (%p163_p2) target bundleno = 868 (0x364), region = 36 }
   0xd   : > { %p188_p3 = scmp.lt.s32.totalorder %s2048_s16, 1  ;;  %vm300_vm0 = vcmask 1046528   ;;  %s2270_s21 = smov 8   ;;  %vm381_vm1 = vcmask 1045504   ;;  %vm1256_vm2 = vcmask 64512   ;;  %vm1289_vm3 = vcmask 130048  }
   0xe   : > { %s2271_s22 = smov 16   ;;  %s2272_s23 = smov 24   ;;  %vm1322_vm4 = vcmask 195584   ;;  %vm1355_vm5 = vcmask 261120   ;;  %vm1388_vm6 = vcmask 326656   ;;  %vm1421_vm7 = vcmask 392192  }
   0xf   : > { %s4437_s16 = smov (!%p188_p3, %s2048_s16), 1  ;;  %s2273_s24 = smov 32   ;;  %vm1454_vm8 = vcmask 457728   ;;  %vm1487_vm9 = vcmask 523264   ;;  %vm1529_vm10 = vcmask 588800  }
  0x10   : > { %s2226_s17 = smul.u32 432, %s4437_s16  ;;  %s2274_s25 = smov 40  }
  0x11   : > { %s2275_s30 = smov 48   ;;  %s2276_s13 = smov 56  }
  0x12   : > { %s2317_s20 = scalar_lea.vmem %s4149_s0, %s2226_s17  ;;  %s2092_s27 = sshll.u32 %s4437_s16, 8 }
  0x13   : > { %v2320_v0 = vld [vmem:[%s2317_s20 + $0x18] sm:$0xff]  ;;  %v2323_v1 = vld [vmem:[%s2317_s20 + $0x20] sm:$0xff]  ;;  %v2331_v5 = vld [vmem:[%s2317_s20 + $0x8] sm:$0xff] }
  0x14   : > { %v2326_v2 = vld [vmem:[%s2317_s20] sm:$0xff]  ;;  %v306_v3 = vrot.slane %v2320_v0, 1  ;;  %v307_v4 = vrot.slane %v2323_v1, 1  ;;  %v2335_v7 = vld [vmem:[%s2317_s20 + $0x28] sm:$0x3]  ;;  %v302_v8 = vrot.slane %v2331_v5, 1 }
  0x15   : > { %v301_v6 = vrot.slane %v2326_v2, 1  ;;  %v309_v9 = vrot.slane %v2335_v7, 1  ;;  %v2340_v10 = vld [vmem:[%s2317_s20 + $0x10] sm:$0x3]  ;;  %v2343_v11 = vld [vmem:[%s2317_s20 + $0x38] sm:$0xff]  ;;  %v2373_v24 = vld [vmem:[%s2317_s20 + $0x48] sm:$0xff] }
  0x16   : > { %v2346_v12 = vsel %vm300_vm0, %v306_v3, %v307_v4  ;;  %v304_v13 = vrot.slane %v2340_v10, 1  ;;  %v2350_v14 = vld [vmem:[%s2317_s20 + $0x40] sm:$0x3]  ;;  %v2353_v15 = vld [vmem:[%s2317_s20 + $0x30] sm:$0xff]  ;;  %v312_v18 = vrot.slane %v2343_v11, 1  ;;  %v316_v29 = vrot.slane %v2373_v24, 1 }
  0x17   : > { %492 = vrot.lane.b32.xlu1 %v2346_v12, %s2270_s21  ;;  %v303_v16 = vsel %vm300_vm0, %v301_v6, %v302_v8  ;;  %v2360_v17 = vsel %vm300_vm0, %v307_v4, %v309_v9  ;;  %v314_v19 = vrot.slane %v2350_v14, 1  ;;  %v311_v21 = vrot.slane %v2353_v15, 1  ;;  %v2367_v22 = vld [vmem:[%s2317_s20 + $0x50] sm:$0xff]  ;;  %v2370_v23 = vld [vmem:[%s2317_s20 + $0x58] sm:$0x3]  ;;  %v2388_v30 = vld [vmem:[%s2317_s20 + $0x68] sm:$0xff] }
  0x18   : > { %488 = vrot.lane.b32.xlu0 %v303_v16, %s2270_s21  ;;  %v305_v20 = vsel %vm300_vm0, %v302_v8, %v304_v13  ;;  %v317_v26 = vrot.slane %v2367_v22, 1  ;;  %v319_v27 = vrot.slane %v2370_v23, 1  ;;  %v2391_v31 = vld [vmem:[%s2317_s20 + $0x70] sm:$0x3]  ;;  %v2394_v32 = vld [vmem:[%s2317_s20 + $0x60] sm:$0xff]  ;;  %v322_v34 = vrot.slane %v2388_v30, 1 }
  0x19   : > { %v2379_v25 = vsel %vm300_vm0, %v312_v18, %v314_v19  ;;  %v2384_v28 = vsel %vm300_vm0, %v311_v21, %v312_v18  ;;  %v324_v35 = vrot.slane %v2391_v31, 1  ;;  %v321_v37 = vrot.slane %v2394_v32, 1  ;;  %v2410_v38 = vld [vmem:[%s2317_s20 + $0x80] sm:$0xff]  ;;  %v2413_v39 = vld [vmem:[%s2317_s20 + $0x88] sm:$0x3]  ;;  %v2416_v40 = vld [vmem:[%s2317_s20 + $0x78] sm:$0xff] }
  0x1a   : > { %v2401_v33 = vsel %vm300_vm0, %v317_v26, %v319_v27  ;;  %v2406_v36 = vsel %vm300_vm0, %v316_v29, %v317_v26  ;;  %v327_v42 = vrot.slane %v2410_v38, 1  ;;  %v329_v43 = vrot.slane %v2413_v39, 1  ;;  %v2432_v46 = vld [vmem:[%s2317_s20 + $0x98] sm:$0xff]  ;;  %v2435_v47 = vld [vmem:[%s2317_s20 + $0xa0] sm:$0x3]  ;;  %v2438_v48 = vld [vmem:[%s2317_s20 + $0x90] sm:$0xff] }
  0x1b   : > { %494 = vrot.lane.b32.xlu1 %v2360_v17, %s2270_s21  ;;  %4259 = vst [vmem:[#allocation2_spill] sm:$0xff] %v2401_v33  ;;  %4260 = vst [vmem:[#allocation3_spill] sm:$0xff] %v2406_v36  ;;  %v2423_v41 = vsel %vm300_vm0, %v322_v34, %v324_v35  ;;  %v2428_v44 = vsel %vm300_vm0, %v321_v37, %v322_v34  ;;  %v326_v45 = vrot.slane %v2416_v40, 1  ;;  %v332_v50 = vrot.slane %v2432_v46, 1  ;;  %v2454_v54 = vld [vmem:[%s2317_s20 + $0xb0] sm:$0xff]  ;;  %v2460_v56 = vld [vmem:[%s2317_s20 + $0xa8] sm:$0xff] }
  0x1c   : > { %490 = vrot.lane.b32.xlu0 %v305_v20, %s2270_s21  ;;  %4261 = vst [vmem:[#allocation4_spill] sm:$0xff] %v2423_v41  ;;  %4262 = vst [vmem:[#allocation5_spill] sm:$0xff] %v2428_v44  ;;  %v2445_v49 = vsel %vm300_vm0, %v327_v42, %v329_v43  ;;  %v334_v51 = vrot.slane %v2435_v47, 1  ;;  %v331_v53 = vrot.slane %v2438_v48, 1  ;;  %v2457_v55 = vld [vmem:[%s2317_s20 + $0xb8] sm:$0x3] }
  0x1d   : > { %4263 = vst [vmem:[#allocation6_spill] sm:$0xff] %v2445_v49  ;;  %v2450_v52 = vsel %vm300_vm0, %v326_v45, %v327_v42  ;;  %v337_v58 = vrot.slane %v2454_v54, 1  ;;  %v339_v59 = vrot.slane %v2457_v55, 1  ;;  %v336_v61 = vrot.slane %v2460_v56, 1  ;;  %v2476_v62 = vld [vmem:[%s2317_s20 + $0xc8] sm:$0xff]  ;;  %v2482_v3 = vld [vmem:[%s2317_s20 + $0xc0] sm:$0xff] }
  0x1e   : > { %4264 = vst [vmem:[#allocation7_spill] sm:$0xff] %v2450_v52  ;;  %v2467_v57 = vsel %vm300_vm0, %v332_v50, %v334_v51  ;;  %v2472_v60 = vsel %vm300_vm0, %v331_v53, %v332_v50  ;;  %v2479_v63 = vld [vmem:[%s2317_s20 + $0xd0] sm:$0x3]  ;;  %v342_v6 = vrot.slane %v2476_v62, 1  ;;  %v341_v13 = vrot.slane %v2482_v3, 1  ;;  %v2498_v16 = vld [vmem:[%s2317_s20 + $0xe0] sm:$0xff] }
  0x1f   : > { %498 = vrot.lane.b32.xlu1 %v2379_v25, %s2270_s21  ;;  %4265 = vst [vmem:[#allocation8_spill] sm:$0xff] %v2467_v57  ;;  %4266 = vst [vmem:[#allocation9_spill] sm:$0xff] %v2472_v60  ;;  %v2489_v4 = vsel %vm300_vm0, %v337_v58, %v339_v59  ;;  %v344_v8 = vrot.slane %v2479_v63, 1  ;;  %v2494_v9 = vsel %vm300_vm0, %v336_v61, %v337_v58  ;;  %v2501_v18 = vld [vmem:[%s2317_s20 + $0xe8] sm:$0x3]  ;;  %v2504_v19 = vld [vmem:[%s2317_s20 + $0xd8] sm:$0xff] }
  0x20   : > { %496 = vrot.lane.b32.xlu0 %v2384_v28, %s2270_s21  ;;  %4267 = vst [vmem:[#allocation10_spill] sm:$0xff] %v2489_v4  ;;  %4268 = vst [vmem:[#allocation11_spill] sm:$0xff] %v2494_v9  ;;  %v347_v21 = vrot.slane %v2498_v16, 1  ;;  %v349_v26 = vrot.slane %v2501_v18, 1  ;;  %v2516_v27 = vsel %vm300_vm0, %v341_v13, %v342_v6  ;;  %v346_v29 = vrot.slane %v2504_v19, 1  ;;  %v2520_v34 = vld [vmem:[%s2317_s20 + $0xf8] sm:$0xff] }
  0x21   : > { %v2511_v20 = vsel %vm300_vm0, %v342_v6, %v344_v8  ;;  %4270 = vst [vmem:[#allocation13_spill] sm:$0xff] %v2516_v27  ;;  %v2523_v35 = vld [vmem:[%s2317_s20 + $0x100] sm:$0x3]  ;;  %v2526_v37 = vld [vmem:[%s2317_s20 + $0xf0] sm:$0xff]  ;;  %v352_v43 = vrot.slane %v2520_v34, 1  ;;  %v2548_v59 = vld [vmem:[%s2317_s20 + $0x108] sm:$0xff] }
  0x22   : > { %4269 = vst [vmem:[#allocation12_spill] sm:$0xff] %v2511_v20  ;;  %v2533_v42 = vsel %vm300_vm0, %v347_v21, %v349_v26  ;;  %v354_v45 = vrot.slane %v2523_v35, 1  ;;  %v2538_v50 = vsel %vm300_vm0, %v346_v29, %v347_v21  ;;  %v351_v51 = vrot.slane %v2526_v37, 1  ;;  %v2542_v53 = vld [vmem:[%s2317_s20 + $0x110] sm:$0xff]  ;;  %v2545_v58 = vld [vmem:[%s2317_s20 + $0x118] sm:$0x3] }
  0x23   : > { %502 = vrot.lane.b32.xlu1 %v2401_v33, %s2270_s21  ;;  %4271 = vst [vmem:[#allocation14_spill] sm:$0xff] %v2533_v42  ;;  %4272 = vst [vmem:[#allocation15_spill] sm:$0xff] %v2538_v50  ;;  %v357_v6 = vrot.slane %v2542_v53, 1  ;;  %v359_v8 = vrot.slane %v2545_v58, 1  ;;  %v356_v21 = vrot.slane %v2548_v59, 1  ;;  %v2564_v26 = vld [vmem:[%s2317_s20 + $0x128] sm:$0xff] }
  0x24   : > { %500 = vrot.lane.b32.xlu0 %v2406_v36, %s2270_s21  ;;  %v2555_v61 = vsel %vm300_vm0, %v352_v43, %v354_v45  ;;  %v2560_v13 = vsel %vm300_vm0, %v351_v51, %v352_v43  ;;  %4275 = vst [vmem:[#allocation18_spill] sm:$0xff] %v2564_v26  ;;  %v2567_v29 = vld [vmem:[%s2317_s20 + $0x130] sm:$0x3]  ;;  %v362_v43 = vrot.slane %v2564_v26, 1 }
  0x25   : > { %4273 = vst [vmem:[#allocation16_spill] sm:$0xff] %v2555_v61  ;;  %4274 = vst [vmem:[#allocation17_spill] sm:$0xff] %v2560_v13  ;;  %v2577_v45 = vsel %vm300_vm0, %v357_v6, %v359_v8  ;;  %v364_v51 = vrot.slane %v2567_v29, 1  ;;  %v2614_v33 = vld [vmem:[%s2317_s20 + $0x150] sm:$0xff] }
  0x26   : > { %4277 = vst [vmem:[#allocation20_spill] sm:$0xff] %v2577_v45  ;;  %4284 = vst [vmem:[#allocation27_spill] sm:$0xff] %v2614_v33 }
  0x27   : > { %506 = vrot.lane.b32.xlu1 %v2423_v41, %s2270_s21  ;;  %v2599_v8 = vsel %vm300_vm0, %v362_v43, %v364_v51  ;;  %v2608_v41 = vld [vmem:[%s2317_s20 + $0x158] sm:$0xff] }
  0x28   : > { %504 = vrot.lane.b32.xlu0 %v2428_v44, %s2270_s21  ;;  %4281 = vst [vmem:[#allocation24_spill] sm:$0xff] %v2599_v8  ;;  %4283 = vst [vmem:[#allocation26_spill] sm:$0xff] %v2608_v41  ;;  %v2611_v44 = vld [vmem:[%s2317_s20 + $0x160] sm:$0x3] }
  0x2b   : > { %510 = vrot.lane.b32.xlu1 %v2445_v49, %s2270_s21 }
  0x2c   : > { %508 = vrot.lane.b32.xlu0 %v2450_v52, %s2270_s21 }
  0x2f   : > { %514 = vrot.lane.b32.xlu1 %v2467_v57, %s2270_s21  ;;  %v2589_v57 = vld [vmem:[%s2317_s20 + $0x148] sm:$0x3] }
  0x30   : > { %512 = vrot.lane.b32.xlu0 %v2472_v60, %s2270_s21  ;;  %v2592_v60 = vld [vmem:[%s2317_s20 + $0x138] sm:$0xff] }
  0x31   : > { %4280 = vst [vmem:[#allocation23_spill] sm:$0xff] %v2592_v60  ;;  %v366_v52 = vrot.slane %v2592_v60, 1 }
  0x33   : > { %518 = vrot.lane.b32.xlu1 %v2489_v4, %s2270_s21 }
  0x34   : > { %516 = vrot.lane.b32.xlu0 %v2494_v9, %s2270_s21  ;;  %v2586_v9 = vld [vmem:[%s2317_s20 + $0x140] sm:$0xff] }
  0x35   : > { %4279 = vst [vmem:[#allocation22_spill] sm:$0xff] %v2586_v9 }
  0x37   : > { %522 = vrot.lane.b32.xlu1 %v2511_v20, %s2270_s21  ;;  %v2570_v20 = vld [vmem:[%s2317_s20 + $0x120] sm:$0xff] }
  0x38   : > { %520 = vrot.lane.b32.xlu0 %v2516_v27, %s2270_s21  ;;  %4276 = vst [vmem:[#allocation19_spill] sm:$0xff] %v2570_v20  ;;  %v2582_v27 = vsel %vm300_vm0, %v356_v21, %v357_v6  ;;  %v361_v4 = vrot.slane %v2570_v20, 1  ;;  %v367_v6 = vrot.slane %v2586_v9, 1  ;;  %v369_v21 = vrot.slane %v2589_v57, 1 }
  0x39   : > { %4278 = vst [vmem:[#allocation21_spill] sm:$0xff] %v2582_v27 }
  0x3a   : > { %v2604_v49 = vsel %vm300_vm0, %v361_v4, %v362_v43  ;;  %v2621_v51 = vsel %vm300_vm0, %v367_v6, %v369_v21  ;;  %v372_v4 = vrot.slane %v2608_v41, 1  ;;  %v374_v43 = vrot.slane %v2611_v44, 1 }
  0x3b   : > { %526 = vrot.lane.b32.xlu1 %v2533_v42, %s2270_s21  ;;  %4282 = vst [vmem:[#allocation25_spill] sm:$0xff] %v2604_v49  ;;  %4285 = vst [vmem:[#allocation28_spill] sm:$0xff] %v2621_v51 }
  0x3c   : > { %524 = vrot.lane.b32.xlu0 %v2538_v50, %s2270_s21  ;;  %v2643_v21 = vsel %vm300_vm0, %v372_v4, %v374_v43  ;;  %v383_v43 = vrot.slane %v2331_v5, 2  ;;  %v390_v5 = vrot.slane %v2335_v7, 2  ;;  %v392_v7 = vrot.slane %v2353_v15, 2 }
  0x3d   : > { %4289 = vst [vmem:[#allocation32_spill] sm:$0xff] %v2643_v21 }
  0x3f   : > { %530 = vrot.lane.b32.xlu1 %v2555_v61, %s2270_s21  ;;  %v2630_v61 = vld [vmem:[%s2317_s20 + $0x170] sm:$0xff] }
  0x40   : > { %528 = vrot.lane.b32.xlu0 %v2560_v13, %s2270_s21  ;;  %4287 = vst [vmem:[#allocation30_spill] sm:$0xff] %v2630_v61  ;;  %v2633_v13 = vld [vmem:[%s2317_s20 + $0x178] sm:$0x3] }
  0x43   : > { %534 = vrot.lane.b32.xlu1 %v2577_v45, %s2270_s21  ;;  %v2626_v45 = vsel %vm300_vm0, %v366_v52, %v367_v6  ;;  %v377_v52 = vrot.slane %v2630_v61, 1  ;;  %v379_v6 = vrot.slane %v2633_v13, 1 }
  0x44   : > { %532 = vrot.lane.b32.xlu0 %v2582_v27, %s2270_s21  ;;  %4286 = vst [vmem:[#allocation29_spill] sm:$0xff] %v2626_v45  ;;  %v371_v27 = vrot.slane %v2614_v33, 1 }
  0x47   : > { %538 = vrot.lane.b32.xlu1 %v2599_v8, %s2270_s21  ;;  %v2636_v8 = vld [vmem:[%s2317_s20 + $0x168] sm:$0xff] }
  0x48   : > { %536 = vrot.lane.b32.xlu0 %v2604_v49, %s2270_s21  ;;  %4288 = vst [vmem:[#allocation31_spill] sm:$0xff] %v2636_v8  ;;  %v2648_v49 = vsel %vm300_vm0, %v371_v27, %v372_v4  ;;  %v376_v42 = vrot.slane %v2636_v8, 1  ;;  %v382_v27 = vrot.slane %v2326_v2, 2 }
  0x49   : > { %4290 = vst [vmem:[#allocation33_spill] sm:$0xff] %v2648_v49 }
  0x4a   : > { %v2661_v36 = vsel %vm300_vm0, %v376_v42, %v377_v52  ;;  %v387_v42 = vrot.slane %v2320_v0, 2 }
  0x4b   : > { %542 = vrot.lane.b32.xlu1 %v2621_v51, %s2270_s21  ;;  %v2656_v51 = vsel %vm300_vm0, %v377_v52, %v379_v6  ;;  %4292 = vst [vmem:[#allocation35_spill] sm:$0xff] %v2661_v36  ;;  %v388_v6 = vrot.slane %v2323_v1, 2  ;;  %v393_v52 = vrot.slane %v2343_v11, 2 }
  0x4c   : > { %540 = vrot.lane.b32.xlu0 %v2626_v45, %s2270_s21  ;;  %4291 = vst [vmem:[#allocation34_spill] sm:$0xff] %v2656_v51  ;;  %v385_v45 = vrot.slane %v2340_v10, 2  ;;  %v384_v10 = vsel %vm381_vm1, %v382_v27, %v383_v43  ;;  %v398_v27 = vrot.slane %v2367_v22, 2 }
  0x4d   : > { %v2676_v2 = vsel %vm381_vm1, %v388_v6, %v390_v5 }
  0x4e   : > { %v386_v4 = vsel %vm381_vm1, %v383_v43, %v385_v45  ;;  %v395_v45 = vrot.slane %v2350_v14, 2  ;;  %v2694_v14 = vsel %vm381_vm1, %v392_v7, %v393_v52  ;;  %v408_v7 = vrot.slane %v2410_v38, 2 }
  0x4f   : > { %546 = vrot.lane.b32.xlu1 %v2643_v21, %s2270_s21  ;;  %v420_v21 = vrot.slane %v2457_v55, 2 }
  0x50   : > { %544 = vrot.lane.b32.xlu0 %v2648_v49, %s2270_s21  ;;  %v2689_v43 = vsel %vm381_vm1, %v393_v52, %v395_v45  ;;  %v402_v52 = vrot.slane %v2394_v32, 2  ;;  %v425_v49 = vrot.slane %v2479_v63, 2 }
  0x53   : > { %550 = vrot.lane.b32.xlu1 %v2656_v51, %s2270_s21  ;;  %v2681_v51 = vsel %vm381_vm1, %v387_v42, %v388_v6  ;;  %v397_v6 = vrot.slane %v2373_v24, 2  ;;  %v405_v42 = vrot.slane %v2391_v31, 2 }
  0x54   : > { %548 = vrot.lane.b32.xlu0 %v2661_v36, %s2270_s21  ;;  %v415_v36 = vrot.slane %v2435_v47, 2 }
  0x57   : > { %586 = vrot.lane.b32.xlu1 %v386_v4, %s2271_s22  ;;  %v400_v4 = vrot.slane %v2370_v23, 2  ;;  %v2707_v23 = vsel %vm381_vm1, %v397_v6, %v398_v27 }
  0x58   : > { %584 = vrot.lane.b32.xlu0 %v384_v10, %s2271_s22  ;;  %v403_v10 = vrot.slane %v2388_v30, 2 }
  0x59   : > { %v2702_v5 = vsel %vm381_vm1, %v398_v27, %v400_v4  ;;  %v410_v4 = vrot.slane %v2413_v39, 2  ;;  %v407_v27 = vrot.slane %v2416_v40, 2 }
  0x5a   : > { %v2715_v45 = vsel %vm381_vm1, %v403_v10, %v405_v42  ;;  %v2720_v31 = vsel %vm381_vm1, %v402_v52, %v403_v10  ;;  %v413_v42 = vrot.slane %v2432_v46, 2  ;;  %v412_v10 = vrot.slane %v2438_v48, 2 }
  0x5b   : > { %590 = vrot.lane.b32.xlu1 %v2676_v2, %s2271_s22  ;;  %4293 = vst [vmem:[#allocation36_spill] sm:$0xff] %v2715_v45  ;;  %4294 = vst [vmem:[#allocation37_spill] sm:$0xff] %v2720_v31  ;;  %v2728_v6 = vsel %vm381_vm1, %v408_v7, %v410_v4  ;;  %v2733_v39 = vsel %vm381_vm1, %v407_v27, %v408_v7  ;;  %v418_v4 = vrot.slane %v2454_v54, 2  ;;  %v417_v7 = vrot.slane %v2460_v56, 2 }
  0x5c   : > { %588 = vrot.lane.b32.xlu0 %v2681_v51, %s2271_s22  ;;  %4295 = vst [vmem:[#allocation38_spill] sm:$0xff] %v2728_v6  ;;  %4296 = vst [vmem:[#allocation39_spill] sm:$0xff] %v2733_v39  ;;  %v2741_v52 = vsel %vm381_vm1, %v413_v42, %v415_v36  ;;  %v2746_v47 = vsel %vm381_vm1, %v412_v10, %v413_v42  ;;  %v423_v36 = vrot.slane %v2476_v62, 2  ;;  %v422_v42 = vrot.slane %v2482_v3, 2 }
  0x5d   : > { %4297 = vst [vmem:[#allocation40_spill] sm:$0xff] %v2741_v52  ;;  %4298 = vst [vmem:[#allocation41_spill] sm:$0xff] %v2746_v47  ;;  %v2754_v27 = vsel %vm381_vm1, %v418_v4, %v420_v21  ;;  %v2759_v55 = vsel %vm381_vm1, %v417_v7, %v418_v4  ;;  %v428_v21 = vrot.slane %v2498_v16, 2  ;;  %v427_v4 = vrot.slane %v2504_v19, 2 }
  0x5e   : > { %4299 = vst [vmem:[#allocation42_spill] sm:$0xff] %v2754_v27  ;;  %4300 = vst [vmem:[#allocation43_spill] sm:$0xff] %v2759_v55  ;;  %v2767_v10 = vsel %vm381_vm1, %v423_v36, %v425_v49  ;;  %v2772_v63 = vsel %vm381_vm1, %v422_v42, %v423_v36  ;;  %v433_v49 = vrot.slane %v2520_v34, 2  ;;  %v432_v36 = vrot.slane %v2526_v37, 2 }
  0x5f   : > { %594 = vrot.lane.b32.xlu1 %v2689_v43, %s2271_s22  ;;  %4301 = vst [vmem:[#allocation44_spill] sm:$0xff] %v2767_v10  ;;  %4302 = vst [vmem:[#allocation45_spill] sm:$0xff] %v2772_v63 }
  0x60   : > { %592 = vrot.lane.b32.xlu0 %v2694_v14, %s2271_s22 }
  0x63   : > { %598 = vrot.lane.b32.xlu1 %v2702_v5, %s2271_s22 }
  0x64   : > { %596 = vrot.lane.b32.xlu0 %v2707_v23, %s2271_s22 }
  0x67   : > { %602 = vrot.lane.b32.xlu1 %v2715_v45, %s2271_s22 }
  0x68   : > { %600 = vrot.lane.b32.xlu0 %v2720_v31, %s2271_s22 }
  0x6b   : > { %606 = vrot.lane.b32.xlu1 %v2728_v6, %s2271_s22 }
  0x6c   : > { %604 = vrot.lane.b32.xlu0 %v2733_v39, %s2271_s22 }
  0x6f   : > { %610 = vrot.lane.b32.xlu1 %v2741_v52, %s2271_s22  ;;  %v430_v52 = vrot.slane %v2501_v18, 2  ;;  %v2785_v18 = vsel %vm381_vm1, %v427_v4, %v428_v21 }
  0x70   : > { %608 = vrot.lane.b32.xlu0 %v2746_v47, %s2271_s22  ;;  %4304 = vst [vmem:[#allocation47_spill] sm:$0xff] %v2785_v18  ;;  %v455_v47 = vrot.slane %v2611_v44, 2  ;;  %v458_v44 = vrot.slane %v2630_v61, 2 }
  0x71   : > { %v2780_v7 = vsel %vm381_vm1, %v428_v21, %v430_v52  ;;  %v438_v52 = vrot.slane %v2542_v53, 2  ;;  %v437_v21 = vrot.slane %v2548_v59, 2 }
  0x72   : > { %4303 = vst [vmem:[#allocation46_spill] sm:$0xff] %v2780_v7 }
  0x73   : > { %614 = vrot.lane.b32.xlu1 %v2754_v27, %s2271_s22  ;;  %v435_v27 = vrot.slane %v2523_v35, 2  ;;  %v2798_v35 = vsel %vm381_vm1, %v432_v36, %v433_v49 }
  0x74   : > { %612 = vrot.lane.b32.xlu0 %v2759_v55, %s2271_s22  ;;  %v450_v55 = vrot.slane %v2589_v57, 2 }
  0x75   : > { %v2793_v42 = vsel %vm381_vm1, %v433_v49, %v435_v27  ;;  %v443_v27 = vrot.slane %v2564_v26, 2  ;;  %v442_v49 = vrot.slane %v2570_v20, 2 }
  0x77   : > { %618 = vrot.lane.b32.xlu1 %v2767_v10, %s2271_s22  ;;  %v440_v10 = vrot.slane %v2545_v58, 2  ;;  %v2811_v58 = vsel %vm381_vm1, %v437_v21, %v438_v52 }
  0x78   : > { %616 = vrot.lane.b32.xlu0 %v2772_v63, %s2271_s22  ;;  %v445_v63 = vrot.slane %v2567_v29, 2  ;;  %v2824_v29 = vsel %vm381_vm1, %v442_v49, %v443_v27 }
  0x79   : > { %v2806_v4 = vsel %vm381_vm1, %v438_v52, %v440_v10  ;;  %v448_v10 = vrot.slane %v2586_v9, 2  ;;  %4306 = vst [vmem:[#allocation49_spill] sm:$0xff] %v2824_v29  ;;  %v447_v52 = vrot.slane %v2592_v60, 2 }
  0x7a   : > { %v2819_v36 = vsel %vm381_vm1, %v443_v27, %v445_v63  ;;  %v453_v63 = vrot.slane %v2608_v41, 2  ;;  %v452_v27 = vrot.slane %v2614_v33, 2 }
  0x7b   : > { %622 = vrot.lane.b32.xlu1 %v2780_v7, %s2271_s22  ;;  %4305 = vst [vmem:[#allocation48_spill] sm:$0xff] %v2819_v36  ;;  %v2832_v21 = vsel %vm381_vm1, %v448_v10, %v450_v55  ;;  %v2839_v57 = vsel %vm381_vm1, %v447_v52, %v448_v10  ;;  %v457_v52 = vrot.slane %v2636_v8, 2 }
  0x7c   : > { %620 = vrot.lane.b32.xlu0 %v2785_v18, %s2271_s22  ;;  %4307 = vst [vmem:[#allocation50_spill] sm:$0xff] %v2832_v21  ;;  %4309 = vst [vmem:[#allocation52_spill] sm:$0xff] %v2839_v57  ;;  %v2849_v55 = vsel %vm381_vm1, %v453_v63, %v455_v47  ;;  %v2856_v10 = vsel %vm381_vm1, %v452_v27, %v453_v63 }
  0x7d   : > { %4311 = vst [vmem:[#allocation54_spill] sm:$0xff] %v2849_v55  ;;  %4313 = vst [vmem:[#allocation56_spill] sm:$0xff] %v2856_v10 }
  0x7f   : > { %626 = vrot.lane.b32.xlu1 %v2793_v42, %s2271_s22 }
  0x80   : > { %624 = vrot.lane.b32.xlu0 %v2798_v35, %s2271_s22 }
  0x83   : > { %630 = vrot.lane.b32.xlu1 %v2806_v4, %s2271_s22 }
  0x84   : > { %628 = vrot.lane.b32.xlu0 %v2811_v58, %s2271_s22 }
  0x87   : > { %634 = vrot.lane.b32.xlu1 %v2819_v36, %s2271_s22 }
  0x88   : > { %632 = vrot.lane.b32.xlu0 %v2824_v29, %s2271_s22 }
  0x89   : > { %v2836_v6 = vpop.permute.xlu1 %492 }
  0x8a   : > { %4308 = vst [vmem:[#allocation51_spill] sm:$0xff] %v2836_v6  ;;  %v2842_v49 = vpop.permute.xlu0 %488  ;;  %v460_v6 = vrot.slane %v2633_v13, 2  ;;  %v2871_v13 = vsel %vm381_vm1, %v457_v52, %v458_v44 }
  0x8b   : > { %4310 = vst [vmem:[#allocation53_spill] sm:$0xff] %v2842_v49  ;;  %638 = vrot.lane.b32.xlu1 %v2832_v21, %s2271_s22  ;;  %4316 = vst [vmem:[#allocation59_spill] sm:$0xff] %v2871_v13 }
  0x8c   : > { %636 = vrot.lane.b32.xlu0 %v2839_v57, %s2271_s22  ;;  %v2866_v47 = vsel %vm381_vm1, %v458_v44, %v460_v6 }
  0x8d   : > { %v2853_v39 = vpop.permute.xlu1 %494  ;;  %4315 = vst [vmem:[#allocation58_spill] sm:$0xff] %v2866_v47 }
  0x8e   : > { %4312 = vst [vmem:[#allocation55_spill] sm:$0xff] %v2853_v39  ;;  %v2859_v49 = vpop.permute.xlu0 %490 }
  0x8f   : > { %4314 = vst [vmem:[#allocation57_spill] sm:$0xff] %v2859_v49  ;;  %642 = vrot.lane.b32.xlu1 %v2849_v55, %s2271_s22 }
  0x90   : > { %640 = vrot.lane.b32.xlu0 %v2856_v10, %s2271_s22 }
  0x91   : > { %v2868_v21 = vpop.permute.xlu1 %498 }
  0x92   : > { %v2873_v63 = vpop.permute.xlu0 %496 }
  0x93   : > { %646 = vrot.lane.b32.xlu1 %v2866_v47, %s2271_s22 }
  0x94   : > { %644 = vrot.lane.b32.xlu0 %v2871_v13, %s2271_s22 }
  0x95   : > { %v2879_v27 = vpop.permute.xlu1 %502 }
  0x96   : > { %v2881_v55 = vpop.permute.xlu0 %500 }
  0x97   : > { %682 = vrot.lane.b32.xlu1 %v2323_v1, %s2272_s23 }
  0x98   : > { %680 = vrot.lane.b32.xlu0 %v2320_v0, %s2272_s23 }
  0x99   : > { %v2887_v6 = vpop.permute.xlu1 %506 }
  0x9a   : > { %v2889_v44 = vpop.permute.xlu0 %504 }
  0x9b   : > { %686 = vrot.lane.b32.xlu1 %v2343_v11, %s2272_s23 }
  0x9c   : > { %684 = vrot.lane.b32.xlu0 %v2353_v15, %s2272_s23 }
  0x9d   : > { %v2895_v52 = vpop.permute.xlu1 %510 }
  0x9e   : > { %v2897_v47 = vpop.permute.xlu0 %508 }
  0x9f   : > { %690 = vrot.lane.b32.xlu1 %v2367_v22, %s2272_s23 }
  0xa0   : > { %688 = vrot.lane.b32.xlu0 %v2373_v24, %s2272_s23 }
  0xa1   : > { %v2903_v0 = vpop.permute.xlu1 %514 }
  0xa2   : > { %v2905_v1 = vpop.permute.xlu0 %512 }
  0xa3   : > { %694 = vrot.lane.b32.xlu1 %v2388_v30, %s2272_s23 }
  0xa4   : > { %692 = vrot.lane.b32.xlu0 %v2394_v32, %s2272_s23 }
  0xa5   : > { %v2911_v13 = vpop.permute.xlu1 %518 }
  0xa6   : > { %v2913_v39 = vpop.permute.xlu0 %516 }
  0xa7   : > { %698 = vrot.lane.b32.xlu1 %v2410_v38, %s2272_s23 }
  0xa8   : > { %696 = vrot.lane.b32.xlu0 %v2416_v40, %s2272_s23 }
  0xa9   : > { %v2919_v10 = vpop.permute.xlu1 %522 }
  0xaa   : > { %4317 = vst [vmem:[#allocation60_spill] sm:$0xff] %v2919_v10  ;;  %v2921_v57 = vpop.permute.xlu0 %520 }
  0xab   : > { %4318 = vst [vmem:[#allocation61_spill] sm:$0xff] %v2921_v57  ;;  %702 = vrot.lane.b32.xlu1 %v2432_v46, %s2272_s23 }
  0xac   : > { %700 = vrot.lane.b32.xlu0 %v2438_v48, %s2272_s23 }
  0xad   : > { %v2927_v49 = vpop.permute.xlu1 %526 }
  0xae   : > { %4319 = vst [vmem:[#allocation62_spill] sm:$0xff] %v2927_v49  ;;  %v2929_v45 = vpop.permute.xlu0 %524 }
  0xaf   : > { %4320 = vst [vmem:[#allocation63_spill] sm:$0xff] %v2929_v45  ;;  %706 = vrot.lane.b32.xlu1 %v2454_v54, %s2272_s23 }
  0xb0   : > { %704 = vrot.lane.b32.xlu0 %v2460_v56, %s2272_s23 }
  0xb1   : > { %v2935_v36 = vpop.permute.xlu1 %530 }
  0xb2   : > { %v2937_v10 = vpop.permute.xlu0 %528 }
  0xb3   : > { %710 = vrot.lane.b32.xlu1 %v2476_v62, %s2272_s23 }
  0xb4   : > { %708 = vrot.lane.b32.xlu0 %v2482_v3, %s2272_s23 }
  0xb5   : > { %v2943_v57 = vpop.permute.xlu1 %534 }
  0xb6   : > { %v2945_v49 = vpop.permute.xlu0 %532 }
  0xb7   : > { %714 = vrot.lane.b32.xlu1 %v2498_v16, %s2272_s23 }
  0xb8   : > { %712 = vrot.lane.b32.xlu0 %v2504_v19, %s2272_s23 }
  0xb9   : > { %v2951_v45 = vpop.permute.xlu1 %538 }
  0xba   : > { %4321 = vst [vmem:[#allocation64_spill] sm:$0xff] %v2951_v45  ;;  %v2953_v31 = vpop.permute.xlu0 %536 }
  0xbb   : > { %4322 = vst [vmem:[#allocation65_spill] sm:$0xff] %v2953_v31  ;;  %718 = vrot.lane.b32.xlu1 %v2520_v34, %s2272_s23 }
  0xbc   : > { %716 = vrot.lane.b32.xlu0 %v2526_v37, %s2272_s23 }
  0xbd   : > { %v2959_v62 = vpop.permute.xlu1 %542 }
  0xbe   : > { %4323 = vst [vmem:[#allocation66_spill] sm:$0xff] %v2959_v62  ;;  %v2961_v3 = vpop.permute.xlu0 %540 }
  0xbf   : > { %4324 = vst [vmem:[#allocation67_spill] sm:$0xff] %v2961_v3  ;;  %722 = vrot.lane.b32.xlu1 %v2542_v53, %s2272_s23 }
  0xc0   : > { %720 = vrot.lane.b32.xlu0 %v2548_v59, %s2272_s23 }
  0xc1   : > { %v2967_v16 = vpop.permute.xlu1 %546 }
  0xc2   : > { %4325 = vst [vmem:[#allocation68_spill] sm:$0xff] %v2967_v16  ;;  %v2969_v19 = vpop.permute.xlu0 %544 }
  0xc3   : > { %4326 = vst [vmem:[#allocation69_spill] sm:$0xff] %v2969_v19  ;;  %726 = vrot.lane.b32.xlu1 %v2564_v26, %s2272_s23  ;;  %v1521_v26 = vld [vmem:[%s4150_s1 + $0x8] sm:$0xff] }
  0xc4   : > { %724 = vrot.lane.b32.xlu0 %v2570_v20, %s2272_s23  ;;  %v1528_v20 = vld [vmem:[%s4150_s1 + $0x40] sm:$0xff] }
  0xc5   : > { %v2975_v29 = vpop.permute.xlu1 %550 }
  0xc6   : > { %4327 = vst [vmem:[#allocation70_spill] sm:$0xff] %v2975_v29  ;;  %v2977_v3 = vpop.permute.xlu0 %548 }
  0xc7   : > { %4328 = vst [vmem:[#allocation71_spill] sm:$0xff] %v2977_v3  ;;  %730 = vrot.lane.b32.xlu1 %v2586_v9, %s2272_s23  ;;  %v3000_v3 = vld [vmem:[%s2317_s20 + $0x188] sm:$0xff] }
  0xc8   : > { %728 = vrot.lane.b32.xlu0 %v2592_v60, %s2272_s23  ;;  %4333 = vst [vmem:[#allocation76_spill] sm:$0xff] %v3000_v3  ;;  %v4336_v60 = vld [vmem:[#allocation14_spill] sm:$0xff] }
  0xc9   : > { %v2983_v16 = vpop.permute.xlu1 %586 }
  0xca   : > { %4329 = vst [vmem:[#allocation72_spill] sm:$0xff] %v2983_v16  ;;  %v2985_v19 = vpop.permute.xlu0 %584 }
  0xcb   : > { %4330 = vst [vmem:[#allocation73_spill] sm:$0xff] %v2985_v19  ;;  %734 = vrot.lane.b32.xlu1 %v2608_v41, %s2272_s23  ;;  %v3005_v19 = vld [vmem:[%s2317_s20 + $0x180] sm:$0xff] }
  0xcc   : > { %732 = vrot.lane.b32.xlu0 %v2614_v33, %s2272_s23  ;;  %4334 = vst [vmem:[#allocation77_spill] sm:$0xff] %v3005_v19 }
  0xcd   : > { %v2991_v62 = vpop.permute.xlu1 %590 }
  0xce   : > { %4331 = vst [vmem:[#allocation74_spill] sm:$0xff] %v2991_v62  ;;  %v2993_v29 = vpop.permute.xlu0 %588 }
  0xcf   : > { %4332 = vst [vmem:[#allocation75_spill] sm:$0xff] %v2993_v29  ;;  %738 = vrot.lane.b32.xlu1 %v2630_v61, %s2272_s23 }
  0xd0   : > { %736 = vrot.lane.b32.xlu0 %v2636_v8, %s2272_s23 }
  0xd1   : > { %v3002_v16 = vpop.permute.xlu1 %594 }
  0xd2   : > { %v3007_v41 = vpop.permute.xlu0 %592 }
  0xd3   : > { %742 = vrot.lane.b32.xlu1 %v3000_v3, %s2272_s23 }
  0xd4   : > { %740 = vrot.lane.b32.xlu0 %v3005_v19, %s2272_s23  ;;  %s2277_s23 = smov 64  }
  0xd5   : > { %v3013_v62 = vpop.permute.xlu1 %598 }
  0xd6   : > { %v3015_v29 = vpop.permute.xlu0 %596 }
  0xd7   : > { %778 = vrot.lane.b32.xlu1 %v2360_v17, %s2273_s24  ;;  %v4335_v17 = vld [vmem:[#allocation3_spill] sm:$0xff] }
  0xd8   : > { %776 = vrot.lane.b32.xlu0 %v2346_v12, %s2273_s24 }
  0xd9   : > { %v3021_v8 = vpop.permute.xlu1 %602 }
  0xda   : > { %v3023_v61 = vpop.permute.xlu0 %600 }
  0xdb   : > { %782 = vrot.lane.b32.xlu1 %v2379_v25, %s2273_s24 }
  0xdc   : > { %780 = vrot.lane.b32.xlu0 %v2384_v28, %s2273_s24 }
  0xdd   : > { %v3029_v3 = vpop.permute.xlu1 %606 }
  0xde   : > { %v3031_v19 = vpop.permute.xlu0 %604 }
  0xdf   : > { %808 = vrot.lane.b32.xlu1 %v2538_v50, %s2273_s24  ;;  %v1520_v50 = vld [vmem:[%s4150_s1] sm:$0xff] }
  0xe0   : > { %784 = vrot.lane.b32.xlu0 %v4335_v17, %s2273_s24 }
  0xe1   : > { %v3037_v12 = vpop.permute.xlu1 %610 }
  0xe2   : > { %v3039_v33 = vpop.permute.xlu0 %608 }
  0xe3   : > { %872 = vrot.lane.b32.xlu1 %v2681_v51, %s2274_s25  ;;  %v2200_v51 = vpack.c.bf16 %v1521_v26, %v1520_v50 }
  0xe4   : > { %810 = vrot.lane.b32.xlu0 %v4336_v60, %s2273_s24 }
  0xe5   : > { %v3045_v9 = vpop.permute.xlu1 %614  ;;  %2201 = vmatprep.subr.bf16.mxu0 %v2200_v51  ;;  %2216 = vmatprep.subr.bf16.mxu1 %v2200_v51 }
  0xe6   : > { %v3047_v31 = vpop.permute.xlu0 %612  ;;  %2203 = vmatpush3.bf16.msra.mxu0 %v2200_v51  ;;  %2221 = vmatpush3.bf16.msra.mxu1 %v2200_v51 }
  0xe7   : > { %874 = vrot.lane.b32.xlu1 %v2676_v2, %s2274_s25  ;;  %v1522_v2 = vld [vmem:[%s4150_s1 + $0x10] sm:$0xff] }
  0xe8   : > { %904 = vrot.lane.b32.xlu0 %v2785_v18, %s2274_s25  ;;  %v1523_v18 = vld [vmem:[%s4150_s1 + $0x18] sm:$0xff] }
  0xe9   : > { %v3059_v60 = vpop.permute.xlu1 %618  ;;  %v2204_v50 = vpack.c.bf16 %v1523_v18, %v1522_v2 }
  0xea   : > { %4337 = vst [vmem:[#allocation3_spill] sm:$0xff] %v3059_v60  ;;  %v3061_v45 = vpop.permute.xlu0 %616 }
  0xeb   : > { %4338 = vst [vmem:[#allocation78_spill] sm:$0xff] %v3061_v45  ;;  %968 = vrot.lane.b32.xlu1 %v2353_v15, %s2275_s30  ;;  %2205 = vmatprep.subr.bf16.mxu0 %v2204_v50  ;;  %v1524_v45 = vld [vmem:[%s4150_s1 + $0x20] sm:$0xff] }
  0xec   : > { %906 = vrot.lane.b32.xlu0 %v2780_v7, %s2274_s25  ;;  %2217 = vmatprep.subr.bf16.mxu1 %v2204_v50  ;;  %v1525_v7 = vld [vmem:[%s4150_s1 + $0x28] sm:$0xff] }
  0xed   : > { %v3073_v26 = vpop.permute.xlu1 %622  ;;  %2207 = vmatpush3.bf16.msra.mxu0 %v2204_v50  ;;  %v2208_v18 = vpack.c.bf16 %v1525_v7, %v1524_v45  ;;  %2222 = vmatpush3.bf16.msra.mxu1 %v2204_v50  ;;  %v1527_v45 = vld [vmem:[%s4150_s1 + $0x38] sm:$0xff] }
  0xee   : > { %4339 = vst [vmem:[#allocation79_spill] sm:$0xff] %v3073_v26  ;;  %v3075_v60 = vpop.permute.xlu0 %620  ;;  %v1526_v26 = vld [vmem:[%s4150_s1 + $0x30] sm:$0xff] }
  0xef   : > { %4340 = vst [vmem:[#allocation80_spill] sm:$0xff] %v3075_v60  ;;  %970 = vrot.lane.b32.xlu1 %v2343_v11, %s2275_s30  ;;  %2209 = vmatprep.subr.bf16.mxu0 %v2208_v18  ;;  %v2212_v7 = vpack.c.bf16 %v1527_v45, %v1526_v26  ;;  %v4344_v45 = vld [vmem:[#allocation16_spill] sm:$0xff] }
  0xf0   : > { %1000 = vrot.lane.b32.xlu0 %v2526_v37, %s2275_s30  ;;  %2218 = vmatprep.subr.bf16.mxu1 %v2208_v18 }
  0xf1   : > { %v3087_v51 = vpop.permute.xlu1 %626  ;;  %2211 = vmatpush3.bf16.msra.mxu0 %v2208_v18  ;;  %2223 = vmatpush3.bf16.msra.mxu1 %v2208_v18 }
  0xf2   : > { %v3089_v2 = vpop.permute.xlu0 %624  ;;  %2213 = vmatprep.subr.bf16.mxu0 %v2212_v7  ;;  %2219 = vmatprep.subr.bf16.mxu1 %v2212_v7 }
  0xf3   : > { %1064 = vrot.lane.b32.xlu1 %v2384_v28, %s2276_s13  ;;  %v4342_v28 = vld [vmem:[#allocation17_spill] sm:$0xff] }
  0xf4   : > { %1002 = vrot.lane.b32.xlu0 %v2520_v34, %s2275_s30 }
  0xf5   : > { %v3101_v50 = vpop.permute.xlu1 %630  ;;  %2215 = vmatpush3.bf16.msra.mxu0 %v2212_v7  ;;  %2224 = vmatpush3.bf16.msra.mxu1 %v2212_v7 }
  0xf6   : > { %v3103_v60 = vpop.permute.xlu0 %628  ;;  %2150 = vmatprep.subr.mxu0 %v1528_v20  ;;  %2220 = vmatprep.subr.mxu1 %v1528_v20 }
  0xf7   : > { %4341 = vst [vmem:[#allocation81_spill] sm:$0xff] %v3103_v60  ;;  %812 = vrot.lane.b32.xlu1 %v4342_v28, %s2273_s24 }
  0xf8   : > { %1096 = vrot.lane.b32.xlu0 %v4342_v28, %s2276_s13 }
  0xf9   : > { %v3112_v26 = vpop.permute.xlu1 %634  ;;  %2151 = vmatpush3.msra.mxu0 %v1528_v20  ;;  %2225 = vmatpush3.msra.mxu1 %v1528_v20 }
  0xfa   : > { %v3114_v18 = vpop.permute.xlu0 %632 }
  0xfb   : > { %4343 = vst [vmem:[#allocation17_spill] sm:$0xff] %v3114_v18  ;;  %1098 = vrot.lane.b32.xlu1 %v4344_v45, %s2276_s13 }
  0xfc   : > { %1066 = vrot.lane.b32.xlu0 %v2379_v25, %s2276_s13 }
  0xfd   : > { %v3120_v28 = vpop.permute.xlu1 %638 }
  0xfe   : > { %v3122_v60 = vpop.permute.xlu0 %636 }
  0xff   : > { %4345 = vst [vmem:[#allocation16_spill] sm:$0xff] %v3122_v60  ;;  %1192 = vrot.lane.b32.xlu1 %v2798_v35, %s2277_s23 }
 0x100   : > { %1160 = vrot.lane.b32.xlu0 %v2694_v14, %s2277_s23 }
 0x101   : > { %v3128_v7 = vpop.permute.xlu1 %642 }
 0x102   : > { %4346 = vst [vmem:[#allocation82_spill] sm:$0xff] %v3128_v7  ;;  %v3130_v18 = vpop.permute.xlu0 %640 }
 0x103   : > { %876 = vrot.lane.b32.xlu1 %v2694_v14, %s2274_s25 }
 0x104   : > { %814 = vrot.lane.b32.xlu0 %v4344_v45, %s2273_s24 }
 0x105   : > { %v3136_v25 = vpop.permute.xlu1 %646 }
 0x106   : > { %v3138_v20 = vpop.permute.xlu0 %644 }
 0x107   : > { %1162 = vrot.lane.b32.xlu1 %v2689_v43, %s2277_s23 }
 0x108   : > { %908 = vrot.lane.b32.xlu0 %v2798_v35, %s2274_s25  ;;  %v1262_v35 = vsel %vm1256_vm2, %v2343_v11, %v2868_v21 }
 0x109   : > { %v3144_v60 = vpop.permute.xlu1 %682 }
 0x10a   : > { %4347 = vst [vmem:[#allocation83_spill] sm:$0xff] %v3144_v60  ;;  %v3146_v7 = vpop.permute.xlu0 %680 }
 0x10b   : > { %4348 = vst [vmem:[#allocation84_spill] sm:$0xff] %v3146_v7  ;;  %878 = vrot.lane.b32.xlu1 %v2689_v43, %s2274_s25  ;;  %v1261_v43 = vsel %vm1256_vm2, %v2353_v15, %v2873_v63  ;;  %v1264_v15 = vsel %vm1256_vm2, %v2367_v22, %v2879_v27 }
 0x10c   : > { %1194 = vrot.lane.b32.xlu0 %v2793_v42, %s2277_s23  ;;  %v1294_v60 = vsel %vm1289_vm3, %v1261_v43, %v3007_v41  ;;  %v1263_v41 = vsel %vm1256_vm2, %v2373_v24, %v2881_v55 }
 0x10d   : > { %v3152_v14 = vpop.permute.xlu1 %686 }
 0x10e   : > { %4349 = vst [vmem:[#allocation85_spill] sm:$0xff] %v3152_v14  ;;  %v3154_v45 = vpop.permute.xlu0 %684  ;;  %v1295_v14 = vsel %vm1289_vm3, %v1262_v35, %v3002_v16 }
 0x10f   : > { %4350 = vst [vmem:[#allocation86_spill] sm:$0xff] %v3154_v45  ;;  %972 = vrot.lane.b32.xlu1 %v2373_v24, %s2275_s30  ;;  %v1266_v24 = vsel %vm1256_vm2, %v2388_v30, %v2887_v6  ;;  %v4351_v6 = vld [vmem:[#allocation21_spill] sm:$0xff] }
 0x110   : > { %910 = vrot.lane.b32.xlu0 %v2793_v42, %s2274_s25  ;;  %v1297_v42 = vsel %vm1289_vm3, %v1264_v15, %v3013_v62  ;;  %v1299_v55 = vsel %vm1289_vm3, %v1266_v24, %v3021_v8 }
 0x111   : > { %v691_v45 = vpop.permute.xlu1 %690 }
 0x112   : > { %v3171_v7 = vsel %vm1322_vm4, %v1295_v14, %v691_v45  ;;  %v689_v11 = vpop.permute.xlu0 %688 }
 0x113   : > { %v3174_v21 = vsel %vm1322_vm4, %v1294_v60, %v689_v11  ;;  %974 = vrot.lane.b32.xlu1 %v2367_v22, %s2275_s30  ;;  %v1296_v60 = vsel %vm1289_vm3, %v1263_v41, %v3015_v29  ;;  %v1265_v29 = vsel %vm1256_vm2, %v2394_v32, %v2889_v44  ;;  %v1268_v44 = vsel %vm1256_vm2, %v2410_v38, %v2895_v52  ;;  %v4352_v52 = vld [vmem:[#allocation20_spill] sm:$0xff] }
 0x114   : > { %1004 = vrot.lane.b32.xlu0 %v2548_v59, %s2275_s30  ;;  %v1298_v62 = vsel %vm1289_vm3, %v1265_v29, %v3023_v61  ;;  %v1267_v61 = vsel %vm1256_vm2, %v2416_v40, %v2897_v47  ;;  %v1301_v8 = vsel %vm1289_vm3, %v1268_v44, %v3029_v3  ;;  %v1270_v40 = vsel %vm1256_vm2, %v2432_v46, %v2903_v0  ;;  %v4353_v47 = vld [vmem:[#allocation2_spill] sm:$0xff] }
 0x115   : > { %v695_v63 = vpop.permute.xlu1 %694  ;;  %v1300_v43 = vsel %vm1289_vm3, %v1267_v61, %v3031_v19  ;;  %v1269_v3 = vsel %vm1256_vm2, %v2438_v48, %v2905_v1  ;;  %v1303_v19 = vsel %vm1289_vm3, %v1270_v40, %v3037_v12  ;;  %v1272_v48 = vsel %vm1256_vm2, %v2454_v54, %v2911_v13 }
 0x116   : > { %v3191_v16 = vsel %vm1322_vm4, %v1297_v42, %v695_v63  ;;  %v693_v14 = vpop.permute.xlu0 %692  ;;  %v1302_v42 = vsel %vm1289_vm3, %v1269_v3, %v3039_v33  ;;  %v1271_v33 = vsel %vm1256_vm2, %v2460_v56, %v2913_v39  ;;  %v1305_v0 = vsel %vm1289_vm3, %v1272_v48, %v3045_v9 }
 0x117   : > { %v3194_v22 = vsel %vm1322_vm4, %v1296_v60, %v693_v14  ;;  %1068 = vrot.lane.b32.xlu1 %v4335_v17, %s2276_s13  ;;  %v1304_v12 = vsel %vm1289_vm3, %v1271_v33, %v3047_v31  ;;  %v1278_v13 = vsel %vm1256_vm2, %v2520_v34, %v2935_v36  ;;  %v1279_v36 = vsel %vm1256_vm2, %v2548_v59, %v2945_v49  ;;  %v4357_v59 = vld [vmem:[#allocation18_spill] sm:$0xff]  ;;  %v4364_v33 = vld [vmem:[#allocation16_spill] sm:$0xff] }
 0x118   : > { %1006 = vrot.lane.b32.xlu0 %v2542_v53, %s2275_s30 }
 0x119   : > { %v699_v27 = vpop.permute.xlu1 %698 }
 0x11a   : > { %v3211_v17 = vsel %vm1322_vm4, %v1299_v55, %v699_v27  ;;  %v697_v45 = vpop.permute.xlu0 %696 }
 0x11b   : > { %v3214_v30 = vsel %vm1322_vm4, %v1298_v62, %v697_v45  ;;  %816 = vrot.lane.b32.xlu1 %v4351_v6, %s2273_s24 }
 0x11c   : > { %1100 = vrot.lane.b32.xlu0 %v4351_v6, %s2276_s13 }
 0x11d   : > { %v703_v35 = vpop.permute.xlu1 %702 }
 0x11e   : > { %v3231_v11 = vsel %vm1322_vm4, %v1301_v8, %v703_v35  ;;  %v701_v15 = vpop.permute.xlu0 %700  ;;  %v4359_v35 = vld [vmem:[#allocation17_spill] sm:$0xff] }
 0x11f   : > { %v3234_v38 = vsel %vm1322_vm4, %v1300_v43, %v701_v15  ;;  %1102 = vrot.lane.b32.xlu1 %v4352_v52, %s2276_s13 }
 0x120   : > { %1070 = vrot.lane.b32.xlu0 %v4353_v47, %s2276_s13 }
 0x121   : > { %v707_v41 = vpop.permute.xlu1 %706 }
 0x122   : > { %v3251_v63 = vsel %vm1322_vm4, %v1303_v19, %v707_v41  ;;  %v705_v60 = vpop.permute.xlu0 %704  ;;  %v2243_v19 = vld [vmem:[%s2317_s20 + $0x68] sm:$0xff] }
 0x123   : > { %v3254_v46 = vsel %vm1322_vm4, %v1302_v42, %v705_v60  ;;  %1196 = vrot.lane.b32.xlu1 %v2811_v58, %s2277_s23  ;;  %v4363_v41 = vld [vmem:[#allocation23_spill] sm:$0xff] }
 0x124   : > { %1164 = vrot.lane.b32.xlu0 %v2707_v23, %s2277_s23 }
 0x125   : > { %v711_v1 = vpop.permute.xlu1 %710 }
 0x126   : > { %v3271_v14 = vsel %vm1322_vm4, %v1305_v0, %v711_v1  ;;  %v709_v24 = vpop.permute.xlu0 %708 }
 0x127   : > { %v3274_v54 = vsel %vm1322_vm4, %v1304_v12, %v709_v24  ;;  %818 = vrot.lane.b32.xlu1 %v4352_v52, %s2273_s24 }
 0x128   : > { %786 = vrot.lane.b32.xlu0 %v4353_v47, %s2273_s24  ;;  %v4361_v47 = vld [vmem:[#allocation22_spill] sm:$0xff] }
 0x129   : > { %v3280_v56 = vpop.permute.xlu1 %714 }
 0x12a   : > { %v3282_v9 = vpop.permute.xlu0 %712 }
 0x12b   : > { %912 = vrot.lane.b32.xlu1 %v2811_v58, %s2274_s25  ;;  %v1277_v58 = vsel %vm1256_vm2, %v2526_v37, %v2937_v10  ;;  %v1280_v37 = vsel %vm1256_vm2, %v2542_v53, %v2943_v57  ;;  %v4356_v57 = vld [vmem:[#allocation64_spill] sm:$0xff] }
 0x12c   : > { %880 = vrot.lane.b32.xlu0 %v2707_v23, %s2274_s25  ;;  %v1311_v23 = vsel %vm1289_vm3, %v1278_v13, %v3087_v51  ;;  %v1310_v55 = vsel %vm1289_vm3, %v1277_v58, %v3089_v2  ;;  %v1313_v10 = vsel %vm1289_vm3, %v1280_v37, %v3101_v50  ;;  %v4354_v2 = vld [vmem:[#allocation81_spill] sm:$0xff]  ;;  %v1282_v49 = vsel %vm1256_vm2, %v4357_v59, %v4356_v57  ;;  %v4366_v58 = vld [vmem:[#allocation68_spill] sm:$0xff]  ;;  %v4372_v57 = vld [vmem:[#allocation70_spill] sm:$0xff] }
 0x12d   : > { %v3288_v31 = vpop.permute.xlu1 %718  ;;  %v1312_v45 = vsel %vm1289_vm3, %v1279_v36, %v4354_v2  ;;  %v4358_v50 = vld [vmem:[#allocation65_spill] sm:$0xff]  ;;  %v1315_v61 = vsel %vm1289_vm3, %v1282_v49, %v3112_v26  ;;  %v4362_v26 = vld [vmem:[#allocation67_spill] sm:$0xff]  ;;  %v4371_v36 = vld [vmem:[#allocation82_spill] sm:$0xff] }
 0x12e   : > { %v3290_v39 = vpop.permute.xlu0 %716  ;;  %v1283_v42 = vsel %vm1256_vm2, %v4363_v41, %v4362_v26  ;;  %v4365_v13 = vld [vmem:[#allocation25_spill] sm:$0xff] }
 0x12f   : > { %1198 = vrot.lane.b32.xlu1 %v2806_v4, %s2277_s23  ;;  %v1316_v0 = vsel %vm1289_vm3, %v1283_v42, %v4364_v33  ;;  %v4378_v42 = vld [vmem:[#allocation49_spill] sm:$0xff] }
 0x130   : > { %1166 = vrot.lane.b32.xlu0 %v2702_v5, %s2277_s23 }
 0x131   : > { %v723_v29 = vpop.permute.xlu1 %722 }
 0x132   : > { %v3307_v27 = vsel %vm1322_vm4, %v1311_v23, %v723_v29  ;;  %v721_v62 = vpop.permute.xlu0 %720  ;;  %v4367_v23 = vld [vmem:[#allocation26_spill] sm:$0xff] }
 0x133   : > { %v3310_v34 = vsel %vm1322_vm4, %v1310_v55, %v721_v62  ;;  %914 = vrot.lane.b32.xlu1 %v2806_v4, %s2274_s25  ;;  %v1286_v29 = vsel %vm1256_vm2, %v4367_v23, %v4366_v58  ;;  %v4369_v55 = vld [vmem:[#allocation69_spill] sm:$0xff]  ;;  %v4370_v62 = vld [vmem:[#allocation27_spill] sm:$0xff]  ;;  %v4380_v58 = vld [vmem:[#allocation48_spill] sm:$0xff] }
 0x134   : > { %882 = vrot.lane.b32.xlu0 %v2702_v5, %s2274_s25  ;;  %v4355_v5 = vld [vmem:[#allocation19_spill] sm:$0xff]  ;;  %v1285_v37 = vsel %vm1256_vm2, %v4370_v62, %v4369_v55  ;;  %v4381_v23 = vld [vmem:[#allocation36_spill] sm:$0xff] }
 0x135   : > { %v727_v51 = vpop.permute.xlu1 %726  ;;  %v1281_v44 = vsel %vm1256_vm2, %v4355_v5, %v4358_v50  ;;  %v1318_v2 = vsel %vm1289_vm3, %v1285_v37, %v3130_v18  ;;  %v4374_v50 = vld [vmem:[#allocation71_spill] sm:$0xff]  ;;  %v2244_v37 = vld [vmem:[%s2317_s20 + $0x78] sm:$0xff] }
 0x136   : > { %v3327_v4 = vsel %vm1322_vm4, %v1313_v10, %v727_v51  ;;  %v725_v6 = vpop.permute.xlu0 %724  ;;  %v1314_v43 = vsel %vm1289_vm3, %v1281_v44, %v4359_v35  ;;  %v1319_v10 = vsel %vm1289_vm3, %v1286_v29, %v4371_v36  ;;  %v4375_v44 = vld [vmem:[#allocation31_spill] sm:$0xff] }
 0x137   : > { %v3330_v53 = vsel %vm1322_vm4, %v1312_v45, %v725_v6  ;;  %1008 = vrot.lane.b32.xlu1 %v4355_v5, %s2275_s30  ;;  %v1287_v18 = vsel %vm1256_vm2, %v4375_v44, %v4374_v50  ;;  %v3467_v50 = vld [vmem:[%s2317_s20 + $0xc0] sm:$0xff]  ;;  %v4384_v44 = vld [vmem:[#allocation61_spill] sm:$0xff] }
 0x138   : > { %976 = vrot.lane.b32.xlu0 %v2394_v32, %s2275_s30  ;;  %v4360_v32 = vld [vmem:[#allocation66_spill] sm:$0xff]  ;;  %v1320_v35 = vsel %vm1289_vm3, %v1287_v18, %v3138_v20  ;;  %v4379_v20 = vld [vmem:[#allocation37_spill] sm:$0xff] }
 0x139   : > { %v731_v8 = vpop.permute.xlu1 %730  ;;  %v1284_v3 = vsel %vm1256_vm2, %v4361_v47, %v4360_v32  ;;  %v2247_v18 = vld [vmem:[%s2317_s20] sm:$0xff] }
 0x13a   : > { %v3347_v15 = vsel %vm1322_vm4, %v1315_v61, %v731_v8  ;;  %v729_v52 = vpop.permute.xlu0 %728  ;;  %v1317_v60 = vsel %vm1289_vm3, %v1284_v3, %v3120_v28  ;;  %v4368_v28 = vld [vmem:[#allocation5_spill] sm:$0xff]  ;;  %v4376_v3 = vld [vmem:[#allocation24_spill] sm:$0xff] }
 0x13b   : > { %v3350_v40 = vsel %vm1322_vm4, %v1314_v43, %v729_v52  ;;  %1010 = vrot.lane.b32.xlu1 %v4357_v59, %s2275_s30  ;;  %v4373_v59 = vld [vmem:[#allocation30_spill] sm:$0xff] }
 0x13c   : > { %978 = vrot.lane.b32.xlu0 %v2243_v19, %s2275_s30  ;;  %v1288_v49 = vsel %vm1256_vm2, %v4373_v59, %v4372_v57  ;;  %v4377_v19 = vld [vmem:[#allocation4_spill] sm:$0xff]  ;;  %v4382_v57 = vld [vmem:[#allocation29_spill] sm:$0xff] }
 0x13d   : > { %v735_v48 = vpop.permute.xlu1 %734  ;;  %v1321_v61 = vsel %vm1289_vm3, %v1288_v49, %v3136_v25 }
 0x13e   : > { %v3367_v1 = vsel %vm1322_vm4, %v1317_v60, %v735_v48  ;;  %v733_v12 = vpop.permute.xlu0 %732 }
 0x13f   : > { %v3370_v24 = vsel %vm1322_vm4, %v1316_v0, %v733_v12  ;;  %1104 = vrot.lane.b32.xlu1 %v4365_v13, %s2276_s13 }
 0x140   : > { %1072 = vrot.lane.b32.xlu0 %v4368_v28, %s2276_s13 }
 0x141   : > { %v739_v51 = vpop.permute.xlu1 %738 }
 0x142   : > { %v3387_v45 = vsel %vm1322_vm4, %v1319_v10, %v739_v51  ;;  %v737_v6 = vpop.permute.xlu0 %736  ;;  %v2245_v51 = vld [vmem:[%s2317_s20 + $0x80] sm:$0xff] }
 0x143   : > { %v3390_v5 = vsel %vm1322_vm4, %v1318_v2, %v737_v6  ;;  %820 = vrot.lane.b32.xlu1 %v4365_v13, %s2273_s24 }
 0x144   : > { %788 = vrot.lane.b32.xlu0 %v4368_v28, %s2273_s24 }
 0x145   : > { %v743_v8 = vpop.permute.xlu1 %742 }
 0x146   : > { %v3407_v43 = vsel %vm1322_vm4, %v1321_v61, %v743_v8  ;;  %v741_v52 = vpop.permute.xlu0 %740  ;;  %v4385_v61 = vld [vmem:[#allocation53_spill] sm:$0xff] }
 0x147   : > { %v3410_v32 = vsel %vm1322_vm4, %v1320_v35, %v741_v52  ;;  %1106 = vrot.lane.b32.xlu1 %v4376_v3, %s2276_s13  ;;  %v1257_v8 = vsel %vm1256_vm2, %v2247_v18, %v4385_v61  ;;  %v4386_v35 = vld [vmem:[#allocation78_spill] sm:$0xff] }
 0x148   : > { %1074 = vrot.lane.b32.xlu0 %v4377_v19, %s2276_s13  ;;  %v4390_v18 = vld [vmem:[#allocation6_spill] sm:$0xff] }
 0x149   : > { %v3416_v26 = vpop.permute.xlu1 %778 }
 0x14a   : > { %v777_v25 = vpop.permute.xlu0 %776 }
 0x14b   : > { %1200 = vrot.lane.b32.xlu1 %v4378_v42, %s2277_s23 }
 0x14c   : > { %1168 = vrot.lane.b32.xlu0 %v4379_v20, %s2277_s23 }
 0x14d   : > { %v3422_v60 = vpop.permute.xlu1 %782 }
 0x14e   : > { %v3424_v48 = vpop.permute.xlu0 %780 }
 0x14f   : > { %822 = vrot.lane.b32.xlu1 %v4376_v3, %s2273_s24  ;;  %v4387_v3 = vld [vmem:[#allocation73_spill] sm:$0xff] }
 0x150   : > { %790 = vrot.lane.b32.xlu0 %v4377_v19, %s2273_s24  ;;  %v1290_v19 = vsel %vm1289_vm3, %v1257_v8, %v4387_v3  ;;  %v4391_v3 = vld [vmem:[#allocation57_spill] sm:$0xff] }
 0x151   : > { %v809_v33 = vpop.permute.xlu1 %808 }
 0x152   : > { %v3430_v0 = vpop.permute.xlu0 %784 }
 0x153   : > { %916 = vrot.lane.b32.xlu1 %v4378_v42, %s2274_s25 }
 0x154   : > { %884 = vrot.lane.b32.xlu0 %v4379_v20, %s2274_s25 }
 0x155   : > { %v873_v12 = vpop.permute.xlu1 %872 }
 0x156   : > { %v3436_v13 = vpop.permute.xlu0 %810 }
 0x157   : > { %1202 = vrot.lane.b32.xlu1 %v4380_v58, %s2277_s23 }
 0x158   : > { %1170 = vrot.lane.b32.xlu0 %v4381_v23, %s2277_s23 }
 0x159   : > { %v3442_v29 = vpop.permute.xlu1 %874 }
 0x15a   : > { %v905_v28 = vpop.permute.xlu0 %904 }
 0x15b   : > { %918 = vrot.lane.b32.xlu1 %v4380_v58, %s2274_s25  ;;  %v4388_v58 = vld [vmem:[#allocation84_spill] sm:$0xff] }
 0x15c   : > { %886 = vrot.lane.b32.xlu0 %v4381_v23, %s2274_s25  ;;  %v1323_v23 = vsel %vm1322_vm4, %v1290_v19, %v4388_v58 }
 0x15d   : > { %v969_v55 = vpop.permute.xlu1 %968 }
 0x15e   : > { %v3448_v62 = vpop.permute.xlu0 %906 }
 0x15f   : > { %1012 = vrot.lane.b32.xlu1 %v4363_v41, %s2275_s30  ;;  %v4383_v41 = vld [vmem:[#allocation7_spill] sm:$0xff] }
 0x160   : > { %980 = vrot.lane.b32.xlu0 %v2244_v37, %s2275_s30 }
 0x161   : > { %v971_v36 = vpop.permute.xlu1 %970 }
 0x162   : > { %v1001_v10 = vpop.permute.xlu0 %1000 }
 0x163   : > { %1014 = vrot.lane.b32.xlu1 %v4361_v47, %s2275_s30  ;;  %v1273_v47 = vsel %vm1256_vm2, %v3467_v50, %v4384_v44  ;;  %v4389_v44 = vld [vmem:[#allocation28_spill] sm:$0xff] }
 0x164   : > { %982 = vrot.lane.b32.xlu0 %v2245_v51, %s2275_s30  ;;  %v1306_v52 = vsel %vm1289_vm3, %v1273_v47, %v4386_v35 }
 0x165   : > { %v1065_v2 = vpop.permute.xlu1 %1064  ;;  %v1339_v42 = vsel %vm1322_vm4, %v1306_v52, %v3282_v9  ;;  %v2248_v52 = vld [vmem:[%s2317_s20 + $0x8] sm:$0xff] }
 0x166   : > { %v3458_v6 = vpop.permute.xlu0 %1002  ;;  %v1372_v37 = vsel %vm1355_vm5, %v1339_v42, %v809_v33  ;;  %v4395_v42 = vld [vmem:[#allocation83_spill] sm:$0xff] }
 0x167   : > { %1108 = vrot.lane.b32.xlu1 %v4382_v57, %s2276_s13 }
 0x168   : > { %1076 = vrot.lane.b32.xlu0 %v4383_v41, %s2276_s13 }
 0x169   : > { %v3464_v59 = vpop.permute.xlu1 %812 }
 0x16a   : > { %v1097_v49 = vpop.permute.xlu0 %1096 }
 0x16b   : > { %824 = vrot.lane.b32.xlu1 %v4382_v57, %s2273_s24  ;;  %v1356_v57 = vsel %vm1355_vm5, %v1323_v23, %v777_v25 }
 0x16c   : > { %792 = vrot.lane.b32.xlu0 %v4383_v41, %s2273_s24  ;;  %v1405_v41 = vsel %vm1388_vm6, %v1372_v37, %v905_v28  ;;  %v1389_v9 = vsel %vm1388_vm6, %v1356_v57, %v873_v12  ;;  %v1258_v12 = vsel %vm1256_vm2, %v2248_v52, %v4391_v3 }
 0x16d   : > { %v1099_v20 = vpop.permute.xlu1 %1098  ;;  %v1438_v47 = vsel %vm1421_vm7, %v1405_v41, %v1001_v10  ;;  %v1422_v33 = vsel %vm1421_vm7, %v1389_v9, %v969_v55  ;;  %v4392_v10 = vld [vmem:[#allocation52_spill] sm:$0xff]  ;;  %v3525_v9 = vld [vmem:[%s2317_s20 + $0xc8] sm:$0xff] }
 0x16e   : > { %v1067_v51 = vpop.permute.xlu0 %1066  ;;  %v1471_v61 = vsel %vm1454_vm8, %v1438_v47, %v1097_v49  ;;  %v1455_v28 = vsel %vm1454_vm8, %v1422_v33, %v1065_v2  ;;  %v4393_v55 = vld [vmem:[#allocation72_spill] sm:$0xff]  ;;  %v4394_v2 = vld [vmem:[#allocation39_spill] sm:$0xff] }
 0x16f   : > { %1110 = vrot.lane.b32.xlu1 %v4389_v44, %s2276_s13  ;;  %v1291_v49 = vsel %vm1289_vm3, %v1258_v12, %v4393_v55  ;;  %v4396_v47 = vld [vmem:[#allocation60_spill] sm:$0xff]  ;;  %v4398_v12 = vld [vmem:[#allocation50_spill] sm:$0xff] }
 0x170   : > { %1078 = vrot.lane.b32.xlu0 %v4390_v18, %s2276_s13  ;;  %v1324_v58 = vsel %vm1322_vm4, %v1291_v49, %v4395_v42  ;;  %v1274_v33 = vsel %vm1256_vm2, %v3525_v9, %v4396_v47  ;;  %v2250_v55 = vld [vmem:[%s2317_s20 + $0x150] sm:$0xff] }
 0x171   : > { %v1193_v25 = vpop.permute.xlu1 %1192  ;;  %v1357_v37 = vsel %vm1355_vm5, %v1324_v58, %v3416_v26  ;;  %v4397_v26 = vld [vmem:[#allocation3_spill] sm:$0xff]  ;;  %v2251_v49 = vld [vmem:[%s2317_s20 + $0x90] sm:$0xff]  ;;  %v2252_v58 = vld [vmem:[%s2317_s20 + $0x158] sm:$0xff] }
 0x172   : > { %v1161_v8 = vpop.permute.xlu0 %1160  ;;  %v1504_v35 = vsel %vm1487_vm9, %v1471_v61, %v1193_v25  ;;  %v1390_v41 = vsel %vm1388_vm6, %v1357_v37, %v3442_v29  ;;  %v1307_v25 = vsel %vm1289_vm3, %v1274_v33, %v4397_v26  ;;  %v2253_v37 = vld [vmem:[%s2317_s20 + $0x98] sm:$0xff] }
 0x173   : > { %1204 = vrot.lane.b32.xlu1 %v4392_v10, %s2277_s23  ;;  %v1488_v19 = vsel %vm1487_vm9, %v1455_v28, %v1161_v8  ;;  %2176 = vmatprep.mubr.msk.f32.mxu1 %vm1529_vm10, %v1504_v35  ;;  %v1423_v61 = vsel %vm1421_vm7, %v1390_v41, %v971_v36  ;;  %v3578_v33 = vld [vmem:[%s2317_s20 + $0xd8] sm:$0xff] }
 0x174   : > { %1172 = vrot.lane.b32.xlu0 %v4394_v2, %s2277_s23  ;;  %2152 = vmatprep.mubr.msk.f32.mxu0 %vm1529_vm10, %v1488_v19  ;;  %v1456_v28 = vsel %vm1454_vm8, %v1423_v61, %v1067_v51  ;;  %v4400_v61 = vld [vmem:[#allocation63_spill] sm:$0xff] }
 0x175   : > { %v3514_v23 = vpop.permute.xlu1 %876  ;;  %v1275_v26 = vsel %vm1256_vm2, %v3578_v33, %v4400_v61 }
 0x176   : > { %v3518_v57 = vpop.permute.xlu0 %814 }
 0x177   : > { %826 = vrot.lane.b32.xlu1 %v4389_v44, %s2273_s24  ;;  %v1340_v44 = vsel %vm1322_vm4, %v1307_v25, %v3280_v56  ;;  %v4401_v25 = vld [vmem:[#allocation33_spill] sm:$0xff] }
 0x178   : > { %794 = vrot.lane.b32.xlu0 %v4390_v18, %s2273_s24  ;;  %v1373_v52 = vsel %vm1355_vm5, %v1340_v44, %v3436_v13 }
 0x179   : > { %v1163_v29 = vpop.permute.xlu1 %1162  ;;  %v1406_v36 = vsel %vm1388_vm6, %v1373_v52, %v3448_v62  ;;  %v4399_v62 = vld [vmem:[#allocation38_spill] sm:$0xff] }
 0x17a   : > { %v1489_v8 = vsel %vm1487_vm9, %v1456_v28, %v1163_v29  ;;  %v909_v35 = vpop.permute.xlu0 %908  ;;  %v1439_v56 = vsel %vm1421_vm7, %v1406_v36, %v3458_v6  ;;  %v2255_v28 = vld [vmem:[%s2317_s20 + $0x18] sm:$0xff]  ;;  %v4402_v29 = vld [vmem:[#allocation51_spill] sm:$0xff] }
 0x17b   : > { %920 = vrot.lane.b32.xlu1 %v4392_v10, %s2274_s25  ;;  %2153 = vmatmul.mubr.msk.f32.vlgmr.msra.gmra.mrb[0].mxu0 %vm1529_vm10, %v1489_v8  ;;  %v1472_v13 = vsel %vm1454_vm8, %v1439_v56, %v1099_v20  ;;  %v1259_v44 = vsel %vm1256_vm2, %v2255_v28, %v4402_v29  ;;  %v4403_v8 = vld [vmem:[#allocation80_spill] sm:$0xff]  ;;  %v4404_v36 = vld [vmem:[#allocation9_spill] sm:$0xff]  ;;  %v4405_v56 = vld [vmem:[#allocation75_spill] sm:$0xff] }
 0x17c   : > { %888 = vrot.lane.b32.xlu0 %v4394_v2, %s2274_s25  ;;  %v1308_v52 = vsel %vm1289_vm3, %v1275_v26, %v4403_v8 }
 0x17d   : > { %v3550_v51 = vpop.permute.xlu1 %878 }
 0x17e   : > { %v1195_v18 = vpop.permute.xlu0 %1194 }
 0x17f   : > { %v1505_v3 = vsel %vm1487_vm9, %v1472_v13, %v1195_v18  ;;  %1206 = vrot.lane.b32.xlu1 %v4398_v12, %s2277_s23  ;;  %v1292_v13 = vsel %vm1289_vm3, %v1259_v44, %v4405_v56  ;;  %v1341_v18 = vsel %vm1322_vm4, %v1308_v52, %v3290_v39  ;;  %v4409_v44 = vld [vmem:[#allocation62_spill] sm:$0xff]  ;;  %v4410_v52 = vld [vmem:[#allocation56_spill] sm:$0xff]  ;;  %v4411_v56 = vld [vmem:[#allocation55_spill] sm:$0xff] }
 0x180   : > { %1174 = vrot.lane.b32.xlu0 %v4399_v62, %s2277_s23  ;;  %2177 = vmatmul.mubr.msk.f32.vlgmr.msra.gmra.mrb[0].mxu1 %vm1529_vm10, %v1505_v3 }
 0x181   : > { %v973_v10 = vpop.permute.xlu1 %972 }
 0x182   : > { %v3559_v6 = vpop.permute.xlu0 %910 }
 0x183   : > { %922 = vrot.lane.b32.xlu1 %v4398_v12, %s2274_s25  ;;  %v4406_v12 = vld [vmem:[#allocation86_spill] sm:$0xff] }
 0x184   : > { %890 = vrot.lane.b32.xlu0 %v4399_v62, %s2274_s25  ;;  %v1325_v62 = vsel %vm1322_vm4, %v1292_v13, %v4406_v12 }
 0x185   : > { %v3565_v20 = vpop.permute.xlu1 %974 }
 0x186   : > { %v1005_v19 = vpop.permute.xlu0 %1004 }
 0x187   : > { %1016 = vrot.lane.b32.xlu1 %v2250_v55, %s2275_s30  ;;  %v1374_v55 = vsel %vm1355_vm5, %v1341_v18, %v3464_v59  ;;  %v4412_v18 = vld [vmem:[#allocation79_spill] sm:$0xff] }
 0x188   : > { %984 = vrot.lane.b32.xlu0 %v2251_v49, %s2275_s30 }
 0x189   : > { %v1069_v2 = vpop.permute.xlu1 %1068 }
 0x18a   : > { %v1007_v42 = vpop.permute.xlu0 %1006 }
 0x18b   : > { %1018 = vrot.lane.b32.xlu1 %v2252_v58, %s2275_s30  ;;  %v1358_v58 = vsel %vm1355_vm5, %v1325_v62, %v3424_v48  ;;  %v4413_v62 = vld [vmem:[#allocation41_spill] sm:$0xff] }
 0x18c   : > { %986 = vrot.lane.b32.xlu0 %v2253_v37, %s2275_s30  ;;  %v1407_v37 = vsel %vm1388_vm6, %v1374_v55, %v909_v35  ;;  %v1391_v61 = vsel %vm1388_vm6, %v1358_v58, %v3514_v23  ;;  %v4407_v23 = vld [vmem:[#allocation32_spill] sm:$0xff]  ;;  %v4414_v55 = vld [vmem:[#allocation74_spill] sm:$0xff] }
 0x18d   : > { %v3575_v41 = vpop.permute.xlu1 %816  ;;  %v1440_v39 = vsel %vm1421_vm7, %v1407_v37, %v1005_v19  ;;  %v1424_v59 = vsel %vm1421_vm7, %v1391_v61, %v973_v10  ;;  %v4408_v19 = vld [vmem:[#allocation8_spill] sm:$0xff] }
 0x18e   : > { %v1101_v47 = vpop.permute.xlu0 %1100  ;;  %v1457_v35 = vsel %vm1454_vm8, %v1424_v59, %v1069_v2  ;;  %v3626_v2 = vld [vmem:[%s2317_s20 + $0xe0] sm:$0xff] }
 0x18f   : > { %1112 = vrot.lane.b32.xlu1 %v4401_v25, %s2276_s13  ;;  %v1473_v26 = vsel %vm1454_vm8, %v1440_v39, %v1101_v47  ;;  %v1276_v8 = vsel %vm1256_vm2, %v3626_v2, %v4409_v44  ;;  %v4415_v39 = vld [vmem:[#allocation85_spill] sm:$0xff] }
 0x190   : > { %1080 = vrot.lane.b32.xlu0 %v4404_v36, %s2276_s13  ;;  %v1309_v12 = vsel %vm1289_vm3, %v1276_v8, %v4412_v18 }
 0x191   : > { %v1103_v3 = vpop.permute.xlu1 %1102  ;;  %v1342_v37 = vsel %vm1322_vm4, %v1309_v12, %v3288_v31 }
 0x192   : > { %v1071_v49 = vpop.permute.xlu0 %1070 }
 0x193   : > { %828 = vrot.lane.b32.xlu1 %v4401_v25, %s2273_s24 }
 0x194   : > { %796 = vrot.lane.b32.xlu0 %v4404_v36, %s2273_s24  ;;  %v2257_v36 = vld [vmem:[%s2317_s20 + $0x20] sm:$0xff] }
 0x195   : > { %v1197_v48 = vpop.permute.xlu1 %1196  ;;  %v1260_v13 = vsel %vm1256_vm2, %v2257_v36, %v4411_v56  ;;  %v2258_v56 = vld [vmem:[%s2317_s20 + $0x168] sm:$0xff] }
 0x196   : > { %v1506_v28 = vsel %vm1487_vm9, %v1473_v26, %v1197_v48  ;;  %v1165_v25 = vpop.permute.xlu0 %1164  ;;  %v1293_v58 = vsel %vm1289_vm3, %v1260_v13, %v4414_v55  ;;  %v1375_v26 = vsel %vm1355_vm5, %v1342_v37, %v3518_v57  ;;  %v2259_v13 = vld [vmem:[%s2317_s20 + $0xa8] sm:$0xff]  ;;  %v2261_v55 = vld [vmem:[%s2317_s20 + $0xb0] sm:$0xff] }
 0x197   : > { %v1490_v29 = vsel %vm1487_vm9, %v1457_v35, %v1165_v25  ;;  %1114 = vrot.lane.b32.xlu1 %v4407_v23, %s2276_s13  ;;  %2179 = vmatprep.mubr.msk.f32.mxu1 %vm1529_vm10, %v1506_v28  ;;  %v1326_v59 = vsel %vm1322_vm4, %v1293_v58, %v4415_v39  ;;  %v1408_v28 = vsel %vm1388_vm6, %v1375_v26, %v3559_v6  ;;  %v4418_v39 = vld [vmem:[#allocation35_spill] sm:$0xff] }
 0x198   : > { %1082 = vrot.lane.b32.xlu0 %v4408_v19, %s2276_s13  ;;  %2155 = vmatprep.mubr.msk.f32.mxu0 %vm1529_vm10, %v1490_v29  ;;  %v1359_v35 = vsel %vm1355_vm5, %v1326_v59, %v3422_v60  ;;  %v1441_v25 = vsel %vm1421_vm7, %v1408_v28, %v1007_v42  ;;  %v4416_v42 = vld [vmem:[#allocation54_spill] sm:$0xff]  ;;  %v4419_v59 = vld [vmem:[#allocation11_spill] sm:$0xff] }
 0x199   : > { %v3621_v10 = vpop.permute.xlu1 %818  ;;  %v1392_v31 = vsel %vm1388_vm6, %v1359_v35, %v3550_v51  ;;  %v1474_v29 = vsel %vm1454_vm8, %v1441_v25, %v1103_v3  ;;  %v4417_v3 = vld [vmem:[#allocation40_spill] sm:$0xff]  ;;  %v1376_v35 = vsel %vm1355_vm5, %v3310_v34, %v3575_v41 }
 0x19a   : > { %v3623_v47 = vpop.permute.xlu0 %786  ;;  %v1425_v57 = vsel %vm1421_vm7, %v1392_v31, %v3565_v20  ;;  %v1360_v31 = vsel %vm1355_vm5, %v3174_v21, %v3430_v0 }
 0x19b   : > { %1208 = vrot.lane.b32.xlu1 %v4410_v52, %s2277_s23  ;;  %v1458_v44 = vsel %vm1454_vm8, %v1425_v57, %v1071_v49 }
 0x19c   : > { %1176 = vrot.lane.b32.xlu0 %v4413_v62, %s2277_s23 }
 0x19d   : > { %v913_v61 = vpop.permute.xlu1 %912 }
 0x19e   : > { %v881_v48 = vpop.permute.xlu0 %880  ;;  %v1409_v25 = vsel %vm1388_vm6, %v1376_v35, %v913_v61 }
 0x19f   : > { %830 = vrot.lane.b32.xlu1 %v4407_v23, %s2273_s24  ;;  %v1393_v57 = vsel %vm1388_vm6, %v1360_v31, %v881_v48  ;;  %v4421_v48 = vld [vmem:[#allocation10_spill] sm:$0xff] }
 0x1a0   : > { %798 = vrot.lane.b32.xlu0 %v4408_v19, %s2273_s24 }
 0x1a1   : > { %v1199_v60 = vpop.permute.xlu1 %1198 }
 0x1a2   : > { %v1507_v6 = vsel %vm1487_vm9, %v1474_v29, %v1199_v60  ;;  %v1167_v8 = vpop.permute.xlu0 %1166 }
 0x1a3   : > { %v1491_v23 = vsel %vm1487_vm9, %v1458_v44, %v1167_v8  ;;  %924 = vrot.lane.b32.xlu1 %v4410_v52, %s2274_s25  ;;  %2180 = vmatmul.mubr.msk.f32.gmra.mrb[2].mxu1 %vm1529_vm10, %v1507_v6  ;;  %v4420_v6 = vld [vmem:[#allocation34_spill] sm:$0xff] }
 0x1a4   : > { %892 = vrot.lane.b32.xlu0 %v4413_v62, %s2274_s25  ;;  %2156 = vmatmul.mubr.msk.f32.gmra.mrb[2].mxu0 %vm1529_vm10, %v1491_v23  ;;  %v2260_v62 = vld [vmem:[%s2317_s20 + $0x170] sm:$0xff] }
 0x1a5   : > { %v915_v51 = vpop.permute.xlu1 %914 }
 0x1a6   : > { %v883_v20 = vpop.permute.xlu0 %882 }
 0x1a7   : > { %1210 = vrot.lane.b32.xlu1 %v4416_v42, %s2277_s23 }
 0x1a8   : > { %1178 = vrot.lane.b32.xlu0 %v4417_v3, %s2277_s23 }
 0x1a9   : > { %v1009_v49 = vpop.permute.xlu1 %1008 }
 0x1aa   : > { %v977_v19 = vpop.permute.xlu0 %976  ;;  %v1442_v29 = vsel %vm1421_vm7, %v1409_v25, %v1009_v49  ;;  %v4426_v25 = vld [vmem:[#allocation77_spill] sm:$0xff] }
 0x1ab   : > { %926 = vrot.lane.b32.xlu1 %v4416_v42, %s2274_s25  ;;  %v1426_v60 = vsel %vm1421_vm7, %v1393_v57, %v977_v19  ;;  %v4422_v42 = vld [vmem:[#allocation59_spill] sm:$0xff]  ;;  %v1377_v19 = vsel %vm1355_vm5, %v3307_v27, %v3621_v10  ;;  %v4427_v57 = vld [vmem:[#allocation76_spill] sm:$0xff] }
 0x1ac   : > { %894 = vrot.lane.b32.xlu0 %v4417_v3, %s2274_s25  ;;  %v4423_v3 = vld [vmem:[#allocation43_spill] sm:$0xff] }
 0x1ad   : > { %v1011_v52 = vpop.permute.xlu1 %1010 }
 0x1ae   : > { %v979_v36 = vpop.permute.xlu0 %978 }
 0x1af   : > { %1020 = vrot.lane.b32.xlu1 %v2258_v56, %s2275_s30 }
 0x1b0   : > { %988 = vrot.lane.b32.xlu0 %v2259_v13, %s2275_s30  ;;  %v1361_v13 = vsel %vm1355_vm5, %v3171_v7, %v3623_v47 }
 0x1b1   : > { %v1105_v18 = vpop.permute.xlu1 %1104 }
 0x1b2   : > { %v1073_v12 = vpop.permute.xlu0 %1072  ;;  %v1475_v34 = vsel %vm1454_vm8, %v1442_v29, %v1105_v18  ;;  %v1410_v18 = vsel %vm1388_vm6, %v1377_v19, %v915_v51  ;;  %v466_v29 = vrot.slane %v4427_v57, 1 }
 0x1b3   : > { %1022 = vrot.lane.b32.xlu1 %v2260_v62, %s2275_s30  ;;  %v1459_v44 = vsel %vm1454_vm8, %v1426_v60, %v1073_v12  ;;  %v1394_v12 = vsel %vm1388_vm6, %v1361_v13, %v883_v20  ;;  %v1443_v62 = vsel %vm1421_vm7, %v1410_v18, %v1011_v52  ;;  %v465_v60 = vrot.slane %v4426_v25, 1 }
 0x1b4   : > { %990 = vrot.lane.b32.xlu0 %v2261_v55, %s2275_s30  ;;  %v1427_v55 = vsel %vm1421_vm7, %v1394_v12, %v979_v36  ;;  %v4424_v36 = vld [vmem:[#allocation58_spill] sm:$0xff]  ;;  %v470_v18 = vrot.slane %v4426_v25, 2 }
 0x1b5   : > { %v3687_v58 = vpop.permute.xlu1 %820 }
 0x1b6   : > { %v3689_v37 = vpop.permute.xlu0 %788 }
 0x1b7   : > { %1116 = vrot.lane.b32.xlu1 %v4418_v39, %s2276_s13  ;;  %v1362_v19 = vsel %vm1355_vm5, %v3194_v22, %v3689_v37 }
 0x1b8   : > { %1084 = vrot.lane.b32.xlu0 %v4419_v59, %s2276_s13 }
 0x1b9   : > { %v1107_v26 = vpop.permute.xlu1 %1106 }
 0x1ba   : > { %v1075_v28 = vpop.permute.xlu0 %1074  ;;  %v1476_v27 = vsel %vm1454_vm8, %v1443_v62, %v1107_v26 }
 0x1bb   : > { %832 = vrot.lane.b32.xlu1 %v4418_v39, %s2273_s24  ;;  %v1460_v39 = vsel %vm1454_vm8, %v1427_v55, %v1075_v28 }
 0x1bc   : > { %800 = vrot.lane.b32.xlu0 %v4419_v59, %s2273_s24  ;;  %v4425_v59 = vld [vmem:[#allocation42_spill] sm:$0xff] }
 0x1bd   : > { %v1201_v41 = vpop.permute.xlu1 %1200 }
 0x1be   : > { %v1508_v21 = vsel %vm1487_vm9, %v1475_v34, %v1201_v41  ;;  %v1169_v0 = vpop.permute.xlu0 %1168 }
 0x1bf   : > { %v1492_v61 = vsel %vm1487_vm9, %v1459_v44, %v1169_v0  ;;  %1118 = vrot.lane.b32.xlu1 %v4420_v6, %s2276_s13  ;;  %2182 = vmatprep.mubr.msk.f32.mxu1 %vm1529_vm10, %v1508_v21  ;;  %v467_v44 = vsel %vm300_vm0, %v465_v60, %v466_v29  ;;  %v248_v0 = vld [vmem:[%s2317_s20 + $0x190] sm:$0x3] }
 0x1c0   : > { %1086 = vrot.lane.b32.xlu0 %v4421_v48, %s2276_s13  ;;  %2158 = vmatprep.mubr.msk.f32.mxu0 %vm1529_vm10, %v1492_v61  ;;  %v473_v60 = vrot.slane %v248_v0, 2 }
 0x1c1   : > { %v3719_v8 = vpop.permute.xlu1 %822 }
 0x1c2   : > { %v3721_v23 = vpop.permute.xlu0 %790 }
 0x1c3   : > { %1212 = vrot.lane.b32.xlu1 %v4422_v42, %s2277_s23 }
 0x1c4   : > { %1180 = vrot.lane.b32.xlu0 %v4423_v3, %s2277_s23 }
 0x1c5   : > { %v917_v49 = vpop.permute.xlu1 %916 }
 0x1c6   : > { %v885_v56 = vpop.permute.xlu0 %884 }
 0x1c7   : > { %834 = vrot.lane.b32.xlu1 %v4420_v6, %s2273_s24  ;;  %v4428_v6 = vld [vmem:[#allocation13_spill] sm:$0xff]  ;;  %v1395_v12 = vsel %vm1388_vm6, %v1362_v19, %v885_v56  ;;  %v4429_v56 = vld [vmem:[#allocation12_spill] sm:$0xff] }
 0x1c8   : > { %802 = vrot.lane.b32.xlu0 %v4421_v48, %s2273_s24 }
 0x1c9   : > { %v1203_v10 = vpop.permute.xlu1 %1202 }
 0x1ca   : > { %v1509_v7 = vsel %vm1487_vm9, %v1476_v27, %v1203_v10  ;;  %v1171_v47 = vpop.permute.xlu0 %1170 }
 0x1cb   : > { %v1493_v51 = vsel %vm1487_vm9, %v1460_v39, %v1171_v47  ;;  %928 = vrot.lane.b32.xlu1 %v4422_v42, %s2274_s25  ;;  %2183 = vmatmul.mubr.msk.f32.gmra.mrb[4].mxu1 %vm1529_vm10, %v1509_v7  ;;  %v1378_v42 = vsel %vm1355_vm5, %v3330_v53, %v3687_v58 }
 0x1cc   : > { %896 = vrot.lane.b32.xlu0 %v4423_v3, %s2274_s25  ;;  %2159 = vmatmul.mubr.msk.f32.gmra.mrb[4].mxu0 %vm1529_vm10, %v1493_v51  ;;  %v1411_v13 = vsel %vm1388_vm6, %v1378_v42, %v917_v49  ;;  %v4430_v51 = vld [vmem:[#allocation45_spill] sm:$0xff]  ;;  %v250_v42 = vld [vmem:[%s2317_s20 + $0x1a0] sm:$0xff] }
 0x1cd   : > { %v919_v20 = vpop.permute.xlu1 %918  ;;  %v479_v19 = vrot.slane %v250_v42, 1 }
 0x1ce   : > { %v887_v52 = vpop.permute.xlu0 %886 }
 0x1cf   : > { %1214 = vrot.lane.b32.xlu1 %v4424_v36, %s2277_s23 }
 0x1d0   : > { %1182 = vrot.lane.b32.xlu0 %v4425_v59, %s2277_s23 }
 0x1d1   : > { %v1013_v26 = vpop.permute.xlu1 %1012 }
 0x1d2   : > { %v981_v35 = vpop.permute.xlu0 %980  ;;  %v1444_v62 = vsel %vm1421_vm7, %v1411_v13, %v1013_v26 }
 0x1d3   : > { %930 = vrot.lane.b32.xlu1 %v4424_v36, %s2274_s25  ;;  %v1428_v58 = vsel %vm1421_vm7, %v1395_v12, %v981_v35  ;;  %v1363_v35 = vsel %vm1355_vm5, %v3191_v16, %v3721_v23 }
 0x1d4   : > { %898 = vrot.lane.b32.xlu0 %v4425_v59, %s2274_s25  ;;  %v1379_v59 = vsel %vm1355_vm5, %v3327_v4, %v3719_v8 }
 0x1d5   : > { %v1015_v28 = vpop.permute.xlu1 %1014 }
 0x1d6   : > { %v983_v31 = vpop.permute.xlu0 %982 }
 0x1d7   : > { %1024 = vrot.lane.b32.xlu1 %v4426_v25, %s2275_s30  ;;  %v1412_v25 = vsel %vm1388_vm6, %v1379_v59, %v919_v20 }
 0x1d8   : > { %992 = vrot.lane.b32.xlu0 %v3467_v50, %s2275_s30  ;;  %v468_v50 = vrot.slane %v248_v0, 1 }
 0x1d9   : > { %v1109_v34 = vpop.permute.xlu1 %1108 }
 0x1da   : > { %v1077_v41 = vpop.permute.xlu0 %1076  ;;  %v469_v53 = vsel %vm300_vm0, %v466_v29, %v468_v50  ;;  %v1477_v55 = vsel %vm1454_vm8, %v1444_v62, %v1109_v34  ;;  %v1445_v29 = vsel %vm1421_vm7, %v1412_v25, %v1015_v28  ;;  %v249_v50 = vld [vmem:[%s2317_s20 + $0x198] sm:$0xff] }
 0x1db   : > { %1026 = vrot.lane.b32.xlu1 %v4427_v57, %s2275_s30  ;;  %v1461_v37 = vsel %vm1454_vm8, %v1428_v58, %v1077_v41 }
 0x1dc   : > { %994 = vrot.lane.b32.xlu0 %v3525_v9, %s2275_s30  ;;  %v471_v9 = vrot.slane %v4427_v57, 2  ;;  %v1396_v57 = vsel %vm1388_vm6, %v1363_v35, %v887_v52  ;;  %v4433_v35 = vld [vmem:[#allocation14_spill] sm:$0xff] }
 0x1dd   : > { %v3770_v21 = vpop.permute.xlu1 %824  ;;  %v1429_v34 = vsel %vm1421_vm7, %v1396_v57, %v983_v31 }
 0x1de   : > { %v3773_v61 = vpop.permute.xlu0 %792  ;;  %v472_v39 = vsel %vm381_vm1, %v470_v18, %v471_v9  ;;  %v474_v52 = vsel %vm381_vm1, %v471_v9, %v473_v60  ;;  %v478_v9 = vrot.slane %v249_v50, 1  ;;  %v251_v18 = vld [vmem:[%s2317_s20 + $0x1a8] sm:$0x3] }
 0x1df   : > { %1120 = vrot.lane.b32.xlu1 %v467_v44, %s2276_s13  ;;  %v486_v57 = vrot.slane %v251_v18, 2  ;;  %v4434_v60 = vld [vmem:[#allocation47_spill] sm:$0xff] }
 0x1e0   : > { %1088 = vrot.lane.b32.xlu0 %v4428_v6, %s2276_s13  ;;  %v480_v62 = vsel %vm300_vm0, %v478_v9, %v479_v19 }
 0x1e1   : > { %v1111_v48 = vpop.permute.xlu1 %1110 }
 0x1e2   : > { %v1079_v3 = vpop.permute.xlu0 %1078  ;;  %v1478_v4 = vsel %vm1454_vm8, %v1445_v29, %v1111_v48 }
 0x1e3   : > { %836 = vrot.lane.b32.xlu1 %v467_v44, %s2273_s24  ;;  %v1462_v41 = vsel %vm1454_vm8, %v1429_v34, %v1079_v3  ;;  %v4431_v44 = vld [vmem:[#allocation44_spill] sm:$0xff] }
 0x1e4   : > { %804 = vrot.lane.b32.xlu0 %v4428_v6, %s2273_s24 }
 0x1e5   : > { %v1205_v22 = vpop.permute.xlu1 %1204 }
 0x1e6   : > { %v1510_v49 = vsel %vm1487_vm9, %v1477_v55, %v1205_v22  ;;  %v1173_v27 = vpop.permute.xlu0 %1172  ;;  %v483_v22 = vrot.slane %v249_v50, 2 }
 0x1e7   : > { %v1494_v10 = vsel %vm1487_vm9, %v1461_v37, %v1173_v27  ;;  %1122 = vrot.lane.b32.xlu1 %v469_v53, %s2276_s13  ;;  %2185 = vmatprep.mubr.msk.f32.mxu1 %vm1529_vm10, %v1510_v49  ;;  %v484_v37 = vrot.slane %v250_v42, 2 }
 0x1e8   : > { %1090 = vrot.lane.b32.xlu0 %v4429_v56, %s2276_s13  ;;  %2161 = vmatprep.mubr.msk.f32.mxu0 %vm1529_vm10, %v1494_v10 }
 0x1e9   : > { %v3804_v7 = vpop.permute.xlu1 %826  ;;  %v485_v25 = vsel %vm381_vm1, %v483_v22, %v484_v37  ;;  %v487_v34 = vsel %vm381_vm1, %v484_v37, %v486_v57 }
 0x1ea   : > { %v3806_v47 = vpop.permute.xlu0 %794 }
 0x1eb   : > { %1216 = vrot.lane.b32.xlu1 %v472_v39, %s2277_s23 }
 0x1ec   : > { %1184 = vrot.lane.b32.xlu0 %v4430_v51, %s2277_s23 }
 0x1ed   : > { %v921_v36 = vpop.permute.xlu1 %920 }
 0x1ee   : > { %v889_v26 = vpop.permute.xlu0 %888 }
 0x1ef   : > { %838 = vrot.lane.b32.xlu1 %v469_v53, %s2273_s24  ;;  %v481_v53 = vrot.slane %v251_v18, 1 }
 0x1f0   : > { %806 = vrot.lane.b32.xlu0 %v4429_v56, %s2273_s24  ;;  %v1364_v56 = vsel %vm1355_vm5, %v3214_v30, %v3773_v61 }
 0x1f1   : > { %v1207_v8 = vpop.permute.xlu1 %1206  ;;  %v482_v49 = vsel %vm300_vm0, %v479_v19, %v481_v53 }
 0x1f2   : > { %v1511_v16 = vsel %vm1487_vm9, %v1478_v4, %v1207_v8  ;;  %v1175_v23 = vpop.permute.xlu0 %1174 }
 0x1f3   : > { %v1495_v20 = vsel %vm1487_vm9, %v1462_v41, %v1175_v23  ;;  %932 = vrot.lane.b32.xlu1 %v472_v39, %s2274_s25  ;;  %2186 = vmatmul.mubr.msk.f32.gmra.mrb[6].mxu1 %vm1529_vm10, %v1511_v16  ;;  %v4435_v41 = vld [vmem:[#allocation46_spill] sm:$0xff]  ;;  %v1381_v23 = vsel %vm1355_vm5, %v3347_v15, %v3804_v7 }
 0x1f4   : > { %900 = vrot.lane.b32.xlu0 %v4430_v51, %s2274_s25  ;;  %2162 = vmatmul.mubr.msk.f32.gmra.mrb[6].mxu0 %vm1529_vm10, %v1495_v20  ;;  %v1397_v51 = vsel %vm1388_vm6, %v1364_v56, %v889_v26 }
 0x1f5   : > { %v923_v28 = vpop.permute.xlu1 %922 }
 0x1f6   : > { %v891_v31 = vpop.permute.xlu0 %890 }
 0x1f7   : > { %1218 = vrot.lane.b32.xlu1 %v474_v52, %s2277_s23 }
 0x1f8   : > { %1186 = vrot.lane.b32.xlu0 %v4431_v44, %s2277_s23 }
 0x1f9   : > { %v1017_v0 = vpop.permute.xlu1 %1016 }
 0x1fa   : > { %v985_v6 = vpop.permute.xlu0 %984 }
 0x1fb   : > { %934 = vrot.lane.b32.xlu1 %v474_v52, %s2274_s25  ;;  %v1365_v52 = vsel %vm1355_vm5, %v3211_v17, %v3806_v47 }
 0x1fc   : > { %902 = vrot.lane.b32.xlu0 %v4431_v44, %s2274_s25  ;;  %v1414_v44 = vsel %vm1388_vm6, %v1381_v23, %v923_v28 }
 0x1fd   : > { %v1019_v48 = vpop.permute.xlu1 %1018 }
 0x1fe   : > { %v987_v3 = vpop.permute.xlu0 %986 }
 0x1ff   : > { %1028 = vrot.lane.b32.xlu1 %v249_v50, %s2275_s30 }
 0x200   : > { %996 = vrot.lane.b32.xlu0 %v3578_v33, %s2275_s30  ;;  %v4432_v33 = vld [vmem:[#allocation15_spill] sm:$0xff] }
 0x201   : > { %v1113_v13 = vpop.permute.xlu1 %1112 }
 0x202   : > { %v1081_v12 = vpop.permute.xlu0 %1080 }
 0x203   : > { %1030 = vrot.lane.b32.xlu1 %v250_v42, %s2275_s30 }
 0x204   : > { %998 = vrot.lane.b32.xlu0 %v3626_v2, %s2275_s30  ;;  %v1380_v2 = vsel %vm1355_vm5, %v3350_v40, %v3770_v21  ;;  %v1430_v40 = vsel %vm1421_vm7, %v1397_v51, %v985_v6  ;;  %v1447_v6 = vsel %vm1421_vm7, %v1414_v44, %v1019_v48  ;;  %s3953_s30 = scalar_lea.vmem %s4153_s4, %s2092_s27 }
 0x205   : > { %v829_v58 = vpop.permute.xlu1 %828  ;;  %v1413_v39 = vsel %vm1388_vm6, %v1380_v2, %v921_v36  ;;  %v1463_v30 = vsel %vm1454_vm8, %v1430_v40, %v1081_v12 }
 0x206   : > { %v3850_v55 = vpop.permute.xlu0 %796  ;;  %v1446_v59 = vsel %vm1421_vm7, %v1413_v39, %v1017_v0  ;;  %v1398_v0 = vsel %vm1388_vm6, %v1365_v52, %v891_v31  ;;  %v1382_v37 = vsel %vm1355_vm5, %v3370_v24, %v829_v58 }
 0x207   : > { %1124 = vrot.lane.b32.xlu1 %v480_v62, %s2276_s13  ;;  %v1479_v21 = vsel %vm1454_vm8, %v1446_v59, %v1113_v13  ;;  %v1431_v50 = vsel %vm1421_vm7, %v1398_v0, %v987_v3 }
 0x208   : > { %1092 = vrot.lane.b32.xlu0 %v4432_v33, %s2276_s13 }
 0x209   : > { %v1115_v27 = vpop.permute.xlu1 %1114 }
 0x20a   : > { %v1083_v10 = vpop.permute.xlu0 %1082  ;;  %v1480_v42 = vsel %vm1454_vm8, %v1447_v6, %v1115_v27  ;;  %v3944_v6 = vld [vmem:[%s4152_s3] ss:$0 sm:$0xff] }
 0x20b   : > { %1126 = vrot.lane.b32.xlu1 %v482_v49, %s2276_s13  ;;  %v1464_v19 = vsel %vm1454_vm8, %v1431_v50, %v1083_v10  ;;  %v1366_v49 = vsel %vm1355_vm5, %v3234_v38, %v3850_v55 }
 0x20c   : > { %1094 = vrot.lane.b32.xlu0 %v4433_v35, %s2276_s13 }
 0x20d   : > { %v1209_v29 = vpop.permute.xlu1 %1208 }
 0x20e   : > { %v1512_v61 = vsel %vm1487_vm9, %v1479_v21, %v1209_v29  ;;  %v1177_v36 = vpop.permute.xlu0 %1176 }
 0x20f   : > { %v1496_v26 = vsel %vm1487_vm9, %v1463_v30, %v1177_v36  ;;  %1220 = vrot.lane.b32.xlu1 %v485_v25, %s2277_s23  ;;  %2188 = vmatprep.mubr.msk.f32.mxu1 %vm1529_vm10, %v1512_v61 }
 0x210   : > { %1188 = vrot.lane.b32.xlu0 %v4434_v60, %s2277_s23  ;;  %2164 = vmatprep.mubr.msk.f32.mxu0 %vm1529_vm10, %v1496_v26 }
 0x211   : > { %v831_v4 = vpop.permute.xlu1 %830 }
 0x212   : > { %v799_v8 = vpop.permute.xlu0 %798  ;;  %v1383_v57 = vsel %vm1355_vm5, %v3367_v1, %v831_v4 }
 0x213   : > { %1222 = vrot.lane.b32.xlu1 %v487_v34, %s2277_s23  ;;  %v1367_v21 = vsel %vm1355_vm5, %v3231_v11, %v799_v8 }
 0x214   : > { %1190 = vrot.lane.b32.xlu0 %v4435_v41, %s2277_s23 }
 0x215   : > { %v925_v16 = vpop.permute.xlu1 %924 }
 0x216   : > { %v893_v20 = vpop.permute.xlu0 %892  ;;  %v1415_v27 = vsel %vm1388_vm6, %v1382_v37, %v925_v16 }
 0x217   : > { %v1399_v2 = vsel %vm1388_vm6, %v1366_v49, %v893_v20  ;;  %v3939_v20 = vld [vmem:[%s4151_s2] ss:$0 sm:$0xff] }
 0x219   : > { %v1211_v9 = vpop.permute.xlu1 %1210 }
 0x21a   : > { %v1513_v15 = vsel %vm1487_vm9, %v1480_v42, %v1211_v9  ;;  %v1179_v7 = vpop.permute.xlu0 %1178 }
 0x21b   : > { %v1497_v13 = vsel %vm1487_vm9, %v1464_v19, %v1179_v7  ;;  %2189 = vmatmul.mubr.msk.f32.gmra.mrb[8].mxu1 %vm1529_vm10, %v1513_v15 }
 0x21c   : > { %2165 = vmatmul.mubr.msk.f32.gmra.mrb[8].mxu0 %vm1529_vm10, %v1497_v13 }
 0x21d   : > { %v927_v17 = vpop.permute.xlu1 %926 }
 0x21e   : > { %v895_v47 = vpop.permute.xlu0 %894  ;;  %v1416_v29 = vsel %vm1388_vm6, %v1383_v57, %v927_v17 }
 0x21f   : > { %v1400_v30 = vsel %vm1388_vm6, %v1367_v21, %v895_v47 }
 0x221   : > { %v1021_v28 = vpop.permute.xlu1 %1020 }
 0x222   : > { %v989_v31 = vpop.permute.xlu0 %988  ;;  %v1448_v10 = vsel %vm1421_vm7, %v1415_v27, %v1021_v28 }
 0x223   : > { %v1432_v56 = vsel %vm1421_vm7, %v1399_v2, %v989_v31 }
 0x225   : > { %v1023_v48 = vpop.permute.xlu1 %1022 }
 0x226   : > { %v991_v3 = vpop.permute.xlu0 %990  ;;  %v1449_v61 = vsel %vm1421_vm7, %v1416_v29, %v1023_v48 }
 0x227   : > { %v1433_v36 = vsel %vm1421_vm7, %v1400_v30, %v991_v3 }
 0x229   : > { %v1117_v18 = vpop.permute.xlu1 %1116 }
 0x22a   : > { %v1085_v12 = vpop.permute.xlu0 %1084  ;;  %v1481_v39 = vsel %vm1454_vm8, %v1448_v10, %v1117_v18 }
 0x22b   : > { %v1465_v59 = vsel %vm1454_vm8, %v1432_v56, %v1085_v12 }
 0x22d   : > { %v3899_v62 = vpop.permute.xlu1 %832 }
 0x22e   : > { %v3901_v53 = vpop.permute.xlu0 %800  ;;  %v1384_v2 = vsel %vm1355_vm5, %v3390_v5, %v3899_v62 }
 0x22f   : > { %v1368_v56 = vsel %vm1355_vm5, %v3254_v46, %v3901_v53 }
 0x231   : > { %v1119_v22 = vpop.permute.xlu1 %1118 }
 0x232   : > { %v1087_v33 = vpop.permute.xlu0 %1086  ;;  %v1482_v26 = vsel %vm1454_vm8, %v1449_v61, %v1119_v22 }
 0x233   : > { %v1466_v34 = vsel %vm1454_vm8, %v1433_v36, %v1087_v33 }
 0x235   : > { %v1213_v51 = vpop.permute.xlu1 %1212 }
 0x236   : > { %v1514_v24 = vsel %vm1487_vm9, %v1481_v39, %v1213_v51  ;;  %v1181_v58 = vpop.permute.xlu0 %1180 }
 0x237   : > { %v1498_v35 = vsel %vm1487_vm9, %v1465_v59, %v1181_v58  ;;  %2191 = vmatprep.mubr.msk.f32.mxu1 %vm1529_vm10, %v1514_v24 }
 0x238   : > { %2167 = vmatprep.mubr.msk.f32.mxu0 %vm1529_vm10, %v1498_v35 }
 0x239   : > { %v3918_v38 = vpop.permute.xlu1 %834 }
 0x23a   : > { %v3920_v55 = vpop.permute.xlu0 %802  ;;  %v1385_v21 = vsel %vm1355_vm5, %v3387_v45, %v3918_v38 }
 0x23b   : > { %v1369_v30 = vsel %vm1355_vm5, %v3251_v63, %v3920_v55 }
 0x23d   : > { %v929_v25 = vpop.permute.xlu1 %928 }
 0x23e   : > { %v897_v40 = vpop.permute.xlu0 %896  ;;  %v1417_v39 = vsel %vm1388_vm6, %v1384_v2, %v929_v25 }
 0x23f   : > { %v1401_v51 = vsel %vm1388_vm6, %v1368_v56, %v897_v40 }
 0x241   : > { %v1215_v60 = vpop.permute.xlu1 %1214 }
 0x242   : > { %v1515_v1 = vsel %vm1487_vm9, %v1482_v26, %v1215_v60  ;;  %v1183_v4 = vpop.permute.xlu0 %1182 }
 0x243   : > { %v1499_v41 = vsel %vm1487_vm9, %v1466_v34, %v1183_v4  ;;  %2192 = vmatmul.mubr.msk.f32.gmra.mrb[10].mxu1 %vm1529_vm10, %v1515_v1 }
 0x244   : > { %2168 = vmatmul.mubr.msk.f32.gmra.mrb[10].mxu0 %vm1529_vm10, %v1499_v41 }
 0x245   : > { %v931_v11 = vpop.permute.xlu1 %930 }
 0x246   : > { %v899_v8 = vpop.permute.xlu0 %898  ;;  %v1418_v61 = vsel %vm1388_vm6, %v1385_v21, %v931_v11 }
 0x247   : > { %v1402_v36 = vsel %vm1388_vm6, %v1369_v30, %v899_v8 }
 0x249   : > { %v1025_v16 = vpop.permute.xlu1 %1024 }
 0x24a   : > { %v993_v23 = vpop.permute.xlu0 %992  ;;  %v1450_v59 = vsel %vm1421_vm7, %v1417_v39, %v1025_v16 }
 0x24b   : > { %v1434_v24 = vsel %vm1421_vm7, %v1401_v51, %v993_v23 }
 0x24d   : > { %v1027_v52 = vpop.permute.xlu1 %1026 }
 0x24e   : > { %v995_v44 = vpop.permute.xlu0 %994  ;;  %v2154_v0 = vpop.f32.mrb[0].mxu0  ;;  %v1451_v26 = vsel %vm1421_vm7, %v1418_v61, %v1027_v52 }
 0x24f   : > { %v1859_v50 = vmul.f32 %v2154_v0, %v3939_v20  ;;  %v1692_v42 = vpop.f32.mrb[1].mxu0  ;;  %v1435_v60 = vsel %vm1421_vm7, %v1402_v36, %v995_v44 }
 0x250   : > { %v1858_v9 = vmul.f32 %v3939_v20, %v1692_v42 }
 0x251   : > { %v1898_v19 = vadd.f32 %v3944_v6, %v1859_v50  ;;  %v1121_v15 = vpop.permute.xlu1 %1120 }
 0x252   : > { %v1897_v7 = vadd.f32 %v3944_v6, %v1858_v9  ;;  %v1089_v13 = vpop.permute.xlu0 %1088  ;;  %v1483_v58 = vsel %vm1454_vm8, %v1450_v59, %v1121_v15 }
 0x253   : > { %v1930_v17 = vmax.f32 %v1898_v19, 0.0  ;;  %v2178_v47 = vpop.f32.mrb[0].mxu1  ;;  %v1467_v62 = vsel %vm1454_vm8, %v1434_v24, %v1089_v13 }
 0x254   : > { %v1929_v28 = vmax.f32 %v1897_v7, 0.0  ;;  %v1875_v31 = vmul.f32 %v2178_v47, %v3939_v20  ;;  %v1772_v48 = vpop.f32.mrb[1].mxu1 }
 0x255   : > { %1962 = vst.msk [vmem:[%s3953_s30 + $0x8] sm:$0xff] %vm1256_vm2, %v1930_v17  ;;  %v1874_v3 = vmul.f32 %v3939_v20, %v1772_v48  ;;  %v3960_v18 = vpop.permute.xlu1 %836 }
 0x256   : > { %1961 = vst.msk [vmem:[%s3953_s30] sm:$0xff] %vm1256_vm2, %v1929_v28  ;;  %v1914_v12 = vadd.f32 %v3944_v6, %v1875_v31  ;;  %v3965_v22 = vpop.permute.xlu0 %804 }
 0x257   : > { %v1913_v37 = vadd.f32 %v3944_v6, %v1874_v3  ;;  %v1370_v2 = vsel %vm1355_vm5, %v3274_v54, %v3965_v22 }
 0x258   : > { %v1946_v33 = vmax.f32 %v1914_v12, 0.0 }
 0x259   : > { %v1945_v49 = vmax.f32 %v1913_v37, 0.0  ;;  %v1123_v27 = vpop.permute.xlu1 %1122 }
 0x25a   : > { %1978 = vst.msk [vmem:[%s3953_s30 + $0x88] sm:$0xff] %vm1256_vm2, %v1946_v33  ;;  %v1091_v10 = vpop.permute.xlu0 %1090  ;;  %v1484_v34 = vsel %vm1454_vm8, %v1451_v26, %v1123_v27 }
 0x25b   : > { %1977 = vst.msk [vmem:[%s3953_s30 + $0x80] sm:$0xff] %vm1256_vm2, %v1945_v49  ;;  %v1468_v4 = vsel %vm1454_vm8, %v1435_v60, %v1091_v10  ;;  %v1386_v49 = vsel %vm1355_vm5, %v3410_v32, %v3960_v18 }
 0x25d   : > { %v1217_v5 = vpop.permute.xlu1 %1216 }
 0x25e   : > { %v1516_v35 = vsel %vm1487_vm9, %v1483_v58, %v1217_v5  ;;  %v1185_v57 = vpop.permute.xlu0 %1184 }
 0x25f   : > { %v1500_v46 = vsel %vm1487_vm9, %v1467_v62, %v1185_v57  ;;  %2194 = vmatprep.mubr.msk.f32.mxu1 %vm1529_vm10, %v1516_v35 }
 0x260   : > { %2170 = vmatprep.mubr.msk.f32.mxu0 %vm1529_vm10, %v1500_v46 }
 0x261   : > { %v839_v53 = vpop.permute.xlu1 %838 }
 0x262   : > { %v807_v25 = vpop.permute.xlu0 %806  ;;  %v1387_v59 = vsel %vm1355_vm5, %v3407_v43, %v839_v53 }
 0x263   : > { %v1371_v58 = vsel %vm1355_vm5, %v3271_v14, %v807_v25 }
 0x265   : > { %v933_v40 = vpop.permute.xlu1 %932 }
 0x266   : > { %v901_v29 = vpop.permute.xlu0 %900  ;;  %v1419_v10 = vsel %vm1388_vm6, %v1386_v49, %v933_v40 }
 0x267   : > { %v1403_v56 = vsel %vm1388_vm6, %v1370_v2, %v901_v29 }
 0x269   : > { %v1219_v1 = vpop.permute.xlu1 %1218 }
 0x26a   : > { %v1517_v45 = vsel %vm1487_vm9, %v1484_v34, %v1219_v1  ;;  %v1187_v38 = vpop.permute.xlu0 %1186 }
 0x26b   : > { %v1501_v41 = vsel %vm1487_vm9, %v1468_v4, %v1187_v38  ;;  %2195 = vmatmul.mubr.msk.f32.gmra.mrb[12].mxu1 %vm1529_vm10, %v1517_v45 }
 0x26c   : > { %2171 = vmatmul.mubr.msk.f32.gmra.mrb[12].mxu0 %vm1529_vm10, %v1501_v41 }
 0x26d   : > { %v935_v63 = vpop.permute.xlu1 %934 }
 0x26e   : > { %v903_v55 = vpop.permute.xlu0 %902  ;;  %v1420_v5 = vsel %vm1388_vm6, %v1387_v59, %v935_v63 }
 0x26f   : > { %v1404_v35 = vsel %vm1388_vm6, %v1371_v58, %v903_v55 }
 0x271   : > { %v1029_v11 = vpop.permute.xlu1 %1028 }
 0x272   : > { %v997_v8 = vpop.permute.xlu0 %996  ;;  %v1452_v39 = vsel %vm1421_vm7, %v1419_v10, %v1029_v11 }
 0x273   : > { %v1436_v51 = vsel %vm1421_vm7, %v1403_v56, %v997_v8 }
 0x275   : > { %v1031_v16 = vpop.permute.xlu1 %1030 }
 0x276   : > { %v999_v23 = vpop.permute.xlu0 %998  ;;  %v2181_v52 = vpop.f32.mrb[2].mxu1  ;;  %v1453_v57 = vsel %vm1421_vm7, %v1420_v5, %v1031_v16 }
 0x277   : > { %v2157_v44 = vpop.f32.mrb[2].mxu0  ;;  %v1877_v0 = vmul.f32 %v2181_v52, %v3939_v20  ;;  %v1782_v50 = vpop.f32.mrb[3].mxu1  ;;  %v1437_v43 = vsel %vm1421_vm7, %v1404_v35, %v999_v23 }
 0x278   : > { %v1861_v42 = vmul.f32 %v2157_v44, %v3939_v20  ;;  %v1702_v9 = vpop.f32.mrb[3].mxu0  ;;  %v1876_v19 = vmul.f32 %v3939_v20, %v1782_v50 }
 0x279   : > { %v1916_v15 = vadd.f32 %v3944_v6, %v1877_v0  ;;  %v1860_v7 = vmul.f32 %v3939_v20, %v1702_v9  ;;  %v1125_v13 = vpop.permute.xlu1 %1124 }
 0x27a   : > { %v1900_v17 = vadd.f32 %v3944_v6, %v1861_v42  ;;  %v1915_v47 = vadd.f32 %v3944_v6, %v1876_v19  ;;  %v1093_v28 = vpop.permute.xlu0 %1092  ;;  %v1485_v32 = vsel %vm1454_vm8, %v1452_v39, %v1125_v13 }
 0x27b   : > { %v1948_v31 = vmax.f32 %v1916_v15, 0.0  ;;  %v1899_v48 = vadd.f32 %v3944_v6, %v1860_v7  ;;  %v1469_v24 = vsel %vm1454_vm8, %v1436_v51, %v1093_v28 }
 0x27c   : > { %v1932_v3 = vmax.f32 %v1900_v17, 0.0  ;;  %v1947_v12 = vmax.f32 %v1915_v47, 0.0 }
 0x27d   : > { %1980 = vst.msk [vmem:[%s3953_s30 + $0x98] sm:$0xff] %vm1256_vm2, %v1948_v31  ;;  %v1931_v37 = vmax.f32 %v1899_v48, 0.0  ;;  %v1127_v33 = vpop.permute.xlu1 %1126 }
 0x27e   : > { %1964 = vst.msk [vmem:[%s3953_s30 + $0x18] sm:$0xff] %vm1256_vm2, %v1932_v3  ;;  %1979 = vst.msk [vmem:[%s3953_s30 + $0x90] sm:$0xff] %vm1256_vm2, %v1947_v12  ;;  %v1095_v27 = vpop.permute.xlu0 %1094  ;;  %v1486_v46 = vsel %vm1454_vm8, %v1453_v57, %v1127_v33 }
 0x27f   : > { %1963 = vst.msk [vmem:[%s3953_s30 + $0x10] sm:$0xff] %vm1256_vm2, %v1931_v37  ;;  %v1470_v40 = vsel %vm1454_vm8, %v1437_v43, %v1095_v27 }
 0x281   : > { %v1221_v18 = vpop.permute.xlu1 %1220 }
 0x282   : > { %v1518_v54 = vsel %vm1487_vm9, %v1485_v32, %v1221_v18  ;;  %v1189_v22 = vpop.permute.xlu0 %1188 }
 0x283   : > { %v1502_v62 = vsel %vm1487_vm9, %v1469_v24, %v1189_v22  ;;  %2197 = vmatprep.mubr.msk.f32.mxu1 %vm1529_vm10, %v1518_v54 }
 0x284   : > { %2173 = vmatprep.mubr.msk.f32.mxu0 %vm1529_vm10, %v1502_v62 }
 0x285   : > { %v1223_v53 = vpop.permute.xlu1 %1222 }
 0x286   : > { %v1519_v14 = vsel %vm1487_vm9, %v1486_v46, %v1223_v53  ;;  %v1191_v25 = vpop.permute.xlu0 %1190 }
 0x287   : > { %v1503_v21 = vsel %vm1487_vm9, %v1470_v40, %v1191_v25  ;;  %2198 = vmatmul.mubr.msk.f32.gmra.mrb[14].mxu1 %vm1529_vm10, %v1519_v14 }
 0x288   : > { %2174 = vmatmul.mubr.msk.f32.gmra.mrb[14].mxu0 %vm1529_vm10, %v1503_v21 }
 0x29e   : > { %v2184_v29 = vpop.f32.mrb[4].mxu1 }
 0x29f   : > { %v2160_v30 = vpop.f32.mrb[4].mxu0  ;;  %v1879_v61 = vmul.f32 %v2184_v29, %v3939_v20  ;;  %v1792_v36 = vpop.f32.mrb[5].mxu1 }
 0x2a0   : > { %v1863_v26 = vmul.f32 %v2160_v30, %v3939_v20  ;;  %v1712_v60 = vpop.f32.mrb[5].mxu0  ;;  %v1878_v34 = vmul.f32 %v3939_v20, %v1792_v36 }
 0x2a1   : > { %v1918_v1 = vadd.f32 %v3944_v6, %v1879_v61  ;;  %v1862_v4 = vmul.f32 %v3939_v20, %v1712_v60 }
 0x2a2   : > { %v1902_v45 = vadd.f32 %v3944_v6, %v1863_v26  ;;  %v1917_v38 = vadd.f32 %v3944_v6, %v1878_v34 }
 0x2a3   : > { %v1950_v41 = vmax.f32 %v1918_v1, 0.0  ;;  %v1901_v63 = vadd.f32 %v3944_v6, %v1862_v4 }
 0x2a4   : > { %v1934_v55 = vmax.f32 %v1902_v45, 0.0  ;;  %v1949_v11 = vmax.f32 %v1917_v38, 0.0 }
 0x2a5   : > { %1982 = vst.msk [vmem:[%s3953_s30 + $0xa8] sm:$0xff] %vm1256_vm2, %v1950_v41  ;;  %v1933_v8 = vmax.f32 %v1901_v63, 0.0 }
 0x2a6   : > { %1966 = vst.msk [vmem:[%s3953_s30 + $0x28] sm:$0xff] %vm1256_vm2, %v1934_v55  ;;  %1981 = vst.msk [vmem:[%s3953_s30 + $0xa0] sm:$0xff] %vm1256_vm2, %v1949_v11 }
 0x2a7   : > { %1965 = vst.msk [vmem:[%s3953_s30 + $0x20] sm:$0xff] %vm1256_vm2, %v1933_v8 }
 0x2c6   : > { %v2187_v16 = vpop.f32.mrb[6].mxu1 }
 0x2c7   : > { %v2163_v23 = vpop.f32.mrb[6].mxu0  ;;  %v1881_v52 = vmul.f32 %v2187_v16, %v3939_v20  ;;  %v1802_v44 = vpop.f32.mrb[7].mxu1 }
 0x2c8   : > { %v1865_v0 = vmul.f32 %v2163_v23, %v3939_v20  ;;  %v1722_v50 = vpop.f32.mrb[7].mxu0  ;;  %v1880_v42 = vmul.f32 %v3939_v20, %v1802_v44 }
 0x2c9   : > { %v1920_v9 = vadd.f32 %v3944_v6, %v1881_v52  ;;  %v1864_v19 = vmul.f32 %v3939_v20, %v1722_v50 }
 0x2ca   : > { %v1904_v15 = vadd.f32 %v3944_v6, %v1865_v0  ;;  %v1919_v7 = vadd.f32 %v3944_v6, %v1880_v42 }
 0x2cb   : > { %v1952_v13 = vmax.f32 %v1920_v9, 0.0  ;;  %v1903_v17 = vadd.f32 %v3944_v6, %v1864_v19 }
 0x2cc   : > { %v1936_v47 = vmax.f32 %v1904_v15, 0.0  ;;  %v1951_v28 = vmax.f32 %v1919_v7, 0.0 }
 0x2cd   : > { %1984 = vst.msk [vmem:[%s3953_s30 + $0xb8] sm:$0xff] %vm1256_vm2, %v1952_v13  ;;  %v1935_v31 = vmax.f32 %v1903_v17, 0.0 }
 0x2ce   : > { %1968 = vst.msk [vmem:[%s3953_s30 + $0x38] sm:$0xff] %vm1256_vm2, %v1936_v47  ;;  %1983 = vst.msk [vmem:[%s3953_s30 + $0xb0] sm:$0xff] %vm1256_vm2, %v1951_v28 }
 0x2cf   : > { %1967 = vst.msk [vmem:[%s3953_s30 + $0x30] sm:$0xff] %vm1256_vm2, %v1935_v31 }
 0x2ee   : > { %v2190_v48 = vpop.f32.mrb[8].mxu1 }
 0x2ef   : > { %v2166_v3 = vpop.f32.mrb[8].mxu0  ;;  %v1883_v12 = vmul.f32 %v2190_v48, %v3939_v20  ;;  %v1812_v37 = vpop.f32.mrb[9].mxu1 }
 0x2f0   : > { %v1867_v33 = vmul.f32 %v2166_v3, %v3939_v20  ;;  %v1732_v49 = vpop.f32.mrb[9].mxu0  ;;  %v1882_v27 = vmul.f32 %v3939_v20, %v1812_v37 }
 0x2f1   : > { %v1922_v2 = vadd.f32 %v3944_v6, %v1883_v12  ;;  %v1866_v10 = vmul.f32 %v3939_v20, %v1732_v49 }
 0x2f2   : > { %v1906_v56 = vadd.f32 %v3944_v6, %v1867_v33  ;;  %v1921_v39 = vadd.f32 %v3944_v6, %v1882_v27 }
 0x2f3   : > { %v1954_v51 = vmax.f32 %v1922_v2, 0.0  ;;  %v1905_v32 = vadd.f32 %v3944_v6, %v1866_v10 }
 0x2f4   : > { %v1938_v18 = vmax.f32 %v1906_v56, 0.0  ;;  %v1953_v59 = vmax.f32 %v1921_v39, 0.0 }
 0x2f5   : > { %1986 = vst.msk [vmem:[%s3953_s30 + $0xc8] sm:$0xff] %vm1256_vm2, %v1954_v51  ;;  %v1937_v24 = vmax.f32 %v1905_v32, 0.0 }
 0x2f6   : > { %1970 = vst.msk [vmem:[%s3953_s30 + $0x48] sm:$0xff] %vm1256_vm2, %v1938_v18  ;;  %1985 = vst.msk [vmem:[%s3953_s30 + $0xc0] sm:$0xff] %vm1256_vm2, %v1953_v59 }
 0x2f7   : > { %1969 = vst.msk [vmem:[%s3953_s30 + $0x40] sm:$0xff] %vm1256_vm2, %v1937_v24 }
 0x316   : > { %v2193_v54 = vpop.f32.mrb[10].mxu1 }
 0x317   : > { %v2169_v22 = vpop.f32.mrb[10].mxu0  ;;  %v1885_v58 = vmul.f32 %v2193_v54, %v3939_v20  ;;  %v1822_v5 = vpop.f32.mrb[11].mxu1 }
 0x318   : > { %v1869_v62 = vmul.f32 %v2169_v22, %v3939_v20  ;;  %v1742_v35 = vpop.f32.mrb[11].mxu0  ;;  %v1884_v57 = vmul.f32 %v3939_v20, %v1822_v5 }
 0x319   : > { %v1924_v43 = vadd.f32 %v3944_v6, %v1885_v58  ;;  %v1868_v46 = vmul.f32 %v3939_v20, %v1742_v35 }
 0x31a   : > { %v1908_v53 = vadd.f32 %v3944_v6, %v1869_v62  ;;  %v1923_v40 = vadd.f32 %v3944_v6, %v1884_v57 }
 0x31b   : > { %v1956_v14 = vmax.f32 %v1924_v43, 0.0  ;;  %v1907_v25 = vadd.f32 %v3944_v6, %v1868_v46 }
 0x31c   : > { %v1940_v21 = vmax.f32 %v1908_v53, 0.0  ;;  %v1955_v29 = vmax.f32 %v1923_v40, 0.0 }
 0x31d   : > { %1988 = vst.msk [vmem:[%s3953_s30 + $0xd8] sm:$0xff] %vm1256_vm2, %v1956_v14  ;;  %v1939_v30 = vmax.f32 %v1907_v25, 0.0 }
 0x31e   : > { %1972 = vst.msk [vmem:[%s3953_s30 + $0x58] sm:$0xff] %vm1256_vm2, %v1940_v21  ;;  %1987 = vst.msk [vmem:[%s3953_s30 + $0xd0] sm:$0xff] %vm1256_vm2, %v1955_v29 }
 0x31f   : > { %1971 = vst.msk [vmem:[%s3953_s30 + $0x50] sm:$0xff] %vm1256_vm2, %v1939_v30 }
 0x33e   : > { %v2196_v61 = vpop.f32.mrb[12].mxu1 }
 0x33f   : > { %v2172_v36 = vpop.f32.mrb[12].mxu0  ;;  %v1887_v26 = vmul.f32 %v2196_v61, %v3939_v20  ;;  %v1832_v60 = vpop.f32.mrb[13].mxu1 }
 0x340   : > { %v1871_v34 = vmul.f32 %v2172_v36, %v3939_v20  ;;  %v1752_v1 = vpop.f32.mrb[13].mxu0  ;;  %v1886_v4 = vmul.f32 %v3939_v20, %v1832_v60 }
 0x341   : > { %v1926_v45 = vadd.f32 %v3944_v6, %v1887_v26  ;;  %v1870_v38 = vmul.f32 %v3939_v20, %v1752_v1 }
 0x342   : > { %v1910_v41 = vadd.f32 %v3944_v6, %v1871_v34  ;;  %v1925_v63 = vadd.f32 %v3944_v6, %v1886_v4 }
 0x343   : > { %v1958_v55 = vmax.f32 %v1926_v45, 0.0  ;;  %v1909_v11 = vadd.f32 %v3944_v6, %v1870_v38 }
 0x344   : > { %v1942_v8 = vmax.f32 %v1910_v41, 0.0  ;;  %v1957_v16 = vmax.f32 %v1925_v63, 0.0 }
 0x345   : > { %1990 = vst.msk [vmem:[%s3953_s30 + $0xe8] sm:$0xff] %vm1256_vm2, %v1958_v55  ;;  %v1941_v23 = vmax.f32 %v1909_v11, 0.0 }
 0x346   : > { %1974 = vst.msk [vmem:[%s3953_s30 + $0x68] sm:$0xff] %vm1256_vm2, %v1942_v8  ;;  %1989 = vst.msk [vmem:[%s3953_s30 + $0xe0] sm:$0xff] %vm1256_vm2, %v1957_v16 }
 0x347   : > { %1973 = vst.msk [vmem:[%s3953_s30 + $0x60] sm:$0xff] %vm1256_vm2, %v1941_v23 }
 0x35a   : > { %v2199_v52 = vpop.f32.mrb[14].mxu1 }
 0x35b   : > { %v2175_v44 = vpop.f32.mrb[14].mxu0  ;;  %v1889_v0 = vmul.f32 %v2199_v52, %v3939_v20  ;;  %v1842_v50 = vpop.f32.mrb[15].mxu1 }
 0x35c   : > { %v1873_v42 = vmul.f32 %v2175_v44, %v3939_v20  ;;  %v1762_v9 = vpop.f32.mrb[15].mxu0  ;;  %v1888_v19 = vmul.f32 %v3939_v20, %v1842_v50 }
 0x35d   : > { %v1928_v15 = vadd.f32 %v3944_v6, %v1889_v0  ;;  %v1872_v7 = vmul.f32 %v3939_v20, %v1762_v9 }
 0x35e   : > { %v1912_v13 = vadd.f32 %v3944_v6, %v1873_v42  ;;  %v1927_v17 = vadd.f32 %v3944_v6, %v1888_v19 }
 0x35f   : > { %v1960_v47 = vmax.f32 %v1928_v15, 0.0  ;;  %v1911_v28 = vadd.f32 %v3944_v6, %v1872_v7 }
 0x360   : > { %v1944_v31 = vmax.f32 %v1912_v13, 0.0  ;;  %v1959_v48 = vmax.f32 %v1927_v17, 0.0 }
 0x361   : > { %1992 = vst.msk [vmem:[%s3953_s30 + $0xf8] sm:$0xff] %vm1256_vm2, %v1960_v47  ;;  %v1943_v3 = vmax.f32 %v1911_v28, 0.0 }
 0x362   : > { %1976 = vst.msk [vmem:[%s3953_s30 + $0x78] sm:$0xff] %vm1256_vm2, %v1944_v31  ;;  %1991 = vst.msk [vmem:[%s3953_s30 + $0xf0] sm:$0xff] %vm1256_vm2, %v1959_v48 }
 0x363   : > { %1975 = vst.msk [vmem:[%s3953_s30 + $0x70] sm:$0xff] %vm1256_vm2, %v1943_v3 }
 0x364 PF: > { %s14_s15 = sadd.s32 1, %s2268_s15  }
 0x365   : > { %p11_p4 = scmp.ge.s32.totalorder %s14_s15, 4  }
 0x367   :  { %13 = sbr.rel (!%p11_p4) target bundleno = 1 (0x1), region = 66 }

</bundles_post_ra>
